<compile_context>
chip_gen: v7x
topology: tpu7x:2x2x1
jax: 0.10.0
libtpu: 0.0.40
codegen_flags: <defaults>
</compile_context>

<pallas_src>
import functools

import jax
import jax.numpy as jnp
from jax.experimental import pallas as pl
from jax.experimental.pallas import tpu as pltpu

_LRELU_SLOPE = 0.2
_IN_EPS = 1e-5


# ----------------------------------------------------------------------------
# Hardware-aware sizing helpers
# ----------------------------------------------------------------------------
@functools.lru_cache(maxsize=None)
def _vmem_cap_bytes():
    """Physical VMEM per TensorCore (conservative 64 MiB fallback == v7x)."""
    try:
        info = pltpu.get_tpu_info()
        for name in ("vmem_capacity_bytes", "vmem_bytes", "vmem_size_bytes"):
            v = getattr(info, name, None)
            if v:
                return int(v)
    except Exception:
        pass
    return 64 << 20


def _tp_target():
    # Larger P tiles on 128 MiB parts (v5e/v6e); 512 rows on 64 MiB parts (v7x).
    return 1024 if _vmem_cap_bytes() >= (96 << 20) else 512


def _mosaic_params(sem, *buffer_bytes):
    """buffer_bytes already include their buffer counts; add headroom, cap at
    75% of physical VMEM (review: never hand Mosaic the full physical budget)."""
    cap = int(_vmem_cap_bytes() * 3 // 4)
    need = int(sum(int(b) for b in buffer_bytes)) + (8 << 20)
    limit = max(min(need, cap), min(32 << 20, cap))
    return pltpu.CompilerParams(dimension_semantics=sem, vmem_limit_bytes=limit)


@functools.lru_cache(maxsize=None)
def _single_buffer_ok():
    """True iff this Pallas build accepts pipeline_mode=pl.Buffered(1)."""
    if not hasattr(pl, "Buffered"):
        return False
    try:
        def k(x_ref, o_ref):
            o_ref[...] = x_ref[...] + 1.0

        fn = pl.pallas_call(
            k,
            out_shape=jax.ShapeDtypeStruct((8, 128), jnp.float32),
            grid_spec=pltpu.PrefetchScalarGridSpec(
                num_scalar_prefetch=0,
                grid=(2,),
                in_specs=[pl.BlockSpec((8, 128), lambda i: (0, 0),
                                       pipeline_mode=pl.Buffered(1))],
                out_specs=pl.BlockSpec((8, 128), lambda i: (0, 0)),
            ),
        )
        jax.jit(fn).lower(jnp.zeros((8, 128), jnp.float32)).compile()
        return True
    except Exception:
        return False


def _invariant_spec(block_shape, index_map):
    """BlockSpec for a grid-invariant operand: single-buffer it when supported
    (saves a redundant VMEM copy of the weights / bias)."""
    if _single_buffer_ok():
        return pl.BlockSpec(block_shape, index_map, pipeline_mode=pl.Buffered(1))
    return pl.BlockSpec(block_shape, index_map)


def _round_up(x, m):
    return -(-x // m) * m


def _plan_p(P):
    """P-axis tiling: TP multiple of 16 (bf16 sublane pairs); minimal zero-pad."""
    target = _tp_target()
    n_tiles = max(1, -(-P // target))
    TP = _round_up(-(-P // n_tiles), 16)
    return TP, n_tiles * TP


def _plan_c(C, B):
    """Split channels so (B, n_c) gives the megacore scheduler >=2 'parallel'
    units for tiny batches (v7x has 2 TensorCores per chip)."""
    if B < 4 and C >= 256 and (C // 2) % 128 == 0:
        return C // 2
    return C


# ----------------------------------------------------------------------------
# Kernel 1: conv-matmul + bias + optional LeakyReLU (non-normalized layers)
# ----------------------------------------------------------------------------
def _conv_bias_act_kernel(p_ref, w_ref, b_ref, o_ref, *, leaky):
    # p_ref:(1,TP,K) bf16  w_ref:(K,C) bf16  b_ref:(1,C) f32  o_ref:(1,TP,C)
    acc = jnp.dot(p_ref[0], w_ref[...], preferred_element_type=jnp.float32)
    acc = acc + b_ref[...]
    if leaky:
        acc = jnp.where(acc >= 0, acc, _LRELU_SLOPE * acc)
    o_ref[0] = acc.astype(o_ref.dtype)


def conv_nonorm_pallas(patches, w, b, *, TP, leaky, out_dtype):
    B, P_pad, K = patches.shape
    C = w.shape[1]
    n_p = P_pad // TP
    obytes = jnp.dtype(out_dtype).itemsize
    wbuf = 1 if _single_buffer_ok() else 2
    kernel = functools.partial(_conv_bias_act_kernel, leaky=leaky)
    ce = pl.CostEstimate(
        flops=2 * B * P_pad * K * C,
        transcendentals=0,
        bytes_accessed=B * P_pad * K * 2 + K * C * 2 + B * P_pad * C * obytes,
    )
    return pl.pallas_call(
        kernel,
        out_shape=jax.ShapeDtypeStruct((B, P_pad, C), out_dtype),
        grid_spec=pltpu.PrefetchScalarGridSpec(
            num_scalar_prefetch=0,
            grid=(B, n_p),
            in_specs=[
                pl.BlockSpec((1, TP, K), lambda bi, pi: (bi, pi, 0)),
                _invariant_spec((K, C), lambda bi, pi: (0, 0)),
                _invariant_spec((1, C), lambda bi, pi: (0, 0)),
            ],
            out_specs=pl.BlockSpec((1, TP, C), lambda bi, pi: (bi, pi, 0)),
        ),
        compiler_params=_mosaic_params(
            ("parallel", "parallel"),
            2 * TP * K * 2, wbuf * K * C * 2, wbuf * C * 4, 2 * TP * C * obytes,
        ),
        cost_estimate=ce,
    )(patches, w, b)


# ----------------------------------------------------------------------------
# Kernel 2: FUSED conv-matmul + InstanceNorm + LeakyReLU (normalized layers)
#   The whole (n_p, TP, TC) conv slab is resident in VMEM across the
#   'arbitrary' P axis; stats accumulate from the f32 MXU accumulator; on the
#   last P tile the slab is normalized in place.  Conv bias is dropped — it is
#   exactly cancelled by the InstanceNorm mean subtraction.
# ----------------------------------------------------------------------------
def _conv_in_lrelu_kernel(p_ref, w_ref, o_ref, sum_ref, sq_ref, *, n_p, inv_n):
    # p_ref:(1,TP,K) bf16  w_ref:(K,TC) bf16
    # o_ref:(1,n_p,TP,TC) out dtype (resident across pi)
    # sum_ref/sq_ref:(1,TC) f32 scratch — running per-channel sum / sum-of-sq.
    pi = pl.program_id(2)

    @pl.when(pi == 0)
    def _():
        sum_ref[...] = jnp.zeros_like(sum_ref)
        sq_ref[...] = jnp.zeros_like(sq_ref)

    acc = jnp.dot(p_ref[0], w_ref[...], preferred_element_type=jnp.float32)
    o_ref[0, pi] = acc.astype(o_ref.dtype)          # raw (pre-norm) conv tile
    sum_ref[...] += jnp.sum(acc, axis=0, keepdims=True)
    sq_ref[...] += jnp.sum(acc * acc, axis=0, keepdims=True)

    @pl.when(pi == n_p - 1)
    def _():
        mean = sum_ref[...] * inv_n                                   # (1, TC)
        var = jnp.maximum(sq_ref[...] * inv_n - mean * mean, 0.0)     # clamp!
        scale = jax.lax.rsqrt(var + _IN_EPS)

        @pl.loop(0, n_p)
        def _(t):
            x = o_ref[0, t].astype(jnp.float32)                       # (TP, TC)
            y = (x - mean) * scale
            o_ref[0, t] = jnp.where(y >= 0, y, _LRELU_SLOPE * y).astype(o_ref.dtype)


def conv_in_lrelu_fused_pallas(patches, w, *, TP, TC, n_valid,
                               out_dtype=jnp.bfloat16):
    B, P_pad, K = patches.shape
    C = w.shape[1]
    n_p = P_pad // TP
    n_c = C // TC
    obytes = jnp.dtype(out_dtype).itemsize
    kernel = functools.partial(_conv_in_lrelu_kernel, n_p=n_p,
                               inv_n=1.0 / float(n_valid))
    if n_c == 1:
        w_spec = _invariant_spec((K, TC), lambda bi, ci, pi: (0, 0))
        wbuf = 1 if _single_buffer_ok() else 2
    else:
        w_spec = pl.BlockSpec((K, TC), lambda bi, ci, pi: (0, ci))
        wbuf = 2
    ce = pl.CostEstimate(
        flops=2 * B * P_pad * K * C + 10 * B * P_pad * C,
        transcendentals=B * C,
        bytes_accessed=B * n_c * P_pad * K * 2 + K * C * 2
        + B * P_pad * C * obytes,
    )
    out = pl.pallas_call(
        kernel,
        out_shape=jax.ShapeDtypeStruct((B, n_p, TP, C), out_dtype),
        grid_spec=pltpu.PrefetchScalarGridSpec(
            num_scalar_prefetch=0,
            grid=(B, n_c, n_p),
            in_specs=[
                pl.BlockSpec((1, TP, K), lambda bi, ci, pi: (bi, pi, 0)),
                w_spec,
            ],
            out_specs=pl.BlockSpec((1, n_p, TP, TC),
                                   lambda bi, ci, pi: (bi, 0, 0, ci)),
            scratch_shapes=[pltpu.VMEM((1, TC), jnp.float32),
                            pltpu.VMEM((1, TC), jnp.float32)],
        ),
        compiler_params=_mosaic_params(
            ("parallel", "parallel", "arbitrary"),
            2 * TP * K * 2,                 # patches (double-buffered)
            wbuf * K * TC * 2,              # weights
            2 * n_p * TP * TC * obytes,     # resident conv/output slab
            2 * TP * TC * 4,                # finalize-loop f32 temporaries
        ),
        cost_estimate=ce,
    )(patches, w)
    return out.reshape(B, P_pad, C)


# ----------------------------------------------------------------------------
# Kernels 3a/3b: two-pass fallback for images whose conv slab exceeds VMEM
#   (pass A intermediate is bf16 now; stats still come from the f32 accumulator)
# ----------------------------------------------------------------------------
def _conv_stats_kernel(p_ref, w_ref, conv_ref, stats_ref):
    acc = jnp.dot(p_ref[0], w_ref[...], preferred_element_type=jnp.float32)
    conv_ref[0] = acc.astype(conv_ref.dtype)

    @pl.when(pl.program_id(1) == 0)
    def _():
        stats_ref[...] = jnp.zeros_like(stats_ref)

    tile_sum = jnp.sum(acc, axis=0, keepdims=True)
    tile_sq = jnp.sum(acc * acc, axis=0, keepdims=True)
    stats_ref[0] = stats_ref[0] + jnp.concatenate([tile_sum, tile_sq], axis=0)


def _in_lrelu_kernel(x_ref, stats_ref, o_ref, *, inv_n):
    x = x_ref[0].astype(jnp.float32)
    s = stats_ref[0]
    mean = s[0:1, :] * inv_n
    var = jnp.maximum(s[1:2, :] * inv_n - mean * mean, 0.0)
    y = (x - mean) * jax.lax.rsqrt(var + _IN_EPS)
    o_ref[0] = jnp.where(y >= 0, y, _LRELU_SLOPE * y).astype(o_ref.dtype)


def conv_stats_pallas(patches, w, *, TP):
    B, P_pad, K = patches.shape
    C = w.shape[1]
    n_p = P_pad // TP
    wbuf = 1 if _single_buffer_ok() else 2
    return pl.pallas_call(
        _conv_stats_kernel,
        out_shape=(jax.ShapeDtypeStruct((B, P_pad, C), jnp.bfloat16),
                   jax.ShapeDtypeStruct((B, 2, C), jnp.float32)),
        grid_spec=pltpu.PrefetchScalarGridSpec(
            num_scalar_prefetch=0,
            grid=(B, n_p),
            in_specs=[
                pl.BlockSpec((1, TP, K), lambda bi, pi: (bi, pi, 0)),
                _invariant_spec((K, C), lambda bi, pi: (0, 0)),
            ],
            out_specs=[
                pl.BlockSpec((1, TP, C), lambda bi, pi: (bi, pi, 0)),
                pl.BlockSpec((1, 2, C), lambda bi, pi: (bi, 0, 0)),  # accumulator
            ],
        ),
        compiler_params=_mosaic_params(
            ("parallel", "arbitrary"),
            2 * TP * K * 2, wbuf * K * C * 2, 2 * TP * C * 2, 2 * 2 * C * 4,
        ),
    )(patches, w)


def in_lrelu_pallas(conv, stats, *, TP, n_valid, out_dtype=jnp.bfloat16):
    B, P_pad, C = conv.shape
    n_p = P_pad // TP
    obytes = jnp.dtype(out_dtype).itemsize
    kernel = functools.partial(_in_lrelu_kernel, inv_n=1.0 / float(n_valid))
    return pl.pallas_call(
        kernel,
        out_shape=jax.ShapeDtypeStruct((B, P_pad, C), out_dtype),
        grid_spec=pltpu.PrefetchScalarGridSpec(
            num_scalar_prefetch=0,
            grid=(B, n_p),
            in_specs=[
                pl.BlockSpec((1, TP, C), lambda bi, pi: (bi, pi, 0)),
                pl.BlockSpec((1, 2, C), lambda bi, pi: (bi, 0, 0)),
            ],
            out_specs=pl.BlockSpec((1, TP, C), lambda bi, pi: (bi, pi, 0)),
        ),
        compiler_params=_mosaic_params(
            ("parallel", "parallel"),
            2 * TP * C * 2, 2 * 2 * C * 4, 2 * TP * C * obytes,
        ),
    )(conv, stats)


# ----------------------------------------------------------------------------
# JAX glue: im2col patch extraction + layer wrapper
# ----------------------------------------------------------------------------
def _im2col(x_nhwc, k, stride, pad_hw):
    """x_nhwc:(B,H,W,C); pad_hw:((top,bottom),(left,right)).
    Returns (patches (B,Ho*Wo,k*k*C), Ho, Wo); feature order (kh, kw, cin)."""
    B, H, W, C = x_nhwc.shape
    (pt, pb), (pl_, pr) = pad_hw
    xp = jnp.pad(x_nhwc, ((0, 0), (pt, pb), (pl_, pr), (0, 0)))
    Hp, Wp = H + pt + pb, W + pl_ + pr
    Ho = (Hp - k) // stride + 1
    Wo = (Wp - k) // stride + 1
    slabs = []
    for i in range(k):
        for j in range(k):
            slabs.append(
                xp[:, i:i + stride * Ho:stride, j:j + stride * Wo:stride, :])
    p = jnp.stack(slabs, axis=3)                       # (B,Ho,Wo,k*k,C)
    return p.reshape(B, Ho * Wo, k * k * C), Ho, Wo


def _flatten_weight(w_oihw):
    """(Cout,Cin,kh,kw) -> (kh*kw*Cin, Cout), matching im2col feature order."""
    return jnp.transpose(w_oihw, (2, 3, 1, 0)).reshape(-1, w_oihw.shape[0])


def _conv_layer(x_nhwc, w_oihw, b, *, stride, pad_hw, normalize, leaky,
                out_dtype=jnp.bfloat16, fused_slab_limit_bytes=None):
    B = x_nhwc.shape[0]
    C = w_oihw.shape[0]
    k = w_oihw.shape[2]
    patches, Ho, Wo = _im2col(x_nhwc.astype(jnp.bfloat16), k, stride, pad_hw)
    P = Ho * Wo
    K = patches.shape[-1]
    TP, P_pad = _plan_p(P)
    if P_pad != P:
        # Zero rows: exact for the matmul and contribute 0 to the IN stats.
        patches = jnp.pad(patches, ((0, 0), (0, P_pad - P), (0, 0)))
    wf = _flatten_weight(w_oihw).astype(jnp.bfloat16)

    if not normalize:
        out = conv_nonorm_pallas(
            patches, wf, b.reshape(1, -1).astype(jnp.float32),
            TP=TP, leaky=leaky, out_dtype=out_dtype)
    else:
        TC = _plan_c(C, B)
        budget = (_vmem_cap_bytes() // 2 if fused_slab_limit_bytes is None
                  else fused_slab_limit_bytes)
        wbuf = 1 if _single_buffer_ok() else 2
        need = (2 * P_pad * TC * 2 + 2 * TP * K * 2 + wbuf * K * TC * 2
                + 2 * TP * TC * 4 + (4 << 20))
        if need <= budget:
            out = conv_in_lrelu_fused_pallas(
                patches, wf, TP=TP, TC=TC, n_valid=P, out_dtype=out_dtype)
        else:
            # Two-pass fallback for very large images (bf16 intermediate).
            conv, stats = conv_stats_pallas(patches, wf, TP=TP)
            out = in_lrelu_pallas(conv, stats, TP=TP, n_valid=P,
                                  out_dtype=out_dtype)
    out = out[:, :P, :]
    return out.reshape(B, Ho, Wo, C)


def _pad_cin_x(x_nhwc, mult=8):
    C = x_nhwc.shape[-1]
    Cp = _round_up(C, mult)
    if Cp == C:
        return x_nhwc
    return jnp.pad(x_nhwc, ((0, 0), (0, 0), (0, 0), (0, Cp - C)))


def _pad_cin_w(w_oihw, mult=8):
    Cin = w_oihw.shape[1]
    Cp = _round_up(Cin, mult)
    if Cp == Cin:
        return w_oihw
    return jnp.pad(w_oihw, ((0, 0), (0, Cp - Cin), (0, 0), (0, 0)))


def _pad_cout(w_oihw, b, mult=128):
    Co = w_oihw.shape[0]
    Cp = _round_up(Co, mult)
    if Cp == Co:
        return w_oihw, b
    return (jnp.pad(w_oihw, ((0, Cp - Co), (0, 0), (0, 0), (0, 0))),
            jnp.pad(b, ((0, Cp - Co),)))


# ----------------------------------------------------------------------------
# Discriminator: parameter init + forward
# ----------------------------------------------------------------------------
def init_discriminator_params(key, in_channels=3):
    shapes = [
        (64, in_channels, 4, 4),
        (128, 64, 4, 4),
        (256, 128, 4, 4),
        (512, 256, 4, 4),
        (1, 512, 4, 4),
    ]
    params = []
    for shp in shapes:
        key, kw, kb = jax.random.split(key, 3)
        w = 0.02 * jax.random.normal(kw, shp, dtype=jnp.float32)
        b = 0.01 * jax.random.normal(kb, (shp[0],), dtype=jnp.float32)
        params.append((w, b))
    return params


def discriminator_forward(params, img_nchw, *, fused_slab_limit_bytes=None):
    """img_nchw: (B,C,H,W) f32 -> (B,1,H/16,W/16) f32 (PatchGAN logits)."""
    x = jnp.transpose(img_nchw, (0, 2, 3, 1))           # NCHW -> NHWC

    # Block 1: Conv(C,64,4,s2,p1) + LeakyReLU (no norm).  Zero-pad Cin 3->8 so
    # K = 4*4*8 = 128 (MXU / lane aligned); exact.
    w0, b0 = params[0]
    x = _conv_layer(_pad_cin_x(x), _pad_cin_w(w0), b0, stride=2,
                    pad_hw=((1, 1), (1, 1)), normalize=False, leaky=True,
                    fused_slab_limit_bytes=fused_slab_limit_bytes)
    # Blocks 2-4: Conv(k4,s2,p1) + InstanceNorm + LeakyReLU (bias cancelled by IN).
    for li in (1, 2, 3):
        x = _conv_layer(x, *params[li], stride=2, pad_hw=((1, 1), (1, 1)),
                        normalize=True, leaky=True,
                        fused_slab_limit_bytes=fused_slab_limit_bytes)
    # ZeroPad2d((1,0,1,0)) then Conv(512,1,4,s1,p1): fold pads -> ((2,1),(2,1)).
    # Pad Cout 1->128 for lane-dense stores; slice the real channel afterwards.
    w4, b4 = params[4]
    w4p, b4p = _pad_cout(w4, b4, mult=128)
    x = _conv_layer(x, w4p, b4p, stride=1, pad_hw=((2, 1), (2, 1)),
                    normalize=False, leaky=False, out_dtype=jnp.float32,
                    fused_slab_limit_bytes=fused_slab_limit_bytes)
    x = x[..., : w4.shape[0]]                            # drop Cout padding
    return jnp.transpose(x, (0, 3, 1, 2))                # NHWC -> NCHW


# ----------------------------------------------------------------------------
# Pure-XLA reference mirroring the kernel's dtype pipeline (bf16 matmul
# operands & intermediates, f32 accumulation / stats) for a tight cross-check.
# ----------------------------------------------------------------------------
def _ref_forward(params, img_nchw):
    def conv(x, w, stride, pad):
        return jax.lax.conv_general_dilated(
            x.astype(jnp.bfloat16),
            jnp.transpose(w, (2, 3, 1, 0)).astype(jnp.bfloat16),
            window_strides=(stride, stride), padding=pad,
            dimension_numbers=("NHWC", "HWIO", "NHWC"),
            preferred_element_type=jnp.float32)

    x = jnp.transpose(img_nchw, (0, 2, 3, 1))
    for li, (w, b) in enumerate(params[:4]):
        y = conv(x, w, 2, ((1, 1), (1, 1)))
        if li == 0:
            y = y + b.astype(jnp.float32)
        else:
            # Bias dropped (cancelled by IN).  Stats from f32; the value being
            # normalized is the bf16-stored conv intermediate, like the kernels.
            mean = jnp.mean(y, axis=(1, 2), keepdims=True)
            var = jnp.mean(jnp.square(y), axis=(1, 2), keepdims=True) - mean * mean
            yq = y.astype(jnp.bfloat16).astype(jnp.float32)
            y = (yq - mean) * jax.lax.rsqrt(jnp.maximum(var, 0.0) + _IN_EPS)
        y = jnp.where(y >= 0, y, _LRELU_SLOPE * y)
        x = y.astype(jnp.bfloat16)
    w4, b4 = params[4]
    y = conv(x, w4, 1, ((2, 1), (2, 1))) + b4.astype(jnp.float32)
    return jnp.transpose(y, (0, 3, 1, 2)).astype(jnp.float32)


if __name__ == "__main__":
    # Resolve hardware queries / feature probes once, outside of jit tracing.
    _ = _vmem_cap_bytes()
    _ = _single_buffer_ok()

    key = jax.random.PRNGKey(0)
    kp, kx = jax.random.split(key)
    in_channels = 3
    params = init_discriminator_params(kp, in_channels=in_channels)

    # 32x32 input so every InstanceNorm layer sees >1 spatial element
    # (32 -> 16 -> 8 -> 4 -> 2 -> final conv -> 2x2 patch map).
    img = jax.random.normal(kx, (2, in_channels, 32, 32), dtype=jnp.float32)

    fwd = jax.jit(discriminator_forward)
    out = jax.block_until_ready(fwd(params, img))
    assert out.shape == (2, 1, 2, 2), out.shape
    assert bool(jnp.all(jnp.isfinite(out)))

    # Cross-check the fused path against the pure-XLA reference.
    ref = jax.block_until_ready(jax.jit(_ref_forward)(params, img))
    err = float(jnp.max(jnp.abs(out - ref)))
    assert err < 3e-2, f"fused path mismatch vs reference: {err}"

    # Also exercise the large-image two-pass (stats + normalize) fallback path.
    fwd_fb = jax.jit(functools.partial(discriminator_forward,
                                       fused_slab_limit_bytes=0))
    out_fb = jax.block_until_ready(fwd_fb(params, img))
    err_fb = float(jnp.max(jnp.abs(out_fb - ref)))
    assert err_fb < 3e-2, f"two-pass path mismatch vs reference: {err_fb}"

    print("KERNEL_OK")
</pallas_src>

<mosaic_0001>
module attributes {stable_mosaic.version = 11 : i64} {
  func.func @_conv_bias_act_kernel(%arg0: i32, %arg1: i32, %arg2: memref<1x256x128xbf16, #tpu.memory_space<vmem>>, %arg3: memref<128x64xbf16, #tpu.memory_space<vmem>>, %arg4: memref<1x64xf32, #tpu.memory_space<vmem>>, %arg5: memref<1x256x64xbf16, #tpu.memory_space<vmem>>) attributes {dimension_semantics = [#tpu.dimension_semantics<parallel>, #tpu.dimension_semantics<parallel>], iteration_bounds = array<i64: 2, 1>, scalar_prefetch = 0 : i64, scratch_operands = 0 : i64, tpu.core_type = #tpu.core_type<tc>, window_params = [{transform_indices = @transform_0, window_bounds = array<i64: 1, 256, 128>}, {pipeline_mode = #tpu.pipeline_mode<synchronous>, transform_indices = @transform_1, window_bounds = array<i64: 128, 64>}, {pipeline_mode = #tpu.pipeline_mode<synchronous>, transform_indices = @transform_2, window_bounds = array<i64: 1, 64>}, {transform_indices = @transform_3, window_bounds = array<i64: 1, 256, 64>}]} {
    %c0 = arith.constant 0 : index
    %c0_0 = arith.constant 0 : index
    %c0_1 = arith.constant 0 : index
    %0 = vector.load %arg2[%c0, %c0_0, %c0_1] : memref<1x256x128xbf16, #tpu.memory_space<vmem>>, vector<1x256x128xbf16>
    %1 = vector.shape_cast %0 : vector<1x256x128xbf16> to vector<256x128xbf16>
    %c0_2 = arith.constant 0 : index
    %c0_3 = arith.constant 0 : index
    %2 = vector.load %arg3[%c0_2, %c0_3] : memref<128x64xbf16, #tpu.memory_space<vmem>>, vector<128x64xbf16>
    %cst = arith.constant dense<0.000000e+00> : vector<256x64xf32>
    %3 = tpu.matmul %1, %2, %cst {dimension_numbers = #tpu.dot_dimension_numbers<[1], [0], [0], [1], [0, 0, 1, 1], [], []>} : vector<256x128xbf16>, vector<128x64xbf16>, vector<256x64xf32> -> vector<256x64xf32>
    %c0_4 = arith.constant 0 : index
    %c0_5 = arith.constant 0 : index
    %4 = vector.load %arg4[%c0_4, %c0_5] : memref<1x64xf32, #tpu.memory_space<vmem>>, vector<1x64xf32>
    %5 = vector.broadcast %4 : vector<1x64xf32> to vector<256x64xf32>
    %6 = arith.addf %3, %5 : vector<256x64xf32>
    %cst_6 = arith.constant 0.000000e+00 : f32
    %7 = vector.broadcast %cst_6 : f32 to vector<256x64xf32>
    %8 = arith.cmpf oge, %6, %7 : vector<256x64xf32>
    %cst_7 = arith.constant 2.000000e-01 : f32
    %9 = vector.broadcast %cst_7 : f32 to vector<256x64xf32>
    %10 = arith.mulf %9, %6 : vector<256x64xf32>
    %11 = arith.select %8, %6, %10 : vector<256x64xi1>, vector<256x64xf32>
    %12 = arith.truncf %11 : vector<256x64xf32> to vector<256x64xbf16>
    %c0_8 = arith.constant 0 : index
    %c0_9 = arith.constant 0 : index
    %c0_10 = arith.constant 0 : index
    %13 = vector.load %arg5[%c0_8, %c0_9, %c0_10] : memref<1x256x64xbf16, #tpu.memory_space<vmem>>, vector<1x256x64xbf16>
    %14 = vector.shape_cast %13 : vector<1x256x64xbf16> to vector<256x64xbf16>
    %15 = vector.shape_cast %12 : vector<256x64xbf16> to vector<1x256x64xbf16>
    tpu.vector_store %arg5[%c0_8, %c0_9, %c0_10], %15 {strides = array<i32>} : memref<1x256x64xbf16, #tpu.memory_space<vmem>>, vector<1x256x64xbf16>,
    return
  }
  func.func @transform_0(%arg0: i32, %arg1: i32) -> (i32, i32, i32) {
    %c0_i32 = arith.constant 0 : i32
    %c0_i32_0 = arith.constant 0 : i32
    return %arg0, %arg1, %c0_i32 : i32, i32, i32
  }
  func.func @transform_1(%arg0: i32, %arg1: i32) -> (i32, i32) {
    %c0_i32 = arith.constant 0 : i32
    %c0_i32_0 = arith.constant 0 : i32
    %c0_i32_1 = arith.constant 0 : i32
    return %c0_i32, %c0_i32_0 : i32, i32
  }
  func.func @transform_2(%arg0: i32, %arg1: i32) -> (i32, i32) {
    %c0_i32 = arith.constant 0 : i32
    %c0_i32_0 = arith.constant 0 : i32
    %c0_i32_1 = arith.constant 0 : i32
    return %c0_i32, %c0_i32_0 : i32, i32
  }
  func.func @transform_3(%arg0: i32, %arg1: i32) -> (i32, i32, i32) {
    %c0_i32 = arith.constant 0 : i32
    %c0_i32_0 = arith.constant 0 : i32
    return %arg0, %arg1, %c0_i32 : i32, i32, i32
  }
}

module attributes {stable_mosaic.version = 11 : i64} {
  func.func @_conv_in_lrelu_kernel(%arg0: i32, %arg1: i32, %arg2: i32, %arg3: memref<1x64x1024xbf16, #tpu.memory_space<vmem>>, %arg4: memref<1024x128xbf16, #tpu.memory_space<vmem>>, %arg5: memref<1x1x64x128xbf16, #tpu.memory_space<vmem>>, %arg6: memref<1x128xf32, #tpu.memory_space<vmem>>, %arg7: memref<1x128xf32, #tpu.memory_space<vmem>>) attributes {dimension_semantics = [#tpu.dimension_semantics<parallel>, #tpu.dimension_semantics<parallel>, #tpu.dimension_semantics<arbitrary>], iteration_bounds = array<i64: 2, 1, 1>, scalar_prefetch = 0 : i64, scratch_operands = 2 : i64, tpu.core_type = #tpu.core_type<tc>, window_params = [{transform_indices = @transform_0, window_bounds = array<i64: 1, 64, 1024>}, {pipeline_mode = #tpu.pipeline_mode<synchronous>, transform_indices = @transform_1, window_bounds = array<i64: 1024, 128>}, {transform_indices = @transform_2, window_bounds = array<i64: 1, 1, 64, 128>}]} {
    %c0_i32 = arith.constant 0 : i32
    %0 = arith.cmpi eq, %arg2, %c0_i32 : i32
    %1 = arith.extui %0 : i1 to i32
    %c0_i32_0 = arith.constant 0 : i32
    %2 = arith.cmpi ne, %1, %c0_i32_0 : i32
    scf.if %2 {
      %cst_20 = arith.constant 0.000000e+00 : f32
      %26 = vector.broadcast %cst_20 : f32 to vector<1x128xf32>
      %c0_21 = arith.constant 0 : index
      %c0_22 = arith.constant 0 : index
      %27 = vector.load %arg6[%c0_21, %c0_22] : memref<1x128xf32, #tpu.memory_space<vmem>>, vector<1x128xf32>
      tpu.vector_store %arg6[%c0_21, %c0_22], %26 {strides = array<i32>} : memref<1x128xf32, #tpu.memory_space<vmem>>, vector<1x128xf32>,
      %cst_23 = arith.constant 0.000000e+00 : f32
      %28 = vector.broadcast %cst_23 : f32 to vector<1x128xf32>
      %c0_24 = arith.constant 0 : index
      %c0_25 = arith.constant 0 : index
      %29 = vector.load %arg7[%c0_24, %c0_25] : memref<1x128xf32, #tpu.memory_space<vmem>>, vector<1x128xf32>
      tpu.vector_store %arg7[%c0_24, %c0_25], %28 {strides = array<i32>} : memref<1x128xf32, #tpu.memory_space<vmem>>, vector<1x128xf32>,
    } else {
    }
    %c0 = arith.constant 0 : index
    %c0_1 = arith.constant 0 : index
    %c0_2 = arith.constant 0 : index
    %3 = vector.load %arg3[%c0, %c0_1, %c0_2] : memref<1x64x1024xbf16, #tpu.memory_space<vmem>>, vector<1x64x1024xbf16>
    %4 = vector.shape_cast %3 : vector<1x64x1024xbf16> to vector<64x1024xbf16>
    %c0_3 = arith.constant 0 : index
    %c0_4 = arith.constant 0 : index
    %5 = vector.load %arg4[%c0_3, %c0_4] : memref<1024x128xbf16, #tpu.memory_space<vmem>>, vector<1024x128xbf16>
    %cst = arith.constant dense<0.000000e+00> : vector<64x128xf32>
    %6 = tpu.matmul %4, %5, %cst {dimension_numbers = #tpu.dot_dimension_numbers<[1], [0], [0], [1], [0, 0, 1, 1], [], []>} : vector<64x1024xbf16>, vector<1024x128xbf16>, vector<64x128xf32> -> vector<64x128xf32>
    %7 = arith.truncf %6 : vector<64x128xf32> to vector<64x128xbf16>
    %c0_5 = arith.constant 0 : index
    %8 = arith.index_cast %arg2 : i32 to index
    %c0_6 = arith.constant 0 : index
    %c0_7 = arith.constant 0 : index
    %9 = vector.load %arg5[%c0_5, %8, %c0_6, %c0_7] : memref<1x1x64x128xbf16, #tpu.memory_space<vmem>>, vector<1x1x64x128xbf16>
    %10 = vector.shape_cast %9 : vector<1x1x64x128xbf16> to vector<64x128xbf16>
    %11 = vector.shape_cast %7 : vector<64x128xbf16> to vector<1x1x64x128xbf16>
    tpu.vector_store %arg5[%c0_5, %8, %c0_6, %c0_7], %11 {strides = array<i32>} : memref<1x1x64x128xbf16, #tpu.memory_space<vmem>>, vector<1x1x64x128xbf16>,
    %c0_8 = arith.constant 0 : index
    %c0_9 = arith.constant 0 : index
    %12 = vector.load %arg6[%c0_8, %c0_9] : memref<1x128xf32, #tpu.memory_space<vmem>>, vector<1x128xf32>
    %cst_10 = arith.constant dense<0.000000e+00> : vector<128xf32>
    %13 = vector.multi_reduction <add>, %6, %cst_10 [0] : vector<64x128xf32> to vector<128xf32>
    %14 = vector.shape_cast %13 : vector<128xf32> to vector<1x128xf32>
    %15 = arith.addf %12, %14 : vector<1x128xf32>
    %c0_11 = arith.constant 0 : index
    %c0_12 = arith.constant 0 : index
    %16 = vector.load %arg6[%c0_11, %c0_12] : memref<1x128xf32, #tpu.memory_space<vmem>>, vector<1x128xf32>
    tpu.vector_store %arg6[%c0_11, %c0_12], %15 {strides = array<i32>} : memref<1x128xf32, #tpu.memory_space<vmem>>, vector<1x128xf32>,
    %c0_13 = arith.constant 0 : index
    %c0_14 = arith.constant 0 : index
    %17 = vector.load %arg7[%c0_13, %c0_14] : memref<1x128xf32, #tpu.memory_space<vmem>>, vector<1x128xf32>
    %18 = arith.mulf %6, %6 : vector<64x128xf32>
    %cst_15 = arith.constant dense<0.000000e+00> : vector<128xf32>
    %19 = vector.multi_reduction <add>, %18, %cst_15 [0] : vector<64x128xf32> to vector<128xf32>
    %20 = vector.shape_cast %19 : vector<128xf32> to vector<1x128xf32>
    %21 = arith.addf %17, %20 : vector<1x128xf32>
    %c0_16 = arith.constant 0 : index
    %c0_17 = arith.constant 0 : index
    %22 = vector.load %arg7[%c0_16, %c0_17] : memref<1x128xf32, #tpu.memory_space<vmem>>, vector<1x128xf32>
    tpu.vector_store %arg7[%c0_16, %c0_17], %21 {strides = array<i32>} : memref<1x128xf32, #tpu.memory_space<vmem>>, vector<1x128xf32>,
    %c0_i32_18 = arith.constant 0 : i32
    %23 = arith.cmpi eq, %arg2, %c0_i32_18 : i32
    %24 = arith.extui %23 : i1 to i32
    %c0_i32_19 = arith.constant 0 : i32
    %25 = arith.cmpi ne, %24, %c0_i32_19 : i32
    scf.if %25 {
      %c0_20 = arith.constant 0 : index
      %c0_21 = arith.constant 0 : index
      %26 = vector.load %arg6[%c0_20, %c0_21] : memref<1x128xf32, #tpu.memory_space<vmem>>, vector<1x128xf32>
      %cst_22 = arith.constant 1.562500e-02 : f32
      %27 = vector.broadcast %cst_22 : f32 to vector<1x128xf32>
      %28 = arith.mulf %26, %27 : vector<1x128xf32>
      %c0_23 = arith.constant 0 : index
      %c0_24 = arith.constant 0 : index
      %29 = vector.load %arg7[%c0_23, %c0_24] : memref<1x128xf32, #tpu.memory_space<vmem>>, vector<1x128xf32>
      %cst_25 = arith.constant 1.562500e-02 : f32
      %30 = vector.broadcast %cst_25 : f32 to vector<1x128xf32>
      %31 = arith.mulf %29, %30 : vector<1x128xf32>
      %32 = arith.mulf %28, %28 : vector<1x128xf32>
      %33 = arith.subf %31, %32 : vector<1x128xf32>
      %cst_26 = arith.constant 0.000000e+00 : f32
      %34 = vector.broadcast %cst_26 : f32 to vector<1x128xf32>
      %35 = arith.maximumf %33, %34 : vector<1x128xf32>
      %cst_27 = arith.constant 9.99999974E-6 : f32
      %36 = vector.broadcast %cst_27 : f32 to vector<1x128xf32>
      %37 = arith.addf %35, %36 : vector<1x128xf32>
      %38 = math.rsqrt %37 : vector<1x128xf32>
      %c0_i32_28 = arith.constant 0 : i32
      %c1_i32 = arith.constant 1 : i32
      %39 = arith.muli %c0_i32_28, %c1_i32 : i32
      %c0_i32_29 = arith.constant 0 : i32
      %40 = arith.addi %c0_i32_29, %39 : i32
      %c0_30 = arith.constant 0 : index
      %41 = arith.index_cast %40 : i32 to index
      %c0_31 = arith.constant 0 : index
      %c0_32 = arith.constant 0 : index
      %42 = vector.load %arg5[%c0_30, %41, %c0_31, %c0_32] : memref<1x1x64x128xbf16, #tpu.memory_space<vmem>>, vector<1x1x64x128xbf16>
      %43 = vector.shape_cast %42 : vector<1x1x64x128xbf16> to vector<64x128xbf16>
      %44 = arith.extf %43 : vector<64x128xbf16> to vector<64x128xf32>
      %45 = vector.broadcast %28 : vector<1x128xf32> to vector<64x128xf32>
      %46 = arith.subf %44, %45 : vector<64x128xf32>
      %47 = vector.broadcast %38 : vector<1x128xf32> to vector<64x128xf32>
      %48 = arith.mulf %46, %47 : vector<64x128xf32>
      %cst_33 = arith.constant 0.000000e+00 : f32
      %49 = vector.broadcast %cst_33 : f32 to vector<64x128xf32>
      %50 = arith.cmpf oge, %48, %49 : vector<64x128xf32>
      %cst_34 = arith.constant 2.000000e-01 : f32
      %51 = vector.broadcast %cst_34 : f32 to vector<64x128xf32>
      %52 = arith.mulf %51, %48 : vector<64x128xf32>
      %53 = arith.select %50, %48, %52 : vector<64x128xi1>, vector<64x128xf32>
      %54 = arith.truncf %53 : vector<64x128xf32> to vector<64x128xbf16>
      %c0_35 = arith.constant 0 : index
      %55 = arith.index_cast %40 : i32 to index
      %c0_36 = arith.constant 0 : index
      %c0_37 = arith.constant 0 : index
      %56 = vector.load %arg5[%c0_35, %55, %c0_36, %c0_37] : memref<1x1x64x128xbf16, #tpu.memory_space<vmem>>, vector<1x1x64x128xbf16>
      %57 = vector.shape_cast %56 : vector<1x1x64x128xbf16> to vector<64x128xbf16>
      %58 = vector.shape_cast %54 : vector<64x128xbf16> to vector<1x1x64x128xbf16>
      tpu.vector_store %arg5[%c0_35, %55, %c0_36, %c0_37], %58 {strides = array<i32>} : memref<1x1x64x128xbf16, #tpu.memory_space<vmem>>, vector<1x1x64x128xbf16>,
      %c1_i32_38 = arith.constant 1 : i32
    } else {
    }
    return
  }
  func.func @transform_0(%arg0: i32, %arg1: i32, %arg2: i32) -> (i32, i32, i32) {
    %c0_i32 = arith.constant 0 : i32
    %c0_i32_0 = arith.constant 0 : i32
    return %arg0, %arg2, %c0_i32 : i32, i32, i32
  }
  func.func @transform_1(%arg0: i32, %arg1: i32, %arg2: i32) -> (i32, i32) {
    %c0_i32 = arith.constant 0 : i32
    %c0_i32_0 = arith.constant 0 : i32
    %c0_i32_1 = arith.constant 0 : i32
    return %c0_i32, %c0_i32_0 : i32, i32
  }
  func.func @transform_2(%arg0: i32, %arg1: i32, %arg2: i32) -> (i32, i32, i32, i32) {
    %c0_i32 = arith.constant 0 : i32
    %c0_i32_0 = arith.constant 0 : i32
    %c0_i32_1 = arith.constant 0 : i32
    return %arg0, %c0_i32, %c0_i32_0, %arg1 : i32, i32, i32, i32
  }
}

module attributes {stable_mosaic.version = 11 : i64} {
  func.func @_conv_in_lrelu_kernel(%arg0: i32, %arg1: i32, %arg2: i32, %arg3: memref<1x16x2048xbf16, #tpu.memory_space<vmem>>, %arg4: memref<2048x128xbf16, #tpu.memory_space<vmem>>, %arg5: memref<1x1x16x128xbf16, #tpu.memory_space<vmem>>, %arg6: memref<1x128xf32, #tpu.memory_space<vmem>>, %arg7: memref<1x128xf32, #tpu.memory_space<vmem>>) attributes {dimension_semantics = [#tpu.dimension_semantics<parallel>, #tpu.dimension_semantics<parallel>, #tpu.dimension_semantics<arbitrary>], iteration_bounds = array<i64: 2, 2, 1>, scalar_prefetch = 0 : i64, scratch_operands = 2 : i64, tpu.core_type = #tpu.core_type<tc>, window_params = [{transform_indices = @transform_0, window_bounds = array<i64: 1, 16, 2048>}, {transform_indices = @transform_1, window_bounds = array<i64: 2048, 128>}, {transform_indices = @transform_2, window_bounds = array<i64: 1, 1, 16, 128>}]} {
    %c0_i32 = arith.constant 0 : i32
    %0 = arith.cmpi eq, %arg2, %c0_i32 : i32
    %1 = arith.extui %0 : i1 to i32
    %c0_i32_0 = arith.constant 0 : i32
    %2 = arith.cmpi ne, %1, %c0_i32_0 : i32
    scf.if %2 {
      %cst_20 = arith.constant 0.000000e+00 : f32
      %26 = vector.broadcast %cst_20 : f32 to vector<1x128xf32>
      %c0_21 = arith.constant 0 : index
      %c0_22 = arith.constant 0 : index
      %27 = vector.load %arg6[%c0_21, %c0_22] : memref<1x128xf32, #tpu.memory_space<vmem>>, vector<1x128xf32>
      tpu.vector_store %arg6[%c0_21, %c0_22], %26 {strides = array<i32>} : memref<1x128xf32, #tpu.memory_space<vmem>>, vector<1x128xf32>,
      %cst_23 = arith.constant 0.000000e+00 : f32
      %28 = vector.broadcast %cst_23 : f32 to vector<1x128xf32>
      %c0_24 = arith.constant 0 : index
      %c0_25 = arith.constant 0 : index
      %29 = vector.load %arg7[%c0_24, %c0_25] : memref<1x128xf32, #tpu.memory_space<vmem>>, vector<1x128xf32>
      tpu.vector_store %arg7[%c0_24, %c0_25], %28 {strides = array<i32>} : memref<1x128xf32, #tpu.memory_space<vmem>>, vector<1x128xf32>,
    } else {
    }
    %c0 = arith.constant 0 : index
    %c0_1 = arith.constant 0 : index
    %c0_2 = arith.constant 0 : index
    %3 = vector.load %arg3[%c0, %c0_1, %c0_2] : memref<1x16x2048xbf16, #tpu.memory_space<vmem>>, vector<1x16x2048xbf16>
    %4 = vector.shape_cast %3 : vector<1x16x2048xbf16> to vector<16x2048xbf16>
    %c0_3 = arith.constant 0 : index
    %c0_4 = arith.constant 0 : index
    %5 = vector.load %arg4[%c0_3, %c0_4] : memref<2048x128xbf16, #tpu.memory_space<vmem>>, vector<2048x128xbf16>
    %cst = arith.constant dense<0.000000e+00> : vector<16x128xf32>
    %6 = tpu.matmul %4, %5, %cst {dimension_numbers = #tpu.dot_dimension_numbers<[1], [0], [0], [1], [0, 0, 1, 1], [], []>} : vector<16x2048xbf16>, vector<2048x128xbf16>, vector<16x128xf32> -> vector<16x128xf32>
    %7 = arith.truncf %6 : vector<16x128xf32> to vector<16x128xbf16>
    %c0_5 = arith.constant 0 : index
    %8 = arith.index_cast %arg2 : i32 to index
    %c0_6 = arith.constant 0 : index
    %c0_7 = arith.constant 0 : index
    %9 = vector.load %arg5[%c0_5, %8, %c0_6, %c0_7] : memref<1x1x16x128xbf16, #tpu.memory_space<vmem>>, vector<1x1x16x128xbf16>
    %10 = vector.shape_cast %9 : vector<1x1x16x128xbf16> to vector<16x128xbf16>
    %11 = vector.shape_cast %7 : vector<16x128xbf16> to vector<1x1x16x128xbf16>
    tpu.vector_store %arg5[%c0_5, %8, %c0_6, %c0_7], %11 {strides = array<i32>} : memref<1x1x16x128xbf16, #tpu.memory_space<vmem>>, vector<1x1x16x128xbf16>,
    %c0_8 = arith.constant 0 : index
    %c0_9 = arith.constant 0 : index
    %12 = vector.load %arg6[%c0_8, %c0_9] : memref<1x128xf32, #tpu.memory_space<vmem>>, vector<1x128xf32>
    %cst_10 = arith.constant dense<0.000000e+00> : vector<128xf32>
    %13 = vector.multi_reduction <add>, %6, %cst_10 [0] : vector<16x128xf32> to vector<128xf32>
    %14 = vector.shape_cast %13 : vector<128xf32> to vector<1x128xf32>
    %15 = arith.addf %12, %14 : vector<1x128xf32>
    %c0_11 = arith.constant 0 : index
    %c0_12 = arith.constant 0 : index
    %16 = vector.load %arg6[%c0_11, %c0_12] : memref<1x128xf32, #tpu.memory_space<vmem>>, vector<1x128xf32>
    tpu.vector_store %arg6[%c0_11, %c0_12], %15 {strides = array<i32>} : memref<1x128xf32, #tpu.memory_space<vmem>>, vector<1x128xf32>,
    %c0_13 = arith.constant 0 : index
    %c0_14 = arith.constant 0 : index
    %17 = vector.load %arg7[%c0_13, %c0_14] : memref<1x128xf32, #tpu.memory_space<vmem>>, vector<1x128xf32>
    %18 = arith.mulf %6, %6 : vector<16x128xf32>
    %cst_15 = arith.constant dense<0.000000e+00> : vector<128xf32>
    %19 = vector.multi_reduction <add>, %18, %cst_15 [0] : vector<16x128xf32> to vector<128xf32>
    %20 = vector.shape_cast %19 : vector<128xf32> to vector<1x128xf32>
    %21 = arith.addf %17, %20 : vector<1x128xf32>
    %c0_16 = arith.constant 0 : index
    %c0_17 = arith.constant 0 : index
    %22 = vector.load %arg7[%c0_16, %c0_17] : memref<1x128xf32, #tpu.memory_space<vmem>>, vector<1x128xf32>
    tpu.vector_store %arg7[%c0_16, %c0_17], %21 {strides = array<i32>} : memref<1x128xf32, #tpu.memory_space<vmem>>, vector<1x128xf32>,
    %c0_i32_18 = arith.constant 0 : i32
    %23 = arith.cmpi eq, %arg2, %c0_i32_18 : i32
    %24 = arith.extui %23 : i1 to i32
    %c0_i32_19 = arith.constant 0 : i32
    %25 = arith.cmpi ne, %24, %c0_i32_19 : i32
    scf.if %25 {
      %c0_20 = arith.constant 0 : index
      %c0_21 = arith.constant 0 : index
      %26 = vector.load %arg6[%c0_20, %c0_21] : memref<1x128xf32, #tpu.memory_space<vmem>>, vector<1x128xf32>
      %cst_22 = arith.constant 6.250000e-02 : f32
      %27 = vector.broadcast %cst_22 : f32 to vector<1x128xf32>
      %28 = arith.mulf %26, %27 : vector<1x128xf32>
      %c0_23 = arith.constant 0 : index
      %c0_24 = arith.constant 0 : index
      %29 = vector.load %arg7[%c0_23, %c0_24] : memref<1x128xf32, #tpu.memory_space<vmem>>, vector<1x128xf32>
      %cst_25 = arith.constant 6.250000e-02 : f32
      %30 = vector.broadcast %cst_25 : f32 to vector<1x128xf32>
      %31 = arith.mulf %29, %30 : vector<1x128xf32>
      %32 = arith.mulf %28, %28 : vector<1x128xf32>
      %33 = arith.subf %31, %32 : vector<1x128xf32>
      %cst_26 = arith.constant 0.000000e+00 : f32
      %34 = vector.broadcast %cst_26 : f32 to vector<1x128xf32>
      %35 = arith.maximumf %33, %34 : vector<1x128xf32>
      %cst_27 = arith.constant 9.99999974E-6 : f32
      %36 = vector.broadcast %cst_27 : f32 to vector<1x128xf32>
      %37 = arith.addf %35, %36 : vector<1x128xf32>
      %38 = math.rsqrt %37 : vector<1x128xf32>
      %c0_i32_28 = arith.constant 0 : i32
      %c1_i32 = arith.constant 1 : i32
      %39 = arith.muli %c0_i32_28, %c1_i32 : i32
      %c0_i32_29 = arith.constant 0 : i32
      %40 = arith.addi %c0_i32_29, %39 : i32
      %c0_30 = arith.constant 0 : index
      %41 = arith.index_cast %40 : i32 to index
      %c0_31 = arith.constant 0 : index
      %c0_32 = arith.constant 0 : index
      %42 = vector.load %arg5[%c0_30, %41, %c0_31, %c0_32] : memref<1x1x16x128xbf16, #tpu.memory_space<vmem>>, vector<1x1x16x128xbf16>
      %43 = vector.shape_cast %42 : vector<1x1x16x128xbf16> to vector<16x128xbf16>
      %44 = arith.extf %43 : vector<16x128xbf16> to vector<16x128xf32>
      %45 = vector.broadcast %28 : vector<1x128xf32> to vector<16x128xf32>
      %46 = arith.subf %44, %45 : vector<16x128xf32>
      %47 = vector.broadcast %38 : vector<1x128xf32> to vector<16x128xf32>
      %48 = arith.mulf %46, %47 : vector<16x128xf32>
      %cst_33 = arith.constant 0.000000e+00 : f32
      %49 = vector.broadcast %cst_33 : f32 to vector<16x128xf32>
      %50 = arith.cmpf oge, %48, %49 : vector<16x128xf32>
      %cst_34 = arith.constant 2.000000e-01 : f32
      %51 = vector.broadcast %cst_34 : f32 to vector<16x128xf32>
      %52 = arith.mulf %51, %48 : vector<16x128xf32>
      %53 = arith.select %50, %48, %52 : vector<16x128xi1>, vector<16x128xf32>
      %54 = arith.truncf %53 : vector<16x128xf32> to vector<16x128xbf16>
      %c0_35 = arith.constant 0 : index
      %55 = arith.index_cast %40 : i32 to index
      %c0_36 = arith.constant 0 : index
      %c0_37 = arith.constant 0 : index
      %56 = vector.load %arg5[%c0_35, %55, %c0_36, %c0_37] : memref<1x1x16x128xbf16, #tpu.memory_space<vmem>>, vector<1x1x16x128xbf16>
      %57 = vector.shape_cast %56 : vector<1x1x16x128xbf16> to vector<16x128xbf16>
      %58 = vector.shape_cast %54 : vector<16x128xbf16> to vector<1x1x16x128xbf16>
      tpu.vector_store %arg5[%c0_35, %55, %c0_36, %c0_37], %58 {strides = array<i32>} : memref<1x1x16x128xbf16, #tpu.memory_space<vmem>>, vector<1x1x16x128xbf16>,
      %c1_i32_38 = arith.constant 1 : i32
    } else {
    }
    return
  }
  func.func @transform_0(%arg0: i32, %arg1: i32, %arg2: i32) -> (i32, i32, i32) {
    %c0_i32 = arith.constant 0 : i32
    %c0_i32_0 = arith.constant 0 : i32
    return %arg0, %arg2, %c0_i32 : i32, i32, i32
  }
  func.func @transform_1(%arg0: i32, %arg1: i32, %arg2: i32) -> (i32, i32) {
    %c0_i32 = arith.constant 0 : i32
    %c0_i32_0 = arith.constant 0 : i32
    return %c0_i32, %arg1 : i32, i32
  }
  func.func @transform_2(%arg0: i32, %arg1: i32, %arg2: i32) -> (i32, i32, i32, i32) {
    %c0_i32 = arith.constant 0 : i32
    %c0_i32_0 = arith.constant 0 : i32
    %c0_i32_1 = arith.constant 0 : i32
    return %arg0, %c0_i32, %c0_i32_0, %arg1 : i32, i32, i32, i32
  }
}

module attributes {stable_mosaic.version = 11 : i64} {
  func.func @_conv_in_lrelu_kernel(%arg0: i32, %arg1: i32, %arg2: i32, %arg3: memref<1x16x4096xbf16, #tpu.memory_space<vmem>>, %arg4: memref<4096x256xbf16, #tpu.memory_space<vmem>>, %arg5: memref<1x1x16x256xbf16, #tpu.memory_space<vmem>>, %arg6: memref<1x256xf32, #tpu.memory_space<vmem>>, %arg7: memref<1x256xf32, #tpu.memory_space<vmem>>) attributes {dimension_semantics = [#tpu.dimension_semantics<parallel>, #tpu.dimension_semantics<parallel>, #tpu.dimension_semantics<arbitrary>], iteration_bounds = array<i64: 2, 2, 1>, scalar_prefetch = 0 : i64, scratch_operands = 2 : i64, tpu.core_type = #tpu.core_type<tc>, window_params = [{transform_indices = @transform_0, window_bounds = array<i64: 1, 16, 4096>}, {transform_indices = @transform_1, window_bounds = array<i64: 4096, 256>}, {transform_indices = @transform_2, window_bounds = array<i64: 1, 1, 16, 256>}]} {
    %c0_i32 = arith.constant 0 : i32
    %0 = arith.cmpi eq, %arg2, %c0_i32 : i32
    %1 = arith.extui %0 : i1 to i32
    %c0_i32_0 = arith.constant 0 : i32
    %2 = arith.cmpi ne, %1, %c0_i32_0 : i32
    scf.if %2 {
      %cst_20 = arith.constant 0.000000e+00 : f32
      %26 = vector.broadcast %cst_20 : f32 to vector<1x256xf32>
      %c0_21 = arith.constant 0 : index
      %c0_22 = arith.constant 0 : index
      %27 = vector.load %arg6[%c0_21, %c0_22] : memref<1x256xf32, #tpu.memory_space<vmem>>, vector<1x256xf32>
      tpu.vector_store %arg6[%c0_21, %c0_22], %26 {strides = array<i32>} : memref<1x256xf32, #tpu.memory_space<vmem>>, vector<1x256xf32>,
      %cst_23 = arith.constant 0.000000e+00 : f32
      %28 = vector.broadcast %cst_23 : f32 to vector<1x256xf32>
      %c0_24 = arith.constant 0 : index
      %c0_25 = arith.constant 0 : index
      %29 = vector.load %arg7[%c0_24, %c0_25] : memref<1x256xf32, #tpu.memory_space<vmem>>, vector<1x256xf32>
      tpu.vector_store %arg7[%c0_24, %c0_25], %28 {strides = array<i32>} : memref<1x256xf32, #tpu.memory_space<vmem>>, vector<1x256xf32>,
    } else {
    }
    %c0 = arith.constant 0 : index
    %c0_1 = arith.constant 0 : index
    %c0_2 = arith.constant 0 : index
    %3 = vector.load %arg3[%c0, %c0_1, %c0_2] : memref<1x16x4096xbf16, #tpu.memory_space<vmem>>, vector<1x16x4096xbf16>
    %4 = vector.shape_cast %3 : vector<1x16x4096xbf16> to vector<16x4096xbf16>
    %c0_3 = arith.constant 0 : index
    %c0_4 = arith.constant 0 : index
    %5 = vector.load %arg4[%c0_3, %c0_4] : memref<4096x256xbf16, #tpu.memory_space<vmem>>, vector<4096x256xbf16>
    %cst = arith.constant dense<0.000000e+00> : vector<16x256xf32>
    %6 = tpu.matmul %4, %5, %cst {dimension_numbers = #tpu.dot_dimension_numbers<[1], [0], [0], [1], [0, 0, 1, 1], [], []>} : vector<16x4096xbf16>, vector<4096x256xbf16>, vector<16x256xf32> -> vector<16x256xf32>
    %7 = arith.truncf %6 : vector<16x256xf32> to vector<16x256xbf16>
    %c0_5 = arith.constant 0 : index
    %8 = arith.index_cast %arg2 : i32 to index
    %c0_6 = arith.constant 0 : index
    %c0_7 = arith.constant 0 : index
    %9 = vector.load %arg5[%c0_5, %8, %c0_6, %c0_7] : memref<1x1x16x256xbf16, #tpu.memory_space<vmem>>, vector<1x1x16x256xbf16>
    %10 = vector.shape_cast %9 : vector<1x1x16x256xbf16> to vector<16x256xbf16>
    %11 = vector.shape_cast %7 : vector<16x256xbf16> to vector<1x1x16x256xbf16>
    tpu.vector_store %arg5[%c0_5, %8, %c0_6, %c0_7], %11 {strides = array<i32>} : memref<1x1x16x256xbf16, #tpu.memory_space<vmem>>, vector<1x1x16x256xbf16>,
    %c0_8 = arith.constant 0 : index
    %c0_9 = arith.constant 0 : index
    %12 = vector.load %arg6[%c0_8, %c0_9] : memref<1x256xf32, #tpu.memory_space<vmem>>, vector<1x256xf32>
    %cst_10 = arith.constant dense<0.000000e+00> : vector<256xf32>
    %13 = vector.multi_reduction <add>, %6, %cst_10 [0] : vector<16x256xf32> to vector<256xf32>
    %14 = vector.shape_cast %13 : vector<256xf32> to vector<1x256xf32>
    %15 = arith.addf %12, %14 : vector<1x256xf32>
    %c0_11 = arith.constant 0 : index
    %c0_12 = arith.constant 0 : index
    %16 = vector.load %arg6[%c0_11, %c0_12] : memref<1x256xf32, #tpu.memory_space<vmem>>, vector<1x256xf32>
    tpu.vector_store %arg6[%c0_11, %c0_12], %15 {strides = array<i32>} : memref<1x256xf32, #tpu.memory_space<vmem>>, vector<1x256xf32>,
    %c0_13 = arith.constant 0 : index
    %c0_14 = arith.constant 0 : index
    %17 = vector.load %arg7[%c0_13, %c0_14] : memref<1x256xf32, #tpu.memory_space<vmem>>, vector<1x256xf32>
    %18 = arith.mulf %6, %6 : vector<16x256xf32>
    %cst_15 = arith.constant dense<0.000000e+00> : vector<256xf32>
    %19 = vector.multi_reduction <add>, %18, %cst_15 [0] : vector<16x256xf32> to vector<256xf32>
    %20 = vector.shape_cast %19 : vector<256xf32> to vector<1x256xf32>
    %21 = arith.addf %17, %20 : vector<1x256xf32>
    %c0_16 = arith.constant 0 : index
    %c0_17 = arith.constant 0 : index
    %22 = vector.load %arg7[%c0_16, %c0_17] : memref<1x256xf32, #tpu.memory_space<vmem>>, vector<1x256xf32>
    tpu.vector_store %arg7[%c0_16, %c0_17], %21 {strides = array<i32>} : memref<1x256xf32, #tpu.memory_space<vmem>>, vector<1x256xf32>,
    %c0_i32_18 = arith.constant 0 : i32
    %23 = arith.cmpi eq, %arg2, %c0_i32_18 : i32
    %24 = arith.extui %23 : i1 to i32
    %c0_i32_19 = arith.constant 0 : i32
    %25 = arith.cmpi ne, %24, %c0_i32_19 : i32
    scf.if %25 {
      %c0_20 = arith.constant 0 : index
      %c0_21 = arith.constant 0 : index
      %26 = vector.load %arg6[%c0_20, %c0_21] : memref<1x256xf32, #tpu.memory_space<vmem>>, vector<1x256xf32>
      %cst_22 = arith.constant 2.500000e-01 : f32
      %27 = vector.broadcast %cst_22 : f32 to vector<1x256xf32>
      %28 = arith.mulf %26, %27 : vector<1x256xf32>
      %c0_23 = arith.constant 0 : index
      %c0_24 = arith.constant 0 : index
      %29 = vector.load %arg7[%c0_23, %c0_24] : memref<1x256xf32, #tpu.memory_space<vmem>>, vector<1x256xf32>
      %cst_25 = arith.constant 2.500000e-01 : f32
      %30 = vector.broadcast %cst_25 : f32 to vector<1x256xf32>
      %31 = arith.mulf %29, %30 : vector<1x256xf32>
      %32 = arith.mulf %28, %28 : vector<1x256xf32>
      %33 = arith.subf %31, %32 : vector<1x256xf32>
      %cst_26 = arith.constant 0.000000e+00 : f32
      %34 = vector.broadcast %cst_26 : f32 to vector<1x256xf32>
      %35 = arith.maximumf %33, %34 : vector<1x256xf32>
      %cst_27 = arith.constant 9.99999974E-6 : f32
      %36 = vector.broadcast %cst_27 : f32 to vector<1x256xf32>
      %37 = arith.addf %35, %36 : vector<1x256xf32>
      %38 = math.rsqrt %37 : vector<1x256xf32>
      %c0_i32_28 = arith.constant 0 : i32
      %c1_i32 = arith.constant 1 : i32
      %39 = arith.muli %c0_i32_28, %c1_i32 : i32
      %c0_i32_29 = arith.constant 0 : i32
      %40 = arith.addi %c0_i32_29, %39 : i32
      %c0_30 = arith.constant 0 : index
      %41 = arith.index_cast %40 : i32 to index
      %c0_31 = arith.constant 0 : index
      %c0_32 = arith.constant 0 : index
      %42 = vector.load %arg5[%c0_30, %41, %c0_31, %c0_32] : memref<1x1x16x256xbf16, #tpu.memory_space<vmem>>, vector<1x1x16x256xbf16>
      %43 = vector.shape_cast %42 : vector<1x1x16x256xbf16> to vector<16x256xbf16>
      %44 = arith.extf %43 : vector<16x256xbf16> to vector<16x256xf32>
      %45 = vector.broadcast %28 : vector<1x256xf32> to vector<16x256xf32>
      %46 = arith.subf %44, %45 : vector<16x256xf32>
      %47 = vector.broadcast %38 : vector<1x256xf32> to vector<16x256xf32>
      %48 = arith.mulf %46, %47 : vector<16x256xf32>
      %cst_33 = arith.constant 0.000000e+00 : f32
      %49 = vector.broadcast %cst_33 : f32 to vector<16x256xf32>
      %50 = arith.cmpf oge, %48, %49 : vector<16x256xf32>
      %cst_34 = arith.constant 2.000000e-01 : f32
      %51 = vector.broadcast %cst_34 : f32 to vector<16x256xf32>
      %52 = arith.mulf %51, %48 : vector<16x256xf32>
      %53 = arith.select %50, %48, %52 : vector<16x256xi1>, vector<16x256xf32>
      %54 = arith.truncf %53 : vector<16x256xf32> to vector<16x256xbf16>
      %c0_35 = arith.constant 0 : index
      %55 = arith.index_cast %40 : i32 to index
      %c0_36 = arith.constant 0 : index
      %c0_37 = arith.constant 0 : index
      %56 = vector.load %arg5[%c0_35, %55, %c0_36, %c0_37] : memref<1x1x16x256xbf16, #tpu.memory_space<vmem>>, vector<1x1x16x256xbf16>
      %57 = vector.shape_cast %56 : vector<1x1x16x256xbf16> to vector<16x256xbf16>
      %58 = vector.shape_cast %54 : vector<16x256xbf16> to vector<1x1x16x256xbf16>
      tpu.vector_store %arg5[%c0_35, %55, %c0_36, %c0_37], %58 {strides = array<i32>} : memref<1x1x16x256xbf16, #tpu.memory_space<vmem>>, vector<1x1x16x256xbf16>,
      %c1_i32_38 = arith.constant 1 : i32
    } else {
    }
    return
  }
  func.func @transform_0(%arg0: i32, %arg1: i32, %arg2: i32) -> (i32, i32, i32) {
    %c0_i32 = arith.constant 0 : i32
    %c0_i32_0 = arith.constant 0 : i32
    return %arg0, %arg2, %c0_i32 : i32, i32, i32
  }
  func.func @transform_1(%arg0: i32, %arg1: i32, %arg2: i32) -> (i32, i32) {
    %c0_i32 = arith.constant 0 : i32
    %c0_i32_0 = arith.constant 0 : i32
    return %c0_i32, %arg1 : i32, i32
  }
  func.func @transform_2(%arg0: i32, %arg1: i32, %arg2: i32) -> (i32, i32, i32, i32) {
    %c0_i32 = arith.constant 0 : i32
    %c0_i32_0 = arith.constant 0 : i32
    %c0_i32_1 = arith.constant 0 : i32
    return %arg0, %c0_i32, %c0_i32_0, %arg1 : i32, i32, i32, i32
  }
}

module attributes {stable_mosaic.version = 11 : i64} {
  func.func @_conv_bias_act_kernel(%arg0: i32, %arg1: i32, %arg2: memref<1x16x8192xbf16, #tpu.memory_space<vmem>>, %arg3: memref<8192x128xbf16, #tpu.memory_space<vmem>>, %arg4: memref<1x128xf32, #tpu.memory_space<vmem>>, %arg5: memref<1x16x128xf32, #tpu.memory_space<vmem>>) attributes {dimension_semantics = [#tpu.dimension_semantics<parallel>, #tpu.dimension_semantics<parallel>], iteration_bounds = array<i64: 2, 1>, scalar_prefetch = 0 : i64, scratch_operands = 0 : i64, tpu.core_type = #tpu.core_type<tc>, window_params = [{transform_indices = @transform_0, window_bounds = array<i64: 1, 16, 8192>}, {pipeline_mode = #tpu.pipeline_mode<synchronous>, transform_indices = @transform_1, window_bounds = array<i64: 8192, 128>}, {pipeline_mode = #tpu.pipeline_mode<synchronous>, transform_indices = @transform_2, window_bounds = array<i64: 1, 128>}, {transform_indices = @transform_3, window_bounds = array<i64: 1, 16, 128>}]} {
    %c0 = arith.constant 0 : index
    %c0_0 = arith.constant 0 : index
    %c0_1 = arith.constant 0 : index
    %0 = vector.load %arg2[%c0, %c0_0, %c0_1] : memref<1x16x8192xbf16, #tpu.memory_space<vmem>>, vector<1x16x8192xbf16>
    %1 = vector.shape_cast %0 : vector<1x16x8192xbf16> to vector<16x8192xbf16>
    %c0_2 = arith.constant 0 : index
    %c0_3 = arith.constant 0 : index
    %2 = vector.load %arg3[%c0_2, %c0_3] : memref<8192x128xbf16, #tpu.memory_space<vmem>>, vector<8192x128xbf16>
    %cst = arith.constant dense<0.000000e+00> : vector<16x128xf32>
    %3 = tpu.matmul %1, %2, %cst {dimension_numbers = #tpu.dot_dimension_numbers<[1], [0], [0], [1], [0, 0, 1, 1], [], []>} : vector<16x8192xbf16>, vector<8192x128xbf16>, vector<16x128xf32> -> vector<16x128xf32>
    %c0_4 = arith.constant 0 : index
    %c0_5 = arith.constant 0 : index
    %4 = vector.load %arg4[%c0_4, %c0_5] : memref<1x128xf32, #tpu.memory_space<vmem>>, vector<1x128xf32>
    %5 = vector.broadcast %4 : vector<1x128xf32> to vector<16x128xf32>
    %6 = arith.addf %3, %5 : vector<16x128xf32>
    %c0_6 = arith.constant 0 : index
    %c0_7 = arith.constant 0 : index
    %c0_8 = arith.constant 0 : index
    %7 = vector.load %arg5[%c0_6, %c0_7, %c0_8] : memref<1x16x128xf32, #tpu.memory_space<vmem>>, vector<1x16x128xf32>
    %8 = vector.shape_cast %7 : vector<1x16x128xf32> to vector<16x128xf32>
    %9 = vector.shape_cast %6 : vector<16x128xf32> to vector<1x16x128xf32>
    tpu.vector_store %arg5[%c0_6, %c0_7, %c0_8], %9 {strides = array<i32>} : memref<1x16x128xf32, #tpu.memory_space<vmem>>, vector<1x16x128xf32>,
    return
  }
  func.func @transform_0(%arg0: i32, %arg1: i32) -> (i32, i32, i32) {
    %c0_i32 = arith.constant 0 : i32
    %c0_i32_0 = arith.constant 0 : i32
    return %arg0, %arg1, %c0_i32 : i32, i32, i32
  }
  func.func @transform_1(%arg0: i32, %arg1: i32) -> (i32, i32) {
    %c0_i32 = arith.constant 0 : i32
    %c0_i32_0 = arith.constant 0 : i32
    %c0_i32_1 = arith.constant 0 : i32
    return %c0_i32, %c0_i32_0 : i32, i32
  }
  func.func @transform_2(%arg0: i32, %arg1: i32) -> (i32, i32) {
    %c0_i32 = arith.constant 0 : i32
    %c0_i32_0 = arith.constant 0 : i32
    %c0_i32_1 = arith.constant 0 : i32
    return %c0_i32, %c0_i32_0 : i32, i32
  }
  func.func @transform_3(%arg0: i32, %arg1: i32) -> (i32, i32, i32) {
    %c0_i32 = arith.constant 0 : i32
    %c0_i32_0 = arith.constant 0 : i32
    return %arg0, %arg1, %c0_i32 : i32, i32, i32
  }
}

</mosaic_0001>

<bundles_post_ra>
// kernel: discriminator_forward.5
= control target key start
LH: loop header
LB: loop body
LE: loop exit
PB: predicated region body
PF: predicated region fallthrough
CT: control target
= control target key end

     0   :  { %s1197_s12 = smov 0   ;;  %s1199_s13 = smov 0   ;;  %s1383_s0 = inlined_call_operand.vmem [shape: bf16[2,256,128], index: 0, kind: input, shape index: {}]   ;;  %s1384_s1 = inlined_call_operand.vmem [shape: bf16[128,64], index: 1, kind: input, shape index: {}]   ;;  %s1385_s2 = inlined_call_operand.vmem [shape: f32[1,64], index: 2, kind: input, shape index: {}]   ;;  %s1386_s3 = inlined_call_operand.vmem [shape: bf16[2,256,64], index: 3, kind: output, shape index: {}]  }
   0x1   :  { %s1201_s14 = smov 0  }
   0x2 LB: > { %s25_s15 = sadd.s32 1, %s1171_s13  ;;  %p919_p0 = scmp.ge.s32.totalorder %s1175_s14, 1  ;;  %s1175_s14 = sphi %s1201_s14, %s13_s14   ;;  %s1171_s13 = sphi %s1199_s13, %s1388_s13   ;;  %s1167_s12 = sphi %s1197_s12, %s1387_s12  }
   0x3   : > { %p27_p1 = scmp.ge.s32.totalorder %s25_s15, 2  ;;  %p158_p2 = scmp.lt.s32.totalorder %s1175_s14, 3 }
   0x5   : > { %s1390_s15 = smov (%p27_p1, %s25_s15), 0  ;;  %p159_p3 = pnand %p919_p0, %p158_p2 }
   0x6   : > { %v1129_v0 = vld [vmem:[%s1384_s1] sm:$0xff] (!%p159_p3)   ;;  %p191_p4 = scmp.lt.s32.totalorder (!%p159_p3), %s1167_s12, 1  ;;  %v1130_v1 = vld [vmem:[%s1384_s1 + $0x8] sm:$0xff] (!%p159_p3)   ;;  %v1131_v2 = vld [vmem:[%s1384_s1 + $0x10] sm:$0xff] (!%p159_p3)   ;;  %vm795_vm0 = vcmask (!%p159_p3), 519168  }
   0x7   : > { %162 = sbr.rel (%p159_p3) target bundleno = 297 (0x129), region = 32  ;;  %1041 = vmatprep.subr.bf16.mxu0 (!%p159_p3), %v1129_v0  ;;  %1089 = vmatprep.subr.bf16.mxu1 (!%p159_p3), %v1129_v0  ;;  %v1132_v3 = vld [vmem:[%s1384_s1 + $0x18] sm:$0xff] (!%p159_p3)   ;;  %v1133_v6 = vld [vmem:[%s1384_s1 + $0x20] sm:$0xff] (!%p159_p3)   ;;  %v1134_v7 = vld [vmem:[%s1384_s1 + $0x28] sm:$0xff] (!%p159_p3)  }
   0x8   : > { %1042 = vmatpush3.bf16.msra.mxu0 (!%p159_p3), %v1129_v0  ;;  %1097 = vmatpush3.bf16.msra.mxu1 (!%p159_p3), %v1129_v0  ;;  %v1135_v8 = vld [vmem:[%s1384_s1 + $0x30] sm:$0xff] (!%p159_p3)   ;;  %v1136_v9 = vld [vmem:[%s1384_s1 + $0x38] sm:$0xff] (!%p159_p3)   ;;  %v1268_v24 = vld [vmem:[%s1385_s2] ss:$0 sm:$0xff] (!%p159_p3) }
   0x9   : > { %1043 = vmatprep.subr.bf16.mxu0 (!%p159_p3), %v1130_v1  ;;  %1090 = vmatprep.subr.bf16.mxu1 (!%p159_p3), %v1130_v1 }
   0xc   : > { %1044 = vmatpush3.bf16.msra.mxu0 (!%p159_p3), %v1130_v1  ;;  %1098 = vmatpush3.bf16.msra.mxu1 (!%p159_p3), %v1130_v1 }
   0xd   : > { %1045 = vmatprep.subr.bf16.mxu0 (!%p159_p3), %v1131_v2  ;;  %1091 = vmatprep.subr.bf16.mxu1 (!%p159_p3), %v1131_v2 }
   0xe   : > { %s1392_s12 = smov (!%p191_p4, %s1167_s12), 1 }
   0xf   : > { %s983_s22 = sshll.u32 %s1392_s12, 7 }
  0x10   : > { %s1232_s25 = scalar_lea.vmem %s1383_s0, %s983_s22  ;;  %1046 = vmatpush3.bf16.msra.mxu0 %v1131_v2  ;;  %1099 = vmatpush3.bf16.msra.mxu1 %v1131_v2  ;;  %s1279_s17 = scalar_lea.vmem %s1386_s3, %s983_s22 }
  0x11   : > { %v1137_v4 = vld [vmem:[%s1232_s25] sm:$0xff]   ;;  %1047 = vmatprep.subr.bf16.mxu0 %v1132_v3  ;;  %1092 = vmatprep.subr.bf16.mxu1 %v1132_v3  ;;  %v1139_v10 = vld [vmem:[%s1232_s25 + $0x8] sm:$0xff]   ;;  %v1141_v12 = vld [vmem:[%s1232_s25 + $0x10] sm:$0xff]  }
  0x12   : > { %v1138_v5 = vld [vmem:[%s1232_s25 + $0x40] sm:$0xff]   ;;  %1057 = vmatprep.mubr.bf16.mxu0 %v1137_v4  ;;  %v1140_v11 = vld [vmem:[%s1232_s25 + $0x48] sm:$0xff]   ;;  %v1142_v13 = vld [vmem:[%s1232_s25 + $0x50] sm:$0xff]  }
  0x13   : > { %1073 = vmatprep.mubr.bf16.mxu1 %v1138_v5  ;;  %v1143_v14 = vld [vmem:[%s1232_s25 + $0x18] sm:$0xff]   ;;  %v1145_v16 = vld [vmem:[%s1232_s25 + $0x20] sm:$0xff]   ;;  %v1147_v18 = vld [vmem:[%s1232_s25 + $0x28] sm:$0xff]  }
  0x14   : > { %1048 = vmatpush3.bf16.msra.mxu0 %v1132_v3  ;;  %1100 = vmatpush3.bf16.msra.mxu1 %v1132_v3  ;;  %v1144_v15 = vld [vmem:[%s1232_s25 + $0x58] sm:$0xff]   ;;  %v1146_v17 = vld [vmem:[%s1232_s25 + $0x60] sm:$0xff]   ;;  %v1148_v19 = vld [vmem:[%s1232_s25 + $0x68] sm:$0xff]  }
  0x15   : > { %1049 = vmatprep.subr.bf16.mxu0 %v1133_v6  ;;  %1093 = vmatprep.subr.bf16.mxu1 %v1133_v6  ;;  %v1149_v20 = vld [vmem:[%s1232_s25 + $0x30] sm:$0xff]   ;;  %v1151_v22 = vld [vmem:[%s1232_s25 + $0x38] sm:$0xff]  }
  0x16   : > { %v1150_v21 = vld [vmem:[%s1232_s25 + $0x70] sm:$0xff]   ;;  %v1152_v23 = vld [vmem:[%s1232_s25 + $0x78] sm:$0xff]  }
  0x18   : > { %1050 = vmatpush3.bf16.msra.mxu0 %v1133_v6  ;;  %1101 = vmatpush3.bf16.msra.mxu1 %v1133_v6 }
  0x19   : > { %1051 = vmatprep.subr.bf16.mxu0 %v1134_v7  ;;  %1094 = vmatprep.subr.bf16.mxu1 %v1134_v7 }
  0x1c   : > { %1052 = vmatpush3.bf16.msra.mxu0 %v1134_v7  ;;  %1102 = vmatpush3.bf16.msra.mxu1 %v1134_v7 }
  0x1d   : > { %1053 = vmatprep.subr.bf16.mxu0 %v1135_v8  ;;  %1095 = vmatprep.subr.bf16.mxu1 %v1135_v8 }
  0x20   : > { %1054 = vmatpush3.bf16.msra.mxu0 %v1135_v8  ;;  %1103 = vmatpush3.bf16.msra.mxu1 %v1135_v8 }
  0x21   : > { %1055 = vmatprep.subr.bf16.mxu0 %v1136_v9  ;;  %1096 = vmatprep.subr.bf16.mxu1 %v1136_v9 }
  0x24   : > { %1056 = vmatpush3.bf16.msra.mxu0 %v1136_v9  ;;  %1104 = vmatpush3.bf16.msra.mxu1 %v1136_v9 }
  0x27   : > { %1058 = vmatmul.mubr.bf16.vlgmr.msra.gmra.mrb[0].mxu0 %v1139_v10  ;;  %1074 = vmatmul.mubr.bf16.vlgmr.msra.gmra.mrb[0].mxu1 %v1140_v11 }
  0x28   : > { %1061 = vmatprep.mubr.bf16.mxu0 %v1141_v12  ;;  %1077 = vmatprep.mubr.bf16.mxu1 %v1142_v13 }
  0x2f   : > { %1062 = vmatmul.mubr.bf16.gmra.mrb[4].mxu0 %v1143_v14  ;;  %1078 = vmatmul.mubr.bf16.gmra.mrb[4].mxu1 %v1144_v15 }
  0x30   : > { %1065 = vmatprep.mubr.bf16.mxu0 %v1145_v16  ;;  %1081 = vmatprep.mubr.bf16.mxu1 %v1146_v17 }
  0x37   : > { %1066 = vmatmul.mubr.bf16.gmra.mrb[8].mxu0 %v1147_v18  ;;  %1082 = vmatmul.mubr.bf16.gmra.mrb[8].mxu1 %v1148_v19 }
  0x38   : > { %1069 = vmatprep.mubr.bf16.mxu0 %v1149_v20  ;;  %1085 = vmatprep.mubr.bf16.mxu1 %v1150_v21 }
  0x3f   : > { %1070 = vmatmul.mubr.bf16.gmra.mrb[12].mxu0 %v1151_v22  ;;  %1086 = vmatmul.mubr.bf16.gmra.mrb[12].mxu1 %v1152_v23 }
  0xfa   : > { %v1059_v25 = vpop.f32.mrb[0].mxu0  ;;  %v1075_v26 = vpop.f32.mrb[0].mxu1 }
  0xfb   : > { %v453_v27 = vadd.f32 %v1059_v25, %v1268_v24  ;;  %v517_v28 = vadd.f32 %v1075_v26, %v1268_v24  ;;  %v444_v29 = vpop.f32.mrb[1].mxu0  ;;  %v508_v30 = vpop.f32.mrb[1].mxu1 }
  0xfc   : > { %v445_v31 = vadd.f32 %v1268_v24, %v444_v29  ;;  %v509_v32 = vadd.f32 %v1268_v24, %v508_v30  ;;  %v1060_v33 = vpop.f32.mrb[2].mxu0  ;;  %v1076_v34 = vpop.f32.mrb[2].mxu1 }
  0xfd   : > { %vm573_vm1 = vcmp.ge.f32.partialorder %v453_v27, 0.0  ;;  %v605_v35 = vmul.f32 0.2, %v453_v27  ;;  %vm589_vm2 = vcmp.ge.f32.partialorder %v517_v28, 0.0  ;;  %v621_v36 = vmul.f32 0.2, %v517_v28 }
  0xfe   : > { %vm571_vm3 = vcmp.ge.f32.partialorder %v445_v31, 0.0  ;;  %v603_v37 = vmul.f32 0.2, %v445_v31  ;;  %vm587_vm4 = vcmp.ge.f32.partialorder %v509_v32, 0.0  ;;  %v619_v38 = vmul.f32 0.2, %v509_v32 }
  0xff   : > { %v637_v39 = vsel %vm573_vm1, %v453_v27, %v605_v35  ;;  %v653_v40 = vsel %vm589_vm2, %v517_v28, %v621_v36  ;;  %v456_v41 = vadd.f32 %v1060_v33, %v1268_v24  ;;  %v520_v42 = vadd.f32 %v1076_v34, %v1268_v24  ;;  %v447_v43 = vpop.f32.mrb[3].mxu0  ;;  %v511_v44 = vpop.f32.mrb[3].mxu1 }
 0x100   : > { %v987_v45 = vpack.c.bf16 %v637_v39, %v637_v39  ;;  %v1003_v46 = vpack.c.bf16 %v653_v40, %v653_v40  ;;  %v635_v47 = vsel %vm571_vm3, %v445_v31, %v603_v37  ;;  %v651_v48 = vsel %vm587_vm4, %v509_v32, %v619_v38 }
 0x101   : > { %v985_v49 = vpack.c.bf16 %v635_v47, %v635_v47  ;;  %v1001_v50 = vpack.c.bf16 %v651_v48, %v651_v48  ;;  %vm574_vm5 = vcmp.ge.f32.partialorder %v456_v41, 0.0  ;;  %v606_v51 = vmul.f32 0.2, %v456_v41 }
 0x102   : > { %798 = vst.msk [vmem:[%s1279_s17 + $0x8] sm:$0xf] %vm795_vm0, %v987_v45  ;;  %814 = vst.msk [vmem:[%s1279_s17 + $0x48] sm:$0xf] %vm795_vm0, %v1003_v46  ;;  %vm590_vm6 = vcmp.ge.f32.partialorder %v520_v42, 0.0  ;;  %v448_v53 = vadd.f32 %v1268_v24, %v447_v43  ;;  %v512_v54 = vadd.f32 %v1268_v24, %v511_v44  ;;  %v1063_v55 = vpop.f32.mrb[4].mxu0 }
 0x103   : > { %v622_v52 = vmul.f32 0.2, %v520_v42  ;;  %v1079_v56 = vpop.f32.mrb[4].mxu1  ;;  %796 = vst.msk [vmem:[%s1279_s17] sm:$0xf] %vm795_vm0, %v985_v49  ;;  %v638_v57 = vsel %vm574_vm5, %v456_v41, %v606_v51  ;;  %v469_v58 = vadd.f32 %v1063_v55, %v1268_v24  ;;  %v460_v60 = vpop.f32.mrb[5].mxu0 }
 0x104   : > { %812 = vst.msk [vmem:[%s1279_s17 + $0x40] sm:$0xf] %vm795_vm0, %v1001_v50  ;;  %v533_v59 = vadd.f32 %v1079_v56, %v1268_v24  ;;  %v524_v61 = vpop.f32.mrb[5].mxu1  ;;  %v988_v62 = vpack.c.bf16 %v638_v57, %v638_v57  ;;  %vm572_vm7 = vcmp.ge.f32.partialorder %v448_v53, 0.0  ;;  %v604_v0 = vmul.f32 0.2, %v448_v53 }
 0x105   : > { %v654_v63 = vsel %vm590_vm6, %v520_v42, %v622_v52  ;;  %v1064_v1 = vpop.f32.mrb[6].mxu0  ;;  %v1080_v2 = vpop.f32.mrb[6].mxu1  ;;  %vm588_vm8 = vcmp.ge.f32.partialorder %v512_v54, 0.0  ;;  %v620_v4 = vmul.f32 0.2, %v512_v54  ;;  %vm577_vm9 = vcmp.ge.f32.partialorder %v469_v58, 0.0 }
 0x106   : > { %v1004_v3 = vpack.c.bf16 %v654_v63, %v654_v63  ;;  %v463_v5 = vpop.f32.mrb[7].mxu0  ;;  %v527_v6 = vpop.f32.mrb[7].mxu1  ;;  %799 = vst.msk [vmem:[%s1279_s17 + $0xc] sm:$0xf] %vm795_vm0, %v988_v62  ;;  %v636_v7 = vsel %vm572_vm7, %v448_v53, %v604_v0  ;;  %v609_v8 = vmul.f32 0.2, %v469_v58  ;;  %v461_v12 = vadd.f32 %v1268_v24, %v460_v60 }
 0x107   : > { %vm593_vm10 = vcmp.ge.f32.partialorder %v533_v59, 0.0  ;;  %v625_v9 = vmul.f32 0.2, %v533_v59  ;;  %v986_v10 = vpack.c.bf16 %v636_v7, %v636_v7  ;;  %v652_v11 = vsel %vm588_vm8, %v512_v54, %v620_v4 }
 0x108   : > { %815 = vst.msk [vmem:[%s1279_s17 + $0x4c] sm:$0xf] %vm795_vm0, %v1004_v3  ;;  %v525_v13 = vadd.f32 %v1268_v24, %v524_v61  ;;  %v1002_v14 = vpack.c.bf16 %v652_v11, %v652_v11  ;;  %v641_v15 = vsel %vm577_vm9, %v469_v58, %v609_v8  ;;  %v472_v17 = vadd.f32 %v1064_v1, %v1268_v24 }
 0x109   : > { %v657_v16 = vsel %vm593_vm10, %v533_v59, %v625_v9  ;;  %797 = vst.msk [vmem:[%s1279_s17 + $0x4] sm:$0xf] %vm795_vm0, %v986_v10  ;;  %v991_v18 = vpack.c.bf16 %v641_v15, %v641_v15  ;;  %vm575_vm11 = vcmp.ge.f32.partialorder %v461_v12, 0.0  ;;  %v607_v20 = vmul.f32 0.2, %v461_v12 }
 0x10a   : > { %v1007_v19 = vpack.c.bf16 %v657_v16, %v657_v16  ;;  %813 = vst.msk [vmem:[%s1279_s17 + $0x44] sm:$0xf] %vm795_vm0, %v1002_v14  ;;  %vm591_vm12 = vcmp.ge.f32.partialorder %v525_v13, 0.0  ;;  %v623_v21 = vmul.f32 0.2, %v525_v13  ;;  %vm578_vm13 = vcmp.ge.f32.partialorder %v472_v17, 0.0 }
 0x10b   : > { %v610_v22 = vmul.f32 0.2, %v472_v17  ;;  %802 = vst.msk [vmem:[%s1279_s17 + $0x18] sm:$0xf] %vm795_vm0, %v991_v18  ;;  %v639_v23 = vsel %vm575_vm11, %v461_v12, %v607_v20  ;;  %v536_v25 = vadd.f32 %v1080_v2, %v1268_v24  ;;  %v464_v26 = vadd.f32 %v1268_v24, %v463_v5  ;;  %v1067_v28 = vpop.f32.mrb[8].mxu0  ;;  %v1083_v29 = vpop.f32.mrb[8].mxu1 }
 0x10c   : > { %818 = vst.msk [vmem:[%s1279_s17 + $0x58] sm:$0xf] %vm795_vm0, %v1007_v19  ;;  %v528_v27 = vadd.f32 %v1268_v24, %v527_v6  ;;  %v989_v30 = vpack.c.bf16 %v639_v23, %v639_v23  ;;  %v655_v31 = vsel %vm591_vm12, %v525_v13, %v623_v21  ;;  %v485_v33 = vadd.f32 %v1067_v28, %v1268_v24  ;;  %v476_v34 = vpop.f32.mrb[9].mxu0  ;;  %v540_v35 = vpop.f32.mrb[9].mxu1 }
 0x10d   : > { %v642_v32 = vsel %vm578_vm13, %v472_v17, %v610_v22  ;;  %v1005_v36 = vpack.c.bf16 %v655_v31, %v655_v31  ;;  %vm594_vm14 = vcmp.ge.f32.partialorder %v536_v25, 0.0  ;;  %v626_v38 = vmul.f32 0.2, %v536_v25  ;;  %v1068_v39 = vpop.f32.mrb[10].mxu0  ;;  %v1084_v40 = vpop.f32.mrb[10].mxu1 }
 0x10e   : > { %v992_v37 = vpack.c.bf16 %v642_v32, %v642_v32  ;;  %800 = vst.msk [vmem:[%s1279_s17 + $0x10] sm:$0xf] %vm795_vm0, %v989_v30  ;;  %vm576_vm15 = vcmp.ge.f32.partialorder %v464_v26, 0.0  ;;  %v608_v41 = vmul.f32 0.2, %v464_v26  ;;  %vm592_vm1 = vcmp.ge.f32.partialorder %v528_v27, 0.0 }
 0x10f   : > { %v624_v42 = vmul.f32 0.2, %v528_v27  ;;  %816 = vst.msk [vmem:[%s1279_s17 + $0x50] sm:$0xf] %vm795_vm0, %v1005_v36  ;;  %v658_v43 = vsel %vm594_vm14, %v536_v25, %v626_v38  ;;  %vm581_vm2 = vcmp.ge.f32.partialorder %v485_v33, 0.0  ;;  %v549_v45 = vadd.f32 %v1083_v29, %v1268_v24  ;;  %v479_v46 = vpop.f32.mrb[11].mxu0 }
 0x110   : > { %803 = vst.msk [vmem:[%s1279_s17 + $0x1c] sm:$0xf] %vm795_vm0, %v992_v37  ;;  %v613_v44 = vmul.f32 0.2, %v485_v33  ;;  %v543_v47 = vpop.f32.mrb[11].mxu1  ;;  %v1008_v48 = vpack.c.bf16 %v658_v43, %v658_v43  ;;  %v640_v49 = vsel %vm576_vm15, %v464_v26, %v608_v41  ;;  %v477_v51 = vadd.f32 %v1268_v24, %v476_v34 }
 0x111   : > { %v656_v50 = vsel %vm592_vm1, %v528_v27, %v624_v42  ;;  %v990_v52 = vpack.c.bf16 %v640_v49, %v640_v49  ;;  %vm597_vm3 = vcmp.ge.f32.partialorder %v549_v45, 0.0  ;;  %v629_v56 = vmul.f32 0.2, %v549_v45 }
 0x112   : > { %v1006_v53 = vpack.c.bf16 %v656_v50, %v656_v50  ;;  %v645_v54 = vsel %vm581_vm2, %v485_v33, %v613_v44  ;;  %819 = vst.msk [vmem:[%s1279_s17 + $0x5c] sm:$0xf] %vm795_vm0, %v1008_v48  ;;  %vm579_vm4 = vcmp.ge.f32.partialorder %v477_v51, 0.0  ;;  %v611_v57 = vmul.f32 0.2, %v477_v51  ;;  %v1071_v58 = vpop.f32.mrb[12].mxu0 }
 0x113   : > { %v995_v55 = vpack.c.bf16 %v645_v54, %v645_v54  ;;  %801 = vst.msk [vmem:[%s1279_s17 + $0x14] sm:$0xf] %vm795_vm0, %v990_v52  ;;  %v541_v59 = vadd.f32 %v1268_v24, %v540_v35  ;;  %v488_v60 = vadd.f32 %v1068_v39, %v1268_v24  ;;  %v552_v61 = vadd.f32 %v1084_v40, %v1268_v24  ;;  %v1087_v63 = vpop.f32.mrb[12].mxu1  ;;  %v492_v0 = vpop.f32.mrb[13].mxu0 }
 0x114   : > { %817 = vst.msk [vmem:[%s1279_s17 + $0x54] sm:$0xf] %vm795_vm0, %v1006_v53  ;;  %v480_v62 = vadd.f32 %v1268_v24, %v479_v46  ;;  %v661_v1 = vsel %vm597_vm3, %v549_v45, %v629_v56  ;;  %v643_v2 = vsel %vm579_vm4, %v477_v51, %v611_v57  ;;  %v544_v3 = vadd.f32 %v1268_v24, %v543_v47  ;;  %v556_v5 = vpop.f32.mrb[13].mxu1  ;;  %v1072_v6 = vpop.f32.mrb[14].mxu0 }
 0x115   : > { %806 = vst.msk [vmem:[%s1279_s17 + $0x28] sm:$0xf] %vm795_vm0, %v995_v55  ;;  %v501_v4 = vadd.f32 %v1071_v58, %v1268_v24  ;;  %v1011_v7 = vpack.c.bf16 %v661_v1, %v661_v1  ;;  %v993_v8 = vpack.c.bf16 %v643_v2, %v643_v2  ;;  %vm595_vm5 = vcmp.ge.f32.partialorder %v541_v59, 0.0  ;;  %v1088_v10 = vpop.f32.mrb[14].mxu1  ;;  %v495_v11 = vpop.f32.mrb[15].mxu0 }
 0x116   : > { %v627_v9 = vmul.f32 0.2, %v541_v59  ;;  %vm582_vm6 = vcmp.ge.f32.partialorder %v488_v60, 0.0  ;;  %v614_v12 = vmul.f32 0.2, %v488_v60  ;;  %vm598_vm7 = vcmp.ge.f32.partialorder %v552_v61, 0.0 }
 0x117   : > { %v630_v13 = vmul.f32 0.2, %v552_v61  ;;  %822 = vst.msk [vmem:[%s1279_s17 + $0x68] sm:$0xf] %vm795_vm0, %v1011_v7  ;;  %804 = vst.msk [vmem:[%s1279_s17 + $0x20] sm:$0xf] %vm795_vm0, %v993_v8  ;;  %v565_v28 = vadd.f32 %v1087_v63, %v1268_v24  ;;  %v493_v30 = vadd.f32 %v1268_v24, %v492_v0  ;;  %v557_v31 = vadd.f32 %v1268_v24, %v556_v5 }
 0x118   : > { %v659_v14 = vsel %vm595_vm5, %v541_v59, %v627_v9  ;;  %vm580_vm8 = vcmp.ge.f32.partialorder %v480_v62, 0.0  ;;  %v612_v15 = vmul.f32 0.2, %v480_v62  ;;  %vm596_vm9 = vcmp.ge.f32.partialorder %v544_v3, 0.0  ;;  %v559_v16 = vpop.f32.mrb[15].mxu1 }
 0x119   : > { %v1009_v17 = vpack.c.bf16 %v659_v14, %v659_v14  ;;  %v646_v18 = vsel %vm582_vm6, %v488_v60, %v614_v12  ;;  %v662_v19 = vsel %vm598_vm7, %v552_v61, %v630_v13  ;;  %v628_v20 = vmul.f32 0.2, %v544_v3 }
 0x11a   : > { %v996_v21 = vpack.c.bf16 %v646_v18, %v646_v18  ;;  %v1012_v22 = vpack.c.bf16 %v662_v19, %v662_v19  ;;  %v644_v23 = vsel %vm580_vm8, %v480_v62, %v612_v15  ;;  %vm585_vm10 = vcmp.ge.f32.partialorder %v501_v4, 0.0 }
 0x11b   : > { %820 = vst.msk [vmem:[%s1279_s17 + $0x60] sm:$0xf] %vm795_vm0, %v1009_v17  ;;  %v994_v25 = vpack.c.bf16 %v644_v23, %v644_v23  ;;  %v660_v26 = vsel %vm596_vm9, %v544_v3, %v628_v20  ;;  %v617_v27 = vmul.f32 0.2, %v501_v4  ;;  %v504_v32 = vadd.f32 %v1072_v6, %v1268_v24 }
 0x11c   : > { %807 = vst.msk [vmem:[%s1279_s17 + $0x2c] sm:$0xf] %vm795_vm0, %v996_v21  ;;  %823 = vst.msk [vmem:[%s1279_s17 + $0x6c] sm:$0xf] %vm795_vm0, %v1012_v22  ;;  %v1010_v29 = vpack.c.bf16 %v660_v26, %v660_v26  ;;  %vm601_vm11 = vcmp.ge.f32.partialorder %v565_v28, 0.0  ;;  %v568_v35 = vadd.f32 %v1088_v10, %v1268_v24  ;;  %vm583_vm12 = vcmp.ge.f32.partialorder %v493_v30, 0.0 }
 0x11d   : > { %805 = vst.msk [vmem:[%s1279_s17 + $0x24] sm:$0xf] %vm795_vm0, %v994_v25  ;;  %v649_v33 = vsel %vm585_vm10, %v501_v4, %v617_v27  ;;  %v633_v34 = vmul.f32 0.2, %v565_v28  ;;  %v615_v37 = vmul.f32 0.2, %v493_v30  ;;  %v496_v47 = vadd.f32 %v1268_v24, %v495_v11 }
 0x11e   : > { %821 = vst.msk [vmem:[%s1279_s17 + $0x64] sm:$0xf] %vm795_vm0, %v1010_v29  ;;  %v999_v36 = vpack.c.bf16 %v649_v33, %v649_v33  ;;  %vm599_vm13 = vcmp.ge.f32.partialorder %v557_v31, 0.0  ;;  %v631_v39 = vmul.f32 0.2, %v557_v31  ;;  %vm586_vm14 = vcmp.ge.f32.partialorder %v504_v32, 0.0 }
 0x11f   : > { %v665_v38 = vsel %vm601_vm11, %v565_v28, %v633_v34  ;;  %v618_v40 = vmul.f32 0.2, %v504_v32  ;;  %v647_v42 = vsel %vm583_vm12, %v493_v30, %v615_v37  ;;  %vm602_vm15 = vcmp.ge.f32.partialorder %v568_v35, 0.0 }
 0x120   : > { %810 = vst.msk [vmem:[%s1279_s17 + $0x38] sm:$0xf] %vm795_vm0, %v999_v36  ;;  %v1015_v41 = vpack.c.bf16 %v665_v38, %v665_v38  ;;  %v634_v43 = vmul.f32 0.2, %v568_v35  ;;  %v997_v44 = vpack.c.bf16 %v647_v42, %v647_v42  ;;  %v663_v45 = vsel %vm599_vm13, %v557_v31, %v631_v39 }
 0x121   : > { %v650_v46 = vsel %vm586_vm14, %v504_v32, %v618_v40  ;;  %v1013_v48 = vpack.c.bf16 %v663_v45, %v663_v45  ;;  %v560_v51 = vadd.f32 %v1268_v24, %v559_v16  ;;  %vm584_vm1 = vcmp.ge.f32.partialorder %v496_v47, 0.0 }
 0x122   : > { %826 = vst.msk [vmem:[%s1279_s17 + $0x78] sm:$0xf] %vm795_vm0, %v1015_v41  ;;  %v1000_v49 = vpack.c.bf16 %v650_v46, %v650_v46  ;;  %v666_v50 = vsel %vm602_vm15, %v568_v35, %v634_v43  ;;  %808 = vst.msk [vmem:[%s1279_s17 + $0x30] sm:$0xf] %vm795_vm0, %v997_v44  ;;  %v616_v53 = vmul.f32 0.2, %v496_v47 }
 0x123   : > { %v1016_v52 = vpack.c.bf16 %v666_v50, %v666_v50  ;;  %824 = vst.msk [vmem:[%s1279_s17 + $0x70] sm:$0xf] %vm795_vm0, %v1013_v48  ;;  %vm600_vm2 = vcmp.ge.f32.partialorder %v560_v51, 0.0  ;;  %v632_v54 = vmul.f32 0.2, %v560_v51 }
 0x124   : > { %811 = vst.msk [vmem:[%s1279_s17 + $0x3c] sm:$0xf] %vm795_vm0, %v1000_v49  ;;  %v648_v55 = vsel %vm584_vm1, %v496_v47, %v616_v53 }
 0x125   : > { %827 = vst.msk [vmem:[%s1279_s17 + $0x7c] sm:$0xf] %vm795_vm0, %v1016_v52  ;;  %v998_v56 = vpack.c.bf16 %v648_v55, %v648_v55  ;;  %v664_v57 = vsel %vm600_vm2, %v560_v51, %v632_v54 }
 0x126   : > { %v1014_v58 = vpack.c.bf16 %v664_v57, %v664_v57 }
 0x127   : > { %809 = vst.msk [vmem:[%s1279_s17 + $0x34] sm:$0xf] %vm795_vm0, %v998_v56 }
 0x128   : > { %825 = vst.msk [vmem:[%s1279_s17 + $0x74] sm:$0xf] %vm795_vm0, %v1014_v58 }
 0x129 PF: > { %s13_s14 = sadd.s32 1, %s1175_s14   ;;  %s1387_s12 = smov %s1171_s13 }
 0x12a   : > { %p10_p5 = scmp.ge.s32.totalorder %s13_s14, 4   ;;  %s1388_s13 = smov %s1390_s15 }
 0x12c   :  { %12 = sbr.rel (!%p10_p5) target bundleno = 2 (0x2), region = 62 }

// kernel: discriminator_forward.6
= control target key start
LH: loop header
LB: loop body
LE: loop exit
PB: predicated region body
PF: predicated region fallthrough
CT: control target
= control target key end

     0   :  { %s1952_s9 = smov 0   ;;  %s1954_s10 = smov 0   ;;  %s2254_s0 = inlined_call_operand.vmem [shape: bf16[2,64,1024], index: 0, kind: input, shape index: {}]   ;;  %s2255_s1 = inlined_call_operand.vmem [shape: bf16[1024,128], index: 1, kind: input, shape index: {}]   ;;  %s2256_s2 = inlined_call_operand.vmem [shape: bf16[2,1,64,128], index: 2, kind: output, shape index: {}]  }
   0x1   :  { %s1956_s11 = smov 0  }
   0x2 LB: > { %s31_s12 = sadd.s32 1, %s1930_s10  ;;  %p1459_p0 = scmp.ge.s32.totalorder %s1934_s11, 1  ;;  %s1934_s11 = sphi %s1956_s11, %s12_s11   ;;  %s1930_s10 = sphi %s1954_s10, %s2258_s10   ;;  %s1926_s9 = sphi %s1952_s9, %s2257_s9  }
   0x3   : > { %p33_p1 = scmp.ge.s32.totalorder %s31_s12, 2  ;;  %p141_p2 = scmp.lt.s32.totalorder %s1934_s11, 3 }
   0x5   : > { %s2260_s12 = smov (%p33_p1, %s31_s12), 0  ;;  %p142_p3 = pnand %p1459_p0, %p141_p2 }
   0x6   : > { %v1846_v0 = vld [vmem:[%s2255_s1 + $0x40] sm:$0xff] (!%p142_p3)   ;;  %v1850_v4 = vld [vmem:[%s2255_s1 + $0x48] sm:$0xff] (!%p142_p3)   ;;  %v1854_v8 = vld [vmem:[%s2255_s1 + $0x50] sm:$0xff] (!%p142_p3)   ;;  %p172_p4 = scmp.lt.s32.totalorder (!%p142_p3), %s1926_s9, 1 }
   0x7   : > { %145 = sbr.rel (%p142_p3) target bundleno = 377 (0x179), region = 28  ;;  %v1847_v1 = vld [vmem:[%s2255_s1 + $0xc0] sm:$0xff] (!%p142_p3)   ;;  %1661 = vmatprep.subr.bf16.mxu0 (!%p142_p3), %v1846_v0  ;;  %v1851_v5 = vld [vmem:[%s2255_s1 + $0xc8] sm:$0xff] (!%p142_p3)   ;;  %v1855_v9 = vld [vmem:[%s2255_s1 + $0xd0] sm:$0xff] (!%p142_p3)  }
   0x8   : > { %v1848_v2 = vld [vmem:[%s2255_s1] sm:$0xff] (!%p142_p3)   ;;  %1701 = vmatprep.subr.bf16.mxu1 (!%p142_p3), %v1847_v1  ;;  %v1852_v6 = vld [vmem:[%s2255_s1 + $0x8] sm:$0xff] (!%p142_p3)   ;;  %v1856_v10 = vld [vmem:[%s2255_s1 + $0x10] sm:$0xff] (!%p142_p3)  }
   0x9   : > { %v1849_v3 = vld [vmem:[%s2255_s1 + $0x80] sm:$0xff] (!%p142_p3)   ;;  %1662 = vmatpush3.bf16.msra.mxu0 (!%p142_p3), %v1848_v2  ;;  %v1853_v7 = vld [vmem:[%s2255_s1 + $0x88] sm:$0xff] (!%p142_p3)   ;;  %v1857_v11 = vld [vmem:[%s2255_s1 + $0x90] sm:$0xff] (!%p142_p3)  }
   0xa   : > { %1702 = vmatpush3.bf16.msra.mxu1 (!%p142_p3), %v1849_v3  ;;  %1663 = vmatprep.subr.bf16.mxu0 (!%p142_p3), %v1850_v4  ;;  %v1858_v12 = vld [vmem:[%s2255_s1 + $0x58] sm:$0xff] (!%p142_p3)   ;;  %v1862_v16 = vld [vmem:[%s2255_s1 + $0x60] sm:$0xff] (!%p142_p3)   ;;  %v1866_v20 = vld [vmem:[%s2255_s1 + $0x68] sm:$0xff] (!%p142_p3)  }
   0xb   : > { %1703 = vmatprep.subr.bf16.mxu1 (!%p142_p3), %v1851_v5  ;;  %v1859_v13 = vld [vmem:[%s2255_s1 + $0xd8] sm:$0xff] (!%p142_p3)   ;;  %v1863_v17 = vld [vmem:[%s2255_s1 + $0xe0] sm:$0xff] (!%p142_p3)   ;;  %v1867_v21 = vld [vmem:[%s2255_s1 + $0xe8] sm:$0xff] (!%p142_p3)  }
   0xc   : > { %v1860_v14 = vld [vmem:[%s2255_s1 + $0x18] sm:$0xff] (!%p142_p3)   ;;  %v1864_v18 = vld [vmem:[%s2255_s1 + $0x20] sm:$0xff] (!%p142_p3)   ;;  %v1868_v22 = vld [vmem:[%s2255_s1 + $0x28] sm:$0xff] (!%p142_p3)  }
   0xd   : > { %1664 = vmatpush3.bf16.msra.mxu0 (!%p142_p3), %v1852_v6  ;;  %v1861_v15 = vld [vmem:[%s2255_s1 + $0x98] sm:$0xff] (!%p142_p3)   ;;  %v1865_v19 = vld [vmem:[%s2255_s1 + $0xa0] sm:$0xff] (!%p142_p3)   ;;  %v1869_v23 = vld [vmem:[%s2255_s1 + $0xa8] sm:$0xff] (!%p142_p3)  }
   0xe   : > { %1704 = vmatpush3.bf16.msra.mxu1 %v1853_v7  ;;  %1665 = vmatprep.subr.bf16.mxu0 %v1854_v8  ;;  %s2262_s9 = smov (!%p172_p4, %s1926_s9), 1  ;;  %v1870_v24 = vld [vmem:[%s2255_s1 + $0x70] sm:$0xff]   ;;  %v1874_v28 = vld [vmem:[%s2255_s1 + $0x78] sm:$0xff]   ;;  %v1878_v40 = vld [vmem:[%s2255_s1 + $0x140] sm:$0xff]  }
   0xf   : > { %1705 = vmatprep.subr.bf16.mxu1 %v1855_v9  ;;  %v1871_v25 = vld [vmem:[%s2255_s1 + $0xf0] sm:$0xff]   ;;  %s1578_s19 = sshll.u32 %s2262_s9, 8  ;;  %v1875_v29 = vld [vmem:[%s2255_s1 + $0xf8] sm:$0xff]   ;;  %v1879_v41 = vld [vmem:[%s2255_s1 + $0x1c0] sm:$0xff]  }
  0x10   : > { %v1872_v26 = vld [vmem:[%s2255_s1 + $0x30] sm:$0xff]   ;;  %s2070_s28 = scalar_lea.vmem %s2254_s0, %s1578_s19  ;;  %v1876_v30 = vld [vmem:[%s2255_s1 + $0x38] sm:$0xff]   ;;  %v1880_v42 = vld [vmem:[%s2255_s1 + $0x100] sm:$0xff]  }
  0x11   : > { %1666 = vmatpush3.bf16.msra.mxu0 %v1856_v10  ;;  %v1873_v27 = vld [vmem:[%s2255_s1 + $0xb0] sm:$0xff]   ;;  %v1877_v31 = vld [vmem:[%s2255_s1 + $0xb8] sm:$0xff]   ;;  %v197_v32 = vld [vmem:[%s2070_s28] sm:$0xff] }
  0x12   : > { %1706 = vmatpush3.bf16.msra.mxu1 %v1857_v11  ;;  %1667 = vmatprep.subr.bf16.mxu0 %v1858_v12  ;;  %v201_v33 = vld [vmem:[%s2070_s28 + $0x20] sm:$0xff]  ;;  %v198_v34 = vld [vmem:[%s2070_s28 + $0x8] sm:$0xff]  ;;  %v1886_v56 = vld [vmem:[%s2255_s1 + $0x150] sm:$0xff]  }
  0x13   : > { %1707 = vmatprep.subr.bf16.mxu1 %v1859_v13  ;;  %v1464_v35 = vcombine.low %v197_v32, %v201_v33  ;;  %v1465_v36 = vcombine.high %v197_v32, %v201_v33  ;;  %v202_v37 = vld [vmem:[%s2070_s28 + $0x28] sm:$0xff]  ;;  %v1881_v43 = vld [vmem:[%s2255_s1 + $0x180] sm:$0xff]   ;;  %v1887_v57 = vld [vmem:[%s2255_s1 + $0x1d0] sm:$0xff]  }
  0x14   : > { %v1466_v38 = vcombine.low %v198_v34, %v202_v37  ;;  %v1467_v39 = vcombine.high %v198_v34, %v202_v37  ;;  %v1882_v44 = vld [vmem:[%s2255_s1 + $0x148] sm:$0xff]   ;;  %v205_v48 = vld [vmem:[%s2070_s28 + $0x40] sm:$0xff]  ;;  %v1888_v58 = vld [vmem:[%s2255_s1 + $0x110] sm:$0xff]  }
  0x15   : > { %1668 = vmatpush3.bf16.msra.mxu0 %v1860_v14  ;;  %933 = vmatprep.mubr.bf16.mxu0 %v1465_v36  ;;  %v1883_v45 = vld [vmem:[%s2255_s1 + $0x1c8] sm:$0xff]   ;;  %v209_v49 = vld [vmem:[%s2070_s28 + $0x60] sm:$0xff]  ;;  %v1889_v59 = vld [vmem:[%s2255_s1 + $0x190] sm:$0xff]  }
  0x16   : > { %1708 = vmatpush3.bf16.msra.mxu1 %v1861_v15  ;;  %1669 = vmatprep.subr.bf16.mxu0 %v1862_v16  ;;  %v1884_v46 = vld [vmem:[%s2255_s1 + $0x108] sm:$0xff]   ;;  %v1473_v50 = vcombine.high %v205_v48, %v209_v49  ;;  %v1472_v53 = vcombine.low %v205_v48, %v209_v49  ;;  %v1890_v60 = vld [vmem:[%s2255_s1 + $0x158] sm:$0xff]   ;;  %v213_v0 = vld [vmem:[%s2070_s28 + $0x80] sm:$0xff] }
  0x17   : > { %1709 = vmatprep.subr.bf16.mxu1 %v1863_v17  ;;  %998 = vmatprep.mubr.bf16.mxu1 %v1467_v39  ;;  %v1885_v47 = vld [vmem:[%s2255_s1 + $0x188] sm:$0xff]   ;;  %v1891_v61 = vld [vmem:[%s2255_s1 + $0x1d8] sm:$0xff]   ;;  %v217_v1 = vld [vmem:[%s2070_s28 + $0xa0] sm:$0xff] }
  0x18   : > { %v206_v51 = vld [vmem:[%s2070_s28 + $0x48] sm:$0xff]  ;;  %v1892_v62 = vld [vmem:[%s2255_s1 + $0x118] sm:$0xff]   ;;  %v1481_v4 = vcombine.high %v213_v0, %v217_v1  ;;  %v1480_v6 = vcombine.low %v213_v0, %v217_v1  ;;  %v1894_v8 = vld [vmem:[%s2255_s1 + $0x160] sm:$0xff]   ;;  %v1936_v0 = vmov 0.0  }
  0x19   : > { %1670 = vmatpush3.bf16.msra.mxu0 %v1864_v18  ;;  %v210_v52 = vld [vmem:[%s2070_s28 + $0x68] sm:$0xff]  ;;  %v1893_v63 = vld [vmem:[%s2255_s1 + $0x198] sm:$0xff]   ;;  %v1895_v9 = vld [vmem:[%s2255_s1 + $0x1e0] sm:$0xff]   ;;  %195 = vst [vmem:[#allocation2] sm:$0x1] %v1936_v0 }
  0x1a   : > { %1710 = vmatpush3.bf16.msra.mxu1 %v1865_v19  ;;  %1671 = vmatprep.subr.bf16.mxu0 %v1866_v20  ;;  %v1475_v54 = vcombine.high %v206_v51, %v210_v52  ;;  %v1474_v55 = vcombine.low %v206_v51, %v210_v52  ;;  %v214_v2 = vld [vmem:[%s2070_s28 + $0x88] sm:$0xff]  ;;  %v1896_v10 = vld [vmem:[%s2255_s1 + $0x120] sm:$0xff]   ;;  %v199_v32 = vld [vmem:[%s2070_s28 + $0x10] sm:$0xff]  ;;  %196 = vst [vmem:[#allocation3] sm:$0x1] %v1936_v0 }
  0x1b   : > { %1711 = vmatprep.subr.bf16.mxu1 %v1867_v21  ;;  %v218_v3 = vld [vmem:[%s2070_s28 + $0xa8] sm:$0xff]  ;;  %v1897_v11 = vld [vmem:[%s2255_s1 + $0x1a0] sm:$0xff]   ;;  %v203_v33 = vld [vmem:[%s2070_s28 + $0x30] sm:$0xff] }
  0x1c   : > { %v1483_v5 = vcombine.high %v214_v2, %v218_v3  ;;  %v1482_v7 = vcombine.low %v214_v2, %v218_v3  ;;  %v1898_v12 = vld [vmem:[%s2255_s1 + $0x168] sm:$0xff]   ;;  %v221_v16 = vld [vmem:[%s2070_s28 + $0xc0] sm:$0xff]  ;;  %v1468_v34 = vcombine.low %v199_v32, %v203_v33  ;;  %v200_v36 = vld [vmem:[%s2070_s28 + $0x18] sm:$0xff] }
  0x1d   : > { %1672 = vmatpush3.bf16.msra.mxu0 %v1868_v22  ;;  %v1899_v13 = vld [vmem:[%s2255_s1 + $0x1e8] sm:$0xff]   ;;  %v225_v17 = vld [vmem:[%s2070_s28 + $0xe0] sm:$0xff]  ;;  %v204_v37 = vld [vmem:[%s2070_s28 + $0x38] sm:$0xff] }
  0x1e   : > { %1712 = vmatpush3.bf16.msra.mxu1 %v1869_v23  ;;  %1673 = vmatprep.subr.bf16.mxu0 %v1870_v24  ;;  %v1900_v14 = vld [vmem:[%s2255_s1 + $0x128] sm:$0xff]   ;;  %v1489_v19 = vcombine.high %v221_v16, %v225_v17  ;;  %v1488_v21 = vcombine.low %v221_v16, %v225_v17  ;;  %v1902_v24 = vld [vmem:[%s2255_s1 + $0x170] sm:$0xff]   ;;  %v1470_v39 = vcombine.low %v200_v36, %v204_v37  ;;  %v216_v48 = vld [vmem:[%s2070_s28 + $0x98] sm:$0xff] }
  0x1f   : > { %1713 = vmatprep.subr.bf16.mxu1 %v1871_v25  ;;  %v1901_v15 = vld [vmem:[%s2255_s1 + $0x1a8] sm:$0xff]   ;;  %v1903_v25 = vld [vmem:[%s2255_s1 + $0x1f0] sm:$0xff]   ;;  %v220_v49 = vld [vmem:[%s2070_s28 + $0xb8] sm:$0xff] }
  0x20   : > { %v222_v18 = vld [vmem:[%s2070_s28 + $0xc8] sm:$0xff] }
  0x21   : > { %1674 = vmatpush3.bf16.msra.mxu0 %v1872_v26  ;;  %v226_v20 = vld [vmem:[%s2070_s28 + $0xe8] sm:$0xff]  ;;  %v1904_v26 = vld [vmem:[%s2255_s1 + $0x130] sm:$0xff]  }
  0x22   : > { %1714 = vmatpush3.bf16.msra.mxu1 %v1873_v27  ;;  %1675 = vmatprep.subr.bf16.mxu0 %v1874_v28  ;;  %v1491_v22 = vcombine.high %v222_v18, %v226_v20  ;;  %v1490_v23 = vcombine.low %v222_v18, %v226_v20  ;;  %v1905_v27 = vld [vmem:[%s2255_s1 + $0x1b0] sm:$0xff]   ;;  %v1906_v28 = vld [vmem:[%s2255_s1 + $0x178] sm:$0xff]  }
  0x23   : > { %1715 = vmatprep.subr.bf16.mxu1 %v1875_v29  ;;  %v1907_v29 = vld [vmem:[%s2255_s1 + $0x1f8] sm:$0xff]  }
  0x25   : > { %1676 = vmatpush3.bf16.msra.mxu0 %v1876_v30  ;;  %v1908_v30 = vld [vmem:[%s2255_s1 + $0x138] sm:$0xff]  }
  0x26   : > { %1716 = vmatpush3.bf16.msra.mxu1 %v1877_v31  ;;  %1741 = vmatprep.subr.bf16.mxu0 %v1878_v40  ;;  %v1909_v31 = vld [vmem:[%s2255_s1 + $0x1b8] sm:$0xff]   ;;  %v1471_v40 = vcombine.high %v200_v36, %v204_v37 }
  0x27   : > { %1781 = vmatprep.subr.bf16.mxu1 %v1879_v41  ;;  %v211_v41 = vld [vmem:[%s2070_s28 + $0x70] sm:$0xff] }
  0x28   : > { %934 = vmatmul.mubr.bf16.vlgmr.msra.gmra.mrb[0].mxu0 %v1464_v35  ;;  %v1469_v35 = vcombine.high %v199_v32, %v203_v33 }
  0x29   : > { %999 = vmatmul.mubr.bf16.vlgmr.msra.gmra.mrb[0].mxu1 %v1466_v38  ;;  %1742 = vmatpush3.bf16.msra.mxu0 %v1880_v42  ;;  %v207_v38 = vld [vmem:[%s2070_s28 + $0x50] sm:$0xff]  ;;  %v208_v42 = vld [vmem:[%s2070_s28 + $0x58] sm:$0xff] }
  0x2a   : > { %1782 = vmatpush3.bf16.msra.mxu1 %v1881_v43  ;;  %1743 = vmatprep.subr.bf16.mxu0 %v1882_v44  ;;  %v212_v43 = vld [vmem:[%s2070_s28 + $0x78] sm:$0xff]  ;;  %v1477_v44 = vcombine.high %v207_v38, %v211_v41 }
  0x2b   : > { %1783 = vmatprep.subr.bf16.mxu1 %v1883_v45  ;;  %941 = vmatprep.mubr.bf16.mxu0 %v1473_v50  ;;  %v1479_v45 = vcombine.high %v208_v42, %v212_v43  ;;  %v1476_v50 = vcombine.low %v207_v38, %v211_v41  ;;  %v1478_v51 = vcombine.low %v208_v42, %v212_v43 }
  0x2c   : > { %1006 = vmatprep.mubr.bf16.mxu1 %v1475_v54  ;;  %v223_v54 = vld [vmem:[%s2070_s28 + $0xd0] sm:$0xff] }
  0x2d   : > { %1744 = vmatpush3.bf16.msra.mxu0 %v1884_v46  ;;  %v215_v46 = vld [vmem:[%s2070_s28 + $0x90] sm:$0xff] }
  0x2e   : > { %1784 = vmatpush3.bf16.msra.mxu1 %v1885_v47  ;;  %1745 = vmatprep.subr.bf16.mxu0 %v1886_v56  ;;  %v219_v47 = vld [vmem:[%s2070_s28 + $0xb0] sm:$0xff]  ;;  %v224_v56 = vld [vmem:[%s2070_s28 + $0xd8] sm:$0xff] }
  0x2f   : > { %1785 = vmatprep.subr.bf16.mxu1 %v1887_v57  ;;  %v1485_v52 = vcombine.high %v215_v46, %v219_v47  ;;  %v228_v57 = vld [vmem:[%s2070_s28 + $0xf8] sm:$0xff] }
  0x30   : > { %942 = vmatmul.mubr.bf16.gmra.mrb[4].mxu0 %v1472_v53  ;;  %v1487_v53 = vcombine.high %v216_v48, %v220_v49 }
  0x31   : > { %1007 = vmatmul.mubr.bf16.gmra.mrb[4].mxu1 %v1474_v55  ;;  %1746 = vmatpush3.bf16.msra.mxu0 %v1888_v58  ;;  %v227_v55 = vld [vmem:[%s2070_s28 + $0xf0] sm:$0xff]  ;;  %v1484_v58 = vcombine.low %v215_v46, %v219_v47  ;;  %s1579_s28 = sshll.u32 %s2262_s9, 5 }
  0x32   : > { %1786 = vmatpush3.bf16.msra.mxu1 %v1889_v59  ;;  %1747 = vmatprep.subr.bf16.mxu0 %v1890_v60  ;;  %v1486_v59 = vcombine.low %v216_v48, %v220_v49  ;;  %v1493_v60 = vcombine.high %v223_v54, %v227_v55  ;;  %s189_s9 = scalar_lea.vmem %s2256_s2, %s1579_s28 }
  0x33   : > { %1787 = vmatprep.subr.bf16.mxu1 %v1891_v61  ;;  %949 = vmatprep.mubr.bf16.mxu0 %v1481_v4  ;;  %v1495_v61 = vcombine.high %v224_v56, %v228_v57 }
  0x34   : > { %1014 = vmatprep.mubr.bf16.mxu1 %v1483_v5 }
  0x35   : > { %1748 = vmatpush3.bf16.msra.mxu0 %v1892_v62  ;;  %v1492_v62 = vcombine.low %v223_v54, %v227_v55 }
  0x36   : > { %1788 = vmatpush3.bf16.msra.mxu1 %v1893_v63  ;;  %1749 = vmatprep.subr.bf16.mxu0 %v1894_v8  ;;  %v1494_v63 = vcombine.low %v224_v56, %v228_v57 }
  0x37   : > { %1789 = vmatprep.subr.bf16.mxu1 %v1895_v9 }
  0x38   : > { %950 = vmatmul.mubr.bf16.gmra.mrb[8].mxu0 %v1480_v6 }
  0x39   : > { %1015 = vmatmul.mubr.bf16.gmra.mrb[8].mxu1 %v1482_v7  ;;  %1750 = vmatpush3.bf16.msra.mxu0 %v1896_v10 }
  0x3a   : > { %1790 = vmatpush3.bf16.msra.mxu1 %v1897_v11  ;;  %1751 = vmatprep.subr.bf16.mxu0 %v1898_v12 }
  0x3b   : > { %1791 = vmatprep.subr.bf16.mxu1 %v1899_v13  ;;  %957 = vmatprep.mubr.bf16.mxu0 %v1489_v19 }
  0x3c   : > { %1022 = vmatprep.mubr.bf16.mxu1 %v1491_v22 }
  0x3d   : > { %1752 = vmatpush3.bf16.msra.mxu0 %v1900_v14 }
  0x3e   : > { %1792 = vmatpush3.bf16.msra.mxu1 %v1901_v15  ;;  %1753 = vmatprep.subr.bf16.mxu0 %v1902_v24 }
  0x3f   : > { %1793 = vmatprep.subr.bf16.mxu1 %v1903_v25 }
  0x40   : > { %958 = vmatmul.mubr.bf16.gmra.mrb[12].mxu0 %v1488_v21 }
  0x41   : > { %1023 = vmatmul.mubr.bf16.gmra.mrb[12].mxu1 %v1490_v23  ;;  %1754 = vmatpush3.bf16.msra.mxu0 %v1904_v26 }
  0x42   : > { %1794 = vmatpush3.bf16.msra.mxu1 %v1905_v27  ;;  %1755 = vmatprep.subr.bf16.mxu0 %v1906_v28 }
  0x43   : > { %1795 = vmatprep.subr.bf16.mxu1 %v1907_v29  ;;  %1063 = vmatprep.mubr.bf16.mxu0 %v1469_v35 }
  0x44   : > { %1128 = vmatprep.mubr.bf16.mxu1 %v1471_v40 }
  0x45   : > { %1756 = vmatpush3.bf16.msra.mxu0 %v1908_v30 }
  0x46   : > { %1796 = vmatpush3.bf16.msra.mxu1 %v1909_v31 }
  0x48   : > { %1064 = vmatmul.mubr.bf16.vlgmr.msra.gmra.mrb[16].mxu0 %v1468_v34 }
  0x49   : > { %1129 = vmatmul.mubr.bf16.vlgmr.msra.gmra.mrb[16].mxu1 %v1470_v39  ;;  %1071 = vmatprep.mubr.bf16.mxu0 %v1477_v44 }
  0x4a   : > { %1136 = vmatprep.mubr.bf16.mxu1 %v1479_v45 }
  0x50   : > { %1072 = vmatmul.mubr.bf16.gmra.mrb[20].mxu0 %v1476_v50 }
  0x51   : > { %1137 = vmatmul.mubr.bf16.gmra.mrb[20].mxu1 %v1478_v51  ;;  %1079 = vmatprep.mubr.bf16.mxu0 %v1485_v52 }
  0x52   : > { %1144 = vmatprep.mubr.bf16.mxu1 %v1487_v53 }
  0x58   : > { %1080 = vmatmul.mubr.bf16.gmra.mrb[24].mxu0 %v1484_v58 }
  0x59   : > { %1145 = vmatmul.mubr.bf16.gmra.mrb[24].mxu1 %v1486_v59  ;;  %1087 = vmatprep.mubr.bf16.mxu0 %v1493_v60 }
  0x5a   : > { %1152 = vmatprep.mubr.bf16.mxu1 %v1495_v61 }
  0x60   : > { %1088 = vmatmul.mubr.bf16.gmra.mrb[28].mxu0 %v1492_v62 }
  0x61   : > { %1153 = vmatmul.mubr.bf16.gmra.mrb[28].mxu1 %v1494_v63 }
  0xfb   : > { %v1677_v1 = vpop.f32.mrb[0].mxu0 }
  0xfc   : > { %v1717_v2 = vpop.f32.mrb[0].mxu1  ;;  %v1678_v3 = vpop.f32.mrb[1].mxu0 }
  0xfd   : > { %v1679_v4 = vadd.f32 %v1678_v3, %v1677_v1  ;;  %v1718_v5 = vpop.f32.mrb[1].mxu1  ;;  %v1680_v6 = vpop.f32.mrb[2].mxu0 }
  0xfe   : > { %v1719_v7 = vadd.f32 %v1718_v5, %v1717_v2  ;;  %v1720_v8 = vpop.f32.mrb[2].mxu1  ;;  %v1681_v9 = vpop.f32.mrb[3].mxu0 }
  0xff   : > { %v1682_v10 = vadd.f32 %v1681_v9, %v1680_v6  ;;  %v1721_v11 = vpop.f32.mrb[3].mxu1 }
 0x100   : > { %v1001_v12 = vadd.f32 %v1719_v7, %v1679_v4  ;;  %v1722_v13 = vadd.f32 %v1721_v11, %v1720_v8 }
 0x102   : > { %v1004_v14 = vadd.f32 %v1722_v13, %v1682_v10 }
 0x103   : > { %v1683_v15 = vpop.f32.mrb[4].mxu0 }
 0x104   : > { %v1723_v16 = vpop.f32.mrb[4].mxu1  ;;  %v1684_v17 = vpop.f32.mrb[5].mxu0 }
 0x105   : > { %v1685_v18 = vadd.f32 %v1684_v17, %v1683_v15  ;;  %v1724_v19 = vpop.f32.mrb[5].mxu1  ;;  %v1686_v20 = vpop.f32.mrb[6].mxu0 }
 0x106   : > { %v1725_v21 = vadd.f32 %v1724_v19, %v1723_v16  ;;  %v1726_v22 = vpop.f32.mrb[6].mxu1  ;;  %v1687_v23 = vpop.f32.mrb[7].mxu0 }
 0x107   : > { %v1688_v24 = vadd.f32 %v1687_v23, %v1686_v20  ;;  %v1727_v25 = vpop.f32.mrb[7].mxu1 }
 0x108   : > { %v1009_v26 = vadd.f32 %v1725_v21, %v1685_v18  ;;  %v1728_v27 = vadd.f32 %v1727_v25, %v1726_v22 }
 0x10a   : > { %v2206_v28 = vadd.f32 %v1728_v27, %v1688_v24 }
 0x10b   : > { %v1689_v29 = vpop.f32.mrb[8].mxu0 }
 0x10c   : > { %v1729_v30 = vpop.f32.mrb[8].mxu1  ;;  %v1690_v31 = vpop.f32.mrb[9].mxu0 }
 0x10d   : > { %v1730_v32 = vpop.f32.mrb[9].mxu1  ;;  %v1691_v33 = vadd.f32 %v1690_v31, %v1689_v29  ;;  %v1692_v35 = vpop.f32.mrb[10].mxu0 }
 0x10e   : > { %v1731_v34 = vadd.f32 %v1730_v32, %v1729_v30  ;;  %v1732_v36 = vpop.f32.mrb[10].mxu1  ;;  %v1693_v37 = vpop.f32.mrb[11].mxu0 }
 0x10f   : > { %v1733_v38 = vpop.f32.mrb[11].mxu1  ;;  %v1694_v40 = vadd.f32 %v1693_v37, %v1692_v35 }
 0x110   : > { %v2208_v39 = vadd.f32 %v1731_v34, %v1691_v33  ;;  %v1734_v41 = vadd.f32 %v1733_v38, %v1732_v36 }
 0x112   : > { %v2210_v42 = vadd.f32 %v1734_v41, %v1694_v40 }
 0x113   : > { %v1695_v43 = vpop.f32.mrb[12].mxu0 }
 0x114   : > { %v1735_v44 = vpop.f32.mrb[12].mxu1  ;;  %v1696_v45 = vpop.f32.mrb[13].mxu0 }
 0x115   : > { %v1697_v46 = vadd.f32 %v1696_v45, %v1695_v43  ;;  %v1736_v47 = vpop.f32.mrb[13].mxu1  ;;  %v1698_v48 = vpop.f32.mrb[14].mxu0 }
 0x116   : > { %v1737_v49 = vadd.f32 %v1736_v47, %v1735_v44  ;;  %v1738_v50 = vpop.f32.mrb[14].mxu1  ;;  %v1699_v51 = vpop.f32.mrb[15].mxu0 }
 0x117   : > { %v1700_v52 = vadd.f32 %v1699_v51, %v1698_v48  ;;  %v1739_v53 = vpop.f32.mrb[15].mxu1 }
 0x118   : > { %v2212_v54 = vadd.f32 %v1737_v49, %v1697_v46  ;;  %v1740_v55 = vadd.f32 %v1739_v53, %v1738_v50 }
 0x11a   : > { %v2214_v56 = vadd.f32 %v1740_v55, %v1700_v52 }
 0x11b   : > { %v1757_v57 = vpop.f32.mrb[16].mxu0 }
 0x11c   : > { %v1797_v58 = vpop.f32.mrb[16].mxu1  ;;  %v1758_v59 = vpop.f32.mrb[17].mxu0 }
 0x11d   : > { %v1759_v60 = vadd.f32 %v1758_v59, %v1757_v57  ;;  %v1798_v61 = vpop.f32.mrb[17].mxu1  ;;  %v1760_v62 = vpop.f32.mrb[18].mxu0 }
 0x11e   : > { %v1799_v63 = vadd.f32 %v1798_v61, %v1797_v58  ;;  %v1800_v0 = vpop.f32.mrb[18].mxu1  ;;  %v1761_v1 = vpop.f32.mrb[19].mxu0 }
 0x11f   : > { %v1066_v2 = vadd.f32 %v1759_v60, %v1001_v12  ;;  %v1762_v3 = vadd.f32 %v1761_v1, %v1760_v62  ;;  %v1801_v4 = vpop.f32.mrb[19].mxu1 }
 0x120   : > { %v1802_v5 = vadd.f32 %v1801_v4, %v1800_v0 }
 0x121   : > { %v1131_v6 = vadd.f32 %v1799_v63, %v1066_v2  ;;  %v1069_v7 = vadd.f32 %v1762_v3, %v1004_v14 }
 0x123   : > { %v1134_v8 = vadd.f32 %v1802_v5, %v1069_v7  ;;  %v1763_v9 = vpop.f32.mrb[20].mxu0  ;;  %v1221_v10 = vmul.f32 %v1131_v6, %v1131_v6 }
 0x124   : > { %v1803_v11 = vpop.f32.mrb[20].mxu1  ;;  %v1764_v13 = vpop.f32.mrb[21].mxu0 }
 0x125   : > { %v2216_v15 = vpack.c.bf16 %v1134_v8, %v1131_v6  ;;  %v1205_v16 = vadd.f32 %v1134_v8, %v1131_v6  ;;  %v1222_v17 = vmul.f32 %v1134_v8, %v1134_v8  ;;  %v1765_v18 = vadd.f32 %v1764_v13, %v1763_v9  ;;  %v1804_v19 = vpop.f32.mrb[21].mxu1  ;;  %v1766_v20 = vpop.f32.mrb[22].mxu0 }
 0x126   : > { %v1805_v21 = vadd.f32 %v1804_v19, %v1803_v11  ;;  %v1806_v22 = vpop.f32.mrb[22].mxu1  ;;  %v1767_v12 = vpop.f32.mrb[23].mxu0 }
 0x127   : > { %v1229_v23 = vadd.f32 %v1222_v17, %v1221_v10  ;;  %v1074_v24 = vadd.f32 %v1765_v18, %v1009_v26  ;;  %v1807_v25 = vpop.f32.mrb[23].mxu1  ;;  %v1768_v27 = vadd.f32 %v1767_v12, %v1766_v20 }
 0x128   : > { %v1808_v14 = vadd.f32 %v1807_v25, %v1806_v22 }
 0x129   : > { %v1139_v29 = vadd.f32 %v1805_v21, %v1074_v24  ;;  %v1077_v30 = vadd.f32 %v1768_v27, %v2206_v28 }
 0x12b   : > { %v1206_v31 = vadd.f32 %v1205_v16, %v1139_v29  ;;  %v1223_v32 = vmul.f32 %v1139_v29, %v1139_v29  ;;  %v1769_v33 = vpop.f32.mrb[24].mxu0  ;;  %v1142_v34 = vadd.f32 %v1808_v14, %v1077_v30 }
 0x12c   : > { %v1809_v35 = vpop.f32.mrb[24].mxu1  ;;  %v1770_v36 = vpop.f32.mrb[25].mxu0 }
 0x12d   : > { %v1230_v37 = vadd.f32 %v1229_v23, %v1223_v32  ;;  %v1771_v38 = vadd.f32 %v1770_v36, %v1769_v33  ;;  %v1810_v40 = vpop.f32.mrb[25].mxu1  ;;  %v1772_v41 = vpop.f32.mrb[26].mxu0  ;;  %v2219_v43 = vpack.c.bf16 %v1142_v34, %v1139_v29  ;;  %v1207_v44 = vadd.f32 %v1206_v31, %v1142_v34  ;;  %v1204_v32 = vld [vmem:[#allocation2] sm:$0x1] }
 0x12e   : > { %v1224_v26 = vmul.f32 %v1142_v34, %v1142_v34  ;;  %v1811_v45 = vadd.f32 %v1810_v40, %v1809_v35  ;;  %v1812_v46 = vpop.f32.mrb[26].mxu1  ;;  %v1773_v47 = vpop.f32.mrb[27].mxu0  ;;  %v1220_v34 = vld [vmem:[#allocation3] sm:$0x1] }
 0x12f   : > { %v1082_v48 = vadd.f32 %v1771_v38, %v2208_v39  ;;  %v1774_v28 = vadd.f32 %v1773_v47, %v1772_v41  ;;  %v1813_v49 = vpop.f32.mrb[27].mxu1 }
 0x130   : > { %v1231_v50 = vadd.f32 %v1230_v37, %v1224_v26  ;;  %v1814_v51 = vadd.f32 %v1813_v49, %v1812_v46  ;;  %v1273_v46 = vlaneseq }
 0x131   : > { %v1147_v52 = vadd.f32 %v1811_v45, %v1082_v48  ;;  %v1085_v53 = vadd.f32 %v1774_v28, %v2210_v42 }
 0x132   : > { %v1274_v28 = vshrl.u32 %v1273_v46, 7 }
 0x133   : > { %v1208_v55 = vadd.f32 %v1207_v44, %v1147_v52  ;;  %v1225_v57 = vmul.f32 %v1147_v52, %v1147_v52  ;;  %v1150_v58 = vadd.f32 %v1814_v51, %v1085_v53  ;;  %v1775_v59 = vpop.f32.mrb[28].mxu0  ;;  %v1618_v51 = vunpack.c.l.bf16 %v2216_v15 }
 0x134   : > { %v1815_v60 = vpop.f32.mrb[28].mxu1  ;;  %v1776_v61 = vpop.f32.mrb[29].mxu0  ;;  %v1275_v49 = vsub.s32 0, %v1274_v28  ;;  %v1622_v53 = vunpack.c.l.bf16 %v2219_v43 }
 0x135   : > { %v1232_v62 = vadd.f32 %v1231_v50, %v1225_v57  ;;  %v2223_v63 = vpack.c.bf16 %v1150_v58, %v1147_v52  ;;  %v1209_v0 = vadd.f32 %v1208_v55, %v1150_v58  ;;  %v1226_v1 = vmul.f32 %v1150_v58, %v1150_v58  ;;  %v1816_v2 = vpop.f32.mrb[29].mxu1  ;;  %v1778_v39 = vpop.f32.mrb[30].mxu0 }
 0x136   : > { %v1777_v3 = vadd.f32 %v1776_v61, %v1775_v59  ;;  %v1817_v4 = vadd.f32 %v1816_v2, %v1815_v60  ;;  %v1818_v5 = vpop.f32.mrb[30].mxu1  ;;  %v1779_v6 = vpop.f32.mrb[31].mxu0  ;;  %v1619_v52 = vunpack.c.h.bf16 %v2216_v15  ;;  %v1623_v55 = vunpack.c.h.bf16 %v2219_v43 }
 0x137   : > { %v1233_v7 = vadd.f32 %v1232_v62, %v1226_v1  ;;  %v1780_v8 = vadd.f32 %v1779_v6, %v1778_v39  ;;  %v1819_v42 = vpop.f32.mrb[31].mxu1  ;;  %v1626_v57 = vunpack.c.l.bf16 %v2223_v63  ;;  %v1627_v59 = vunpack.c.h.bf16 %v2223_v63 }
 0x138   : > { %v1090_v9 = vadd.f32 %v1777_v3, %v2212_v54  ;;  %v1820_v10 = vadd.f32 %v1819_v42, %v1818_v5 }
 0x139   : > { %v1093_v11 = vadd.f32 %v1780_v8, %v2214_v56 }
 0x13a   : > { %v1155_v13 = vadd.f32 %v1817_v4, %v1090_v9 }
 0x13b   : > { %v1158_v16 = vadd.f32 %v1820_v10, %v1093_v11 }
 0x13c   : > { %v1210_v17 = vadd.f32 %v1209_v0, %v1155_v13  ;;  %v1227_v18 = vmul.f32 %v1155_v13, %v1155_v13 }
 0x13d   : > { %v1614_v19 = vpack.c.bf16 %v1158_v16, %v1155_v13  ;;  %v1228_v20 = vmul.f32 %v1158_v16, %v1158_v16 }
 0x13e   : > { %v1234_v21 = vadd.f32 %v1233_v7, %v1227_v18  ;;  %v1211_v22 = vadd.f32 %v1210_v17, %v1158_v16 }
 0x13f   : > { %v1630_v60 = vunpack.c.l.bf16 %v1614_v19  ;;  %v1631_v61 = vunpack.c.h.bf16 %v1614_v19 }
 0x140   : > { %v1212_v12 = vrot.slane %v1211_v22, 4  ;;  %v1235_v23 = vadd.f32 %v1234_v21, %v1228_v20 }
 0x142   : > { %v1213_v24 = vadd.f32 %v1212_v12, %v1211_v22  ;;  %v1236_v25 = vrot.slane %v1235_v23, 4 }
 0x144   : > { %v1214_v27 = vrot.slane %v1213_v24, 2  ;;  %v1237_v14 = vadd.f32 %v1236_v25, %v1235_v23 }
 0x146   : > { %v1215_v29 = vadd.f32 %v1214_v27, %v1213_v24  ;;  %v1238_v30 = vrot.slane %v1237_v14, 2 }
 0x148   : > { %v1216_v54 = vrot.slane %v1215_v29, 1  ;;  %v1239_v31 = vadd.f32 %v1238_v30, %v1237_v14 }
 0x14a   : > { %v1217_v56 = vadd.f32 %v1216_v54, %v1215_v29  ;;  %v1240_v33 = vrot.slane %v1239_v31, 1 }
 0x14c   : > { %v1218_v35 = vadd.f32 %v1217_v56, %v1204_v32  ;;  %v1241_v36 = vadd.f32 %v1240_v33, %v1239_v31 }
 0x14e   : > { %1219 = vst [vmem:[#allocation2] sm:$0x1] %v1218_v35  ;;  %v1242_v37 = vadd.f32 %v1241_v36, %v1220_v34 }
 0x150   : > { %1243 = vst [vmem:[#allocation3] sm:$0x1] %v1242_v37 }
 0x155   : > { %v1247_v38 = vld [vmem:[#allocation2] sm:$0x1] }
 0x156   : > { %v1248_v40 = vmul.f32 0.015625, %v1247_v38 }
 0x157   : > { %v1249_v41 = vld [vmem:[#allocation3] sm:$0x1] }
 0x158   : > { %v1250_v44 = vmul.f32 0.015625, %v1249_v41  ;;  %v1251_v26 = vmul.f32 %v1248_v40, %v1248_v40  ;;  %v1276_v50 = vrot.slane %v1248_v40, %v1275_v49 }
 0x15a   : > { %v1252_v45 = vsub.f32 %v1250_v44, %v1251_v26  ;;  %v1278_v62 = vsub.f32 %v1618_v51, %v1276_v50  ;;  %v1279_v0 = vsub.f32 %v1619_v52, %v1276_v50  ;;  %v1280_v1 = vsub.f32 %v1622_v53, %v1276_v50 }
 0x15b   : > { %v1281_v2 = vsub.f32 %v1623_v55, %v1276_v50  ;;  %v1282_v3 = vsub.f32 %v1626_v57, %v1276_v50  ;;  %v1283_v4 = vsub.f32 %v1627_v59, %v1276_v50  ;;  %v1284_v15 = vsub.f32 %v1630_v60, %v1276_v50 }
 0x15c   : > { %v1253_v47 = vmax.f32 %v1252_v45, 0.0  ;;  %v1285_v5 = vsub.f32 %v1631_v61, %v1276_v50 }
 0x15e   : > { %v1254_v48 = vadd.f32 1e-05, %v1253_v47 }
 0x160   : > { %1910 = vrsqrt.f32 %v1254_v48 }
 0x16a   : > { %v1911_v58 = vpop.eup %1910 }
 0x16b   : > { %v1290_v39 = vrot.slane %v1911_v58, %v1275_v49 }
 0x16d   : > { %v1292_v6 = vmul.f32 %v1290_v39, %v1278_v62  ;;  %v1293_v7 = vmul.f32 %v1290_v39, %v1279_v0  ;;  %v1294_v43 = vmul.f32 %v1290_v39, %v1280_v1  ;;  %v1295_v8 = vmul.f32 %v1290_v39, %v1281_v2 }
 0x16e   : > { %v1296_v42 = vmul.f32 %v1290_v39, %v1282_v3  ;;  %v1297_v9 = vmul.f32 %v1290_v39, %v1283_v4  ;;  %v1298_v10 = vmul.f32 %v1290_v39, %v1284_v15  ;;  %v1299_v63 = vmul.f32 %v1290_v39, %v1285_v5 }
 0x16f   : > { %vm1300_vm0 = vcmp.ge.f32.partialorder %v1292_v6, 0.0  ;;  %vm1301_vm1 = vcmp.ge.f32.partialorder %v1293_v7, 0.0  ;;  %vm1302_vm2 = vcmp.ge.f32.partialorder %v1294_v43, 0.0  ;;  %vm1303_vm3 = vcmp.ge.f32.partialorder %v1295_v8, 0.0 }
 0x170   : > { %vm1304_vm4 = vcmp.ge.f32.partialorder %v1296_v42, 0.0  ;;  %vm1305_vm5 = vcmp.ge.f32.partialorder %v1297_v9, 0.0  ;;  %vm1306_vm6 = vcmp.ge.f32.partialorder %v1298_v10, 0.0  ;;  %vm1307_vm7 = vcmp.ge.f32.partialorder %v1299_v63, 0.0 }
 0x171   : > { %v1308_v11 = vmul.f32 0.2, %v1292_v6  ;;  %v1309_v13 = vmul.f32 0.2, %v1293_v7  ;;  %v1310_v16 = vmul.f32 0.2, %v1294_v43 }
 0x172   : > { %v1311_v17 = vmul.f32 0.2, %v1295_v8  ;;  %v1312_v18 = vmul.f32 0.2, %v1296_v42  ;;  %v1313_v19 = vmul.f32 0.2, %v1297_v9 }
 0x173   : > { %v1314_v20 = vmul.f32 0.2, %v1298_v10  ;;  %v1315_v21 = vmul.f32 0.2, %v1299_v63  ;;  %v1316_v22 = vsel %vm1300_vm0, %v1292_v6, %v1308_v11  ;;  %v1317_v12 = vsel %vm1301_vm1, %v1293_v7, %v1309_v13 }
 0x174   : > { %v1318_v23 = vsel %vm1302_vm2, %v1294_v43, %v1310_v16  ;;  %v1319_v24 = vsel %vm1303_vm3, %v1295_v8, %v1311_v17  ;;  %v1320_v25 = vsel %vm1304_vm4, %v1296_v42, %v1312_v18  ;;  %v1321_v27 = vsel %vm1305_vm5, %v1297_v9, %v1313_v19 }
 0x175   : > { %v1322_v14 = vsel %vm1306_vm6, %v1298_v10, %v1314_v20  ;;  %v1323_v29 = vsel %vm1307_vm7, %v1299_v63, %v1315_v21  ;;  %v1635_v30 = vpack.c.bf16 %v1317_v12, %v1316_v22  ;;  %v1640_v54 = vpack.c.bf16 %v1319_v24, %v1318_v23 }
 0x176   : > { %v1645_v31 = vpack.c.bf16 %v1321_v27, %v1320_v25  ;;  %v1650_v32 = vpack.c.bf16 %v1323_v29, %v1322_v14 }
 0x177   : > { %1636 = vst [vmem:[%s189_s9] sm:$0xff] %v1635_v30   ;;  %1658 = vst [vmem:[%s189_s9 + $0x8] sm:$0xff] %v1640_v54  }
 0x178   : > { %1659 = vst [vmem:[%s189_s9 + $0x10] sm:$0xff] %v1645_v31   ;;  %1660 = vst [vmem:[%s189_s9 + $0x18] sm:$0xff] %v1650_v32  }
 0x179 PF: > { %s12_s11 = sadd.s32 1, %s1934_s11   ;;  %s2257_s9 = smov %s1930_s10 }
 0x17a   : > { %p9_p5 = scmp.ge.s32.totalorder %s12_s11, 4   ;;  %s2258_s10 = smov %s2260_s12 }
 0x17c   :  { %11 = sbr.rel (!%p9_p5) target bundleno = 2 (0x2), region = 67 }

// kernel: discriminator_forward.7
= control target key start
LH: loop header
LB: loop body
LE: loop exit
PB: predicated region body
PF: predicated region fallthrough
CT: control target
= control target key end

     0   :  { %s3597_s9 = smov 0   ;;  %s3599_s10 = smov 0   ;;  %s4384_s0 = inlined_call_operand.vmem [shape: bf16[2,16,2048], index: 0, kind: input, shape index: {}]   ;;  %s4385_s1 = inlined_call_operand.vmem [shape: bf16[2048,256], index: 1, kind: input, shape index: {}]   ;;  %s4386_s2 = inlined_call_operand.vmem [shape: bf16[2,1,16,256], index: 2, kind: output, shape index: {}]  }
   0x1   :  { %s3601_s11 = smov 0   ;;  %s3603_s12 = smov 0  }
   0x2   :  { %s3605_s13 = smov 0   ;;  %s3607_s14 = smov 0  }
   0x3   :  { %s3609_s15 = smov 0   ;;  %s3611_s16 = smov 0  }
   0x4   :  { %s3613_s17 = smov 0  }
   0x5 LB: > { %s2947_s18 = sadd.s32 4294967295, %s3579_s17   ;;  %s27_s19 = sadd.s32 1, %s3571_s15  ;;  %s3579_s17 = sphi %s3613_s17, %s12_s17   ;;  %s3575_s16 = sphi %s3611_s16, %s4395_s16   ;;  %s3571_s15 = sphi %s3609_s15, %s4394_s15   ;;  %s3567_s14 = sphi %s3607_s14, %s4393_s14   ;;  %s3563_s13 = sphi %s3605_s13, %s4392_s13   ;;  %s3559_s12 = sphi %s3603_s12, %s4391_s12   ;;  %s3555_s11 = sphi %s3601_s11, %s4390_s11   ;;  %s3551_s10 = sphi %s3599_s10, %s4389_s10   ;;  %s3547_s9 = sphi %s3597_s9, %s4388_s9  }
   0x6   : > { %p29_p0 = scmp.ge.s32.totalorder %s27_s19, 2  ;;  %s31_s20 = sadd.s32 1, %s3575_s16 }
   0x7   : > { %s66_s21 = sadd.s32 1, %s3559_s12  ;;  %p73_p1 = scmp.ne.s32.totalorder %s3559_s12, %s3555_s11 }
   0x8   : > { %s4397_s19 = smov (%p29_p0, %s27_s19), 0  ;;  %s4399_s20 = smov (!%p29_p0, %s31_s20), %s3575_s16 }
   0x9   : > { %s63_s22 = ssub.s32 %s3571_s15, %s4397_s19  ;;  %p74_p2 = scmp.eq.s32.totalorder %s3579_s17, 0 }
   0xa   : > { %p33_p3 = scmp.ge.s32.totalorder %s4399_s20, 2  ;;  %p64_p4 = scmp.eq.s32.totalorder %s63_s22, 0 }
   0xb   : > { %p75_p5 = por %p74_p2, %p73_p1  ;;  %s94_s23 = sadd.s32 1, %s3551_s10 }
   0xc   : > { %s4401_s20 = smov (%p33_p3, %s4399_s20), 0  ;;  %p104_p6 = scmp.ne.s32.totalorder %s3551_s10, %s3547_s9 }
   0xd   : > { %s3658_s24 = scalar_select %p64_p4, %s3559_s12, %s66_s21  }
   0xe   : > { %s89_s25 = ssub.s32 %s3575_s16, %s4401_s20  ;;  %p105_p7 = scmp.eq.s32.totalorder %s2947_s18, 3 }
   0xf   : > { %s91_s26 = sor.u32 %s89_s25, %s63_s22  ;;  %p2950_p10 = scmp.ge.s32.totalorder %s3579_s17, 4 }
  0x10   : > { %p92_p8 = scmp.eq.s32.totalorder %s91_s26, 0  ;;  %p3664_p9 = por %p105_p7, %p104_p6 }
  0x11   : > { %127 = sbr.rel (%p2950_p10) target bundleno = 198 (0xc6), region = 16 }
  0x12   : > { %s3669_s28 = scalar_select %p92_p8, %s3551_s10, %s94_s23  }
  0x18   : > { %144 = sbr.rel (!%p75_p5) target bundleno = 198 (0xc6), region = 24  ;;  %s146_s29 = sand.u32 (%p75_p5), 1, %s3559_s12  }
  0x19   : > { %s2952_s30 = sshll.u32 (%p75_p5), %s3571_s15, 2  ;;  %s2951_s3 = sshll.u32 (%p75_p5), %s146_s29, 10 }
  0x1a   : > { %s3677_s6 = scalar_lea.vmem (%p75_p5), %s4385_s1, %s2952_s30  ;;  %s3681_s7 = scalar_lea.vmem (%p75_p5), [#allocation4], %s2951_s3 }
  0x1b   : > { %v166_v0 = vld [vmem:[%s3677_s6] sm:$0xf] (%p75_p5)  ;;  %v168_v1 = vld [vmem:[%s3677_s6 + $0x8] sm:$0xf] (%p75_p5)  ;;  %v170_v2 = vld [vmem:[%s3677_s6 + $0x10] sm:$0xf] (%p75_p5) }
  0x1c   : > { %167 = vst [vmem:[%s3681_s7] sm:$0xf] (%p75_p5), %v166_v0  ;;  %169 = vst [vmem:[%s3681_s7 + $0x4] sm:$0xf] (%p75_p5), %v168_v1  ;;  %v172_v3 = vld [vmem:[%s3677_s6 + $0x18] sm:$0xf] (%p75_p5) }
  0x1d   : > { %v174_v4 = vld [vmem:[%s3677_s6 + $0x20] sm:$0xf] (%p75_p5)  ;;  %171 = vst [vmem:[%s3681_s7 + $0x8] sm:$0xf] (%p75_p5), %v170_v2  ;;  %173 = vst [vmem:[%s3681_s7 + $0xc] sm:$0xf] (%p75_p5), %v172_v3 }
  0x1e   : > { %175 = vst [vmem:[%s3681_s7 + $0x10] sm:$0xf] (%p75_p5), %v174_v4  ;;  %v176_v5 = vld [vmem:[%s3677_s6 + $0x28] sm:$0xf] (%p75_p5)  ;;  %v178_v6 = vld [vmem:[%s3677_s6 + $0x30] sm:$0xf] (%p75_p5) }
  0x1f   : > { %v180_v7 = vld [vmem:[%s3677_s6 + $0x38] sm:$0xf]  ;;  %177 = vst [vmem:[%s3681_s7 + $0x14] sm:$0xf] %v176_v5  ;;  %179 = vst [vmem:[%s3681_s7 + $0x18] sm:$0xf] %v178_v6 }
  0x20   : > { %181 = vst [vmem:[%s3681_s7 + $0x1c] sm:$0xf] %v180_v7  ;;  %v182_v8 = vld [vmem:[%s3677_s6 + $0x40] sm:$0xf]  ;;  %v184_v9 = vld [vmem:[%s3677_s6 + $0x48] sm:$0xf] }
  0x21   : > { %v186_v10 = vld [vmem:[%s3677_s6 + $0x50] sm:$0xf]  ;;  %183 = vst [vmem:[%s3681_s7 + $0x20] sm:$0xf] %v182_v8  ;;  %185 = vst [vmem:[%s3681_s7 + $0x24] sm:$0xf] %v184_v9 }
  0x22   : > { %187 = vst [vmem:[%s3681_s7 + $0x28] sm:$0xf] %v186_v10  ;;  %v188_v11 = vld [vmem:[%s3677_s6 + $0x58] sm:$0xf]  ;;  %v190_v12 = vld [vmem:[%s3677_s6 + $0x60] sm:$0xf] }
  0x23   : > { %v192_v13 = vld [vmem:[%s3677_s6 + $0x68] sm:$0xf]  ;;  %189 = vst [vmem:[%s3681_s7 + $0x2c] sm:$0xf] %v188_v11  ;;  %191 = vst [vmem:[%s3681_s7 + $0x30] sm:$0xf] %v190_v12 }
  0x24   : > { %193 = vst [vmem:[%s3681_s7 + $0x34] sm:$0xf] %v192_v13  ;;  %v194_v14 = vld [vmem:[%s3677_s6 + $0x70] sm:$0xf]  ;;  %v196_v15 = vld [vmem:[%s3677_s6 + $0x78] sm:$0xf] }
  0x25   : > { %v198_v16 = vld [vmem:[%s3677_s6 + $0x80] sm:$0xf]  ;;  %195 = vst [vmem:[%s3681_s7 + $0x38] sm:$0xf] %v194_v14  ;;  %197 = vst [vmem:[%s3681_s7 + $0x3c] sm:$0xf] %v196_v15 }
  0x26   : > { %199 = vst [vmem:[%s3681_s7 + $0x40] sm:$0xf] %v198_v16  ;;  %v200_v17 = vld [vmem:[%s3677_s6 + $0x88] sm:$0xf]  ;;  %v202_v18 = vld [vmem:[%s3677_s6 + $0x90] sm:$0xf] }
  0x27   : > { %v204_v19 = vld [vmem:[%s3677_s6 + $0x98] sm:$0xf]  ;;  %201 = vst [vmem:[%s3681_s7 + $0x44] sm:$0xf] %v200_v17  ;;  %203 = vst [vmem:[%s3681_s7 + $0x48] sm:$0xf] %v202_v18 }
  0x28   : > { %205 = vst [vmem:[%s3681_s7 + $0x4c] sm:$0xf] %v204_v19  ;;  %v206_v20 = vld [vmem:[%s3677_s6 + $0xa0] sm:$0xf]  ;;  %v208_v21 = vld [vmem:[%s3677_s6 + $0xa8] sm:$0xf] }
  0x29   : > { %v210_v22 = vld [vmem:[%s3677_s6 + $0xb0] sm:$0xf]  ;;  %207 = vst [vmem:[%s3681_s7 + $0x50] sm:$0xf] %v206_v20  ;;  %209 = vst [vmem:[%s3681_s7 + $0x54] sm:$0xf] %v208_v21 }
  0x2a   : > { %211 = vst [vmem:[%s3681_s7 + $0x58] sm:$0xf] %v210_v22  ;;  %v212_v23 = vld [vmem:[%s3677_s6 + $0xb8] sm:$0xf]  ;;  %v214_v24 = vld [vmem:[%s3677_s6 + $0xc0] sm:$0xf] }
  0x2b   : > { %v216_v25 = vld [vmem:[%s3677_s6 + $0xc8] sm:$0xf]  ;;  %213 = vst [vmem:[%s3681_s7 + $0x5c] sm:$0xf] %v212_v23  ;;  %215 = vst [vmem:[%s3681_s7 + $0x60] sm:$0xf] %v214_v24 }
  0x2c   : > { %217 = vst [vmem:[%s3681_s7 + $0x64] sm:$0xf] %v216_v25  ;;  %v218_v26 = vld [vmem:[%s3677_s6 + $0xd0] sm:$0xf]  ;;  %v220_v27 = vld [vmem:[%s3677_s6 + $0xd8] sm:$0xf] }
  0x2d   : > { %v222_v28 = vld [vmem:[%s3677_s6 + $0xe0] sm:$0xf]  ;;  %219 = vst [vmem:[%s3681_s7 + $0x68] sm:$0xf] %v218_v26  ;;  %221 = vst [vmem:[%s3681_s7 + $0x6c] sm:$0xf] %v220_v27 }
  0x2e   : > { %223 = vst [vmem:[%s3681_s7 + $0x70] sm:$0xf] %v222_v28  ;;  %v224_v29 = vld [vmem:[%s3677_s6 + $0xe8] sm:$0xf]  ;;  %v226_v30 = vld [vmem:[%s3677_s6 + $0xf0] sm:$0xf] }
  0x2f   : > { %v228_v31 = vld [vmem:[%s3677_s6 + $0xf8] sm:$0xf]  ;;  %225 = vst [vmem:[%s3681_s7 + $0x74] sm:$0xf] %v224_v29  ;;  %227 = vst [vmem:[%s3681_s7 + $0x78] sm:$0xf] %v226_v30 }
  0x30   : > { %229 = vst [vmem:[%s3681_s7 + $0x7c] sm:$0xf] %v228_v31  ;;  %v230_v32 = vld [vmem:[%s3677_s6 + $0x100] sm:$0xf]  ;;  %v232_v33 = vld [vmem:[%s3677_s6 + $0x108] sm:$0xf] }
  0x31   : > { %v234_v34 = vld [vmem:[%s3677_s6 + $0x110] sm:$0xf]  ;;  %231 = vst [vmem:[%s3681_s7 + $0x80] sm:$0xf] %v230_v32  ;;  %233 = vst [vmem:[%s3681_s7 + $0x84] sm:$0xf] %v232_v33 }
  0x32   : > { %235 = vst [vmem:[%s3681_s7 + $0x88] sm:$0xf] %v234_v34  ;;  %v236_v35 = vld [vmem:[%s3677_s6 + $0x118] sm:$0xf]  ;;  %v238_v36 = vld [vmem:[%s3677_s6 + $0x120] sm:$0xf] }
  0x33   : > { %v240_v37 = vld [vmem:[%s3677_s6 + $0x128] sm:$0xf]  ;;  %237 = vst [vmem:[%s3681_s7 + $0x8c] sm:$0xf] %v236_v35  ;;  %239 = vst [vmem:[%s3681_s7 + $0x90] sm:$0xf] %v238_v36 }
  0x34   : > { %241 = vst [vmem:[%s3681_s7 + $0x94] sm:$0xf] %v240_v37  ;;  %v242_v38 = vld [vmem:[%s3677_s6 + $0x130] sm:$0xf]  ;;  %v244_v39 = vld [vmem:[%s3677_s6 + $0x138] sm:$0xf] }
  0x35   : > { %v246_v40 = vld [vmem:[%s3677_s6 + $0x140] sm:$0xf]  ;;  %243 = vst [vmem:[%s3681_s7 + $0x98] sm:$0xf] %v242_v38  ;;  %245 = vst [vmem:[%s3681_s7 + $0x9c] sm:$0xf] %v244_v39 }
  0x36   : > { %247 = vst [vmem:[%s3681_s7 + $0xa0] sm:$0xf] %v246_v40  ;;  %v248_v41 = vld [vmem:[%s3677_s6 + $0x148] sm:$0xf]  ;;  %v250_v42 = vld [vmem:[%s3677_s6 + $0x150] sm:$0xf] }
  0x37   : > { %v252_v43 = vld [vmem:[%s3677_s6 + $0x158] sm:$0xf]  ;;  %249 = vst [vmem:[%s3681_s7 + $0xa4] sm:$0xf] %v248_v41  ;;  %251 = vst [vmem:[%s3681_s7 + $0xa8] sm:$0xf] %v250_v42 }
  0x38   : > { %253 = vst [vmem:[%s3681_s7 + $0xac] sm:$0xf] %v252_v43  ;;  %v254_v44 = vld [vmem:[%s3677_s6 + $0x160] sm:$0xf]  ;;  %v256_v45 = vld [vmem:[%s3677_s6 + $0x168] sm:$0xf] }
  0x39   : > { %v258_v46 = vld [vmem:[%s3677_s6 + $0x170] sm:$0xf]  ;;  %255 = vst [vmem:[%s3681_s7 + $0xb0] sm:$0xf] %v254_v44  ;;  %257 = vst [vmem:[%s3681_s7 + $0xb4] sm:$0xf] %v256_v45 }
  0x3a   : > { %259 = vst [vmem:[%s3681_s7 + $0xb8] sm:$0xf] %v258_v46  ;;  %v260_v47 = vld [vmem:[%s3677_s6 + $0x178] sm:$0xf]  ;;  %v262_v48 = vld [vmem:[%s3677_s6 + $0x180] sm:$0xf] }
  0x3b   : > { %v264_v49 = vld [vmem:[%s3677_s6 + $0x188] sm:$0xf]  ;;  %261 = vst [vmem:[%s3681_s7 + $0xbc] sm:$0xf] %v260_v47  ;;  %263 = vst [vmem:[%s3681_s7 + $0xc0] sm:$0xf] %v262_v48 }
  0x3c   : > { %265 = vst [vmem:[%s3681_s7 + $0xc4] sm:$0xf] %v264_v49  ;;  %v266_v50 = vld [vmem:[%s3677_s6 + $0x190] sm:$0xf]  ;;  %v268_v51 = vld [vmem:[%s3677_s6 + $0x198] sm:$0xf] }
  0x3d   : > { %v270_v52 = vld [vmem:[%s3677_s6 + $0x1a0] sm:$0xf]  ;;  %267 = vst [vmem:[%s3681_s7 + $0xc8] sm:$0xf] %v266_v50  ;;  %269 = vst [vmem:[%s3681_s7 + $0xcc] sm:$0xf] %v268_v51 }
  0x3e   : > { %271 = vst [vmem:[%s3681_s7 + $0xd0] sm:$0xf] %v270_v52  ;;  %v272_v53 = vld [vmem:[%s3677_s6 + $0x1a8] sm:$0xf]  ;;  %v274_v54 = vld [vmem:[%s3677_s6 + $0x1b0] sm:$0xf] }
  0x3f   : > { %v276_v55 = vld [vmem:[%s3677_s6 + $0x1b8] sm:$0xf]  ;;  %273 = vst [vmem:[%s3681_s7 + $0xd4] sm:$0xf] %v272_v53  ;;  %275 = vst [vmem:[%s3681_s7 + $0xd8] sm:$0xf] %v274_v54 }
  0x40   : > { %277 = vst [vmem:[%s3681_s7 + $0xdc] sm:$0xf] %v276_v55  ;;  %v278_v56 = vld [vmem:[%s3677_s6 + $0x1c0] sm:$0xf]  ;;  %v280_v57 = vld [vmem:[%s3677_s6 + $0x1c8] sm:$0xf] }
  0x41   : > { %v282_v58 = vld [vmem:[%s3677_s6 + $0x1d0] sm:$0xf]  ;;  %279 = vst [vmem:[%s3681_s7 + $0xe0] sm:$0xf] %v278_v56  ;;  %281 = vst [vmem:[%s3681_s7 + $0xe4] sm:$0xf] %v280_v57 }
  0x42   : > { %283 = vst [vmem:[%s3681_s7 + $0xe8] sm:$0xf] %v282_v58  ;;  %v284_v59 = vld [vmem:[%s3677_s6 + $0x1d8] sm:$0xf]  ;;  %v286_v60 = vld [vmem:[%s3677_s6 + $0x1e0] sm:$0xf] }
  0x43   : > { %v288_v61 = vld [vmem:[%s3677_s6 + $0x1e8] sm:$0xf]  ;;  %285 = vst [vmem:[%s3681_s7 + $0xec] sm:$0xf] %v284_v59  ;;  %287 = vst [vmem:[%s3681_s7 + $0xf0] sm:$0xf] %v286_v60 }
  0x44   : > { %289 = vst [vmem:[%s3681_s7 + $0xf4] sm:$0xf] %v288_v61  ;;  %v290_v62 = vld [vmem:[%s3677_s6 + $0x1f0] sm:$0xf]  ;;  %v292_v63 = vld [vmem:[%s3677_s6 + $0x1f8] sm:$0xf] }
  0x45   : > { %v294_v0 = vld [vmem:[%s3677_s6 + $0x200] sm:$0xf]  ;;  %291 = vst [vmem:[%s3681_s7 + $0xf8] sm:$0xf] %v290_v62  ;;  %293 = vst [vmem:[%s3681_s7 + $0xfc] sm:$0xf] %v292_v63 }
  0x46   : > { %295 = vst [vmem:[%s3681_s7 + $0x100] sm:$0xf] %v294_v0  ;;  %v296_v1 = vld [vmem:[%s3677_s6 + $0x208] sm:$0xf]  ;;  %v298_v2 = vld [vmem:[%s3677_s6 + $0x210] sm:$0xf] }
  0x47   : > { %v300_v3 = vld [vmem:[%s3677_s6 + $0x218] sm:$0xf]  ;;  %297 = vst [vmem:[%s3681_s7 + $0x104] sm:$0xf] %v296_v1  ;;  %299 = vst [vmem:[%s3681_s7 + $0x108] sm:$0xf] %v298_v2 }
  0x48   : > { %301 = vst [vmem:[%s3681_s7 + $0x10c] sm:$0xf] %v300_v3  ;;  %v302_v4 = vld [vmem:[%s3677_s6 + $0x220] sm:$0xf]  ;;  %v304_v5 = vld [vmem:[%s3677_s6 + $0x228] sm:$0xf] }
  0x49   : > { %v306_v6 = vld [vmem:[%s3677_s6 + $0x230] sm:$0xf]  ;;  %303 = vst [vmem:[%s3681_s7 + $0x110] sm:$0xf] %v302_v4  ;;  %305 = vst [vmem:[%s3681_s7 + $0x114] sm:$0xf] %v304_v5 }
  0x4a   : > { %307 = vst [vmem:[%s3681_s7 + $0x118] sm:$0xf] %v306_v6  ;;  %v308_v7 = vld [vmem:[%s3677_s6 + $0x238] sm:$0xf]  ;;  %v310_v8 = vld [vmem:[%s3677_s6 + $0x240] sm:$0xf] }
  0x4b   : > { %v312_v9 = vld [vmem:[%s3677_s6 + $0x248] sm:$0xf]  ;;  %309 = vst [vmem:[%s3681_s7 + $0x11c] sm:$0xf] %v308_v7  ;;  %311 = vst [vmem:[%s3681_s7 + $0x120] sm:$0xf] %v310_v8 }
  0x4c   : > { %313 = vst [vmem:[%s3681_s7 + $0x124] sm:$0xf] %v312_v9  ;;  %v314_v10 = vld [vmem:[%s3677_s6 + $0x250] sm:$0xf]  ;;  %v316_v11 = vld [vmem:[%s3677_s6 + $0x258] sm:$0xf] }
  0x4d   : > { %v318_v12 = vld [vmem:[%s3677_s6 + $0x260] sm:$0xf]  ;;  %315 = vst [vmem:[%s3681_s7 + $0x128] sm:$0xf] %v314_v10  ;;  %317 = vst [vmem:[%s3681_s7 + $0x12c] sm:$0xf] %v316_v11 }
  0x4e   : > { %319 = vst [vmem:[%s3681_s7 + $0x130] sm:$0xf] %v318_v12  ;;  %v320_v13 = vld [vmem:[%s3677_s6 + $0x268] sm:$0xf]  ;;  %v322_v14 = vld [vmem:[%s3677_s6 + $0x270] sm:$0xf] }
  0x4f   : > { %v324_v15 = vld [vmem:[%s3677_s6 + $0x278] sm:$0xf]  ;;  %321 = vst [vmem:[%s3681_s7 + $0x134] sm:$0xf] %v320_v13  ;;  %323 = vst [vmem:[%s3681_s7 + $0x138] sm:$0xf] %v322_v14 }
  0x50   : > { %325 = vst [vmem:[%s3681_s7 + $0x13c] sm:$0xf] %v324_v15  ;;  %v326_v16 = vld [vmem:[%s3677_s6 + $0x280] sm:$0xf]  ;;  %v328_v17 = vld [vmem:[%s3677_s6 + $0x288] sm:$0xf] }
  0x51   : > { %v330_v18 = vld [vmem:[%s3677_s6 + $0x290] sm:$0xf]  ;;  %327 = vst [vmem:[%s3681_s7 + $0x140] sm:$0xf] %v326_v16  ;;  %329 = vst [vmem:[%s3681_s7 + $0x144] sm:$0xf] %v328_v17 }
  0x52   : > { %331 = vst [vmem:[%s3681_s7 + $0x148] sm:$0xf] %v330_v18  ;;  %v332_v19 = vld [vmem:[%s3677_s6 + $0x298] sm:$0xf]  ;;  %v334_v20 = vld [vmem:[%s3677_s6 + $0x2a0] sm:$0xf] }
  0x53   : > { %v336_v21 = vld [vmem:[%s3677_s6 + $0x2a8] sm:$0xf]  ;;  %333 = vst [vmem:[%s3681_s7 + $0x14c] sm:$0xf] %v332_v19  ;;  %335 = vst [vmem:[%s3681_s7 + $0x150] sm:$0xf] %v334_v20 }
  0x54   : > { %337 = vst [vmem:[%s3681_s7 + $0x154] sm:$0xf] %v336_v21  ;;  %v338_v22 = vld [vmem:[%s3677_s6 + $0x2b0] sm:$0xf]  ;;  %v340_v23 = vld [vmem:[%s3677_s6 + $0x2b8] sm:$0xf] }
  0x55   : > { %v342_v24 = vld [vmem:[%s3677_s6 + $0x2c0] sm:$0xf]  ;;  %339 = vst [vmem:[%s3681_s7 + $0x158] sm:$0xf] %v338_v22  ;;  %341 = vst [vmem:[%s3681_s7 + $0x15c] sm:$0xf] %v340_v23 }
  0x56   : > { %343 = vst [vmem:[%s3681_s7 + $0x160] sm:$0xf] %v342_v24  ;;  %v344_v25 = vld [vmem:[%s3677_s6 + $0x2c8] sm:$0xf]  ;;  %v346_v26 = vld [vmem:[%s3677_s6 + $0x2d0] sm:$0xf] }
  0x57   : > { %v348_v27 = vld [vmem:[%s3677_s6 + $0x2d8] sm:$0xf]  ;;  %345 = vst [vmem:[%s3681_s7 + $0x164] sm:$0xf] %v344_v25  ;;  %347 = vst [vmem:[%s3681_s7 + $0x168] sm:$0xf] %v346_v26 }
  0x58   : > { %349 = vst [vmem:[%s3681_s7 + $0x16c] sm:$0xf] %v348_v27  ;;  %v350_v28 = vld [vmem:[%s3677_s6 + $0x2e0] sm:$0xf]  ;;  %v352_v29 = vld [vmem:[%s3677_s6 + $0x2e8] sm:$0xf] }
  0x59   : > { %v354_v30 = vld [vmem:[%s3677_s6 + $0x2f0] sm:$0xf]  ;;  %351 = vst [vmem:[%s3681_s7 + $0x170] sm:$0xf] %v350_v28  ;;  %353 = vst [vmem:[%s3681_s7 + $0x174] sm:$0xf] %v352_v29 }
  0x5a   : > { %355 = vst [vmem:[%s3681_s7 + $0x178] sm:$0xf] %v354_v30  ;;  %v356_v31 = vld [vmem:[%s3677_s6 + $0x2f8] sm:$0xf]  ;;  %v358_v32 = vld [vmem:[%s3677_s6 + $0x300] sm:$0xf] }
  0x5b   : > { %v360_v33 = vld [vmem:[%s3677_s6 + $0x308] sm:$0xf]  ;;  %357 = vst [vmem:[%s3681_s7 + $0x17c] sm:$0xf] %v356_v31  ;;  %359 = vst [vmem:[%s3681_s7 + $0x180] sm:$0xf] %v358_v32 }
  0x5c   : > { %361 = vst [vmem:[%s3681_s7 + $0x184] sm:$0xf] %v360_v33  ;;  %v362_v34 = vld [vmem:[%s3677_s6 + $0x310] sm:$0xf]  ;;  %v364_v35 = vld [vmem:[%s3677_s6 + $0x318] sm:$0xf] }
  0x5d   : > { %v366_v36 = vld [vmem:[%s3677_s6 + $0x320] sm:$0xf]  ;;  %363 = vst [vmem:[%s3681_s7 + $0x188] sm:$0xf] %v362_v34  ;;  %365 = vst [vmem:[%s3681_s7 + $0x18c] sm:$0xf] %v364_v35 }
  0x5e   : > { %367 = vst [vmem:[%s3681_s7 + $0x190] sm:$0xf] %v366_v36  ;;  %v368_v37 = vld [vmem:[%s3677_s6 + $0x328] sm:$0xf]  ;;  %v370_v38 = vld [vmem:[%s3677_s6 + $0x330] sm:$0xf] }
  0x5f   : > { %v372_v39 = vld [vmem:[%s3677_s6 + $0x338] sm:$0xf]  ;;  %369 = vst [vmem:[%s3681_s7 + $0x194] sm:$0xf] %v368_v37  ;;  %371 = vst [vmem:[%s3681_s7 + $0x198] sm:$0xf] %v370_v38 }
  0x60   : > { %373 = vst [vmem:[%s3681_s7 + $0x19c] sm:$0xf] %v372_v39  ;;  %v374_v40 = vld [vmem:[%s3677_s6 + $0x340] sm:$0xf]  ;;  %v376_v41 = vld [vmem:[%s3677_s6 + $0x348] sm:$0xf] }
  0x61   : > { %v378_v42 = vld [vmem:[%s3677_s6 + $0x350] sm:$0xf]  ;;  %375 = vst [vmem:[%s3681_s7 + $0x1a0] sm:$0xf] %v374_v40  ;;  %377 = vst [vmem:[%s3681_s7 + $0x1a4] sm:$0xf] %v376_v41 }
  0x62   : > { %379 = vst [vmem:[%s3681_s7 + $0x1a8] sm:$0xf] %v378_v42  ;;  %v380_v43 = vld [vmem:[%s3677_s6 + $0x358] sm:$0xf]  ;;  %v382_v44 = vld [vmem:[%s3677_s6 + $0x360] sm:$0xf] }
  0x63   : > { %v384_v45 = vld [vmem:[%s3677_s6 + $0x368] sm:$0xf]  ;;  %381 = vst [vmem:[%s3681_s7 + $0x1ac] sm:$0xf] %v380_v43  ;;  %383 = vst [vmem:[%s3681_s7 + $0x1b0] sm:$0xf] %v382_v44 }
  0x64   : > { %385 = vst [vmem:[%s3681_s7 + $0x1b4] sm:$0xf] %v384_v45  ;;  %v386_v46 = vld [vmem:[%s3677_s6 + $0x370] sm:$0xf]  ;;  %v388_v47 = vld [vmem:[%s3677_s6 + $0x378] sm:$0xf] }
  0x65   : > { %v390_v48 = vld [vmem:[%s3677_s6 + $0x380] sm:$0xf]  ;;  %387 = vst [vmem:[%s3681_s7 + $0x1b8] sm:$0xf] %v386_v46  ;;  %389 = vst [vmem:[%s3681_s7 + $0x1bc] sm:$0xf] %v388_v47 }
  0x66   : > { %391 = vst [vmem:[%s3681_s7 + $0x1c0] sm:$0xf] %v390_v48  ;;  %v392_v49 = vld [vmem:[%s3677_s6 + $0x388] sm:$0xf]  ;;  %v394_v50 = vld [vmem:[%s3677_s6 + $0x390] sm:$0xf] }
  0x67   : > { %v396_v51 = vld [vmem:[%s3677_s6 + $0x398] sm:$0xf]  ;;  %393 = vst [vmem:[%s3681_s7 + $0x1c4] sm:$0xf] %v392_v49  ;;  %395 = vst [vmem:[%s3681_s7 + $0x1c8] sm:$0xf] %v394_v50 }
  0x68   : > { %397 = vst [vmem:[%s3681_s7 + $0x1cc] sm:$0xf] %v396_v51  ;;  %v398_v52 = vld [vmem:[%s3677_s6 + $0x3a0] sm:$0xf]  ;;  %v400_v53 = vld [vmem:[%s3677_s6 + $0x3a8] sm:$0xf] }
  0x69   : > { %v402_v54 = vld [vmem:[%s3677_s6 + $0x3b0] sm:$0xf]  ;;  %399 = vst [vmem:[%s3681_s7 + $0x1d0] sm:$0xf] %v398_v52  ;;  %401 = vst [vmem:[%s3681_s7 + $0x1d4] sm:$0xf] %v400_v53 }
  0x6a   : > { %403 = vst [vmem:[%s3681_s7 + $0x1d8] sm:$0xf] %v402_v54  ;;  %v404_v55 = vld [vmem:[%s3677_s6 + $0x3b8] sm:$0xf]  ;;  %v406_v56 = vld [vmem:[%s3677_s6 + $0x3c0] sm:$0xf] }
  0x6b   : > { %v408_v57 = vld [vmem:[%s3677_s6 + $0x3c8] sm:$0xf]  ;;  %405 = vst [vmem:[%s3681_s7 + $0x1dc] sm:$0xf] %v404_v55  ;;  %407 = vst [vmem:[%s3681_s7 + $0x1e0] sm:$0xf] %v406_v56 }
  0x6c   : > { %409 = vst [vmem:[%s3681_s7 + $0x1e4] sm:$0xf] %v408_v57  ;;  %v410_v58 = vld [vmem:[%s3677_s6 + $0x3d0] sm:$0xf]  ;;  %v412_v59 = vld [vmem:[%s3677_s6 + $0x3d8] sm:$0xf] }
  0x6d   : > { %v414_v60 = vld [vmem:[%s3677_s6 + $0x3e0] sm:$0xf]  ;;  %411 = vst [vmem:[%s3681_s7 + $0x1e8] sm:$0xf] %v410_v58  ;;  %413 = vst [vmem:[%s3681_s7 + $0x1ec] sm:$0xf] %v412_v59 }
  0x6e   : > { %415 = vst [vmem:[%s3681_s7 + $0x1f0] sm:$0xf] %v414_v60  ;;  %v416_v61 = vld [vmem:[%s3677_s6 + $0x3e8] sm:$0xf]  ;;  %v418_v62 = vld [vmem:[%s3677_s6 + $0x3f0] sm:$0xf] }
  0x6f   : > { %v420_v63 = vld [vmem:[%s3677_s6 + $0x3f8] sm:$0xf]  ;;  %417 = vst [vmem:[%s3681_s7 + $0x1f4] sm:$0xf] %v416_v61  ;;  %419 = vst [vmem:[%s3681_s7 + $0x1f8] sm:$0xf] %v418_v62 }
  0x70   : > { %421 = vst [vmem:[%s3681_s7 + $0x1fc] sm:$0xf] %v420_v63  ;;  %v422_v0 = vld [vmem:[%s3677_s6 + $0x400] sm:$0xf]  ;;  %v424_v1 = vld [vmem:[%s3677_s6 + $0x408] sm:$0xf] }
  0x71   : > { %v426_v2 = vld [vmem:[%s3677_s6 + $0x410] sm:$0xf]  ;;  %423 = vst [vmem:[%s3681_s7 + $0x200] sm:$0xf] %v422_v0  ;;  %425 = vst [vmem:[%s3681_s7 + $0x204] sm:$0xf] %v424_v1 }
  0x72   : > { %427 = vst [vmem:[%s3681_s7 + $0x208] sm:$0xf] %v426_v2  ;;  %v428_v3 = vld [vmem:[%s3677_s6 + $0x418] sm:$0xf]  ;;  %v430_v4 = vld [vmem:[%s3677_s6 + $0x420] sm:$0xf] }
  0x73   : > { %v432_v5 = vld [vmem:[%s3677_s6 + $0x428] sm:$0xf]  ;;  %429 = vst [vmem:[%s3681_s7 + $0x20c] sm:$0xf] %v428_v3  ;;  %431 = vst [vmem:[%s3681_s7 + $0x210] sm:$0xf] %v430_v4 }
  0x74   : > { %433 = vst [vmem:[%s3681_s7 + $0x214] sm:$0xf] %v432_v5  ;;  %v434_v6 = vld [vmem:[%s3677_s6 + $0x430] sm:$0xf]  ;;  %v436_v7 = vld [vmem:[%s3677_s6 + $0x438] sm:$0xf] }
  0x75   : > { %v438_v8 = vld [vmem:[%s3677_s6 + $0x440] sm:$0xf]  ;;  %435 = vst [vmem:[%s3681_s7 + $0x218] sm:$0xf] %v434_v6  ;;  %437 = vst [vmem:[%s3681_s7 + $0x21c] sm:$0xf] %v436_v7 }
  0x76   : > { %439 = vst [vmem:[%s3681_s7 + $0x220] sm:$0xf] %v438_v8  ;;  %v440_v9 = vld [vmem:[%s3677_s6 + $0x448] sm:$0xf]  ;;  %v442_v10 = vld [vmem:[%s3677_s6 + $0x450] sm:$0xf] }
  0x77   : > { %v444_v11 = vld [vmem:[%s3677_s6 + $0x458] sm:$0xf]  ;;  %441 = vst [vmem:[%s3681_s7 + $0x224] sm:$0xf] %v440_v9  ;;  %443 = vst [vmem:[%s3681_s7 + $0x228] sm:$0xf] %v442_v10 }
  0x78   : > { %445 = vst [vmem:[%s3681_s7 + $0x22c] sm:$0xf] %v444_v11  ;;  %v446_v12 = vld [vmem:[%s3677_s6 + $0x460] sm:$0xf]  ;;  %v448_v13 = vld [vmem:[%s3677_s6 + $0x468] sm:$0xf] }
  0x79   : > { %v450_v14 = vld [vmem:[%s3677_s6 + $0x470] sm:$0xf]  ;;  %447 = vst [vmem:[%s3681_s7 + $0x230] sm:$0xf] %v446_v12  ;;  %449 = vst [vmem:[%s3681_s7 + $0x234] sm:$0xf] %v448_v13 }
  0x7a   : > { %451 = vst [vmem:[%s3681_s7 + $0x238] sm:$0xf] %v450_v14  ;;  %v452_v15 = vld [vmem:[%s3677_s6 + $0x478] sm:$0xf]  ;;  %v454_v16 = vld [vmem:[%s3677_s6 + $0x480] sm:$0xf] }
  0x7b   : > { %v456_v17 = vld [vmem:[%s3677_s6 + $0x488] sm:$0xf]  ;;  %453 = vst [vmem:[%s3681_s7 + $0x23c] sm:$0xf] %v452_v15  ;;  %455 = vst [vmem:[%s3681_s7 + $0x240] sm:$0xf] %v454_v16 }
  0x7c   : > { %457 = vst [vmem:[%s3681_s7 + $0x244] sm:$0xf] %v456_v17  ;;  %v458_v18 = vld [vmem:[%s3677_s6 + $0x490] sm:$0xf]  ;;  %v460_v19 = vld [vmem:[%s3677_s6 + $0x498] sm:$0xf] }
  0x7d   : > { %v462_v20 = vld [vmem:[%s3677_s6 + $0x4a0] sm:$0xf]  ;;  %459 = vst [vmem:[%s3681_s7 + $0x248] sm:$0xf] %v458_v18  ;;  %461 = vst [vmem:[%s3681_s7 + $0x24c] sm:$0xf] %v460_v19 }
  0x7e   : > { %463 = vst [vmem:[%s3681_s7 + $0x250] sm:$0xf] %v462_v20  ;;  %v464_v21 = vld [vmem:[%s3677_s6 + $0x4a8] sm:$0xf]  ;;  %v466_v22 = vld [vmem:[%s3677_s6 + $0x4b0] sm:$0xf] }
  0x7f   : > { %v468_v23 = vld [vmem:[%s3677_s6 + $0x4b8] sm:$0xf]  ;;  %465 = vst [vmem:[%s3681_s7 + $0x254] sm:$0xf] %v464_v21  ;;  %467 = vst [vmem:[%s3681_s7 + $0x258] sm:$0xf] %v466_v22 }
  0x80   : > { %469 = vst [vmem:[%s3681_s7 + $0x25c] sm:$0xf] %v468_v23  ;;  %v470_v24 = vld [vmem:[%s3677_s6 + $0x4c0] sm:$0xf]  ;;  %v472_v25 = vld [vmem:[%s3677_s6 + $0x4c8] sm:$0xf] }
  0x81   : > { %v474_v26 = vld [vmem:[%s3677_s6 + $0x4d0] sm:$0xf]  ;;  %471 = vst [vmem:[%s3681_s7 + $0x260] sm:$0xf] %v470_v24  ;;  %473 = vst [vmem:[%s3681_s7 + $0x264] sm:$0xf] %v472_v25 }
  0x82   : > { %475 = vst [vmem:[%s3681_s7 + $0x268] sm:$0xf] %v474_v26  ;;  %v476_v27 = vld [vmem:[%s3677_s6 + $0x4d8] sm:$0xf]  ;;  %v478_v28 = vld [vmem:[%s3677_s6 + $0x4e0] sm:$0xf] }
  0x83   : > { %v480_v29 = vld [vmem:[%s3677_s6 + $0x4e8] sm:$0xf]  ;;  %477 = vst [vmem:[%s3681_s7 + $0x26c] sm:$0xf] %v476_v27  ;;  %479 = vst [vmem:[%s3681_s7 + $0x270] sm:$0xf] %v478_v28 }
  0x84   : > { %481 = vst [vmem:[%s3681_s7 + $0x274] sm:$0xf] %v480_v29  ;;  %v482_v30 = vld [vmem:[%s3677_s6 + $0x4f0] sm:$0xf]  ;;  %v484_v31 = vld [vmem:[%s3677_s6 + $0x4f8] sm:$0xf] }
  0x85   : > { %v486_v32 = vld [vmem:[%s3677_s6 + $0x500] sm:$0xf]  ;;  %483 = vst [vmem:[%s3681_s7 + $0x278] sm:$0xf] %v482_v30  ;;  %485 = vst [vmem:[%s3681_s7 + $0x27c] sm:$0xf] %v484_v31 }
  0x86   : > { %487 = vst [vmem:[%s3681_s7 + $0x280] sm:$0xf] %v486_v32  ;;  %v488_v33 = vld [vmem:[%s3677_s6 + $0x508] sm:$0xf]  ;;  %v490_v34 = vld [vmem:[%s3677_s6 + $0x510] sm:$0xf] }
  0x87   : > { %v492_v35 = vld [vmem:[%s3677_s6 + $0x518] sm:$0xf]  ;;  %489 = vst [vmem:[%s3681_s7 + $0x284] sm:$0xf] %v488_v33  ;;  %491 = vst [vmem:[%s3681_s7 + $0x288] sm:$0xf] %v490_v34 }
  0x88   : > { %493 = vst [vmem:[%s3681_s7 + $0x28c] sm:$0xf] %v492_v35  ;;  %v494_v36 = vld [vmem:[%s3677_s6 + $0x520] sm:$0xf]  ;;  %v496_v37 = vld [vmem:[%s3677_s6 + $0x528] sm:$0xf] }
  0x89   : > { %v498_v38 = vld [vmem:[%s3677_s6 + $0x530] sm:$0xf]  ;;  %495 = vst [vmem:[%s3681_s7 + $0x290] sm:$0xf] %v494_v36  ;;  %497 = vst [vmem:[%s3681_s7 + $0x294] sm:$0xf] %v496_v37 }
  0x8a   : > { %499 = vst [vmem:[%s3681_s7 + $0x298] sm:$0xf] %v498_v38  ;;  %v500_v39 = vld [vmem:[%s3677_s6 + $0x538] sm:$0xf]  ;;  %v502_v40 = vld [vmem:[%s3677_s6 + $0x540] sm:$0xf] }
  0x8b   : > { %v504_v41 = vld [vmem:[%s3677_s6 + $0x548] sm:$0xf]  ;;  %501 = vst [vmem:[%s3681_s7 + $0x29c] sm:$0xf] %v500_v39  ;;  %503 = vst [vmem:[%s3681_s7 + $0x2a0] sm:$0xf] %v502_v40 }
  0x8c   : > { %505 = vst [vmem:[%s3681_s7 + $0x2a4] sm:$0xf] %v504_v41  ;;  %v506_v42 = vld [vmem:[%s3677_s6 + $0x550] sm:$0xf]  ;;  %v508_v43 = vld [vmem:[%s3677_s6 + $0x558] sm:$0xf] }
  0x8d   : > { %v510_v44 = vld [vmem:[%s3677_s6 + $0x560] sm:$0xf]  ;;  %507 = vst [vmem:[%s3681_s7 + $0x2a8] sm:$0xf] %v506_v42  ;;  %509 = vst [vmem:[%s3681_s7 + $0x2ac] sm:$0xf] %v508_v43 }
  0x8e   : > { %511 = vst [vmem:[%s3681_s7 + $0x2b0] sm:$0xf] %v510_v44  ;;  %v512_v45 = vld [vmem:[%s3677_s6 + $0x568] sm:$0xf]  ;;  %v514_v46 = vld [vmem:[%s3677_s6 + $0x570] sm:$0xf] }
  0x8f   : > { %v516_v47 = vld [vmem:[%s3677_s6 + $0x578] sm:$0xf]  ;;  %513 = vst [vmem:[%s3681_s7 + $0x2b4] sm:$0xf] %v512_v45  ;;  %515 = vst [vmem:[%s3681_s7 + $0x2b8] sm:$0xf] %v514_v46 }
  0x90   : > { %517 = vst [vmem:[%s3681_s7 + $0x2bc] sm:$0xf] %v516_v47  ;;  %v518_v48 = vld [vmem:[%s3677_s6 + $0x580] sm:$0xf]  ;;  %v520_v49 = vld [vmem:[%s3677_s6 + $0x588] sm:$0xf] }
  0x91   : > { %v522_v50 = vld [vmem:[%s3677_s6 + $0x590] sm:$0xf]  ;;  %519 = vst [vmem:[%s3681_s7 + $0x2c0] sm:$0xf] %v518_v48  ;;  %521 = vst [vmem:[%s3681_s7 + $0x2c4] sm:$0xf] %v520_v49 }
  0x92   : > { %523 = vst [vmem:[%s3681_s7 + $0x2c8] sm:$0xf] %v522_v50  ;;  %v524_v51 = vld [vmem:[%s3677_s6 + $0x598] sm:$0xf]  ;;  %v526_v52 = vld [vmem:[%s3677_s6 + $0x5a0] sm:$0xf] }
  0x93   : > { %v528_v53 = vld [vmem:[%s3677_s6 + $0x5a8] sm:$0xf]  ;;  %525 = vst [vmem:[%s3681_s7 + $0x2cc] sm:$0xf] %v524_v51  ;;  %527 = vst [vmem:[%s3681_s7 + $0x2d0] sm:$0xf] %v526_v52 }
  0x94   : > { %529 = vst [vmem:[%s3681_s7 + $0x2d4] sm:$0xf] %v528_v53  ;;  %v530_v54 = vld [vmem:[%s3677_s6 + $0x5b0] sm:$0xf]  ;;  %v532_v55 = vld [vmem:[%s3677_s6 + $0x5b8] sm:$0xf] }
  0x95   : > { %v534_v56 = vld [vmem:[%s3677_s6 + $0x5c0] sm:$0xf]  ;;  %531 = vst [vmem:[%s3681_s7 + $0x2d8] sm:$0xf] %v530_v54  ;;  %533 = vst [vmem:[%s3681_s7 + $0x2dc] sm:$0xf] %v532_v55 }
  0x96   : > { %535 = vst [vmem:[%s3681_s7 + $0x2e0] sm:$0xf] %v534_v56  ;;  %v536_v57 = vld [vmem:[%s3677_s6 + $0x5c8] sm:$0xf]  ;;  %v538_v58 = vld [vmem:[%s3677_s6 + $0x5d0] sm:$0xf] }
  0x97   : > { %v540_v59 = vld [vmem:[%s3677_s6 + $0x5d8] sm:$0xf]  ;;  %537 = vst [vmem:[%s3681_s7 + $0x2e4] sm:$0xf] %v536_v57  ;;  %539 = vst [vmem:[%s3681_s7 + $0x2e8] sm:$0xf] %v538_v58 }
  0x98   : > { %541 = vst [vmem:[%s3681_s7 + $0x2ec] sm:$0xf] %v540_v59  ;;  %v542_v60 = vld [vmem:[%s3677_s6 + $0x5e0] sm:$0xf]  ;;  %v544_v61 = vld [vmem:[%s3677_s6 + $0x5e8] sm:$0xf] }
  0x99   : > { %v546_v62 = vld [vmem:[%s3677_s6 + $0x5f0] sm:$0xf]  ;;  %543 = vst [vmem:[%s3681_s7 + $0x2f0] sm:$0xf] %v542_v60  ;;  %545 = vst [vmem:[%s3681_s7 + $0x2f4] sm:$0xf] %v544_v61 }
  0x9a   : > { %547 = vst [vmem:[%s3681_s7 + $0x2f8] sm:$0xf] %v546_v62  ;;  %v548_v63 = vld [vmem:[%s3677_s6 + $0x5f8] sm:$0xf]  ;;  %v550_v0 = vld [vmem:[%s3677_s6 + $0x600] sm:$0xf] }
  0x9b   : > { %v552_v1 = vld [vmem:[%s3677_s6 + $0x608] sm:$0xf]  ;;  %549 = vst [vmem:[%s3681_s7 + $0x2fc] sm:$0xf] %v548_v63  ;;  %551 = vst [vmem:[%s3681_s7 + $0x300] sm:$0xf] %v550_v0 }
  0x9c   : > { %553 = vst [vmem:[%s3681_s7 + $0x304] sm:$0xf] %v552_v1  ;;  %v554_v2 = vld [vmem:[%s3677_s6 + $0x610] sm:$0xf]  ;;  %v556_v3 = vld [vmem:[%s3677_s6 + $0x618] sm:$0xf] }
  0x9d   : > { %v558_v4 = vld [vmem:[%s3677_s6 + $0x620] sm:$0xf]  ;;  %555 = vst [vmem:[%s3681_s7 + $0x308] sm:$0xf] %v554_v2  ;;  %557 = vst [vmem:[%s3681_s7 + $0x30c] sm:$0xf] %v556_v3 }
  0x9e   : > { %559 = vst [vmem:[%s3681_s7 + $0x310] sm:$0xf] %v558_v4  ;;  %v560_v5 = vld [vmem:[%s3677_s6 + $0x628] sm:$0xf]  ;;  %v562_v6 = vld [vmem:[%s3677_s6 + $0x630] sm:$0xf] }
  0x9f   : > { %v564_v7 = vld [vmem:[%s3677_s6 + $0x638] sm:$0xf]  ;;  %561 = vst [vmem:[%s3681_s7 + $0x314] sm:$0xf] %v560_v5  ;;  %563 = vst [vmem:[%s3681_s7 + $0x318] sm:$0xf] %v562_v6 }
  0xa0   : > { %565 = vst [vmem:[%s3681_s7 + $0x31c] sm:$0xf] %v564_v7  ;;  %v566_v8 = vld [vmem:[%s3677_s6 + $0x640] sm:$0xf]  ;;  %v568_v9 = vld [vmem:[%s3677_s6 + $0x648] sm:$0xf] }
  0xa1   : > { %v570_v10 = vld [vmem:[%s3677_s6 + $0x650] sm:$0xf]  ;;  %567 = vst [vmem:[%s3681_s7 + $0x320] sm:$0xf] %v566_v8  ;;  %569 = vst [vmem:[%s3681_s7 + $0x324] sm:$0xf] %v568_v9 }
  0xa2   : > { %571 = vst [vmem:[%s3681_s7 + $0x328] sm:$0xf] %v570_v10  ;;  %v572_v11 = vld [vmem:[%s3677_s6 + $0x658] sm:$0xf]  ;;  %v574_v12 = vld [vmem:[%s3677_s6 + $0x660] sm:$0xf] }
  0xa3   : > { %v576_v13 = vld [vmem:[%s3677_s6 + $0x668] sm:$0xf]  ;;  %573 = vst [vmem:[%s3681_s7 + $0x32c] sm:$0xf] %v572_v11  ;;  %575 = vst [vmem:[%s3681_s7 + $0x330] sm:$0xf] %v574_v12 }
  0xa4   : > { %577 = vst [vmem:[%s3681_s7 + $0x334] sm:$0xf] %v576_v13  ;;  %v578_v14 = vld [vmem:[%s3677_s6 + $0x670] sm:$0xf]  ;;  %v580_v15 = vld [vmem:[%s3677_s6 + $0x678] sm:$0xf] }
  0xa5   : > { %v582_v16 = vld [vmem:[%s3677_s6 + $0x680] sm:$0xf]  ;;  %579 = vst [vmem:[%s3681_s7 + $0x338] sm:$0xf] %v578_v14  ;;  %581 = vst [vmem:[%s3681_s7 + $0x33c] sm:$0xf] %v580_v15 }
  0xa6   : > { %583 = vst [vmem:[%s3681_s7 + $0x340] sm:$0xf] %v582_v16  ;;  %v584_v17 = vld [vmem:[%s3677_s6 + $0x688] sm:$0xf]  ;;  %v586_v18 = vld [vmem:[%s3677_s6 + $0x690] sm:$0xf] }
  0xa7   : > { %v588_v19 = vld [vmem:[%s3677_s6 + $0x698] sm:$0xf]  ;;  %585 = vst [vmem:[%s3681_s7 + $0x344] sm:$0xf] %v584_v17  ;;  %587 = vst [vmem:[%s3681_s7 + $0x348] sm:$0xf] %v586_v18 }
  0xa8   : > { %589 = vst [vmem:[%s3681_s7 + $0x34c] sm:$0xf] %v588_v19  ;;  %v590_v20 = vld [vmem:[%s3677_s6 + $0x6a0] sm:$0xf]  ;;  %v592_v21 = vld [vmem:[%s3677_s6 + $0x6a8] sm:$0xf] }
  0xa9   : > { %v594_v22 = vld [vmem:[%s3677_s6 + $0x6b0] sm:$0xf]  ;;  %591 = vst [vmem:[%s3681_s7 + $0x350] sm:$0xf] %v590_v20  ;;  %593 = vst [vmem:[%s3681_s7 + $0x354] sm:$0xf] %v592_v21 }
  0xaa   : > { %595 = vst [vmem:[%s3681_s7 + $0x358] sm:$0xf] %v594_v22  ;;  %v596_v23 = vld [vmem:[%s3677_s6 + $0x6b8] sm:$0xf]  ;;  %v598_v24 = vld [vmem:[%s3677_s6 + $0x6c0] sm:$0xf] }
  0xab   : > { %v600_v25 = vld [vmem:[%s3677_s6 + $0x6c8] sm:$0xf]  ;;  %597 = vst [vmem:[%s3681_s7 + $0x35c] sm:$0xf] %v596_v23  ;;  %599 = vst [vmem:[%s3681_s7 + $0x360] sm:$0xf] %v598_v24 }
  0xac   : > { %601 = vst [vmem:[%s3681_s7 + $0x364] sm:$0xf] %v600_v25  ;;  %v602_v26 = vld [vmem:[%s3677_s6 + $0x6d0] sm:$0xf]  ;;  %v604_v27 = vld [vmem:[%s3677_s6 + $0x6d8] sm:$0xf] }
  0xad   : > { %v606_v28 = vld [vmem:[%s3677_s6 + $0x6e0] sm:$0xf]  ;;  %603 = vst [vmem:[%s3681_s7 + $0x368] sm:$0xf] %v602_v26  ;;  %605 = vst [vmem:[%s3681_s7 + $0x36c] sm:$0xf] %v604_v27 }
  0xae   : > { %607 = vst [vmem:[%s3681_s7 + $0x370] sm:$0xf] %v606_v28  ;;  %v608_v29 = vld [vmem:[%s3677_s6 + $0x6e8] sm:$0xf]  ;;  %v610_v30 = vld [vmem:[%s3677_s6 + $0x6f0] sm:$0xf] }
  0xaf   : > { %v612_v31 = vld [vmem:[%s3677_s6 + $0x6f8] sm:$0xf]  ;;  %609 = vst [vmem:[%s3681_s7 + $0x374] sm:$0xf] %v608_v29  ;;  %611 = vst [vmem:[%s3681_s7 + $0x378] sm:$0xf] %v610_v30 }
  0xb0   : > { %613 = vst [vmem:[%s3681_s7 + $0x37c] sm:$0xf] %v612_v31  ;;  %v614_v32 = vld [vmem:[%s3677_s6 + $0x700] sm:$0xf]  ;;  %v616_v33 = vld [vmem:[%s3677_s6 + $0x708] sm:$0xf] }
  0xb1   : > { %v618_v34 = vld [vmem:[%s3677_s6 + $0x710] sm:$0xf]  ;;  %615 = vst [vmem:[%s3681_s7 + $0x380] sm:$0xf] %v614_v32  ;;  %617 = vst [vmem:[%s3681_s7 + $0x384] sm:$0xf] %v616_v33 }
  0xb2   : > { %619 = vst [vmem:[%s3681_s7 + $0x388] sm:$0xf] %v618_v34  ;;  %v620_v35 = vld [vmem:[%s3677_s6 + $0x718] sm:$0xf]  ;;  %v622_v36 = vld [vmem:[%s3677_s6 + $0x720] sm:$0xf] }
  0xb3   : > { %v624_v37 = vld [vmem:[%s3677_s6 + $0x728] sm:$0xf]  ;;  %621 = vst [vmem:[%s3681_s7 + $0x38c] sm:$0xf] %v620_v35  ;;  %623 = vst [vmem:[%s3681_s7 + $0x390] sm:$0xf] %v622_v36 }
  0xb4   : > { %625 = vst [vmem:[%s3681_s7 + $0x394] sm:$0xf] %v624_v37  ;;  %v626_v38 = vld [vmem:[%s3677_s6 + $0x730] sm:$0xf]  ;;  %v628_v39 = vld [vmem:[%s3677_s6 + $0x738] sm:$0xf] }
  0xb5   : > { %v630_v40 = vld [vmem:[%s3677_s6 + $0x740] sm:$0xf]  ;;  %627 = vst [vmem:[%s3681_s7 + $0x398] sm:$0xf] %v626_v38  ;;  %629 = vst [vmem:[%s3681_s7 + $0x39c] sm:$0xf] %v628_v39 }
  0xb6   : > { %631 = vst [vmem:[%s3681_s7 + $0x3a0] sm:$0xf] %v630_v40  ;;  %v632_v41 = vld [vmem:[%s3677_s6 + $0x748] sm:$0xf]  ;;  %v634_v42 = vld [vmem:[%s3677_s6 + $0x750] sm:$0xf] }
  0xb7   : > { %v636_v43 = vld [vmem:[%s3677_s6 + $0x758] sm:$0xf]  ;;  %633 = vst [vmem:[%s3681_s7 + $0x3a4] sm:$0xf] %v632_v41  ;;  %635 = vst [vmem:[%s3681_s7 + $0x3a8] sm:$0xf] %v634_v42 }
  0xb8   : > { %637 = vst [vmem:[%s3681_s7 + $0x3ac] sm:$0xf] %v636_v43  ;;  %v638_v44 = vld [vmem:[%s3677_s6 + $0x760] sm:$0xf]  ;;  %v640_v45 = vld [vmem:[%s3677_s6 + $0x768] sm:$0xf] }
  0xb9   : > { %v642_v46 = vld [vmem:[%s3677_s6 + $0x770] sm:$0xf]  ;;  %639 = vst [vmem:[%s3681_s7 + $0x3b0] sm:$0xf] %v638_v44  ;;  %641 = vst [vmem:[%s3681_s7 + $0x3b4] sm:$0xf] %v640_v45 }
  0xba   : > { %643 = vst [vmem:[%s3681_s7 + $0x3b8] sm:$0xf] %v642_v46  ;;  %v644_v47 = vld [vmem:[%s3677_s6 + $0x778] sm:$0xf]  ;;  %v646_v48 = vld [vmem:[%s3677_s6 + $0x780] sm:$0xf] }
  0xbb   : > { %v648_v49 = vld [vmem:[%s3677_s6 + $0x788] sm:$0xf]  ;;  %645 = vst [vmem:[%s3681_s7 + $0x3bc] sm:$0xf] %v644_v47  ;;  %647 = vst [vmem:[%s3681_s7 + $0x3c0] sm:$0xf] %v646_v48 }
  0xbc   : > { %649 = vst [vmem:[%s3681_s7 + $0x3c4] sm:$0xf] %v648_v49  ;;  %v650_v50 = vld [vmem:[%s3677_s6 + $0x790] sm:$0xf]  ;;  %v652_v51 = vld [vmem:[%s3677_s6 + $0x798] sm:$0xf] }
  0xbd   : > { %v654_v52 = vld [vmem:[%s3677_s6 + $0x7a0] sm:$0xf]  ;;  %651 = vst [vmem:[%s3681_s7 + $0x3c8] sm:$0xf] %v650_v50  ;;  %653 = vst [vmem:[%s3681_s7 + $0x3cc] sm:$0xf] %v652_v51 }
  0xbe   : > { %655 = vst [vmem:[%s3681_s7 + $0x3d0] sm:$0xf] %v654_v52  ;;  %v656_v53 = vld [vmem:[%s3677_s6 + $0x7a8] sm:$0xf]  ;;  %v658_v54 = vld [vmem:[%s3677_s6 + $0x7b0] sm:$0xf] }
  0xbf   : > { %v660_v55 = vld [vmem:[%s3677_s6 + $0x7b8] sm:$0xf]  ;;  %657 = vst [vmem:[%s3681_s7 + $0x3d4] sm:$0xf] %v656_v53  ;;  %659 = vst [vmem:[%s3681_s7 + $0x3d8] sm:$0xf] %v658_v54 }
  0xc0   : > { %661 = vst [vmem:[%s3681_s7 + $0x3dc] sm:$0xf] %v660_v55  ;;  %v662_v56 = vld [vmem:[%s3677_s6 + $0x7c0] sm:$0xf]  ;;  %v664_v57 = vld [vmem:[%s3677_s6 + $0x7c8] sm:$0xf] }
  0xc1   : > { %v666_v58 = vld [vmem:[%s3677_s6 + $0x7d0] sm:$0xf]  ;;  %663 = vst [vmem:[%s3681_s7 + $0x3e0] sm:$0xf] %v662_v56  ;;  %665 = vst [vmem:[%s3681_s7 + $0x3e4] sm:$0xf] %v664_v57 }
  0xc2   : > { %667 = vst [vmem:[%s3681_s7 + $0x3e8] sm:$0xf] %v666_v58  ;;  %v668_v59 = vld [vmem:[%s3677_s6 + $0x7d8] sm:$0xf]  ;;  %v670_v60 = vld [vmem:[%s3677_s6 + $0x7e0] sm:$0xf] }
  0xc3   : > { %v672_v61 = vld [vmem:[%s3677_s6 + $0x7e8] sm:$0xf]  ;;  %669 = vst [vmem:[%s3681_s7 + $0x3ec] sm:$0xf] %v668_v59  ;;  %671 = vst [vmem:[%s3681_s7 + $0x3f0] sm:$0xf] %v670_v60 }
  0xc4   : > { %673 = vst [vmem:[%s3681_s7 + $0x3f4] sm:$0xf] %v672_v61  ;;  %v674_v62 = vld [vmem:[%s3677_s6 + $0x7f0] sm:$0xf]  ;;  %v676_v63 = vld [vmem:[%s3677_s6 + $0x7f8] sm:$0xf] }
  0xc5   : > { %675 = vst [vmem:[%s3681_s7 + $0x3f8] sm:$0xf] %v674_v62  ;;  %677 = vst [vmem:[%s3681_s7 + $0x3fc] sm:$0xf] %v676_v63 }
  0xc6 PF: > { %p2953_p11 = scmp.ge.s32.totalorder %s3579_s17, 1  ;;  %p1211_p12 = scmp.lt.s32.totalorder %s3579_s17, 5 }
  0xc8   : > { %p1212_p13 = pnand %p2953_p11, %p1211_p12 }
  0xc9   : > { %s1218_s8 = sand.u32 (!%p1212_p13), 1, %s3555_s11   ;;  %p1249_p0 = scmp.lt.s32.totalorder (!%p1212_p13), %s3567_s14, 1 }
  0xca   : > { %1215 = sbr.rel (%p1212_p13) target bundleno = 618 (0x26a), region = 65  ;;  %s2954_s18 = sshll.u32 (!%p1212_p13), %s1218_s8, 10 }
  0xcb   : > { %s4196_s21 = scalar_lea.vmem (!%p1212_p13), [#allocation4], %s2954_s18  ;;  %s1245_s29 = sand.u32 (!%p1212_p13), 1, %s3547_s9  }
  0xcc   : > { %v3379_v0 = vld [vmem:[%s4196_s21 + $0x40] sm:$0xff] (!%p1212_p13)   ;;  %v3383_v4 = vld [vmem:[%s4196_s21 + $0x48] sm:$0xff] (!%p1212_p13)   ;;  %v3387_v8 = vld [vmem:[%s4196_s21 + $0x50] sm:$0xff] (!%p1212_p13)   ;;  %s2955_s30 = sshll.u32 (!%p1212_p13), %s1245_s29, 3 }
  0xcd   : > { %v3380_v1 = vld [vmem:[%s4196_s21 + $0xc0] sm:$0xff] (!%p1212_p13)   ;;  %3130 = vmatprep.subr.bf16.mxu0 (!%p1212_p13), %v3379_v0  ;;  %v3384_v5 = vld [vmem:[%s4196_s21 + $0xc8] sm:$0xff] (!%p1212_p13)   ;;  %v3388_v9 = vld [vmem:[%s4196_s21 + $0xd0] sm:$0xff] (!%p1212_p13)   ;;  %s1247_s3 = scalar_lea.vmem (!%p1212_p13), [#allocation5], %s2955_s30 }
  0xce   : > { %v3381_v2 = vld [vmem:[%s4196_s21] sm:$0xff] (!%p1212_p13)   ;;  %3152 = vmatprep.subr.bf16.mxu1 (!%p1212_p13), %v3380_v1  ;;  %v3385_v6 = vld [vmem:[%s4196_s21 + $0x8] sm:$0xff] (!%p1212_p13)   ;;  %v3389_v10 = vld [vmem:[%s4196_s21 + $0x10] sm:$0xff] (!%p1212_p13)  }
  0xcf   : > { %v3382_v3 = vld [vmem:[%s4196_s21 + $0x80] sm:$0xff] (!%p1212_p13)   ;;  %3131 = vmatpush3.bf16.msra.mxu0 (!%p1212_p13), %v3381_v2  ;;  %v3386_v7 = vld [vmem:[%s4196_s21 + $0x88] sm:$0xff] (!%p1212_p13)   ;;  %v3390_v11 = vld [vmem:[%s4196_s21 + $0x90] sm:$0xff] (!%p1212_p13)  }
  0xd0   : > { %3153 = vmatpush3.bf16.msra.mxu1 (!%p1212_p13), %v3382_v3  ;;  %3132 = vmatprep.subr.bf16.mxu0 (!%p1212_p13), %v3383_v4  ;;  %v3391_v12 = vld [vmem:[%s4196_s21 + $0x58] sm:$0xff] (!%p1212_p13)   ;;  %v3395_v16 = vld [vmem:[%s4196_s21 + $0x60] sm:$0xff] (!%p1212_p13)   ;;  %v3399_v20 = vld [vmem:[%s4196_s21 + $0x68] sm:$0xff] (!%p1212_p13)  }
  0xd1   : > { %3154 = vmatprep.subr.bf16.mxu1 %v3384_v5  ;;  %v3392_v13 = vld [vmem:[%s4196_s21 + $0xd8] sm:$0xff]   ;;  %v3396_v17 = vld [vmem:[%s4196_s21 + $0xe0] sm:$0xff]   ;;  %v3400_v21 = vld [vmem:[%s4196_s21 + $0xe8] sm:$0xff]   ;;  %s1250_s11 = scalar_select %p1249_p0, %s3567_s14, 1 }
  0xd2   : > { %v3393_v14 = vld [vmem:[%s4196_s21 + $0x18] sm:$0xff]   ;;  %v3397_v18 = vld [vmem:[%s4196_s21 + $0x20] sm:$0xff]   ;;  %v3401_v22 = vld [vmem:[%s4196_s21 + $0x28] sm:$0xff]   ;;  %s3107_s9 = sshll.u32 (%p3664_p9), %s3567_s14, 2 }
  0xd3   : > { %3133 = vmatpush3.bf16.msra.mxu0 %v3385_v6  ;;  %v3394_v15 = vld [vmem:[%s4196_s21 + $0x98] sm:$0xff]   ;;  %v3398_v19 = vld [vmem:[%s4196_s21 + $0xa0] sm:$0xff]   ;;  %v3402_v23 = vld [vmem:[%s4196_s21 + $0xa8] sm:$0xff]   ;;  %s3111_s22 = sshll.u32 %s1250_s11, 7  ;;  %s2805_s4 = sadd.s32 (%p3664_p9), %s3563_s13, %s3107_s9 }
  0xd4   : > { %3155 = vmatpush3.bf16.msra.mxu1 %v3386_v7  ;;  %3134 = vmatprep.subr.bf16.mxu0 %v3387_v8  ;;  %v3403_v24 = vld [vmem:[%s4196_s21 + $0x70] sm:$0xff]   ;;  %v3407_v28 = vld [vmem:[%s4196_s21 + $0x78] sm:$0xff]   ;;  %s4233_s26 = scalar_lea.vmem %s4384_s0, %s3111_s22  ;;  %v3411_v40 = vld [vmem:[%s4196_s21 + $0x140] sm:$0xff]   ;;  %s3108_s5 = sshll.u32 (%p3664_p9), %s2805_s4, 2 }
  0xd5   : > { %3156 = vmatprep.subr.bf16.mxu1 %v3388_v9  ;;  %v3404_v25 = vld [vmem:[%s4196_s21 + $0xf0] sm:$0xff]   ;;  %v3408_v29 = vld [vmem:[%s4196_s21 + $0xf8] sm:$0xff]   ;;  %v1267_v34 = vld [vmem:[%s4233_s26 + $0x8] sm:$0xff]  ;;  %s2807_s8 = scalar_lea.vmem (%p3664_p9), %s4386_s2, %s3108_s5 }
  0xd6   : > { %v3405_v26 = vld [vmem:[%s4196_s21 + $0x30] sm:$0xff]   ;;  %v3409_v30 = vld [vmem:[%s4196_s21 + $0x38] sm:$0xff]   ;;  %v1275_v37 = vld [vmem:[%s4233_s26 + $0x48] sm:$0xff] }
  0xd7   : > { %3135 = vmatpush3.bf16.msra.mxu0 %v3389_v10  ;;  %v3406_v27 = vld [vmem:[%s4196_s21 + $0xb0] sm:$0xff]   ;;  %v3410_v31 = vld [vmem:[%s4196_s21 + $0xb8] sm:$0xff]   ;;  %v2960_v38 = vcombine.low %v1267_v34, %v1275_v37  ;;  %v2961_v39 = vcombine.high %v1267_v34, %v1275_v37  ;;  %v3412_v41 = vld [vmem:[%s4196_s21 + $0x1c0] sm:$0xff]  }
  0xd8   : > { %3157 = vmatpush3.bf16.msra.mxu1 %v3390_v11  ;;  %3136 = vmatprep.subr.bf16.mxu0 %v3391_v12  ;;  %v1266_v32 = vld [vmem:[%s4233_s26] sm:$0xff]  ;;  %v3415_v44 = vld [vmem:[%s4196_s21 + $0x148] sm:$0xff]   ;;  %v3419_v48 = vld [vmem:[%s4196_s21 + $0x150] sm:$0xff]  }
  0xd9   : > { %3158 = vmatprep.subr.bf16.mxu1 %v3392_v13  ;;  %v1274_v33 = vld [vmem:[%s4233_s26 + $0x40] sm:$0xff]  ;;  %2459 = vmatprep.mubr.bf16.mxu1 %v2961_v39  ;;  %v3416_v45 = vld [vmem:[%s4196_s21 + $0x1c8] sm:$0xff]   ;;  %v3420_v49 = vld [vmem:[%s4196_s21 + $0x1d0] sm:$0xff]  }
  0xda   : > { %v2958_v35 = vcombine.low %v1266_v32, %v1274_v33  ;;  %v2959_v36 = vcombine.high %v1266_v32, %v1274_v33  ;;  %v3413_v42 = vld [vmem:[%s4196_s21 + $0x100] sm:$0xff]   ;;  %v3417_v46 = vld [vmem:[%s4196_s21 + $0x108] sm:$0xff]   ;;  %v3421_v50 = vld [vmem:[%s4196_s21 + $0x110] sm:$0xff]  }
  0xdb   : > { %3137 = vmatpush3.bf16.msra.mxu0 %v3393_v14  ;;  %v3414_v43 = vld [vmem:[%s4196_s21 + $0x180] sm:$0xff]   ;;  %v3418_v47 = vld [vmem:[%s4196_s21 + $0x188] sm:$0xff]   ;;  %v3422_v51 = vld [vmem:[%s4196_s21 + $0x190] sm:$0xff]  }
  0xdc   : > { %3159 = vmatpush3.bf16.msra.mxu1 %v3394_v15  ;;  %3138 = vmatprep.subr.bf16.mxu0 %v3395_v16  ;;  %v3423_v52 = vld [vmem:[%s4196_s21 + $0x158] sm:$0xff]   ;;  %v3427_v56 = vld [vmem:[%s4196_s21 + $0x160] sm:$0xff]   ;;  %v3431_v60 = vld [vmem:[%s4196_s21 + $0x168] sm:$0xff]  }
  0xdd   : > { %3160 = vmatprep.subr.bf16.mxu1 %v3396_v17  ;;  %2418 = vmatprep.mubr.bf16.mxu0 %v2959_v36  ;;  %v3424_v53 = vld [vmem:[%s4196_s21 + $0x1d8] sm:$0xff]   ;;  %v3428_v57 = vld [vmem:[%s4196_s21 + $0x1e0] sm:$0xff]   ;;  %v3432_v61 = vld [vmem:[%s4196_s21 + $0x1e8] sm:$0xff]  }
  0xde   : > { %v3425_v54 = vld [vmem:[%s4196_s21 + $0x118] sm:$0xff]   ;;  %v3429_v58 = vld [vmem:[%s4196_s21 + $0x120] sm:$0xff]   ;;  %v3433_v62 = vld [vmem:[%s4196_s21 + $0x128] sm:$0xff]  }
  0xdf   : > { %3139 = vmatpush3.bf16.msra.mxu0 %v3397_v18  ;;  %v3426_v55 = vld [vmem:[%s4196_s21 + $0x198] sm:$0xff]   ;;  %v3430_v59 = vld [vmem:[%s4196_s21 + $0x1a0] sm:$0xff]   ;;  %v3434_v63 = vld [vmem:[%s4196_s21 + $0x1a8] sm:$0xff]  }
  0xe0   : > { %3161 = vmatpush3.bf16.msra.mxu1 %v3398_v19  ;;  %3140 = vmatprep.subr.bf16.mxu0 %v3399_v20  ;;  %v3435_v0 = vld [vmem:[%s4196_s21 + $0x170] sm:$0xff]   ;;  %v3439_v4 = vld [vmem:[%s4196_s21 + $0x178] sm:$0xff]   ;;  %v3443_v16 = vld [vmem:[%s4196_s21 + $0x240] sm:$0xff]  }
  0xe1   : > { %3162 = vmatprep.subr.bf16.mxu1 %v3400_v21  ;;  %v3436_v1 = vld [vmem:[%s4196_s21 + $0x1f0] sm:$0xff]   ;;  %v3440_v5 = vld [vmem:[%s4196_s21 + $0x1f8] sm:$0xff]   ;;  %v3444_v17 = vld [vmem:[%s4196_s21 + $0x2c0] sm:$0xff]  }
  0xe2   : > { %v3437_v2 = vld [vmem:[%s4196_s21 + $0x130] sm:$0xff]   ;;  %v3441_v6 = vld [vmem:[%s4196_s21 + $0x138] sm:$0xff]   ;;  %v3445_v18 = vld [vmem:[%s4196_s21 + $0x200] sm:$0xff]  }
  0xe3   : > { %3141 = vmatpush3.bf16.msra.mxu0 %v3401_v22  ;;  %v3438_v3 = vld [vmem:[%s4196_s21 + $0x1b0] sm:$0xff]   ;;  %v3442_v7 = vld [vmem:[%s4196_s21 + $0x1b8] sm:$0xff]   ;;  %v3446_v19 = vld [vmem:[%s4196_s21 + $0x280] sm:$0xff]  }
  0xe4   : > { %3163 = vmatpush3.bf16.msra.mxu1 %v3402_v23  ;;  %3142 = vmatprep.subr.bf16.mxu0 %v3403_v24  ;;  %v1268_v8 = vld [vmem:[%s4233_s26 + $0x10] sm:$0xff]  ;;  %v1269_v12 = vld [vmem:[%s4233_s26 + $0x18] sm:$0xff]  ;;  %v3459_v32 = vld [vmem:[%s4196_s21 + $0x260] sm:$0xff]  }
  0xe5   : > { %3164 = vmatprep.subr.bf16.mxu1 %v3404_v25  ;;  %v1276_v9 = vld [vmem:[%s4233_s26 + $0x50] sm:$0xff]  ;;  %v1277_v13 = vld [vmem:[%s4233_s26 + $0x58] sm:$0xff]  ;;  %v3460_v33 = vld [vmem:[%s4196_s21 + $0x2e0] sm:$0xff]  }
  0xe6   : > { %v2962_v10 = vcombine.low %v1268_v8, %v1276_v9  ;;  %v2963_v11 = vcombine.high %v1268_v8, %v1276_v9  ;;  %v2964_v14 = vcombine.low %v1269_v12, %v1277_v13  ;;  %v2965_v15 = vcombine.high %v1269_v12, %v1277_v13  ;;  %v3447_v20 = vld [vmem:[%s4196_s21 + $0x248] sm:$0xff]   ;;  %v3451_v24 = vld [vmem:[%s4196_s21 + $0x250] sm:$0xff]   ;;  %v3461_v34 = vld [vmem:[%s4196_s21 + $0x220] sm:$0xff]  }
  0xe7   : > { %3143 = vmatpush3.bf16.msra.mxu0 %v3405_v26  ;;  %v3448_v21 = vld [vmem:[%s4196_s21 + $0x2c8] sm:$0xff]   ;;  %v3452_v25 = vld [vmem:[%s4196_s21 + $0x2d0] sm:$0xff]   ;;  %v3491_v8 = vld [vmem:[%s4196_s21 + $0x360] sm:$0xff]  }
  0xe8   : > { %3165 = vmatpush3.bf16.msra.mxu1 %v3406_v27  ;;  %3144 = vmatprep.subr.bf16.mxu0 %v3407_v28  ;;  %v3449_v22 = vld [vmem:[%s4196_s21 + $0x208] sm:$0xff]   ;;  %v3453_v26 = vld [vmem:[%s4196_s21 + $0x210] sm:$0xff]   ;;  %v3455_v28 = vld [vmem:[%s4196_s21 + $0x258] sm:$0xff]  }
  0xe9   : > { %3166 = vmatprep.subr.bf16.mxu1 %v3408_v29  ;;  %v3450_v23 = vld [vmem:[%s4196_s21 + $0x288] sm:$0xff]   ;;  %v3454_v27 = vld [vmem:[%s4196_s21 + $0x290] sm:$0xff]   ;;  %v3456_v29 = vld [vmem:[%s4196_s21 + $0x2d8] sm:$0xff]  }
  0xea   : > { %v3463_v36 = vld [vmem:[%s4196_s21 + $0x268] sm:$0xff]   ;;  %v3492_v9 = vld [vmem:[%s4196_s21 + $0x3e0] sm:$0xff]  }
  0xeb   : > { %3145 = vmatpush3.bf16.msra.mxu0 %v3409_v30  ;;  %v3457_v30 = vld [vmem:[%s4196_s21 + $0x218] sm:$0xff]   ;;  %v3464_v37 = vld [vmem:[%s4196_s21 + $0x2e8] sm:$0xff]  }
  0xec   : > { %3167 = vmatpush3.bf16.msra.mxu1 %v3410_v31  ;;  %3174 = vmatprep.subr.bf16.mxu0 %v3411_v40  ;;  %v3458_v31 = vld [vmem:[%s4196_s21 + $0x298] sm:$0xff]   ;;  %v3466_v39 = vld [vmem:[%s4196_s21 + $0x2a8] sm:$0xff]   ;;  %v3467_v40 = vld [vmem:[%s4196_s21 + $0x270] sm:$0xff]  }
  0xed   : > { %3196 = vmatprep.subr.bf16.mxu1 %v3412_v41  ;;  %v3468_v41 = vld [vmem:[%s4196_s21 + $0x2f0] sm:$0xff]   ;;  %v3495_v12 = vld [vmem:[%s4196_s21 + $0x368] sm:$0xff]  }
  0xee   : > { %2419 = vmatmul.mubr.bf16.vlgmr.msra.gmra.mrb[0].mxu0 %v2958_v35  ;;  %v3462_v35 = vld [vmem:[%s4196_s21 + $0x2a0] sm:$0xff]   ;;  %v3496_v13 = vld [vmem:[%s4196_s21 + $0x3e8] sm:$0xff]  }
  0xef   : > { %2460 = vmatmul.mubr.bf16.vlgmr.msra.gmra.mrb[0].mxu1 %v2960_v38  ;;  %3175 = vmatpush3.bf16.msra.mxu0 %v3413_v42  ;;  %v3465_v38 = vld [vmem:[%s4196_s21 + $0x228] sm:$0xff]   ;;  %v3469_v42 = vld [vmem:[%s4196_s21 + $0x230] sm:$0xff]  }
  0xf0   : > { %3197 = vmatpush3.bf16.msra.mxu1 %v3414_v43  ;;  %3176 = vmatprep.subr.bf16.mxu0 %v3415_v44  ;;  %v3470_v43 = vld [vmem:[%s4196_s21 + $0x2b0] sm:$0xff]   ;;  %v3471_v44 = vld [vmem:[%s4196_s21 + $0x278] sm:$0xff]  }
  0xf1   : > { %3198 = vmatprep.subr.bf16.mxu1 %v3416_v45  ;;  %2500 = vmatprep.mubr.bf16.mxu0 %v2963_v11  ;;  %v3472_v45 = vld [vmem:[%s4196_s21 + $0x2f8] sm:$0xff]   ;;  %v3494_v11 = vld [vmem:[%s4196_s21 + $0x3a0] sm:$0xff]  }
  0xf2   : > { %2541 = vmatprep.mubr.bf16.mxu1 %v2965_v15  ;;  %v3498_v15 = vld [vmem:[%s4196_s21 + $0x3a8] sm:$0xff]  }
  0xf3   : > { %3177 = vmatpush3.bf16.msra.mxu0 %v3417_v46  ;;  %v3473_v46 = vld [vmem:[%s4196_s21 + $0x238] sm:$0xff]  }
  0xf4   : > { %3199 = vmatpush3.bf16.msra.mxu1 %v3418_v47  ;;  %3178 = vmatprep.subr.bf16.mxu0 %v3419_v48  ;;  %v3474_v47 = vld [vmem:[%s4196_s21 + $0x2b8] sm:$0xff]  }
  0xf5   : > { %3200 = vmatprep.subr.bf16.mxu1 %v3420_v49  ;;  %v1270_v48 = vld [vmem:[%s4233_s26 + $0x20] sm:$0xff] }
  0xf6   : > { %v1278_v49 = vld [vmem:[%s4233_s26 + $0x60] sm:$0xff] }
  0xf7   : > { %3179 = vmatpush3.bf16.msra.mxu0 %v3421_v50  ;;  %v1271_v50 = vld [vmem:[%s4233_s26 + $0x28] sm:$0xff] }
  0xf8   : > { %3201 = vmatpush3.bf16.msra.mxu1 %v3422_v51  ;;  %3180 = vmatprep.subr.bf16.mxu0 %v3423_v52  ;;  %v1279_v51 = vld [vmem:[%s4233_s26 + $0x68] sm:$0xff]  ;;  %v2966_v52 = vcombine.low %v1270_v48, %v1278_v49 }
  0xf9   : > { %3202 = vmatprep.subr.bf16.mxu1 %v3424_v53  ;;  %v2967_v53 = vcombine.high %v1270_v48, %v1278_v49 }
  0xfb   : > { %3181 = vmatpush3.bf16.msra.mxu0 %v3425_v54  ;;  %v2968_v54 = vcombine.low %v1271_v50, %v1279_v51 }
  0xfc   : > { %3203 = vmatpush3.bf16.msra.mxu1 %v3426_v55  ;;  %3182 = vmatprep.subr.bf16.mxu0 %v3427_v56  ;;  %v2969_v55 = vcombine.high %v1271_v50, %v1279_v51  ;;  %v3475_v56 = vld [vmem:[%s4196_s21 + $0x340] sm:$0xff]  }
  0xfd   : > { %3204 = vmatprep.subr.bf16.mxu1 %v3428_v57  ;;  %v3476_v57 = vld [vmem:[%s4196_s21 + $0x3c0] sm:$0xff]  }
  0xff   : > { %3183 = vmatpush3.bf16.msra.mxu0 %v3429_v58  ;;  %v3477_v58 = vld [vmem:[%s4196_s21 + $0x300] sm:$0xff]  }
 0x100   : > { %3205 = vmatpush3.bf16.msra.mxu1 %v3430_v59  ;;  %3184 = vmatprep.subr.bf16.mxu0 %v3431_v60  ;;  %v3478_v59 = vld [vmem:[%s4196_s21 + $0x380] sm:$0xff]   ;;  %v3479_v60 = vld [vmem:[%s4196_s21 + $0x348] sm:$0xff]  }
 0x101   : > { %3206 = vmatprep.subr.bf16.mxu1 %v3432_v61  ;;  %v3480_v61 = vld [vmem:[%s4196_s21 + $0x3c8] sm:$0xff]  }
 0x103   : > { %3185 = vmatpush3.bf16.msra.mxu0 %v3433_v62  ;;  %v3481_v62 = vld [vmem:[%s4196_s21 + $0x308] sm:$0xff]  }
 0x104   : > { %3207 = vmatpush3.bf16.msra.mxu1 %v3434_v63  ;;  %3186 = vmatprep.subr.bf16.mxu0 %v3435_v0  ;;  %v3482_v63 = vld [vmem:[%s4196_s21 + $0x388] sm:$0xff]   ;;  %v3483_v0 = vld [vmem:[%s4196_s21 + $0x350] sm:$0xff]  }
 0x105   : > { %3208 = vmatprep.subr.bf16.mxu1 %v3436_v1  ;;  %v3484_v1 = vld [vmem:[%s4196_s21 + $0x3d0] sm:$0xff]  }
 0x107   : > { %3187 = vmatpush3.bf16.msra.mxu0 %v3437_v2  ;;  %v3485_v2 = vld [vmem:[%s4196_s21 + $0x310] sm:$0xff]  }
 0x108   : > { %3209 = vmatpush3.bf16.msra.mxu1 %v3438_v3  ;;  %3188 = vmatprep.subr.bf16.mxu0 %v3439_v4  ;;  %v3486_v3 = vld [vmem:[%s4196_s21 + $0x390] sm:$0xff]   ;;  %v3487_v4 = vld [vmem:[%s4196_s21 + $0x358] sm:$0xff]  }
 0x109   : > { %3210 = vmatprep.subr.bf16.mxu1 %v3440_v5  ;;  %v3488_v5 = vld [vmem:[%s4196_s21 + $0x3d8] sm:$0xff]  }
 0x10b   : > { %3189 = vmatpush3.bf16.msra.mxu0 %v3441_v6  ;;  %v3489_v6 = vld [vmem:[%s4196_s21 + $0x318] sm:$0xff]  }
 0x10c   : > { %3211 = vmatpush3.bf16.msra.mxu1 %v3442_v7  ;;  %3218 = vmatprep.subr.bf16.mxu0 %v3443_v16  ;;  %v3490_v7 = vld [vmem:[%s4196_s21 + $0x398] sm:$0xff]   ;;  %v3499_v16 = vld [vmem:[%s4196_s21 + $0x370] sm:$0xff]  }
 0x10d   : > { %3240 = vmatprep.subr.bf16.mxu1 %v3444_v17  ;;  %v3500_v17 = vld [vmem:[%s4196_s21 + $0x3f0] sm:$0xff]  }
 0x10e   : > { %2501 = vmatmul.mubr.bf16.vlgmr.msra.gmra.mrb[4].mxu0 %v2962_v10  ;;  %v3493_v10 = vld [vmem:[%s4196_s21 + $0x320] sm:$0xff]  }
 0x10f   : > { %2542 = vmatmul.mubr.bf16.vlgmr.msra.gmra.mrb[4].mxu1 %v2964_v14  ;;  %3219 = vmatpush3.bf16.msra.mxu0 %v3445_v18  ;;  %v3497_v14 = vld [vmem:[%s4196_s21 + $0x328] sm:$0xff]   ;;  %v3501_v18 = vld [vmem:[%s4196_s21 + $0x330] sm:$0xff]  }
 0x110   : > { %3241 = vmatpush3.bf16.msra.mxu1 %v3446_v19  ;;  %3220 = vmatprep.subr.bf16.mxu0 %v3447_v20  ;;  %v3502_v19 = vld [vmem:[%s4196_s21 + $0x3b0] sm:$0xff]   ;;  %v3503_v20 = vld [vmem:[%s4196_s21 + $0x378] sm:$0xff]  }
 0x111   : > { %3242 = vmatprep.subr.bf16.mxu1 %v3448_v21  ;;  %2582 = vmatprep.mubr.bf16.mxu0 %v2967_v53  ;;  %v3504_v21 = vld [vmem:[%s4196_s21 + $0x3f8] sm:$0xff]  }
 0x112   : > { %2623 = vmatprep.mubr.bf16.mxu1 %v2969_v55 }
 0x113   : > { %3221 = vmatpush3.bf16.msra.mxu0 %v3449_v22  ;;  %v3505_v22 = vld [vmem:[%s4196_s21 + $0x338] sm:$0xff]  }
 0x114   : > { %3243 = vmatpush3.bf16.msra.mxu1 %v3450_v23  ;;  %3222 = vmatprep.subr.bf16.mxu0 %v3451_v24  ;;  %v3506_v23 = vld [vmem:[%s4196_s21 + $0x3b8] sm:$0xff]   ;;  %v1272_v24 = vld [vmem:[%s4233_s26 + $0x30] sm:$0xff] }
 0x115   : > { %3244 = vmatprep.subr.bf16.mxu1 %v3452_v25  ;;  %v1280_v25 = vld [vmem:[%s4233_s26 + $0x70] sm:$0xff] }
 0x117   : > { %3223 = vmatpush3.bf16.msra.mxu0 %v3453_v26  ;;  %v1273_v26 = vld [vmem:[%s4233_s26 + $0x38] sm:$0xff] }
 0x118   : > { %3245 = vmatpush3.bf16.msra.mxu1 %v3454_v27  ;;  %3224 = vmatprep.subr.bf16.mxu0 %v3455_v28  ;;  %v2970_v27 = vcombine.low %v1272_v24, %v1280_v25  ;;  %v2971_v28 = vcombine.high %v1272_v24, %v1280_v25 }
 0x119   : > { %3246 = vmatprep.subr.bf16.mxu1 %v3456_v29  ;;  %v1281_v29 = vld [vmem:[%s4233_s26 + $0x78] sm:$0xff] }
 0x11b   : > { %3225 = vmatpush3.bf16.msra.mxu0 %v3457_v30  ;;  %v2972_v30 = vcombine.low %v1273_v26, %v1281_v29 }
 0x11c   : > { %3247 = vmatpush3.bf16.msra.mxu1 %v3458_v31  ;;  %3226 = vmatprep.subr.bf16.mxu0 %v3459_v32  ;;  %v2973_v31 = vcombine.high %v1273_v26, %v1281_v29  ;;  %v3581_v32 = vmov 0.0  }
 0x11d   : > { %3248 = vmatprep.subr.bf16.mxu1 %v3460_v33  ;;  %1264 = vst [vmem:[#allocation2] sm:$0x1] %v3581_v32  ;;  %1265 = vst [vmem:[#allocation3] sm:$0x1] %v3581_v32 }
 0x11f   : > { %3227 = vmatpush3.bf16.msra.mxu0 %v3461_v34 }
 0x120   : > { %3249 = vmatpush3.bf16.msra.mxu1 %v3462_v35  ;;  %3228 = vmatprep.subr.bf16.mxu0 %v3463_v36 }
 0x121   : > { %3250 = vmatprep.subr.bf16.mxu1 %v3464_v37 }
 0x123   : > { %3229 = vmatpush3.bf16.msra.mxu0 %v3465_v38 }
 0x124   : > { %3251 = vmatpush3.bf16.msra.mxu1 %v3466_v39  ;;  %3230 = vmatprep.subr.bf16.mxu0 %v3467_v40 }
 0x125   : > { %3252 = vmatprep.subr.bf16.mxu1 %v3468_v41 }
 0x127   : > { %3231 = vmatpush3.bf16.msra.mxu0 %v3469_v42 }
 0x128   : > { %3253 = vmatpush3.bf16.msra.mxu1 %v3470_v43  ;;  %3232 = vmatprep.subr.bf16.mxu0 %v3471_v44 }
 0x129   : > { %3254 = vmatprep.subr.bf16.mxu1 %v3472_v45 }
 0x12b   : > { %3233 = vmatpush3.bf16.msra.mxu0 %v3473_v46 }
 0x12c   : > { %3255 = vmatpush3.bf16.msra.mxu1 %v3474_v47  ;;  %3262 = vmatprep.subr.bf16.mxu0 %v3475_v56 }
 0x12d   : > { %3284 = vmatprep.subr.bf16.mxu1 %v3476_v57 }
 0x12e   : > { %2583 = vmatmul.mubr.bf16.vlgmr.msra.gmra.mrb[8].mxu0 %v2966_v52 }
 0x12f   : > { %2624 = vmatmul.mubr.bf16.vlgmr.msra.gmra.mrb[8].mxu1 %v2968_v54  ;;  %3263 = vmatpush3.bf16.msra.mxu0 %v3477_v58 }
 0x130   : > { %3285 = vmatpush3.bf16.msra.mxu1 %v3478_v59  ;;  %3264 = vmatprep.subr.bf16.mxu0 %v3479_v60 }
 0x131   : > { %3286 = vmatprep.subr.bf16.mxu1 %v3480_v61  ;;  %2664 = vmatprep.mubr.bf16.mxu0 %v2971_v28 }
 0x132   : > { %2705 = vmatprep.mubr.bf16.mxu1 %v2973_v31 }
 0x133   : > { %3265 = vmatpush3.bf16.msra.mxu0 %v3481_v62 }
 0x134   : > { %3287 = vmatpush3.bf16.msra.mxu1 %v3482_v63  ;;  %3266 = vmatprep.subr.bf16.mxu0 %v3483_v0 }
 0x135   : > { %3288 = vmatprep.subr.bf16.mxu1 %v3484_v1 }
 0x137   : > { %3267 = vmatpush3.bf16.msra.mxu0 %v3485_v2 }
 0x138   : > { %3289 = vmatpush3.bf16.msra.mxu1 %v3486_v3  ;;  %3268 = vmatprep.subr.bf16.mxu0 %v3487_v4 }
 0x139   : > { %3290 = vmatprep.subr.bf16.mxu1 %v3488_v5 }
 0x13b   : > { %3269 = vmatpush3.bf16.msra.mxu0 %v3489_v6 }
 0x13c   : > { %3291 = vmatpush3.bf16.msra.mxu1 %v3490_v7  ;;  %3270 = vmatprep.subr.bf16.mxu0 %v3491_v8 }
 0x13d   : > { %3292 = vmatprep.subr.bf16.mxu1 %v3492_v9 }
 0x13f   : > { %3271 = vmatpush3.bf16.msra.mxu0 %v3493_v10 }
 0x140   : > { %3293 = vmatpush3.bf16.msra.mxu1 %v3494_v11  ;;  %3272 = vmatprep.subr.bf16.mxu0 %v3495_v12 }
 0x141   : > { %3294 = vmatprep.subr.bf16.mxu1 %v3496_v13 }
 0x143   : > { %3273 = vmatpush3.bf16.msra.mxu0 %v3497_v14 }
 0x144   : > { %3295 = vmatpush3.bf16.msra.mxu1 %v3498_v15  ;;  %3274 = vmatprep.subr.bf16.mxu0 %v3499_v16 }
 0x145   : > { %3296 = vmatprep.subr.bf16.mxu1 %v3500_v17 }
 0x147   : > { %3275 = vmatpush3.bf16.msra.mxu0 %v3501_v18 }
 0x148   : > { %3297 = vmatpush3.bf16.msra.mxu1 %v3502_v19  ;;  %3276 = vmatprep.subr.bf16.mxu0 %v3503_v20 }
 0x149   : > { %3298 = vmatprep.subr.bf16.mxu1 %v3504_v21 }
 0x14b   : > { %3277 = vmatpush3.bf16.msra.mxu0 %v3505_v22 }
 0x14c   : > { %3299 = vmatpush3.bf16.msra.mxu1 %v3506_v23 }
 0x14e   : > { %2665 = vmatmul.mubr.bf16.vlgmr.msra.gmra.mrb[12].mxu0 %v2970_v27 }
 0x14f   : > { %2706 = vmatmul.mubr.bf16.vlgmr.msra.gmra.mrb[12].mxu1 %v2972_v30 }
 0x1c1   : > { %v3146_v33 = vpop.f32.mrb[0].mxu0 }
 0x1c2   : > { %v3168_v34 = vpop.f32.mrb[0].mxu1  ;;  %v3147_v35 = vpop.f32.mrb[1].mxu0 }
 0x1c3   : > { %v3148_v36 = vadd.f32 %v3147_v35, %v3146_v33  ;;  %v3169_v37 = vpop.f32.mrb[1].mxu1  ;;  %v3149_v38 = vpop.f32.mrb[2].mxu0 }
 0x1c4   : > { %v3170_v39 = vadd.f32 %v3169_v37, %v3168_v34  ;;  %v3171_v40 = vpop.f32.mrb[2].mxu1  ;;  %v3150_v41 = vpop.f32.mrb[3].mxu0 }
 0x1c5   : > { %v3151_v42 = vadd.f32 %v3150_v41, %v3149_v38  ;;  %v3172_v43 = vpop.f32.mrb[3].mxu1 }
 0x1c6   : > { %v2462_v44 = vadd.f32 %v3170_v39, %v3148_v36  ;;  %v3173_v45 = vadd.f32 %v3172_v43, %v3171_v40 }
 0x1c8   : > { %v2465_v46 = vadd.f32 %v3173_v45, %v3151_v42  ;;  %v2727_v45 = vld [vmem:[#allocation2] sm:$0x1] }
 0x1e1   : > { %v3190_v47 = vpop.f32.mrb[4].mxu0 }
 0x1e2   : > { %v3212_v48 = vpop.f32.mrb[4].mxu1  ;;  %v3191_v49 = vpop.f32.mrb[5].mxu0 }
 0x1e3   : > { %v3192_v50 = vadd.f32 %v3191_v49, %v3190_v47  ;;  %v3213_v51 = vpop.f32.mrb[5].mxu1  ;;  %v3193_v52 = vpop.f32.mrb[6].mxu0 }
 0x1e4   : > { %v3214_v53 = vadd.f32 %v3213_v51, %v3212_v48  ;;  %v3215_v54 = vpop.f32.mrb[6].mxu1  ;;  %v3194_v55 = vpop.f32.mrb[7].mxu0  ;;  %v2737_v48 = vld [vmem:[#allocation3] sm:$0x1] }
 0x1e5   : > { %v2503_v56 = vadd.f32 %v3192_v50, %v2462_v44  ;;  %v3195_v57 = vadd.f32 %v3194_v55, %v3193_v52  ;;  %v3216_v58 = vpop.f32.mrb[7].mxu1 }
 0x1e6   : > { %v3217_v59 = vadd.f32 %v3216_v58, %v3215_v54  ;;  %v2766_v58 = vlaneseq }
 0x1e7   : > { %v2544_v60 = vadd.f32 %v3214_v53, %v2503_v56  ;;  %v2506_v61 = vadd.f32 %v3195_v57, %v2465_v46 }
 0x1e9   : > { %v2547_v62 = vadd.f32 %v3217_v59, %v2506_v61  ;;  %v2767_v61 = vshrl.u32 %v2766_v58, 7 }
 0x201   : > { %v3234_v63 = vpop.f32.mrb[8].mxu0 }
 0x202   : > { %v3256_v0 = vpop.f32.mrb[8].mxu1  ;;  %v3235_v1 = vpop.f32.mrb[9].mxu0 }
 0x203   : > { %v3257_v2 = vpop.f32.mrb[9].mxu1  ;;  %v3236_v3 = vadd.f32 %v3235_v1, %v3234_v63  ;;  %v3237_v5 = vpop.f32.mrb[10].mxu0 }
 0x204   : > { %v3258_v4 = vadd.f32 %v3257_v2, %v3256_v0  ;;  %v3259_v6 = vpop.f32.mrb[10].mxu1  ;;  %v3238_v7 = vpop.f32.mrb[11].mxu0 }
 0x205   : > { %v3260_v8 = vpop.f32.mrb[11].mxu1  ;;  %v2585_v9 = vadd.f32 %v3236_v3, %v2544_v60  ;;  %v3239_v10 = vadd.f32 %v3238_v7, %v3237_v5 }
 0x206   : > { %v3261_v11 = vadd.f32 %v3260_v8, %v3259_v6 }
 0x207   : > { %v2626_v12 = vadd.f32 %v3258_v4, %v2585_v9  ;;  %v2588_v13 = vadd.f32 %v3239_v10, %v2547_v62  ;;  %v2768_v62 = vsub.s32 0, %v2767_v61 }
 0x209   : > { %v2629_v14 = vadd.f32 %v3261_v11, %v2588_v13 }
 0x221   : > { %v3278_v15 = vpop.f32.mrb[12].mxu0 }
 0x222   : > { %v3300_v16 = vpop.f32.mrb[12].mxu1  ;;  %v3279_v17 = vpop.f32.mrb[13].mxu0 }
 0x223   : > { %v3280_v18 = vadd.f32 %v3279_v17, %v3278_v15  ;;  %v3301_v19 = vpop.f32.mrb[13].mxu1  ;;  %v3281_v20 = vpop.f32.mrb[14].mxu0 }
 0x224   : > { %v3302_v21 = vadd.f32 %v3301_v19, %v3300_v16  ;;  %v3303_v22 = vpop.f32.mrb[14].mxu1  ;;  %v3282_v23 = vpop.f32.mrb[15].mxu0 }
 0x225   : > { %v2667_v24 = vadd.f32 %v3280_v18, %v2626_v12  ;;  %v3283_v25 = vadd.f32 %v3282_v23, %v3281_v20  ;;  %v3304_v26 = vpop.f32.mrb[15].mxu1 }
 0x226   : > { %v3305_v27 = vadd.f32 %v3304_v26, %v3303_v22 }
 0x227   : > { %v2708_v28 = vadd.f32 %v3302_v21, %v2667_v24  ;;  %v2670_v29 = vadd.f32 %v3283_v25, %v2629_v14 }
 0x229   : > { %v2711_v30 = vadd.f32 %v3305_v27, %v2670_v29  ;;  %v2738_v31 = vmul.f32 %v2708_v28, %v2708_v28 }
 0x22b   : > { %v3119_v32 = vpack.c.bf16 %v2711_v30, %v2708_v28  ;;  %v2728_v33 = vadd.f32 %v2711_v30, %v2708_v28  ;;  %v2739_v34 = vmul.f32 %v2711_v30, %v2711_v30 }
 0x22d   : > { %v2729_v35 = vrot.slane %v2728_v33, 4  ;;  %v2740_v36 = vadd.f32 %v2739_v34, %v2738_v31  ;;  %v3123_v0 = vunpack.c.l.bf16 %v3119_v32  ;;  %v3124_v1 = vunpack.c.h.bf16 %v3119_v32 }
 0x22f   : > { %v2730_v37 = vadd.f32 %v2729_v35, %v2728_v33  ;;  %v2741_v38 = vrot.slane %v2740_v36, 4 }
 0x231   : > { %v2731_v39 = vrot.slane %v2730_v37, 2  ;;  %v2742_v40 = vadd.f32 %v2741_v38, %v2740_v36 }
 0x233   : > { %v2732_v41 = vadd.f32 %v2731_v39, %v2730_v37  ;;  %v2743_v42 = vrot.slane %v2742_v40, 2 }
 0x235   : > { %v2733_v43 = vrot.slane %v2732_v41, 1  ;;  %v2744_v44 = vadd.f32 %v2743_v42, %v2742_v40 }
 0x237   : > { %v2734_v46 = vadd.f32 %v2733_v43, %v2732_v41  ;;  %v2745_v47 = vrot.slane %v2744_v44, 1 }
 0x239   : > { %v2735_v49 = vadd.f32 %v2734_v46, %v2727_v45  ;;  %v2746_v50 = vadd.f32 %v2745_v47, %v2744_v44 }
 0x23b   : > { %2736 = vst [vmem:[#allocation2] sm:$0x1] %v2735_v49  ;;  %v2747_v51 = vadd.f32 %v2746_v50, %v2737_v48 }
 0x23d   : > { %2748 = vst [vmem:[#allocation3] sm:$0x1] %v2747_v51 }
 0x242   : > { %v2752_v52 = vld [vmem:[#allocation2] sm:$0x1] }
 0x243   : > { %v2753_v53 = vmul.f32 0.0625, %v2752_v52 }
 0x244   : > { %v2754_v54 = vld [vmem:[#allocation3] sm:$0x1] }
 0x245   : > { %v2755_v55 = vmul.f32 0.0625, %v2754_v54  ;;  %v2756_v56 = vmul.f32 %v2753_v53, %v2753_v53  ;;  %v2769_v63 = vrot.slane %v2753_v53, %v2768_v62 }
 0x247   : > { %v2757_v57 = vsub.f32 %v2755_v55, %v2756_v56  ;;  %v2771_v3 = vsub.f32 %v3123_v0, %v2769_v63  ;;  %v2772_v4 = vsub.f32 %v3124_v1, %v2769_v63 }
 0x249   : > { %v2758_v59 = vmax.f32 %v2757_v57, 0.0 }
 0x24b   : > { %v2759_v60 = vadd.f32 1e-05, %v2758_v59 }
 0x24d   : > { %3507 = vrsqrt.f32 %v2759_v60 }
 0x257   : > { %v3508_v2 = vpop.eup %3507 }
 0x258   : > { %v2777_v5 = vrot.slane %v3508_v2, %v2768_v62 }
 0x25a   : > { %v2779_v6 = vmul.f32 %v2777_v5, %v2771_v3  ;;  %v2780_v7 = vmul.f32 %v2777_v5, %v2772_v4 }
 0x25b   : > { %2803 = sbr.rel (!%p3664_p9) target bundleno = 618 (0x26a), region = 81 }
 0x25c   : > { %vm2781_vm0 = vcmp.ge.f32.partialorder %v2779_v6, 0.0  ;;  %vm2782_vm1 = vcmp.ge.f32.partialorder %v2780_v7, 0.0  ;;  %v2783_v8 = vmul.f32 0.2, %v2779_v6  ;;  %v2784_v9 = vmul.f32 0.2, %v2780_v7 }
 0x25e   : > { %v2785_v10 = vsel %vm2781_vm0, %v2779_v6, %v2783_v8  ;;  %v2786_v11 = vsel %vm2782_vm1, %v2780_v7, %v2784_v9 }
 0x25f   : > { %v3128_v12 = vpack.c.bf16 %v2786_v11, %v2785_v10 }
 0x261   : > { %3129 = vst [vmem:[%s1247_s3] sm:$0xff] %v3128_v12  }
 0x268   : > { %v2823_v13 = vld [vmem:[%s1247_s3] sm:$0xf]  ;;  %v2825_v14 = vld [vmem:[%s1247_s3 + $0x4] sm:$0xf] }
 0x269   : > { %2824 = vst [vmem:[%s2807_s8] sm:$0xf] %v2823_v13  ;;  %2826 = vst [vmem:[%s2807_s8 + $0x8] sm:$0xf] %v2825_v14 }
 0x26a PF: > { %s12_s17 = sadd.s32 1, %s3579_s17   ;;  %s4388_s9 = smov %s3551_s10 }
 0x26b   : > { %p9_p1 = scmp.ge.s32.totalorder %s12_s17, 6   ;;  %s4389_s10 = smov %s3669_s28 }
 0x26c   : > { %s4390_s11 = smov %s3559_s12  ;;  %s4391_s12 = smov %s3658_s24 }
 0x26d   : > { %s4392_s13 = smov %s3571_s15  ;;  %s4393_s14 = smov %s3575_s16 }
 0x26e   : > { %s4394_s15 = smov %s4397_s19  ;;  %s4395_s16 = smov %s4401_s20 }
 0x26f   :  { %11 = sbr.rel (!%p9_p1) target bundleno = 5 (0x5), region = 157 }

// kernel: discriminator_forward.8
= control target key start
LH: loop header
LB: loop body
LE: loop exit
PB: predicated region body
PF: predicated region fallthrough
CT: control target
= control target key end

     0   :  { %s10216_s9 = smov 0   ;;  %s10218_s10 = smov 0   ;;  %s12047_s0 = inlined_call_operand.vmem [shape: bf16[2,16,4096], index: 0, kind: input, shape index: {}]   ;;  %s12048_s1 = inlined_call_operand.vmem [shape: bf16[4096,512], index: 1, kind: input, shape index: {}]   ;;  %s12049_s2 = inlined_call_operand.vmem [shape: bf16[2,1,16,512], index: 2, kind: output, shape index: {}]  }
   0x1   :  { %s10220_s11 = smov 0   ;;  %s10222_s12 = smov 0  }
   0x2   :  { %s10224_s13 = smov 0   ;;  %s10226_s14 = smov 0  }
   0x3   :  { %s10228_s15 = smov 0   ;;  %s10230_s16 = smov 0  }
   0x4   :  { %s10232_s17 = smov 0  }
   0x5 LB: > { %s8651_s18 = sadd.s32 4294967295, %s10197_s17   ;;  %s27_s19 = sadd.s32 1, %s10189_s15  ;;  %s10197_s17 = sphi %s10232_s17, %s12_s17   ;;  %s10193_s16 = sphi %s10230_s16, %s12060_s16   ;;  %s10189_s15 = sphi %s10228_s15, %s12059_s15   ;;  %s10185_s14 = sphi %s10226_s14, %s12058_s14   ;;  %s10181_s13 = sphi %s10224_s13, %s12057_s13   ;;  %s10177_s12 = sphi %s10222_s12, %s12056_s12   ;;  %s10173_s11 = sphi %s10220_s11, %s12055_s11   ;;  %s10169_s10 = sphi %s10218_s10, %s12054_s10   ;;  %s10165_s9 = sphi %s10216_s9, %s12053_s9  }
   0x6   : > { %p29_p0 = scmp.ge.s32.totalorder %s27_s19, 2  ;;  %s31_s20 = sadd.s32 1, %s10193_s16 }
   0x7   : > { %s66_s21 = sadd.s32 1, %s10177_s12  ;;  %p73_p1 = scmp.ne.s32.totalorder %s10177_s12, %s10173_s11 }
   0x8   : > { %s12062_s19 = smov (%p29_p0, %s27_s19), 0  ;;  %s12064_s20 = smov (!%p29_p0, %s31_s20), %s10193_s16 }
   0x9   : > { %s63_s22 = ssub.s32 %s10189_s15, %s12062_s19  ;;  %p74_p2 = scmp.eq.s32.totalorder %s10197_s17, 0 }
   0xa   : > { %p33_p3 = scmp.ge.s32.totalorder %s12064_s20, 2  ;;  %p64_p4 = scmp.eq.s32.totalorder %s63_s22, 0 }
   0xb   : > { %p75_p5 = por %p74_p2, %p73_p1  ;;  %s94_s23 = sadd.s32 1, %s10169_s10 }
   0xc   : > { %s12066_s20 = smov (%p33_p3, %s12064_s20), 0  ;;  %p104_p6 = scmp.ne.s32.totalorder %s10169_s10, %s10165_s9 }
   0xd   : > { %s10277_s24 = scalar_select %p64_p4, %s10177_s12, %s66_s21  }
   0xe   : > { %s89_s25 = ssub.s32 %s10193_s16, %s12066_s20  ;;  %p105_p7 = scmp.eq.s32.totalorder %s8651_s18, 3 }
   0xf   : > { %s91_s26 = sor.u32 %s89_s25, %s63_s22  ;;  %p8654_p10 = scmp.ge.s32.totalorder %s10197_s17, 4 }
  0x10   : > { %p92_p8 = scmp.eq.s32.totalorder %s91_s26, 0  ;;  %p10283_p9 = por %p105_p7, %p104_p6 }
  0x11   : > { %127 = sbr.rel (%p8654_p10) target bundleno = 284 (0x11c), region = 16 }
  0x12   : > { %s10288_s28 = scalar_select %p92_p8, %s10169_s10, %s94_s23  }
  0x18   : > { %144 = sbr.rel (!%p75_p5) target bundleno = 284 (0x11c), region = 24  ;;  %s146_s29 = sand.u32 (%p75_p5), 1, %s10177_s12  }
  0x19   : > { %s9217_s30 = sshll.u32 (%p75_p5), %s10189_s15, 3  ;;  %s8655_s3 = sshll.u32 (%p75_p5), %s146_s29, 12 }
  0x1a   : > { %s10296_s6 = scalar_lea.vmem (%p75_p5), %s12048_s1, %s9217_s30  ;;  %s10301_s7 = scalar_lea.vmem (%p75_p5), [#allocation4], %s8655_s3 }
  0x1b   : > { %v1204_v0 = vld [vmem:[%s10296_s6] sm:$0xff] (%p75_p5)  ;;  %v1206_v1 = vld [vmem:[%s10296_s6 + $0x10] sm:$0xff] (%p75_p5) }
  0x1c   : > { %v1208_v2 = vld [vmem:[%s10296_s6 + $0x20] sm:$0xff] (%p75_p5)  ;;  %1205 = vst [vmem:[%s10301_s7] sm:$0xff] (%p75_p5), %v1204_v0  ;;  %1207 = vst [vmem:[%s10301_s7 + $0x8] sm:$0xff] (%p75_p5), %v1206_v1  ;;  %v1210_v3 = vld [vmem:[%s10296_s6 + $0x30] sm:$0xff] (%p75_p5) }
  0x1d   : > { %1209 = vst [vmem:[%s10301_s7 + $0x10] sm:$0xff] (%p75_p5), %v1208_v2  ;;  %v1212_v4 = vld [vmem:[%s10296_s6 + $0x40] sm:$0xff] (%p75_p5)  ;;  %v1214_v5 = vld [vmem:[%s10296_s6 + $0x50] sm:$0xff] (%p75_p5)  ;;  %1211 = vst [vmem:[%s10301_s7 + $0x18] sm:$0xff] (%p75_p5), %v1210_v3 }
  0x1e   : > { %1213 = vst [vmem:[%s10301_s7 + $0x20] sm:$0xff] (%p75_p5), %v1212_v4  ;;  %1215 = vst [vmem:[%s10301_s7 + $0x28] sm:$0xff] (%p75_p5), %v1214_v5  ;;  %v1216_v6 = vld [vmem:[%s10296_s6 + $0x60] sm:$0xff] (%p75_p5)  ;;  %v1218_v7 = vld [vmem:[%s10296_s6 + $0x70] sm:$0xff] (%p75_p5) }
  0x1f   : > { %v1220_v8 = vld [vmem:[%s10296_s6 + $0x80] sm:$0xff]  ;;  %1217 = vst [vmem:[%s10301_s7 + $0x30] sm:$0xff] %v1216_v6  ;;  %1219 = vst [vmem:[%s10301_s7 + $0x38] sm:$0xff] %v1218_v7  ;;  %v1222_v9 = vld [vmem:[%s10296_s6 + $0x90] sm:$0xff] }
  0x20   : > { %1221 = vst [vmem:[%s10301_s7 + $0x40] sm:$0xff] %v1220_v8  ;;  %v1224_v10 = vld [vmem:[%s10296_s6 + $0xa0] sm:$0xff]  ;;  %v1226_v11 = vld [vmem:[%s10296_s6 + $0xb0] sm:$0xff]  ;;  %1223 = vst [vmem:[%s10301_s7 + $0x48] sm:$0xff] %v1222_v9 }
  0x21   : > { %1225 = vst [vmem:[%s10301_s7 + $0x50] sm:$0xff] %v1224_v10  ;;  %1227 = vst [vmem:[%s10301_s7 + $0x58] sm:$0xff] %v1226_v11  ;;  %v1228_v12 = vld [vmem:[%s10296_s6 + $0xc0] sm:$0xff]  ;;  %v1230_v13 = vld [vmem:[%s10296_s6 + $0xd0] sm:$0xff] }
  0x22   : > { %v1232_v14 = vld [vmem:[%s10296_s6 + $0xe0] sm:$0xff]  ;;  %1229 = vst [vmem:[%s10301_s7 + $0x60] sm:$0xff] %v1228_v12  ;;  %1231 = vst [vmem:[%s10301_s7 + $0x68] sm:$0xff] %v1230_v13  ;;  %v1234_v15 = vld [vmem:[%s10296_s6 + $0xf0] sm:$0xff] }
  0x23   : > { %1233 = vst [vmem:[%s10301_s7 + $0x70] sm:$0xff] %v1232_v14  ;;  %v1236_v16 = vld [vmem:[%s10296_s6 + $0x100] sm:$0xff]  ;;  %v1238_v17 = vld [vmem:[%s10296_s6 + $0x110] sm:$0xff]  ;;  %1235 = vst [vmem:[%s10301_s7 + $0x78] sm:$0xff] %v1234_v15 }
  0x24   : > { %1237 = vst [vmem:[%s10301_s7 + $0x80] sm:$0xff] %v1236_v16  ;;  %1239 = vst [vmem:[%s10301_s7 + $0x88] sm:$0xff] %v1238_v17  ;;  %v1240_v18 = vld [vmem:[%s10296_s6 + $0x120] sm:$0xff]  ;;  %v1242_v19 = vld [vmem:[%s10296_s6 + $0x130] sm:$0xff] }
  0x25   : > { %v1244_v20 = vld [vmem:[%s10296_s6 + $0x140] sm:$0xff]  ;;  %1241 = vst [vmem:[%s10301_s7 + $0x90] sm:$0xff] %v1240_v18  ;;  %1243 = vst [vmem:[%s10301_s7 + $0x98] sm:$0xff] %v1242_v19  ;;  %v1246_v21 = vld [vmem:[%s10296_s6 + $0x150] sm:$0xff] }
  0x26   : > { %1245 = vst [vmem:[%s10301_s7 + $0xa0] sm:$0xff] %v1244_v20  ;;  %v1248_v22 = vld [vmem:[%s10296_s6 + $0x160] sm:$0xff]  ;;  %v1250_v23 = vld [vmem:[%s10296_s6 + $0x170] sm:$0xff]  ;;  %1247 = vst [vmem:[%s10301_s7 + $0xa8] sm:$0xff] %v1246_v21 }
  0x27   : > { %1249 = vst [vmem:[%s10301_s7 + $0xb0] sm:$0xff] %v1248_v22  ;;  %1251 = vst [vmem:[%s10301_s7 + $0xb8] sm:$0xff] %v1250_v23  ;;  %v1252_v24 = vld [vmem:[%s10296_s6 + $0x180] sm:$0xff]  ;;  %v1254_v25 = vld [vmem:[%s10296_s6 + $0x190] sm:$0xff] }
  0x28   : > { %v1256_v26 = vld [vmem:[%s10296_s6 + $0x1a0] sm:$0xff]  ;;  %1253 = vst [vmem:[%s10301_s7 + $0xc0] sm:$0xff] %v1252_v24  ;;  %1255 = vst [vmem:[%s10301_s7 + $0xc8] sm:$0xff] %v1254_v25  ;;  %v1258_v27 = vld [vmem:[%s10296_s6 + $0x1b0] sm:$0xff] }
  0x29   : > { %1257 = vst [vmem:[%s10301_s7 + $0xd0] sm:$0xff] %v1256_v26  ;;  %v1260_v28 = vld [vmem:[%s10296_s6 + $0x1c0] sm:$0xff]  ;;  %v1262_v29 = vld [vmem:[%s10296_s6 + $0x1d0] sm:$0xff]  ;;  %1259 = vst [vmem:[%s10301_s7 + $0xd8] sm:$0xff] %v1258_v27 }
  0x2a   : > { %1261 = vst [vmem:[%s10301_s7 + $0xe0] sm:$0xff] %v1260_v28  ;;  %1263 = vst [vmem:[%s10301_s7 + $0xe8] sm:$0xff] %v1262_v29  ;;  %v1264_v30 = vld [vmem:[%s10296_s6 + $0x1e0] sm:$0xff]  ;;  %v1266_v31 = vld [vmem:[%s10296_s6 + $0x1f0] sm:$0xff] }
  0x2b   : > { %v1268_v32 = vld [vmem:[%s10296_s6 + $0x200] sm:$0xff]  ;;  %1265 = vst [vmem:[%s10301_s7 + $0xf0] sm:$0xff] %v1264_v30  ;;  %1267 = vst [vmem:[%s10301_s7 + $0xf8] sm:$0xff] %v1266_v31  ;;  %v1270_v33 = vld [vmem:[%s10296_s6 + $0x210] sm:$0xff] }
  0x2c   : > { %1269 = vst [vmem:[%s10301_s7 + $0x100] sm:$0xff] %v1268_v32  ;;  %v1272_v34 = vld [vmem:[%s10296_s6 + $0x220] sm:$0xff]  ;;  %v1274_v35 = vld [vmem:[%s10296_s6 + $0x230] sm:$0xff]  ;;  %1271 = vst [vmem:[%s10301_s7 + $0x108] sm:$0xff] %v1270_v33 }
  0x2d   : > { %1273 = vst [vmem:[%s10301_s7 + $0x110] sm:$0xff] %v1272_v34  ;;  %1275 = vst [vmem:[%s10301_s7 + $0x118] sm:$0xff] %v1274_v35  ;;  %v1276_v36 = vld [vmem:[%s10296_s6 + $0x240] sm:$0xff]  ;;  %v1278_v37 = vld [vmem:[%s10296_s6 + $0x250] sm:$0xff] }
  0x2e   : > { %v1280_v38 = vld [vmem:[%s10296_s6 + $0x260] sm:$0xff]  ;;  %1277 = vst [vmem:[%s10301_s7 + $0x120] sm:$0xff] %v1276_v36  ;;  %1279 = vst [vmem:[%s10301_s7 + $0x128] sm:$0xff] %v1278_v37  ;;  %v1282_v39 = vld [vmem:[%s10296_s6 + $0x270] sm:$0xff] }
  0x2f   : > { %1281 = vst [vmem:[%s10301_s7 + $0x130] sm:$0xff] %v1280_v38  ;;  %v1284_v40 = vld [vmem:[%s10296_s6 + $0x280] sm:$0xff]  ;;  %v1286_v41 = vld [vmem:[%s10296_s6 + $0x290] sm:$0xff]  ;;  %1283 = vst [vmem:[%s10301_s7 + $0x138] sm:$0xff] %v1282_v39 }
  0x30   : > { %1285 = vst [vmem:[%s10301_s7 + $0x140] sm:$0xff] %v1284_v40  ;;  %1287 = vst [vmem:[%s10301_s7 + $0x148] sm:$0xff] %v1286_v41  ;;  %v1288_v42 = vld [vmem:[%s10296_s6 + $0x2a0] sm:$0xff]  ;;  %v1290_v43 = vld [vmem:[%s10296_s6 + $0x2b0] sm:$0xff] }
  0x31   : > { %v1292_v44 = vld [vmem:[%s10296_s6 + $0x2c0] sm:$0xff]  ;;  %1289 = vst [vmem:[%s10301_s7 + $0x150] sm:$0xff] %v1288_v42  ;;  %1291 = vst [vmem:[%s10301_s7 + $0x158] sm:$0xff] %v1290_v43  ;;  %v1294_v45 = vld [vmem:[%s10296_s6 + $0x2d0] sm:$0xff] }
  0x32   : > { %1293 = vst [vmem:[%s10301_s7 + $0x160] sm:$0xff] %v1292_v44  ;;  %v1296_v46 = vld [vmem:[%s10296_s6 + $0x2e0] sm:$0xff]  ;;  %v1298_v47 = vld [vmem:[%s10296_s6 + $0x2f0] sm:$0xff]  ;;  %1295 = vst [vmem:[%s10301_s7 + $0x168] sm:$0xff] %v1294_v45 }
  0x33   : > { %1297 = vst [vmem:[%s10301_s7 + $0x170] sm:$0xff] %v1296_v46  ;;  %1299 = vst [vmem:[%s10301_s7 + $0x178] sm:$0xff] %v1298_v47  ;;  %v1300_v48 = vld [vmem:[%s10296_s6 + $0x300] sm:$0xff]  ;;  %v1302_v49 = vld [vmem:[%s10296_s6 + $0x310] sm:$0xff] }
  0x34   : > { %v1304_v50 = vld [vmem:[%s10296_s6 + $0x320] sm:$0xff]  ;;  %1301 = vst [vmem:[%s10301_s7 + $0x180] sm:$0xff] %v1300_v48  ;;  %1303 = vst [vmem:[%s10301_s7 + $0x188] sm:$0xff] %v1302_v49  ;;  %v1306_v51 = vld [vmem:[%s10296_s6 + $0x330] sm:$0xff] }
  0x35   : > { %1305 = vst [vmem:[%s10301_s7 + $0x190] sm:$0xff] %v1304_v50  ;;  %v1308_v52 = vld [vmem:[%s10296_s6 + $0x340] sm:$0xff]  ;;  %v1310_v53 = vld [vmem:[%s10296_s6 + $0x350] sm:$0xff]  ;;  %1307 = vst [vmem:[%s10301_s7 + $0x198] sm:$0xff] %v1306_v51 }
  0x36   : > { %1309 = vst [vmem:[%s10301_s7 + $0x1a0] sm:$0xff] %v1308_v52  ;;  %1311 = vst [vmem:[%s10301_s7 + $0x1a8] sm:$0xff] %v1310_v53  ;;  %v1312_v54 = vld [vmem:[%s10296_s6 + $0x360] sm:$0xff]  ;;  %v1314_v55 = vld [vmem:[%s10296_s6 + $0x370] sm:$0xff] }
  0x37   : > { %v1316_v56 = vld [vmem:[%s10296_s6 + $0x380] sm:$0xff]  ;;  %1313 = vst [vmem:[%s10301_s7 + $0x1b0] sm:$0xff] %v1312_v54  ;;  %1315 = vst [vmem:[%s10301_s7 + $0x1b8] sm:$0xff] %v1314_v55  ;;  %v1318_v57 = vld [vmem:[%s10296_s6 + $0x390] sm:$0xff] }
  0x38   : > { %1317 = vst [vmem:[%s10301_s7 + $0x1c0] sm:$0xff] %v1316_v56  ;;  %v1320_v58 = vld [vmem:[%s10296_s6 + $0x3a0] sm:$0xff]  ;;  %v1322_v59 = vld [vmem:[%s10296_s6 + $0x3b0] sm:$0xff]  ;;  %1319 = vst [vmem:[%s10301_s7 + $0x1c8] sm:$0xff] %v1318_v57 }
  0x39   : > { %1321 = vst [vmem:[%s10301_s7 + $0x1d0] sm:$0xff] %v1320_v58  ;;  %1323 = vst [vmem:[%s10301_s7 + $0x1d8] sm:$0xff] %v1322_v59  ;;  %v1324_v60 = vld [vmem:[%s10296_s6 + $0x3c0] sm:$0xff]  ;;  %v1326_v61 = vld [vmem:[%s10296_s6 + $0x3d0] sm:$0xff] }
  0x3a   : > { %v1328_v62 = vld [vmem:[%s10296_s6 + $0x3e0] sm:$0xff]  ;;  %1325 = vst [vmem:[%s10301_s7 + $0x1e0] sm:$0xff] %v1324_v60  ;;  %1327 = vst [vmem:[%s10301_s7 + $0x1e8] sm:$0xff] %v1326_v61  ;;  %v1330_v63 = vld [vmem:[%s10296_s6 + $0x3f0] sm:$0xff] }
  0x3b   : > { %1329 = vst [vmem:[%s10301_s7 + $0x1f0] sm:$0xff] %v1328_v62  ;;  %v1332_v0 = vld [vmem:[%s10296_s6 + $0x400] sm:$0xff]  ;;  %v1334_v1 = vld [vmem:[%s10296_s6 + $0x410] sm:$0xff]  ;;  %1331 = vst [vmem:[%s10301_s7 + $0x1f8] sm:$0xff] %v1330_v63 }
  0x3c   : > { %1333 = vst [vmem:[%s10301_s7 + $0x200] sm:$0xff] %v1332_v0  ;;  %1335 = vst [vmem:[%s10301_s7 + $0x208] sm:$0xff] %v1334_v1  ;;  %v1336_v2 = vld [vmem:[%s10296_s6 + $0x420] sm:$0xff]  ;;  %v1338_v3 = vld [vmem:[%s10296_s6 + $0x430] sm:$0xff] }
  0x3d   : > { %v1340_v4 = vld [vmem:[%s10296_s6 + $0x440] sm:$0xff]  ;;  %1337 = vst [vmem:[%s10301_s7 + $0x210] sm:$0xff] %v1336_v2  ;;  %1339 = vst [vmem:[%s10301_s7 + $0x218] sm:$0xff] %v1338_v3  ;;  %v1342_v5 = vld [vmem:[%s10296_s6 + $0x450] sm:$0xff] }
  0x3e   : > { %1341 = vst [vmem:[%s10301_s7 + $0x220] sm:$0xff] %v1340_v4  ;;  %v1344_v6 = vld [vmem:[%s10296_s6 + $0x460] sm:$0xff]  ;;  %v1346_v7 = vld [vmem:[%s10296_s6 + $0x470] sm:$0xff]  ;;  %1343 = vst [vmem:[%s10301_s7 + $0x228] sm:$0xff] %v1342_v5 }
  0x3f   : > { %1345 = vst [vmem:[%s10301_s7 + $0x230] sm:$0xff] %v1344_v6  ;;  %1347 = vst [vmem:[%s10301_s7 + $0x238] sm:$0xff] %v1346_v7  ;;  %v1348_v8 = vld [vmem:[%s10296_s6 + $0x480] sm:$0xff]  ;;  %v1350_v9 = vld [vmem:[%s10296_s6 + $0x490] sm:$0xff] }
  0x40   : > { %v1352_v10 = vld [vmem:[%s10296_s6 + $0x4a0] sm:$0xff]  ;;  %1349 = vst [vmem:[%s10301_s7 + $0x240] sm:$0xff] %v1348_v8  ;;  %1351 = vst [vmem:[%s10301_s7 + $0x248] sm:$0xff] %v1350_v9  ;;  %v1354_v11 = vld [vmem:[%s10296_s6 + $0x4b0] sm:$0xff] }
  0x41   : > { %1353 = vst [vmem:[%s10301_s7 + $0x250] sm:$0xff] %v1352_v10  ;;  %v1356_v12 = vld [vmem:[%s10296_s6 + $0x4c0] sm:$0xff]  ;;  %v1358_v13 = vld [vmem:[%s10296_s6 + $0x4d0] sm:$0xff]  ;;  %1355 = vst [vmem:[%s10301_s7 + $0x258] sm:$0xff] %v1354_v11 }
  0x42   : > { %1357 = vst [vmem:[%s10301_s7 + $0x260] sm:$0xff] %v1356_v12  ;;  %1359 = vst [vmem:[%s10301_s7 + $0x268] sm:$0xff] %v1358_v13  ;;  %v1360_v14 = vld [vmem:[%s10296_s6 + $0x4e0] sm:$0xff]  ;;  %v1362_v15 = vld [vmem:[%s10296_s6 + $0x4f0] sm:$0xff] }
  0x43   : > { %v1364_v16 = vld [vmem:[%s10296_s6 + $0x500] sm:$0xff]  ;;  %1361 = vst [vmem:[%s10301_s7 + $0x270] sm:$0xff] %v1360_v14  ;;  %1363 = vst [vmem:[%s10301_s7 + $0x278] sm:$0xff] %v1362_v15  ;;  %v1366_v17 = vld [vmem:[%s10296_s6 + $0x510] sm:$0xff] }
  0x44   : > { %1365 = vst [vmem:[%s10301_s7 + $0x280] sm:$0xff] %v1364_v16  ;;  %v1368_v18 = vld [vmem:[%s10296_s6 + $0x520] sm:$0xff]  ;;  %v1370_v19 = vld [vmem:[%s10296_s6 + $0x530] sm:$0xff]  ;;  %1367 = vst [vmem:[%s10301_s7 + $0x288] sm:$0xff] %v1366_v17 }
  0x45   : > { %1369 = vst [vmem:[%s10301_s7 + $0x290] sm:$0xff] %v1368_v18  ;;  %1371 = vst [vmem:[%s10301_s7 + $0x298] sm:$0xff] %v1370_v19  ;;  %v1372_v20 = vld [vmem:[%s10296_s6 + $0x540] sm:$0xff]  ;;  %v1374_v21 = vld [vmem:[%s10296_s6 + $0x550] sm:$0xff] }
  0x46   : > { %v1376_v22 = vld [vmem:[%s10296_s6 + $0x560] sm:$0xff]  ;;  %1373 = vst [vmem:[%s10301_s7 + $0x2a0] sm:$0xff] %v1372_v20  ;;  %1375 = vst [vmem:[%s10301_s7 + $0x2a8] sm:$0xff] %v1374_v21  ;;  %v1378_v23 = vld [vmem:[%s10296_s6 + $0x570] sm:$0xff] }
  0x47   : > { %1377 = vst [vmem:[%s10301_s7 + $0x2b0] sm:$0xff] %v1376_v22  ;;  %v1380_v24 = vld [vmem:[%s10296_s6 + $0x580] sm:$0xff]  ;;  %v1382_v25 = vld [vmem:[%s10296_s6 + $0x590] sm:$0xff]  ;;  %1379 = vst [vmem:[%s10301_s7 + $0x2b8] sm:$0xff] %v1378_v23 }
  0x48   : > { %1381 = vst [vmem:[%s10301_s7 + $0x2c0] sm:$0xff] %v1380_v24  ;;  %1383 = vst [vmem:[%s10301_s7 + $0x2c8] sm:$0xff] %v1382_v25  ;;  %v1384_v26 = vld [vmem:[%s10296_s6 + $0x5a0] sm:$0xff]  ;;  %v1386_v27 = vld [vmem:[%s10296_s6 + $0x5b0] sm:$0xff] }
  0x49   : > { %v1388_v28 = vld [vmem:[%s10296_s6 + $0x5c0] sm:$0xff]  ;;  %1385 = vst [vmem:[%s10301_s7 + $0x2d0] sm:$0xff] %v1384_v26  ;;  %1387 = vst [vmem:[%s10301_s7 + $0x2d8] sm:$0xff] %v1386_v27  ;;  %v1390_v29 = vld [vmem:[%s10296_s6 + $0x5d0] sm:$0xff] }
  0x4a   : > { %1389 = vst [vmem:[%s10301_s7 + $0x2e0] sm:$0xff] %v1388_v28  ;;  %v1392_v30 = vld [vmem:[%s10296_s6 + $0x5e0] sm:$0xff]  ;;  %v1394_v31 = vld [vmem:[%s10296_s6 + $0x5f0] sm:$0xff]  ;;  %1391 = vst [vmem:[%s10301_s7 + $0x2e8] sm:$0xff] %v1390_v29 }
  0x4b   : > { %1393 = vst [vmem:[%s10301_s7 + $0x2f0] sm:$0xff] %v1392_v30  ;;  %1395 = vst [vmem:[%s10301_s7 + $0x2f8] sm:$0xff] %v1394_v31  ;;  %v1396_v32 = vld [vmem:[%s10296_s6 + $0x600] sm:$0xff]  ;;  %v1398_v33 = vld [vmem:[%s10296_s6 + $0x610] sm:$0xff] }
  0x4c   : > { %v1400_v34 = vld [vmem:[%s10296_s6 + $0x620] sm:$0xff]  ;;  %1397 = vst [vmem:[%s10301_s7 + $0x300] sm:$0xff] %v1396_v32  ;;  %1399 = vst [vmem:[%s10301_s7 + $0x308] sm:$0xff] %v1398_v33  ;;  %v1402_v35 = vld [vmem:[%s10296_s6 + $0x630] sm:$0xff] }
  0x4d   : > { %1401 = vst [vmem:[%s10301_s7 + $0x310] sm:$0xff] %v1400_v34  ;;  %v1404_v36 = vld [vmem:[%s10296_s6 + $0x640] sm:$0xff]  ;;  %v1406_v37 = vld [vmem:[%s10296_s6 + $0x650] sm:$0xff]  ;;  %1403 = vst [vmem:[%s10301_s7 + $0x318] sm:$0xff] %v1402_v35 }
  0x4e   : > { %1405 = vst [vmem:[%s10301_s7 + $0x320] sm:$0xff] %v1404_v36  ;;  %1407 = vst [vmem:[%s10301_s7 + $0x328] sm:$0xff] %v1406_v37  ;;  %v1408_v38 = vld [vmem:[%s10296_s6 + $0x660] sm:$0xff]  ;;  %v1410_v39 = vld [vmem:[%s10296_s6 + $0x670] sm:$0xff] }
  0x4f   : > { %v1412_v40 = vld [vmem:[%s10296_s6 + $0x680] sm:$0xff]  ;;  %1409 = vst [vmem:[%s10301_s7 + $0x330] sm:$0xff] %v1408_v38  ;;  %1411 = vst [vmem:[%s10301_s7 + $0x338] sm:$0xff] %v1410_v39  ;;  %v1414_v41 = vld [vmem:[%s10296_s6 + $0x690] sm:$0xff] }
  0x50   : > { %1413 = vst [vmem:[%s10301_s7 + $0x340] sm:$0xff] %v1412_v40  ;;  %v1416_v42 = vld [vmem:[%s10296_s6 + $0x6a0] sm:$0xff]  ;;  %v1418_v43 = vld [vmem:[%s10296_s6 + $0x6b0] sm:$0xff]  ;;  %1415 = vst [vmem:[%s10301_s7 + $0x348] sm:$0xff] %v1414_v41 }
  0x51   : > { %1417 = vst [vmem:[%s10301_s7 + $0x350] sm:$0xff] %v1416_v42  ;;  %1419 = vst [vmem:[%s10301_s7 + $0x358] sm:$0xff] %v1418_v43  ;;  %v1420_v44 = vld [vmem:[%s10296_s6 + $0x6c0] sm:$0xff]  ;;  %v1422_v45 = vld [vmem:[%s10296_s6 + $0x6d0] sm:$0xff] }
  0x52   : > { %v1424_v46 = vld [vmem:[%s10296_s6 + $0x6e0] sm:$0xff]  ;;  %1421 = vst [vmem:[%s10301_s7 + $0x360] sm:$0xff] %v1420_v44  ;;  %1423 = vst [vmem:[%s10301_s7 + $0x368] sm:$0xff] %v1422_v45  ;;  %v1426_v47 = vld [vmem:[%s10296_s6 + $0x6f0] sm:$0xff] }
  0x53   : > { %1425 = vst [vmem:[%s10301_s7 + $0x370] sm:$0xff] %v1424_v46  ;;  %v1428_v48 = vld [vmem:[%s10296_s6 + $0x700] sm:$0xff]  ;;  %v1430_v49 = vld [vmem:[%s10296_s6 + $0x710] sm:$0xff]  ;;  %1427 = vst [vmem:[%s10301_s7 + $0x378] sm:$0xff] %v1426_v47 }
  0x54   : > { %1429 = vst [vmem:[%s10301_s7 + $0x380] sm:$0xff] %v1428_v48  ;;  %1431 = vst [vmem:[%s10301_s7 + $0x388] sm:$0xff] %v1430_v49  ;;  %v1432_v50 = vld [vmem:[%s10296_s6 + $0x720] sm:$0xff]  ;;  %v1434_v51 = vld [vmem:[%s10296_s6 + $0x730] sm:$0xff] }
  0x55   : > { %v1436_v52 = vld [vmem:[%s10296_s6 + $0x740] sm:$0xff]  ;;  %1433 = vst [vmem:[%s10301_s7 + $0x390] sm:$0xff] %v1432_v50  ;;  %1435 = vst [vmem:[%s10301_s7 + $0x398] sm:$0xff] %v1434_v51  ;;  %v1438_v53 = vld [vmem:[%s10296_s6 + $0x750] sm:$0xff] }
  0x56   : > { %1437 = vst [vmem:[%s10301_s7 + $0x3a0] sm:$0xff] %v1436_v52  ;;  %v1440_v54 = vld [vmem:[%s10296_s6 + $0x760] sm:$0xff]  ;;  %v1442_v55 = vld [vmem:[%s10296_s6 + $0x770] sm:$0xff]  ;;  %1439 = vst [vmem:[%s10301_s7 + $0x3a8] sm:$0xff] %v1438_v53 }
  0x57   : > { %1441 = vst [vmem:[%s10301_s7 + $0x3b0] sm:$0xff] %v1440_v54  ;;  %1443 = vst [vmem:[%s10301_s7 + $0x3b8] sm:$0xff] %v1442_v55  ;;  %v1444_v56 = vld [vmem:[%s10296_s6 + $0x780] sm:$0xff]  ;;  %v1446_v57 = vld [vmem:[%s10296_s6 + $0x790] sm:$0xff] }
  0x58   : > { %v1448_v58 = vld [vmem:[%s10296_s6 + $0x7a0] sm:$0xff]  ;;  %1445 = vst [vmem:[%s10301_s7 + $0x3c0] sm:$0xff] %v1444_v56  ;;  %1447 = vst [vmem:[%s10301_s7 + $0x3c8] sm:$0xff] %v1446_v57  ;;  %v1450_v59 = vld [vmem:[%s10296_s6 + $0x7b0] sm:$0xff] }
  0x59   : > { %1449 = vst [vmem:[%s10301_s7 + $0x3d0] sm:$0xff] %v1448_v58  ;;  %v1452_v60 = vld [vmem:[%s10296_s6 + $0x7c0] sm:$0xff]  ;;  %v1454_v61 = vld [vmem:[%s10296_s6 + $0x7d0] sm:$0xff]  ;;  %1451 = vst [vmem:[%s10301_s7 + $0x3d8] sm:$0xff] %v1450_v59 }
  0x5a   : > { %1453 = vst [vmem:[%s10301_s7 + $0x3e0] sm:$0xff] %v1452_v60  ;;  %1455 = vst [vmem:[%s10301_s7 + $0x3e8] sm:$0xff] %v1454_v61  ;;  %v1456_v62 = vld [vmem:[%s10296_s6 + $0x7e0] sm:$0xff]  ;;  %v1458_v63 = vld [vmem:[%s10296_s6 + $0x7f0] sm:$0xff] }
  0x5b   : > { %v1460_v0 = vld [vmem:[%s10296_s6 + $0x800] sm:$0xff]  ;;  %1457 = vst [vmem:[%s10301_s7 + $0x3f0] sm:$0xff] %v1456_v62  ;;  %1459 = vst [vmem:[%s10301_s7 + $0x3f8] sm:$0xff] %v1458_v63  ;;  %v1462_v1 = vld [vmem:[%s10296_s6 + $0x810] sm:$0xff] }
  0x5c   : > { %1461 = vst [vmem:[%s10301_s7 + $0x400] sm:$0xff] %v1460_v0  ;;  %v1464_v2 = vld [vmem:[%s10296_s6 + $0x820] sm:$0xff]  ;;  %v1466_v3 = vld [vmem:[%s10296_s6 + $0x830] sm:$0xff]  ;;  %1463 = vst [vmem:[%s10301_s7 + $0x408] sm:$0xff] %v1462_v1 }
  0x5d   : > { %1465 = vst [vmem:[%s10301_s7 + $0x410] sm:$0xff] %v1464_v2  ;;  %1467 = vst [vmem:[%s10301_s7 + $0x418] sm:$0xff] %v1466_v3  ;;  %v1468_v4 = vld [vmem:[%s10296_s6 + $0x840] sm:$0xff]  ;;  %v1470_v5 = vld [vmem:[%s10296_s6 + $0x850] sm:$0xff] }
  0x5e   : > { %v1472_v6 = vld [vmem:[%s10296_s6 + $0x860] sm:$0xff]  ;;  %1469 = vst [vmem:[%s10301_s7 + $0x420] sm:$0xff] %v1468_v4  ;;  %1471 = vst [vmem:[%s10301_s7 + $0x428] sm:$0xff] %v1470_v5  ;;  %v1474_v7 = vld [vmem:[%s10296_s6 + $0x870] sm:$0xff] }
  0x5f   : > { %1473 = vst [vmem:[%s10301_s7 + $0x430] sm:$0xff] %v1472_v6  ;;  %v1476_v8 = vld [vmem:[%s10296_s6 + $0x880] sm:$0xff]  ;;  %v1478_v9 = vld [vmem:[%s10296_s6 + $0x890] sm:$0xff]  ;;  %1475 = vst [vmem:[%s10301_s7 + $0x438] sm:$0xff] %v1474_v7 }
  0x60   : > { %1477 = vst [vmem:[%s10301_s7 + $0x440] sm:$0xff] %v1476_v8  ;;  %1479 = vst [vmem:[%s10301_s7 + $0x448] sm:$0xff] %v1478_v9  ;;  %v1480_v10 = vld [vmem:[%s10296_s6 + $0x8a0] sm:$0xff]  ;;  %v1482_v11 = vld [vmem:[%s10296_s6 + $0x8b0] sm:$0xff] }
  0x61   : > { %v1484_v12 = vld [vmem:[%s10296_s6 + $0x8c0] sm:$0xff]  ;;  %1481 = vst [vmem:[%s10301_s7 + $0x450] sm:$0xff] %v1480_v10  ;;  %1483 = vst [vmem:[%s10301_s7 + $0x458] sm:$0xff] %v1482_v11  ;;  %v1486_v13 = vld [vmem:[%s10296_s6 + $0x8d0] sm:$0xff] }
  0x62   : > { %1485 = vst [vmem:[%s10301_s7 + $0x460] sm:$0xff] %v1484_v12  ;;  %v1488_v14 = vld [vmem:[%s10296_s6 + $0x8e0] sm:$0xff]  ;;  %v1490_v15 = vld [vmem:[%s10296_s6 + $0x8f0] sm:$0xff]  ;;  %1487 = vst [vmem:[%s10301_s7 + $0x468] sm:$0xff] %v1486_v13 }
  0x63   : > { %1489 = vst [vmem:[%s10301_s7 + $0x470] sm:$0xff] %v1488_v14  ;;  %1491 = vst [vmem:[%s10301_s7 + $0x478] sm:$0xff] %v1490_v15  ;;  %v1492_v16 = vld [vmem:[%s10296_s6 + $0x900] sm:$0xff]  ;;  %v1494_v17 = vld [vmem:[%s10296_s6 + $0x910] sm:$0xff] }
  0x64   : > { %v1496_v18 = vld [vmem:[%s10296_s6 + $0x920] sm:$0xff]  ;;  %1493 = vst [vmem:[%s10301_s7 + $0x480] sm:$0xff] %v1492_v16  ;;  %1495 = vst [vmem:[%s10301_s7 + $0x488] sm:$0xff] %v1494_v17  ;;  %v1498_v19 = vld [vmem:[%s10296_s6 + $0x930] sm:$0xff] }
  0x65   : > { %1497 = vst [vmem:[%s10301_s7 + $0x490] sm:$0xff] %v1496_v18  ;;  %v1500_v20 = vld [vmem:[%s10296_s6 + $0x940] sm:$0xff]  ;;  %v1502_v21 = vld [vmem:[%s10296_s6 + $0x950] sm:$0xff]  ;;  %1499 = vst [vmem:[%s10301_s7 + $0x498] sm:$0xff] %v1498_v19 }
  0x66   : > { %1501 = vst [vmem:[%s10301_s7 + $0x4a0] sm:$0xff] %v1500_v20  ;;  %1503 = vst [vmem:[%s10301_s7 + $0x4a8] sm:$0xff] %v1502_v21  ;;  %v1504_v22 = vld [vmem:[%s10296_s6 + $0x960] sm:$0xff]  ;;  %v1506_v23 = vld [vmem:[%s10296_s6 + $0x970] sm:$0xff] }
  0x67   : > { %v1508_v24 = vld [vmem:[%s10296_s6 + $0x980] sm:$0xff]  ;;  %1505 = vst [vmem:[%s10301_s7 + $0x4b0] sm:$0xff] %v1504_v22  ;;  %1507 = vst [vmem:[%s10301_s7 + $0x4b8] sm:$0xff] %v1506_v23  ;;  %v1510_v25 = vld [vmem:[%s10296_s6 + $0x990] sm:$0xff] }
  0x68   : > { %1509 = vst [vmem:[%s10301_s7 + $0x4c0] sm:$0xff] %v1508_v24  ;;  %v1512_v26 = vld [vmem:[%s10296_s6 + $0x9a0] sm:$0xff]  ;;  %v1514_v27 = vld [vmem:[%s10296_s6 + $0x9b0] sm:$0xff]  ;;  %1511 = vst [vmem:[%s10301_s7 + $0x4c8] sm:$0xff] %v1510_v25 }
  0x69   : > { %1513 = vst [vmem:[%s10301_s7 + $0x4d0] sm:$0xff] %v1512_v26  ;;  %1515 = vst [vmem:[%s10301_s7 + $0x4d8] sm:$0xff] %v1514_v27  ;;  %v1516_v28 = vld [vmem:[%s10296_s6 + $0x9c0] sm:$0xff]  ;;  %v1518_v29 = vld [vmem:[%s10296_s6 + $0x9d0] sm:$0xff] }
  0x6a   : > { %v1520_v30 = vld [vmem:[%s10296_s6 + $0x9e0] sm:$0xff]  ;;  %1517 = vst [vmem:[%s10301_s7 + $0x4e0] sm:$0xff] %v1516_v28  ;;  %1519 = vst [vmem:[%s10301_s7 + $0x4e8] sm:$0xff] %v1518_v29  ;;  %v1522_v31 = vld [vmem:[%s10296_s6 + $0x9f0] sm:$0xff] }
  0x6b   : > { %1521 = vst [vmem:[%s10301_s7 + $0x4f0] sm:$0xff] %v1520_v30  ;;  %v1524_v32 = vld [vmem:[%s10296_s6 + $0xa00] sm:$0xff]  ;;  %v1526_v33 = vld [vmem:[%s10296_s6 + $0xa10] sm:$0xff]  ;;  %1523 = vst [vmem:[%s10301_s7 + $0x4f8] sm:$0xff] %v1522_v31 }
  0x6c   : > { %1525 = vst [vmem:[%s10301_s7 + $0x500] sm:$0xff] %v1524_v32  ;;  %1527 = vst [vmem:[%s10301_s7 + $0x508] sm:$0xff] %v1526_v33  ;;  %v1528_v34 = vld [vmem:[%s10296_s6 + $0xa20] sm:$0xff]  ;;  %v1530_v35 = vld [vmem:[%s10296_s6 + $0xa30] sm:$0xff] }
  0x6d   : > { %v1532_v36 = vld [vmem:[%s10296_s6 + $0xa40] sm:$0xff]  ;;  %1529 = vst [vmem:[%s10301_s7 + $0x510] sm:$0xff] %v1528_v34  ;;  %1531 = vst [vmem:[%s10301_s7 + $0x518] sm:$0xff] %v1530_v35  ;;  %v1534_v37 = vld [vmem:[%s10296_s6 + $0xa50] sm:$0xff] }
  0x6e   : > { %1533 = vst [vmem:[%s10301_s7 + $0x520] sm:$0xff] %v1532_v36  ;;  %v1536_v38 = vld [vmem:[%s10296_s6 + $0xa60] sm:$0xff]  ;;  %v1538_v39 = vld [vmem:[%s10296_s6 + $0xa70] sm:$0xff]  ;;  %1535 = vst [vmem:[%s10301_s7 + $0x528] sm:$0xff] %v1534_v37 }
  0x6f   : > { %1537 = vst [vmem:[%s10301_s7 + $0x530] sm:$0xff] %v1536_v38  ;;  %1539 = vst [vmem:[%s10301_s7 + $0x538] sm:$0xff] %v1538_v39  ;;  %v1540_v40 = vld [vmem:[%s10296_s6 + $0xa80] sm:$0xff]  ;;  %v1542_v41 = vld [vmem:[%s10296_s6 + $0xa90] sm:$0xff] }
  0x70   : > { %v1544_v42 = vld [vmem:[%s10296_s6 + $0xaa0] sm:$0xff]  ;;  %1541 = vst [vmem:[%s10301_s7 + $0x540] sm:$0xff] %v1540_v40  ;;  %1543 = vst [vmem:[%s10301_s7 + $0x548] sm:$0xff] %v1542_v41  ;;  %v1546_v43 = vld [vmem:[%s10296_s6 + $0xab0] sm:$0xff] }
  0x71   : > { %1545 = vst [vmem:[%s10301_s7 + $0x550] sm:$0xff] %v1544_v42  ;;  %v1548_v44 = vld [vmem:[%s10296_s6 + $0xac0] sm:$0xff]  ;;  %v1550_v45 = vld [vmem:[%s10296_s6 + $0xad0] sm:$0xff]  ;;  %1547 = vst [vmem:[%s10301_s7 + $0x558] sm:$0xff] %v1546_v43 }
  0x72   : > { %1549 = vst [vmem:[%s10301_s7 + $0x560] sm:$0xff] %v1548_v44  ;;  %1551 = vst [vmem:[%s10301_s7 + $0x568] sm:$0xff] %v1550_v45  ;;  %v1552_v46 = vld [vmem:[%s10296_s6 + $0xae0] sm:$0xff]  ;;  %v1554_v47 = vld [vmem:[%s10296_s6 + $0xaf0] sm:$0xff] }
  0x73   : > { %v1556_v48 = vld [vmem:[%s10296_s6 + $0xb00] sm:$0xff]  ;;  %1553 = vst [vmem:[%s10301_s7 + $0x570] sm:$0xff] %v1552_v46  ;;  %1555 = vst [vmem:[%s10301_s7 + $0x578] sm:$0xff] %v1554_v47  ;;  %v1558_v49 = vld [vmem:[%s10296_s6 + $0xb10] sm:$0xff] }
  0x74   : > { %1557 = vst [vmem:[%s10301_s7 + $0x580] sm:$0xff] %v1556_v48  ;;  %v1560_v50 = vld [vmem:[%s10296_s6 + $0xb20] sm:$0xff]  ;;  %v1562_v51 = vld [vmem:[%s10296_s6 + $0xb30] sm:$0xff]  ;;  %1559 = vst [vmem:[%s10301_s7 + $0x588] sm:$0xff] %v1558_v49 }
  0x75   : > { %1561 = vst [vmem:[%s10301_s7 + $0x590] sm:$0xff] %v1560_v50  ;;  %1563 = vst [vmem:[%s10301_s7 + $0x598] sm:$0xff] %v1562_v51  ;;  %v1564_v52 = vld [vmem:[%s10296_s6 + $0xb40] sm:$0xff]  ;;  %v1566_v53 = vld [vmem:[%s10296_s6 + $0xb50] sm:$0xff] }
  0x76   : > { %v1568_v54 = vld [vmem:[%s10296_s6 + $0xb60] sm:$0xff]  ;;  %1565 = vst [vmem:[%s10301_s7 + $0x5a0] sm:$0xff] %v1564_v52  ;;  %1567 = vst [vmem:[%s10301_s7 + $0x5a8] sm:$0xff] %v1566_v53  ;;  %v1570_v55 = vld [vmem:[%s10296_s6 + $0xb70] sm:$0xff] }
  0x77   : > { %1569 = vst [vmem:[%s10301_s7 + $0x5b0] sm:$0xff] %v1568_v54  ;;  %v1572_v56 = vld [vmem:[%s10296_s6 + $0xb80] sm:$0xff]  ;;  %v1574_v57 = vld [vmem:[%s10296_s6 + $0xb90] sm:$0xff]  ;;  %1571 = vst [vmem:[%s10301_s7 + $0x5b8] sm:$0xff] %v1570_v55 }
  0x78   : > { %1573 = vst [vmem:[%s10301_s7 + $0x5c0] sm:$0xff] %v1572_v56  ;;  %1575 = vst [vmem:[%s10301_s7 + $0x5c8] sm:$0xff] %v1574_v57  ;;  %v1576_v58 = vld [vmem:[%s10296_s6 + $0xba0] sm:$0xff]  ;;  %v1578_v59 = vld [vmem:[%s10296_s6 + $0xbb0] sm:$0xff] }
  0x79   : > { %v1580_v60 = vld [vmem:[%s10296_s6 + $0xbc0] sm:$0xff]  ;;  %1577 = vst [vmem:[%s10301_s7 + $0x5d0] sm:$0xff] %v1576_v58  ;;  %1579 = vst [vmem:[%s10301_s7 + $0x5d8] sm:$0xff] %v1578_v59  ;;  %v1582_v61 = vld [vmem:[%s10296_s6 + $0xbd0] sm:$0xff] }
  0x7a   : > { %1581 = vst [vmem:[%s10301_s7 + $0x5e0] sm:$0xff] %v1580_v60  ;;  %v1584_v62 = vld [vmem:[%s10296_s6 + $0xbe0] sm:$0xff]  ;;  %v1586_v63 = vld [vmem:[%s10296_s6 + $0xbf0] sm:$0xff]  ;;  %1583 = vst [vmem:[%s10301_s7 + $0x5e8] sm:$0xff] %v1582_v61 }
  0x7b   : > { %1585 = vst [vmem:[%s10301_s7 + $0x5f0] sm:$0xff] %v1584_v62  ;;  %1587 = vst [vmem:[%s10301_s7 + $0x5f8] sm:$0xff] %v1586_v63  ;;  %v1588_v0 = vld [vmem:[%s10296_s6 + $0xc00] sm:$0xff]  ;;  %v1590_v1 = vld [vmem:[%s10296_s6 + $0xc10] sm:$0xff] }
  0x7c   : > { %v1592_v2 = vld [vmem:[%s10296_s6 + $0xc20] sm:$0xff]  ;;  %1589 = vst [vmem:[%s10301_s7 + $0x600] sm:$0xff] %v1588_v0  ;;  %1591 = vst [vmem:[%s10301_s7 + $0x608] sm:$0xff] %v1590_v1  ;;  %v1594_v3 = vld [vmem:[%s10296_s6 + $0xc30] sm:$0xff] }
  0x7d   : > { %1593 = vst [vmem:[%s10301_s7 + $0x610] sm:$0xff] %v1592_v2  ;;  %v1596_v4 = vld [vmem:[%s10296_s6 + $0xc40] sm:$0xff]  ;;  %v1598_v5 = vld [vmem:[%s10296_s6 + $0xc50] sm:$0xff]  ;;  %1595 = vst [vmem:[%s10301_s7 + $0x618] sm:$0xff] %v1594_v3 }
  0x7e   : > { %1597 = vst [vmem:[%s10301_s7 + $0x620] sm:$0xff] %v1596_v4  ;;  %1599 = vst [vmem:[%s10301_s7 + $0x628] sm:$0xff] %v1598_v5  ;;  %v1600_v6 = vld [vmem:[%s10296_s6 + $0xc60] sm:$0xff]  ;;  %v1602_v7 = vld [vmem:[%s10296_s6 + $0xc70] sm:$0xff] }
  0x7f   : > { %v1604_v8 = vld [vmem:[%s10296_s6 + $0xc80] sm:$0xff]  ;;  %1601 = vst [vmem:[%s10301_s7 + $0x630] sm:$0xff] %v1600_v6  ;;  %1603 = vst [vmem:[%s10301_s7 + $0x638] sm:$0xff] %v1602_v7  ;;  %v1606_v9 = vld [vmem:[%s10296_s6 + $0xc90] sm:$0xff] }
  0x80   : > { %1605 = vst [vmem:[%s10301_s7 + $0x640] sm:$0xff] %v1604_v8  ;;  %v1608_v10 = vld [vmem:[%s10296_s6 + $0xca0] sm:$0xff]  ;;  %v1610_v11 = vld [vmem:[%s10296_s6 + $0xcb0] sm:$0xff]  ;;  %1607 = vst [vmem:[%s10301_s7 + $0x648] sm:$0xff] %v1606_v9 }
  0x81   : > { %1609 = vst [vmem:[%s10301_s7 + $0x650] sm:$0xff] %v1608_v10  ;;  %1611 = vst [vmem:[%s10301_s7 + $0x658] sm:$0xff] %v1610_v11  ;;  %v1612_v12 = vld [vmem:[%s10296_s6 + $0xcc0] sm:$0xff]  ;;  %v1614_v13 = vld [vmem:[%s10296_s6 + $0xcd0] sm:$0xff] }
  0x82   : > { %v1616_v14 = vld [vmem:[%s10296_s6 + $0xce0] sm:$0xff]  ;;  %1613 = vst [vmem:[%s10301_s7 + $0x660] sm:$0xff] %v1612_v12  ;;  %1615 = vst [vmem:[%s10301_s7 + $0x668] sm:$0xff] %v1614_v13  ;;  %v1618_v15 = vld [vmem:[%s10296_s6 + $0xcf0] sm:$0xff] }
  0x83   : > { %1617 = vst [vmem:[%s10301_s7 + $0x670] sm:$0xff] %v1616_v14  ;;  %v1620_v16 = vld [vmem:[%s10296_s6 + $0xd00] sm:$0xff]  ;;  %v1622_v17 = vld [vmem:[%s10296_s6 + $0xd10] sm:$0xff]  ;;  %1619 = vst [vmem:[%s10301_s7 + $0x678] sm:$0xff] %v1618_v15 }
  0x84   : > { %1621 = vst [vmem:[%s10301_s7 + $0x680] sm:$0xff] %v1620_v16  ;;  %1623 = vst [vmem:[%s10301_s7 + $0x688] sm:$0xff] %v1622_v17  ;;  %v1624_v18 = vld [vmem:[%s10296_s6 + $0xd20] sm:$0xff]  ;;  %v1626_v19 = vld [vmem:[%s10296_s6 + $0xd30] sm:$0xff] }
  0x85   : > { %v1628_v20 = vld [vmem:[%s10296_s6 + $0xd40] sm:$0xff]  ;;  %1625 = vst [vmem:[%s10301_s7 + $0x690] sm:$0xff] %v1624_v18  ;;  %1627 = vst [vmem:[%s10301_s7 + $0x698] sm:$0xff] %v1626_v19  ;;  %v1630_v21 = vld [vmem:[%s10296_s6 + $0xd50] sm:$0xff] }
  0x86   : > { %1629 = vst [vmem:[%s10301_s7 + $0x6a0] sm:$0xff] %v1628_v20  ;;  %v1632_v22 = vld [vmem:[%s10296_s6 + $0xd60] sm:$0xff]  ;;  %v1634_v23 = vld [vmem:[%s10296_s6 + $0xd70] sm:$0xff]  ;;  %1631 = vst [vmem:[%s10301_s7 + $0x6a8] sm:$0xff] %v1630_v21 }
  0x87   : > { %1633 = vst [vmem:[%s10301_s7 + $0x6b0] sm:$0xff] %v1632_v22  ;;  %1635 = vst [vmem:[%s10301_s7 + $0x6b8] sm:$0xff] %v1634_v23  ;;  %v1636_v24 = vld [vmem:[%s10296_s6 + $0xd80] sm:$0xff]  ;;  %v1638_v25 = vld [vmem:[%s10296_s6 + $0xd90] sm:$0xff] }
  0x88   : > { %v1640_v26 = vld [vmem:[%s10296_s6 + $0xda0] sm:$0xff]  ;;  %1637 = vst [vmem:[%s10301_s7 + $0x6c0] sm:$0xff] %v1636_v24  ;;  %1639 = vst [vmem:[%s10301_s7 + $0x6c8] sm:$0xff] %v1638_v25  ;;  %v1642_v27 = vld [vmem:[%s10296_s6 + $0xdb0] sm:$0xff] }
  0x89   : > { %1641 = vst [vmem:[%s10301_s7 + $0x6d0] sm:$0xff] %v1640_v26  ;;  %v1644_v28 = vld [vmem:[%s10296_s6 + $0xdc0] sm:$0xff]  ;;  %v1646_v29 = vld [vmem:[%s10296_s6 + $0xdd0] sm:$0xff]  ;;  %1643 = vst [vmem:[%s10301_s7 + $0x6d8] sm:$0xff] %v1642_v27 }
  0x8a   : > { %1645 = vst [vmem:[%s10301_s7 + $0x6e0] sm:$0xff] %v1644_v28  ;;  %1647 = vst [vmem:[%s10301_s7 + $0x6e8] sm:$0xff] %v1646_v29  ;;  %v1648_v30 = vld [vmem:[%s10296_s6 + $0xde0] sm:$0xff]  ;;  %v1650_v31 = vld [vmem:[%s10296_s6 + $0xdf0] sm:$0xff] }
  0x8b   : > { %v1652_v32 = vld [vmem:[%s10296_s6 + $0xe00] sm:$0xff]  ;;  %1649 = vst [vmem:[%s10301_s7 + $0x6f0] sm:$0xff] %v1648_v30  ;;  %1651 = vst [vmem:[%s10301_s7 + $0x6f8] sm:$0xff] %v1650_v31  ;;  %v1654_v33 = vld [vmem:[%s10296_s6 + $0xe10] sm:$0xff] }
  0x8c   : > { %1653 = vst [vmem:[%s10301_s7 + $0x700] sm:$0xff] %v1652_v32  ;;  %v1656_v34 = vld [vmem:[%s10296_s6 + $0xe20] sm:$0xff]  ;;  %v1658_v35 = vld [vmem:[%s10296_s6 + $0xe30] sm:$0xff]  ;;  %1655 = vst [vmem:[%s10301_s7 + $0x708] sm:$0xff] %v1654_v33 }
  0x8d   : > { %1657 = vst [vmem:[%s10301_s7 + $0x710] sm:$0xff] %v1656_v34  ;;  %1659 = vst [vmem:[%s10301_s7 + $0x718] sm:$0xff] %v1658_v35  ;;  %v1660_v36 = vld [vmem:[%s10296_s6 + $0xe40] sm:$0xff]  ;;  %v1662_v37 = vld [vmem:[%s10296_s6 + $0xe50] sm:$0xff] }
  0x8e   : > { %v1664_v38 = vld [vmem:[%s10296_s6 + $0xe60] sm:$0xff]  ;;  %1661 = vst [vmem:[%s10301_s7 + $0x720] sm:$0xff] %v1660_v36  ;;  %1663 = vst [vmem:[%s10301_s7 + $0x728] sm:$0xff] %v1662_v37  ;;  %v1666_v39 = vld [vmem:[%s10296_s6 + $0xe70] sm:$0xff] }
  0x8f   : > { %1665 = vst [vmem:[%s10301_s7 + $0x730] sm:$0xff] %v1664_v38  ;;  %v1668_v40 = vld [vmem:[%s10296_s6 + $0xe80] sm:$0xff]  ;;  %v1670_v41 = vld [vmem:[%s10296_s6 + $0xe90] sm:$0xff]  ;;  %1667 = vst [vmem:[%s10301_s7 + $0x738] sm:$0xff] %v1666_v39 }
  0x90   : > { %1669 = vst [vmem:[%s10301_s7 + $0x740] sm:$0xff] %v1668_v40  ;;  %1671 = vst [vmem:[%s10301_s7 + $0x748] sm:$0xff] %v1670_v41  ;;  %v1672_v42 = vld [vmem:[%s10296_s6 + $0xea0] sm:$0xff]  ;;  %v1674_v43 = vld [vmem:[%s10296_s6 + $0xeb0] sm:$0xff] }
  0x91   : > { %v1676_v44 = vld [vmem:[%s10296_s6 + $0xec0] sm:$0xff]  ;;  %1673 = vst [vmem:[%s10301_s7 + $0x750] sm:$0xff] %v1672_v42  ;;  %1675 = vst [vmem:[%s10301_s7 + $0x758] sm:$0xff] %v1674_v43  ;;  %v1678_v45 = vld [vmem:[%s10296_s6 + $0xed0] sm:$0xff] }
  0x92   : > { %1677 = vst [vmem:[%s10301_s7 + $0x760] sm:$0xff] %v1676_v44  ;;  %v1680_v46 = vld [vmem:[%s10296_s6 + $0xee0] sm:$0xff]  ;;  %v1682_v47 = vld [vmem:[%s10296_s6 + $0xef0] sm:$0xff]  ;;  %1679 = vst [vmem:[%s10301_s7 + $0x768] sm:$0xff] %v1678_v45 }
  0x93   : > { %1681 = vst [vmem:[%s10301_s7 + $0x770] sm:$0xff] %v1680_v46  ;;  %1683 = vst [vmem:[%s10301_s7 + $0x778] sm:$0xff] %v1682_v47  ;;  %v1684_v48 = vld [vmem:[%s10296_s6 + $0xf00] sm:$0xff]  ;;  %v1686_v49 = vld [vmem:[%s10296_s6 + $0xf10] sm:$0xff] }
  0x94   : > { %v1688_v50 = vld [vmem:[%s10296_s6 + $0xf20] sm:$0xff]  ;;  %1685 = vst [vmem:[%s10301_s7 + $0x780] sm:$0xff] %v1684_v48  ;;  %1687 = vst [vmem:[%s10301_s7 + $0x788] sm:$0xff] %v1686_v49  ;;  %v1690_v51 = vld [vmem:[%s10296_s6 + $0xf30] sm:$0xff] }
  0x95   : > { %1689 = vst [vmem:[%s10301_s7 + $0x790] sm:$0xff] %v1688_v50  ;;  %v1692_v52 = vld [vmem:[%s10296_s6 + $0xf40] sm:$0xff]  ;;  %v1694_v53 = vld [vmem:[%s10296_s6 + $0xf50] sm:$0xff]  ;;  %1691 = vst [vmem:[%s10301_s7 + $0x798] sm:$0xff] %v1690_v51 }
  0x96   : > { %1693 = vst [vmem:[%s10301_s7 + $0x7a0] sm:$0xff] %v1692_v52  ;;  %1695 = vst [vmem:[%s10301_s7 + $0x7a8] sm:$0xff] %v1694_v53  ;;  %v1696_v54 = vld [vmem:[%s10296_s6 + $0xf60] sm:$0xff]  ;;  %v1698_v55 = vld [vmem:[%s10296_s6 + $0xf70] sm:$0xff] }
  0x97   : > { %v1700_v56 = vld [vmem:[%s10296_s6 + $0xf80] sm:$0xff]  ;;  %1697 = vst [vmem:[%s10301_s7 + $0x7b0] sm:$0xff] %v1696_v54  ;;  %1699 = vst [vmem:[%s10301_s7 + $0x7b8] sm:$0xff] %v1698_v55  ;;  %v1702_v57 = vld [vmem:[%s10296_s6 + $0xf90] sm:$0xff] }
  0x98   : > { %1701 = vst [vmem:[%s10301_s7 + $0x7c0] sm:$0xff] %v1700_v56  ;;  %v1704_v58 = vld [vmem:[%s10296_s6 + $0xfa0] sm:$0xff]  ;;  %v1706_v59 = vld [vmem:[%s10296_s6 + $0xfb0] sm:$0xff]  ;;  %1703 = vst [vmem:[%s10301_s7 + $0x7c8] sm:$0xff] %v1702_v57 }
  0x99   : > { %1705 = vst [vmem:[%s10301_s7 + $0x7d0] sm:$0xff] %v1704_v58  ;;  %1707 = vst [vmem:[%s10301_s7 + $0x7d8] sm:$0xff] %v1706_v59  ;;  %v1708_v60 = vld [vmem:[%s10296_s6 + $0xfc0] sm:$0xff]  ;;  %v1710_v61 = vld [vmem:[%s10296_s6 + $0xfd0] sm:$0xff] }
  0x9a   : > { %v1712_v62 = vld [vmem:[%s10296_s6 + $0xfe0] sm:$0xff]  ;;  %1709 = vst [vmem:[%s10301_s7 + $0x7e0] sm:$0xff] %v1708_v60  ;;  %1711 = vst [vmem:[%s10301_s7 + $0x7e8] sm:$0xff] %v1710_v61  ;;  %v1714_v63 = vld [vmem:[%s10296_s6 + $0xff0] sm:$0xff] }
  0x9b   : > { %1713 = vst [vmem:[%s10301_s7 + $0x7f0] sm:$0xff] %v1712_v62  ;;  %v1716_v0 = vld [vmem:[%s10296_s6 + $0x1000] sm:$0xff]  ;;  %v1718_v1 = vld [vmem:[%s10296_s6 + $0x1010] sm:$0xff]  ;;  %1715 = vst [vmem:[%s10301_s7 + $0x7f8] sm:$0xff] %v1714_v63 }
  0x9c   : > { %1717 = vst [vmem:[%s10301_s7 + $0x800] sm:$0xff] %v1716_v0  ;;  %1719 = vst [vmem:[%s10301_s7 + $0x808] sm:$0xff] %v1718_v1  ;;  %v1720_v2 = vld [vmem:[%s10296_s6 + $0x1020] sm:$0xff]  ;;  %v1722_v3 = vld [vmem:[%s10296_s6 + $0x1030] sm:$0xff] }
  0x9d   : > { %v1724_v4 = vld [vmem:[%s10296_s6 + $0x1040] sm:$0xff]  ;;  %1721 = vst [vmem:[%s10301_s7 + $0x810] sm:$0xff] %v1720_v2  ;;  %1723 = vst [vmem:[%s10301_s7 + $0x818] sm:$0xff] %v1722_v3  ;;  %v1726_v5 = vld [vmem:[%s10296_s6 + $0x1050] sm:$0xff] }
  0x9e   : > { %1725 = vst [vmem:[%s10301_s7 + $0x820] sm:$0xff] %v1724_v4  ;;  %v1728_v6 = vld [vmem:[%s10296_s6 + $0x1060] sm:$0xff]  ;;  %v1730_v7 = vld [vmem:[%s10296_s6 + $0x1070] sm:$0xff]  ;;  %1727 = vst [vmem:[%s10301_s7 + $0x828] sm:$0xff] %v1726_v5 }
  0x9f   : > { %1729 = vst [vmem:[%s10301_s7 + $0x830] sm:$0xff] %v1728_v6  ;;  %1731 = vst [vmem:[%s10301_s7 + $0x838] sm:$0xff] %v1730_v7  ;;  %v1732_v8 = vld [vmem:[%s10296_s6 + $0x1080] sm:$0xff]  ;;  %v1734_v9 = vld [vmem:[%s10296_s6 + $0x1090] sm:$0xff] }
  0xa0   : > { %v1736_v10 = vld [vmem:[%s10296_s6 + $0x10a0] sm:$0xff]  ;;  %1733 = vst [vmem:[%s10301_s7 + $0x840] sm:$0xff] %v1732_v8  ;;  %1735 = vst [vmem:[%s10301_s7 + $0x848] sm:$0xff] %v1734_v9  ;;  %v1738_v11 = vld [vmem:[%s10296_s6 + $0x10b0] sm:$0xff] }
  0xa1   : > { %1737 = vst [vmem:[%s10301_s7 + $0x850] sm:$0xff] %v1736_v10  ;;  %v1740_v12 = vld [vmem:[%s10296_s6 + $0x10c0] sm:$0xff]  ;;  %v1742_v13 = vld [vmem:[%s10296_s6 + $0x10d0] sm:$0xff]  ;;  %1739 = vst [vmem:[%s10301_s7 + $0x858] sm:$0xff] %v1738_v11 }
  0xa2   : > { %1741 = vst [vmem:[%s10301_s7 + $0x860] sm:$0xff] %v1740_v12  ;;  %1743 = vst [vmem:[%s10301_s7 + $0x868] sm:$0xff] %v1742_v13  ;;  %v1744_v14 = vld [vmem:[%s10296_s6 + $0x10e0] sm:$0xff]  ;;  %v1746_v15 = vld [vmem:[%s10296_s6 + $0x10f0] sm:$0xff] }
  0xa3   : > { %v1748_v16 = vld [vmem:[%s10296_s6 + $0x1100] sm:$0xff]  ;;  %1745 = vst [vmem:[%s10301_s7 + $0x870] sm:$0xff] %v1744_v14  ;;  %1747 = vst [vmem:[%s10301_s7 + $0x878] sm:$0xff] %v1746_v15  ;;  %v1750_v17 = vld [vmem:[%s10296_s6 + $0x1110] sm:$0xff] }
  0xa4   : > { %1749 = vst [vmem:[%s10301_s7 + $0x880] sm:$0xff] %v1748_v16  ;;  %v1752_v18 = vld [vmem:[%s10296_s6 + $0x1120] sm:$0xff]  ;;  %v1754_v19 = vld [vmem:[%s10296_s6 + $0x1130] sm:$0xff]  ;;  %1751 = vst [vmem:[%s10301_s7 + $0x888] sm:$0xff] %v1750_v17 }
  0xa5   : > { %1753 = vst [vmem:[%s10301_s7 + $0x890] sm:$0xff] %v1752_v18  ;;  %1755 = vst [vmem:[%s10301_s7 + $0x898] sm:$0xff] %v1754_v19  ;;  %v1756_v20 = vld [vmem:[%s10296_s6 + $0x1140] sm:$0xff]  ;;  %v1758_v21 = vld [vmem:[%s10296_s6 + $0x1150] sm:$0xff] }
  0xa6   : > { %v1760_v22 = vld [vmem:[%s10296_s6 + $0x1160] sm:$0xff]  ;;  %1757 = vst [vmem:[%s10301_s7 + $0x8a0] sm:$0xff] %v1756_v20  ;;  %1759 = vst [vmem:[%s10301_s7 + $0x8a8] sm:$0xff] %v1758_v21  ;;  %v1762_v23 = vld [vmem:[%s10296_s6 + $0x1170] sm:$0xff] }
  0xa7   : > { %1761 = vst [vmem:[%s10301_s7 + $0x8b0] sm:$0xff] %v1760_v22  ;;  %v1764_v24 = vld [vmem:[%s10296_s6 + $0x1180] sm:$0xff]  ;;  %v1766_v25 = vld [vmem:[%s10296_s6 + $0x1190] sm:$0xff]  ;;  %1763 = vst [vmem:[%s10301_s7 + $0x8b8] sm:$0xff] %v1762_v23 }
  0xa8   : > { %1765 = vst [vmem:[%s10301_s7 + $0x8c0] sm:$0xff] %v1764_v24  ;;  %1767 = vst [vmem:[%s10301_s7 + $0x8c8] sm:$0xff] %v1766_v25  ;;  %v1768_v26 = vld [vmem:[%s10296_s6 + $0x11a0] sm:$0xff]  ;;  %v1770_v27 = vld [vmem:[%s10296_s6 + $0x11b0] sm:$0xff] }
  0xa9   : > { %v1772_v28 = vld [vmem:[%s10296_s6 + $0x11c0] sm:$0xff]  ;;  %1769 = vst [vmem:[%s10301_s7 + $0x8d0] sm:$0xff] %v1768_v26  ;;  %1771 = vst [vmem:[%s10301_s7 + $0x8d8] sm:$0xff] %v1770_v27  ;;  %v1774_v29 = vld [vmem:[%s10296_s6 + $0x11d0] sm:$0xff] }
  0xaa   : > { %1773 = vst [vmem:[%s10301_s7 + $0x8e0] sm:$0xff] %v1772_v28  ;;  %v1776_v30 = vld [vmem:[%s10296_s6 + $0x11e0] sm:$0xff]  ;;  %v1778_v31 = vld [vmem:[%s10296_s6 + $0x11f0] sm:$0xff]  ;;  %1775 = vst [vmem:[%s10301_s7 + $0x8e8] sm:$0xff] %v1774_v29 }
  0xab   : > { %1777 = vst [vmem:[%s10301_s7 + $0x8f0] sm:$0xff] %v1776_v30  ;;  %1779 = vst [vmem:[%s10301_s7 + $0x8f8] sm:$0xff] %v1778_v31  ;;  %v1780_v32 = vld [vmem:[%s10296_s6 + $0x1200] sm:$0xff]  ;;  %v1782_v33 = vld [vmem:[%s10296_s6 + $0x1210] sm:$0xff] }
  0xac   : > { %v1784_v34 = vld [vmem:[%s10296_s6 + $0x1220] sm:$0xff]  ;;  %1781 = vst [vmem:[%s10301_s7 + $0x900] sm:$0xff] %v1780_v32  ;;  %1783 = vst [vmem:[%s10301_s7 + $0x908] sm:$0xff] %v1782_v33  ;;  %v1786_v35 = vld [vmem:[%s10296_s6 + $0x1230] sm:$0xff] }
  0xad   : > { %1785 = vst [vmem:[%s10301_s7 + $0x910] sm:$0xff] %v1784_v34  ;;  %v1788_v36 = vld [vmem:[%s10296_s6 + $0x1240] sm:$0xff]  ;;  %v1790_v37 = vld [vmem:[%s10296_s6 + $0x1250] sm:$0xff]  ;;  %1787 = vst [vmem:[%s10301_s7 + $0x918] sm:$0xff] %v1786_v35 }
  0xae   : > { %1789 = vst [vmem:[%s10301_s7 + $0x920] sm:$0xff] %v1788_v36  ;;  %1791 = vst [vmem:[%s10301_s7 + $0x928] sm:$0xff] %v1790_v37  ;;  %v1792_v38 = vld [vmem:[%s10296_s6 + $0x1260] sm:$0xff]  ;;  %v1794_v39 = vld [vmem:[%s10296_s6 + $0x1270] sm:$0xff] }
  0xaf   : > { %v1796_v40 = vld [vmem:[%s10296_s6 + $0x1280] sm:$0xff]  ;;  %1793 = vst [vmem:[%s10301_s7 + $0x930] sm:$0xff] %v1792_v38  ;;  %1795 = vst [vmem:[%s10301_s7 + $0x938] sm:$0xff] %v1794_v39  ;;  %v1798_v41 = vld [vmem:[%s10296_s6 + $0x1290] sm:$0xff] }
  0xb0   : > { %1797 = vst [vmem:[%s10301_s7 + $0x940] sm:$0xff] %v1796_v40  ;;  %v1800_v42 = vld [vmem:[%s10296_s6 + $0x12a0] sm:$0xff]  ;;  %v1802_v43 = vld [vmem:[%s10296_s6 + $0x12b0] sm:$0xff]  ;;  %1799 = vst [vmem:[%s10301_s7 + $0x948] sm:$0xff] %v1798_v41 }
  0xb1   : > { %1801 = vst [vmem:[%s10301_s7 + $0x950] sm:$0xff] %v1800_v42  ;;  %1803 = vst [vmem:[%s10301_s7 + $0x958] sm:$0xff] %v1802_v43  ;;  %v1804_v44 = vld [vmem:[%s10296_s6 + $0x12c0] sm:$0xff]  ;;  %v1806_v45 = vld [vmem:[%s10296_s6 + $0x12d0] sm:$0xff] }
  0xb2   : > { %v1808_v46 = vld [vmem:[%s10296_s6 + $0x12e0] sm:$0xff]  ;;  %1805 = vst [vmem:[%s10301_s7 + $0x960] sm:$0xff] %v1804_v44  ;;  %1807 = vst [vmem:[%s10301_s7 + $0x968] sm:$0xff] %v1806_v45  ;;  %v1810_v47 = vld [vmem:[%s10296_s6 + $0x12f0] sm:$0xff] }
  0xb3   : > { %1809 = vst [vmem:[%s10301_s7 + $0x970] sm:$0xff] %v1808_v46  ;;  %v1812_v48 = vld [vmem:[%s10296_s6 + $0x1300] sm:$0xff]  ;;  %v1814_v49 = vld [vmem:[%s10296_s6 + $0x1310] sm:$0xff]  ;;  %1811 = vst [vmem:[%s10301_s7 + $0x978] sm:$0xff] %v1810_v47 }
  0xb4   : > { %1813 = vst [vmem:[%s10301_s7 + $0x980] sm:$0xff] %v1812_v48  ;;  %1815 = vst [vmem:[%s10301_s7 + $0x988] sm:$0xff] %v1814_v49  ;;  %v1816_v50 = vld [vmem:[%s10296_s6 + $0x1320] sm:$0xff]  ;;  %v1818_v51 = vld [vmem:[%s10296_s6 + $0x1330] sm:$0xff] }
  0xb5   : > { %v1820_v52 = vld [vmem:[%s10296_s6 + $0x1340] sm:$0xff]  ;;  %1817 = vst [vmem:[%s10301_s7 + $0x990] sm:$0xff] %v1816_v50  ;;  %1819 = vst [vmem:[%s10301_s7 + $0x998] sm:$0xff] %v1818_v51  ;;  %v1822_v53 = vld [vmem:[%s10296_s6 + $0x1350] sm:$0xff] }
  0xb6   : > { %1821 = vst [vmem:[%s10301_s7 + $0x9a0] sm:$0xff] %v1820_v52  ;;  %v1824_v54 = vld [vmem:[%s10296_s6 + $0x1360] sm:$0xff]  ;;  %v1826_v55 = vld [vmem:[%s10296_s6 + $0x1370] sm:$0xff]  ;;  %1823 = vst [vmem:[%s10301_s7 + $0x9a8] sm:$0xff] %v1822_v53 }
  0xb7   : > { %1825 = vst [vmem:[%s10301_s7 + $0x9b0] sm:$0xff] %v1824_v54  ;;  %1827 = vst [vmem:[%s10301_s7 + $0x9b8] sm:$0xff] %v1826_v55  ;;  %v1828_v56 = vld [vmem:[%s10296_s6 + $0x1380] sm:$0xff]  ;;  %v1830_v57 = vld [vmem:[%s10296_s6 + $0x1390] sm:$0xff] }
  0xb8   : > { %v1832_v58 = vld [vmem:[%s10296_s6 + $0x13a0] sm:$0xff]  ;;  %1829 = vst [vmem:[%s10301_s7 + $0x9c0] sm:$0xff] %v1828_v56  ;;  %1831 = vst [vmem:[%s10301_s7 + $0x9c8] sm:$0xff] %v1830_v57  ;;  %v1834_v59 = vld [vmem:[%s10296_s6 + $0x13b0] sm:$0xff] }
  0xb9   : > { %1833 = vst [vmem:[%s10301_s7 + $0x9d0] sm:$0xff] %v1832_v58  ;;  %v1836_v60 = vld [vmem:[%s10296_s6 + $0x13c0] sm:$0xff]  ;;  %v1838_v61 = vld [vmem:[%s10296_s6 + $0x13d0] sm:$0xff]  ;;  %1835 = vst [vmem:[%s10301_s7 + $0x9d8] sm:$0xff] %v1834_v59 }
  0xba   : > { %1837 = vst [vmem:[%s10301_s7 + $0x9e0] sm:$0xff] %v1836_v60  ;;  %1839 = vst [vmem:[%s10301_s7 + $0x9e8] sm:$0xff] %v1838_v61  ;;  %v1840_v62 = vld [vmem:[%s10296_s6 + $0x13e0] sm:$0xff]  ;;  %v1842_v63 = vld [vmem:[%s10296_s6 + $0x13f0] sm:$0xff] }
  0xbb   : > { %v1844_v0 = vld [vmem:[%s10296_s6 + $0x1400] sm:$0xff]  ;;  %1841 = vst [vmem:[%s10301_s7 + $0x9f0] sm:$0xff] %v1840_v62  ;;  %1843 = vst [vmem:[%s10301_s7 + $0x9f8] sm:$0xff] %v1842_v63  ;;  %v1846_v1 = vld [vmem:[%s10296_s6 + $0x1410] sm:$0xff] }
  0xbc   : > { %1845 = vst [vmem:[%s10301_s7 + $0xa00] sm:$0xff] %v1844_v0  ;;  %v1848_v2 = vld [vmem:[%s10296_s6 + $0x1420] sm:$0xff]  ;;  %v1850_v3 = vld [vmem:[%s10296_s6 + $0x1430] sm:$0xff]  ;;  %1847 = vst [vmem:[%s10301_s7 + $0xa08] sm:$0xff] %v1846_v1 }
  0xbd   : > { %1849 = vst [vmem:[%s10301_s7 + $0xa10] sm:$0xff] %v1848_v2  ;;  %1851 = vst [vmem:[%s10301_s7 + $0xa18] sm:$0xff] %v1850_v3  ;;  %v1852_v4 = vld [vmem:[%s10296_s6 + $0x1440] sm:$0xff]  ;;  %v1854_v5 = vld [vmem:[%s10296_s6 + $0x1450] sm:$0xff] }
  0xbe   : > { %v1856_v6 = vld [vmem:[%s10296_s6 + $0x1460] sm:$0xff]  ;;  %1853 = vst [vmem:[%s10301_s7 + $0xa20] sm:$0xff] %v1852_v4  ;;  %1855 = vst [vmem:[%s10301_s7 + $0xa28] sm:$0xff] %v1854_v5  ;;  %v1858_v7 = vld [vmem:[%s10296_s6 + $0x1470] sm:$0xff] }
  0xbf   : > { %1857 = vst [vmem:[%s10301_s7 + $0xa30] sm:$0xff] %v1856_v6  ;;  %v1860_v8 = vld [vmem:[%s10296_s6 + $0x1480] sm:$0xff]  ;;  %v1862_v9 = vld [vmem:[%s10296_s6 + $0x1490] sm:$0xff]  ;;  %1859 = vst [vmem:[%s10301_s7 + $0xa38] sm:$0xff] %v1858_v7 }
  0xc0   : > { %1861 = vst [vmem:[%s10301_s7 + $0xa40] sm:$0xff] %v1860_v8  ;;  %1863 = vst [vmem:[%s10301_s7 + $0xa48] sm:$0xff] %v1862_v9  ;;  %v1864_v10 = vld [vmem:[%s10296_s6 + $0x14a0] sm:$0xff]  ;;  %v1866_v11 = vld [vmem:[%s10296_s6 + $0x14b0] sm:$0xff] }
  0xc1   : > { %v1868_v12 = vld [vmem:[%s10296_s6 + $0x14c0] sm:$0xff]  ;;  %1865 = vst [vmem:[%s10301_s7 + $0xa50] sm:$0xff] %v1864_v10  ;;  %1867 = vst [vmem:[%s10301_s7 + $0xa58] sm:$0xff] %v1866_v11  ;;  %v1870_v13 = vld [vmem:[%s10296_s6 + $0x14d0] sm:$0xff] }
  0xc2   : > { %1869 = vst [vmem:[%s10301_s7 + $0xa60] sm:$0xff] %v1868_v12  ;;  %v1872_v14 = vld [vmem:[%s10296_s6 + $0x14e0] sm:$0xff]  ;;  %v1874_v15 = vld [vmem:[%s10296_s6 + $0x14f0] sm:$0xff]  ;;  %1871 = vst [vmem:[%s10301_s7 + $0xa68] sm:$0xff] %v1870_v13 }
  0xc3   : > { %1873 = vst [vmem:[%s10301_s7 + $0xa70] sm:$0xff] %v1872_v14  ;;  %1875 = vst [vmem:[%s10301_s7 + $0xa78] sm:$0xff] %v1874_v15  ;;  %v1876_v16 = vld [vmem:[%s10296_s6 + $0x1500] sm:$0xff]  ;;  %v1878_v17 = vld [vmem:[%s10296_s6 + $0x1510] sm:$0xff] }
  0xc4   : > { %v1880_v18 = vld [vmem:[%s10296_s6 + $0x1520] sm:$0xff]  ;;  %1877 = vst [vmem:[%s10301_s7 + $0xa80] sm:$0xff] %v1876_v16  ;;  %1879 = vst [vmem:[%s10301_s7 + $0xa88] sm:$0xff] %v1878_v17  ;;  %v1882_v19 = vld [vmem:[%s10296_s6 + $0x1530] sm:$0xff] }
  0xc5   : > { %1881 = vst [vmem:[%s10301_s7 + $0xa90] sm:$0xff] %v1880_v18  ;;  %v1884_v20 = vld [vmem:[%s10296_s6 + $0x1540] sm:$0xff]  ;;  %v1886_v21 = vld [vmem:[%s10296_s6 + $0x1550] sm:$0xff]  ;;  %1883 = vst [vmem:[%s10301_s7 + $0xa98] sm:$0xff] %v1882_v19 }
  0xc6   : > { %1885 = vst [vmem:[%s10301_s7 + $0xaa0] sm:$0xff] %v1884_v20  ;;  %1887 = vst [vmem:[%s10301_s7 + $0xaa8] sm:$0xff] %v1886_v21  ;;  %v1888_v22 = vld [vmem:[%s10296_s6 + $0x1560] sm:$0xff]  ;;  %v1890_v23 = vld [vmem:[%s10296_s6 + $0x1570] sm:$0xff] }
  0xc7   : > { %v1892_v24 = vld [vmem:[%s10296_s6 + $0x1580] sm:$0xff]  ;;  %1889 = vst [vmem:[%s10301_s7 + $0xab0] sm:$0xff] %v1888_v22  ;;  %1891 = vst [vmem:[%s10301_s7 + $0xab8] sm:$0xff] %v1890_v23  ;;  %v1894_v25 = vld [vmem:[%s10296_s6 + $0x1590] sm:$0xff] }
  0xc8   : > { %1893 = vst [vmem:[%s10301_s7 + $0xac0] sm:$0xff] %v1892_v24  ;;  %v1896_v26 = vld [vmem:[%s10296_s6 + $0x15a0] sm:$0xff]  ;;  %v1898_v27 = vld [vmem:[%s10296_s6 + $0x15b0] sm:$0xff]  ;;  %1895 = vst [vmem:[%s10301_s7 + $0xac8] sm:$0xff] %v1894_v25 }
  0xc9   : > { %1897 = vst [vmem:[%s10301_s7 + $0xad0] sm:$0xff] %v1896_v26  ;;  %1899 = vst [vmem:[%s10301_s7 + $0xad8] sm:$0xff] %v1898_v27  ;;  %v1900_v28 = vld [vmem:[%s10296_s6 + $0x15c0] sm:$0xff]  ;;  %v1902_v29 = vld [vmem:[%s10296_s6 + $0x15d0] sm:$0xff] }
  0xca   : > { %v1904_v30 = vld [vmem:[%s10296_s6 + $0x15e0] sm:$0xff]  ;;  %1901 = vst [vmem:[%s10301_s7 + $0xae0] sm:$0xff] %v1900_v28  ;;  %1903 = vst [vmem:[%s10301_s7 + $0xae8] sm:$0xff] %v1902_v29  ;;  %v1906_v31 = vld [vmem:[%s10296_s6 + $0x15f0] sm:$0xff] }
  0xcb   : > { %1905 = vst [vmem:[%s10301_s7 + $0xaf0] sm:$0xff] %v1904_v30  ;;  %v1908_v32 = vld [vmem:[%s10296_s6 + $0x1600] sm:$0xff]  ;;  %v1910_v33 = vld [vmem:[%s10296_s6 + $0x1610] sm:$0xff]  ;;  %1907 = vst [vmem:[%s10301_s7 + $0xaf8] sm:$0xff] %v1906_v31 }
  0xcc   : > { %1909 = vst [vmem:[%s10301_s7 + $0xb00] sm:$0xff] %v1908_v32  ;;  %1911 = vst [vmem:[%s10301_s7 + $0xb08] sm:$0xff] %v1910_v33  ;;  %v1912_v34 = vld [vmem:[%s10296_s6 + $0x1620] sm:$0xff]  ;;  %v1914_v35 = vld [vmem:[%s10296_s6 + $0x1630] sm:$0xff] }
  0xcd   : > { %v1916_v36 = vld [vmem:[%s10296_s6 + $0x1640] sm:$0xff]  ;;  %1913 = vst [vmem:[%s10301_s7 + $0xb10] sm:$0xff] %v1912_v34  ;;  %1915 = vst [vmem:[%s10301_s7 + $0xb18] sm:$0xff] %v1914_v35  ;;  %v1918_v37 = vld [vmem:[%s10296_s6 + $0x1650] sm:$0xff] }
  0xce   : > { %1917 = vst [vmem:[%s10301_s7 + $0xb20] sm:$0xff] %v1916_v36  ;;  %v1920_v38 = vld [vmem:[%s10296_s6 + $0x1660] sm:$0xff]  ;;  %v1922_v39 = vld [vmem:[%s10296_s6 + $0x1670] sm:$0xff]  ;;  %1919 = vst [vmem:[%s10301_s7 + $0xb28] sm:$0xff] %v1918_v37 }
  0xcf   : > { %1921 = vst [vmem:[%s10301_s7 + $0xb30] sm:$0xff] %v1920_v38  ;;  %1923 = vst [vmem:[%s10301_s7 + $0xb38] sm:$0xff] %v1922_v39  ;;  %v1924_v40 = vld [vmem:[%s10296_s6 + $0x1680] sm:$0xff]  ;;  %v1926_v41 = vld [vmem:[%s10296_s6 + $0x1690] sm:$0xff] }
  0xd0   : > { %v1928_v42 = vld [vmem:[%s10296_s6 + $0x16a0] sm:$0xff]  ;;  %1925 = vst [vmem:[%s10301_s7 + $0xb40] sm:$0xff] %v1924_v40  ;;  %1927 = vst [vmem:[%s10301_s7 + $0xb48] sm:$0xff] %v1926_v41  ;;  %v1930_v43 = vld [vmem:[%s10296_s6 + $0x16b0] sm:$0xff] }
  0xd1   : > { %1929 = vst [vmem:[%s10301_s7 + $0xb50] sm:$0xff] %v1928_v42  ;;  %v1932_v44 = vld [vmem:[%s10296_s6 + $0x16c0] sm:$0xff]  ;;  %v1934_v45 = vld [vmem:[%s10296_s6 + $0x16d0] sm:$0xff]  ;;  %1931 = vst [vmem:[%s10301_s7 + $0xb58] sm:$0xff] %v1930_v43 }
  0xd2   : > { %1933 = vst [vmem:[%s10301_s7 + $0xb60] sm:$0xff] %v1932_v44  ;;  %1935 = vst [vmem:[%s10301_s7 + $0xb68] sm:$0xff] %v1934_v45  ;;  %v1936_v46 = vld [vmem:[%s10296_s6 + $0x16e0] sm:$0xff]  ;;  %v1938_v47 = vld [vmem:[%s10296_s6 + $0x16f0] sm:$0xff] }
  0xd3   : > { %v1940_v48 = vld [vmem:[%s10296_s6 + $0x1700] sm:$0xff]  ;;  %1937 = vst [vmem:[%s10301_s7 + $0xb70] sm:$0xff] %v1936_v46  ;;  %1939 = vst [vmem:[%s10301_s7 + $0xb78] sm:$0xff] %v1938_v47  ;;  %v1942_v49 = vld [vmem:[%s10296_s6 + $0x1710] sm:$0xff] }
  0xd4   : > { %1941 = vst [vmem:[%s10301_s7 + $0xb80] sm:$0xff] %v1940_v48  ;;  %v1944_v50 = vld [vmem:[%s10296_s6 + $0x1720] sm:$0xff]  ;;  %v1946_v51 = vld [vmem:[%s10296_s6 + $0x1730] sm:$0xff]  ;;  %1943 = vst [vmem:[%s10301_s7 + $0xb88] sm:$0xff] %v1942_v49 }
  0xd5   : > { %1945 = vst [vmem:[%s10301_s7 + $0xb90] sm:$0xff] %v1944_v50  ;;  %1947 = vst [vmem:[%s10301_s7 + $0xb98] sm:$0xff] %v1946_v51  ;;  %v1948_v52 = vld [vmem:[%s10296_s6 + $0x1740] sm:$0xff]  ;;  %v1950_v53 = vld [vmem:[%s10296_s6 + $0x1750] sm:$0xff] }
  0xd6   : > { %v1952_v54 = vld [vmem:[%s10296_s6 + $0x1760] sm:$0xff]  ;;  %1949 = vst [vmem:[%s10301_s7 + $0xba0] sm:$0xff] %v1948_v52  ;;  %1951 = vst [vmem:[%s10301_s7 + $0xba8] sm:$0xff] %v1950_v53  ;;  %v1954_v55 = vld [vmem:[%s10296_s6 + $0x1770] sm:$0xff] }
  0xd7   : > { %1953 = vst [vmem:[%s10301_s7 + $0xbb0] sm:$0xff] %v1952_v54  ;;  %v1956_v56 = vld [vmem:[%s10296_s6 + $0x1780] sm:$0xff]  ;;  %v1958_v57 = vld [vmem:[%s10296_s6 + $0x1790] sm:$0xff]  ;;  %1955 = vst [vmem:[%s10301_s7 + $0xbb8] sm:$0xff] %v1954_v55 }
  0xd8   : > { %1957 = vst [vmem:[%s10301_s7 + $0xbc0] sm:$0xff] %v1956_v56  ;;  %1959 = vst [vmem:[%s10301_s7 + $0xbc8] sm:$0xff] %v1958_v57  ;;  %v1960_v58 = vld [vmem:[%s10296_s6 + $0x17a0] sm:$0xff]  ;;  %v1962_v59 = vld [vmem:[%s10296_s6 + $0x17b0] sm:$0xff] }
  0xd9   : > { %v1964_v60 = vld [vmem:[%s10296_s6 + $0x17c0] sm:$0xff]  ;;  %1961 = vst [vmem:[%s10301_s7 + $0xbd0] sm:$0xff] %v1960_v58  ;;  %1963 = vst [vmem:[%s10301_s7 + $0xbd8] sm:$0xff] %v1962_v59  ;;  %v1966_v61 = vld [vmem:[%s10296_s6 + $0x17d0] sm:$0xff] }
  0xda   : > { %1965 = vst [vmem:[%s10301_s7 + $0xbe0] sm:$0xff] %v1964_v60  ;;  %v1968_v62 = vld [vmem:[%s10296_s6 + $0x17e0] sm:$0xff]  ;;  %v1970_v63 = vld [vmem:[%s10296_s6 + $0x17f0] sm:$0xff]  ;;  %1967 = vst [vmem:[%s10301_s7 + $0xbe8] sm:$0xff] %v1966_v61 }
  0xdb   : > { %1969 = vst [vmem:[%s10301_s7 + $0xbf0] sm:$0xff] %v1968_v62  ;;  %1971 = vst [vmem:[%s10301_s7 + $0xbf8] sm:$0xff] %v1970_v63  ;;  %v1972_v0 = vld [vmem:[%s10296_s6 + $0x1800] sm:$0xff]  ;;  %v1974_v1 = vld [vmem:[%s10296_s6 + $0x1810] sm:$0xff] }
  0xdc   : > { %v1976_v2 = vld [vmem:[%s10296_s6 + $0x1820] sm:$0xff]  ;;  %1973 = vst [vmem:[%s10301_s7 + $0xc00] sm:$0xff] %v1972_v0  ;;  %1975 = vst [vmem:[%s10301_s7 + $0xc08] sm:$0xff] %v1974_v1  ;;  %v1978_v3 = vld [vmem:[%s10296_s6 + $0x1830] sm:$0xff] }
  0xdd   : > { %1977 = vst [vmem:[%s10301_s7 + $0xc10] sm:$0xff] %v1976_v2  ;;  %v1980_v4 = vld [vmem:[%s10296_s6 + $0x1840] sm:$0xff]  ;;  %v1982_v5 = vld [vmem:[%s10296_s6 + $0x1850] sm:$0xff]  ;;  %1979 = vst [vmem:[%s10301_s7 + $0xc18] sm:$0xff] %v1978_v3 }
  0xde   : > { %1981 = vst [vmem:[%s10301_s7 + $0xc20] sm:$0xff] %v1980_v4  ;;  %1983 = vst [vmem:[%s10301_s7 + $0xc28] sm:$0xff] %v1982_v5  ;;  %v1984_v6 = vld [vmem:[%s10296_s6 + $0x1860] sm:$0xff]  ;;  %v1986_v7 = vld [vmem:[%s10296_s6 + $0x1870] sm:$0xff] }
  0xdf   : > { %v1988_v8 = vld [vmem:[%s10296_s6 + $0x1880] sm:$0xff]  ;;  %1985 = vst [vmem:[%s10301_s7 + $0xc30] sm:$0xff] %v1984_v6  ;;  %1987 = vst [vmem:[%s10301_s7 + $0xc38] sm:$0xff] %v1986_v7  ;;  %v1990_v9 = vld [vmem:[%s10296_s6 + $0x1890] sm:$0xff] }
  0xe0   : > { %1989 = vst [vmem:[%s10301_s7 + $0xc40] sm:$0xff] %v1988_v8  ;;  %v1992_v10 = vld [vmem:[%s10296_s6 + $0x18a0] sm:$0xff]  ;;  %v1994_v11 = vld [vmem:[%s10296_s6 + $0x18b0] sm:$0xff]  ;;  %1991 = vst [vmem:[%s10301_s7 + $0xc48] sm:$0xff] %v1990_v9 }
  0xe1   : > { %1993 = vst [vmem:[%s10301_s7 + $0xc50] sm:$0xff] %v1992_v10  ;;  %1995 = vst [vmem:[%s10301_s7 + $0xc58] sm:$0xff] %v1994_v11  ;;  %v1996_v12 = vld [vmem:[%s10296_s6 + $0x18c0] sm:$0xff]  ;;  %v1998_v13 = vld [vmem:[%s10296_s6 + $0x18d0] sm:$0xff] }
  0xe2   : > { %v2000_v14 = vld [vmem:[%s10296_s6 + $0x18e0] sm:$0xff]  ;;  %1997 = vst [vmem:[%s10301_s7 + $0xc60] sm:$0xff] %v1996_v12  ;;  %1999 = vst [vmem:[%s10301_s7 + $0xc68] sm:$0xff] %v1998_v13  ;;  %v2002_v15 = vld [vmem:[%s10296_s6 + $0x18f0] sm:$0xff] }
  0xe3   : > { %2001 = vst [vmem:[%s10301_s7 + $0xc70] sm:$0xff] %v2000_v14  ;;  %v2004_v16 = vld [vmem:[%s10296_s6 + $0x1900] sm:$0xff]  ;;  %v2006_v17 = vld [vmem:[%s10296_s6 + $0x1910] sm:$0xff]  ;;  %2003 = vst [vmem:[%s10301_s7 + $0xc78] sm:$0xff] %v2002_v15 }
  0xe4   : > { %2005 = vst [vmem:[%s10301_s7 + $0xc80] sm:$0xff] %v2004_v16  ;;  %2007 = vst [vmem:[%s10301_s7 + $0xc88] sm:$0xff] %v2006_v17  ;;  %v2008_v18 = vld [vmem:[%s10296_s6 + $0x1920] sm:$0xff]  ;;  %v2010_v19 = vld [vmem:[%s10296_s6 + $0x1930] sm:$0xff] }
  0xe5   : > { %v2012_v20 = vld [vmem:[%s10296_s6 + $0x1940] sm:$0xff]  ;;  %2009 = vst [vmem:[%s10301_s7 + $0xc90] sm:$0xff] %v2008_v18  ;;  %2011 = vst [vmem:[%s10301_s7 + $0xc98] sm:$0xff] %v2010_v19  ;;  %v2014_v21 = vld [vmem:[%s10296_s6 + $0x1950] sm:$0xff] }
  0xe6   : > { %2013 = vst [vmem:[%s10301_s7 + $0xca0] sm:$0xff] %v2012_v20  ;;  %v2016_v22 = vld [vmem:[%s10296_s6 + $0x1960] sm:$0xff]  ;;  %v2018_v23 = vld [vmem:[%s10296_s6 + $0x1970] sm:$0xff]  ;;  %2015 = vst [vmem:[%s10301_s7 + $0xca8] sm:$0xff] %v2014_v21 }
  0xe7   : > { %2017 = vst [vmem:[%s10301_s7 + $0xcb0] sm:$0xff] %v2016_v22  ;;  %2019 = vst [vmem:[%s10301_s7 + $0xcb8] sm:$0xff] %v2018_v23  ;;  %v2020_v24 = vld [vmem:[%s10296_s6 + $0x1980] sm:$0xff]  ;;  %v2022_v25 = vld [vmem:[%s10296_s6 + $0x1990] sm:$0xff] }
  0xe8   : > { %v2024_v26 = vld [vmem:[%s10296_s6 + $0x19a0] sm:$0xff]  ;;  %2021 = vst [vmem:[%s10301_s7 + $0xcc0] sm:$0xff] %v2020_v24  ;;  %2023 = vst [vmem:[%s10301_s7 + $0xcc8] sm:$0xff] %v2022_v25  ;;  %v2026_v27 = vld [vmem:[%s10296_s6 + $0x19b0] sm:$0xff] }
  0xe9   : > { %2025 = vst [vmem:[%s10301_s7 + $0xcd0] sm:$0xff] %v2024_v26  ;;  %v2028_v28 = vld [vmem:[%s10296_s6 + $0x19c0] sm:$0xff]  ;;  %v2030_v29 = vld [vmem:[%s10296_s6 + $0x19d0] sm:$0xff]  ;;  %2027 = vst [vmem:[%s10301_s7 + $0xcd8] sm:$0xff] %v2026_v27 }
  0xea   : > { %2029 = vst [vmem:[%s10301_s7 + $0xce0] sm:$0xff] %v2028_v28  ;;  %2031 = vst [vmem:[%s10301_s7 + $0xce8] sm:$0xff] %v2030_v29  ;;  %v2032_v30 = vld [vmem:[%s10296_s6 + $0x19e0] sm:$0xff]  ;;  %v2034_v31 = vld [vmem:[%s10296_s6 + $0x19f0] sm:$0xff] }
  0xeb   : > { %v2036_v32 = vld [vmem:[%s10296_s6 + $0x1a00] sm:$0xff]  ;;  %2033 = vst [vmem:[%s10301_s7 + $0xcf0] sm:$0xff] %v2032_v30  ;;  %2035 = vst [vmem:[%s10301_s7 + $0xcf8] sm:$0xff] %v2034_v31  ;;  %v2038_v33 = vld [vmem:[%s10296_s6 + $0x1a10] sm:$0xff] }
  0xec   : > { %2037 = vst [vmem:[%s10301_s7 + $0xd00] sm:$0xff] %v2036_v32  ;;  %v2040_v34 = vld [vmem:[%s10296_s6 + $0x1a20] sm:$0xff]  ;;  %v2042_v35 = vld [vmem:[%s10296_s6 + $0x1a30] sm:$0xff]  ;;  %2039 = vst [vmem:[%s10301_s7 + $0xd08] sm:$0xff] %v2038_v33 }
  0xed   : > { %2041 = vst [vmem:[%s10301_s7 + $0xd10] sm:$0xff] %v2040_v34  ;;  %2043 = vst [vmem:[%s10301_s7 + $0xd18] sm:$0xff] %v2042_v35  ;;  %v2044_v36 = vld [vmem:[%s10296_s6 + $0x1a40] sm:$0xff]  ;;  %v2046_v37 = vld [vmem:[%s10296_s6 + $0x1a50] sm:$0xff] }
  0xee   : > { %v2048_v38 = vld [vmem:[%s10296_s6 + $0x1a60] sm:$0xff]  ;;  %2045 = vst [vmem:[%s10301_s7 + $0xd20] sm:$0xff] %v2044_v36  ;;  %2047 = vst [vmem:[%s10301_s7 + $0xd28] sm:$0xff] %v2046_v37  ;;  %v2050_v39 = vld [vmem:[%s10296_s6 + $0x1a70] sm:$0xff] }
  0xef   : > { %2049 = vst [vmem:[%s10301_s7 + $0xd30] sm:$0xff] %v2048_v38  ;;  %v2052_v40 = vld [vmem:[%s10296_s6 + $0x1a80] sm:$0xff]  ;;  %v2054_v41 = vld [vmem:[%s10296_s6 + $0x1a90] sm:$0xff]  ;;  %2051 = vst [vmem:[%s10301_s7 + $0xd38] sm:$0xff] %v2050_v39 }
  0xf0   : > { %2053 = vst [vmem:[%s10301_s7 + $0xd40] sm:$0xff] %v2052_v40  ;;  %2055 = vst [vmem:[%s10301_s7 + $0xd48] sm:$0xff] %v2054_v41  ;;  %v2056_v42 = vld [vmem:[%s10296_s6 + $0x1aa0] sm:$0xff]  ;;  %v2058_v43 = vld [vmem:[%s10296_s6 + $0x1ab0] sm:$0xff] }
  0xf1   : > { %v2060_v44 = vld [vmem:[%s10296_s6 + $0x1ac0] sm:$0xff]  ;;  %2057 = vst [vmem:[%s10301_s7 + $0xd50] sm:$0xff] %v2056_v42  ;;  %2059 = vst [vmem:[%s10301_s7 + $0xd58] sm:$0xff] %v2058_v43  ;;  %v2062_v45 = vld [vmem:[%s10296_s6 + $0x1ad0] sm:$0xff] }
  0xf2   : > { %2061 = vst [vmem:[%s10301_s7 + $0xd60] sm:$0xff] %v2060_v44  ;;  %v2064_v46 = vld [vmem:[%s10296_s6 + $0x1ae0] sm:$0xff]  ;;  %v2066_v47 = vld [vmem:[%s10296_s6 + $0x1af0] sm:$0xff]  ;;  %2063 = vst [vmem:[%s10301_s7 + $0xd68] sm:$0xff] %v2062_v45 }
  0xf3   : > { %2065 = vst [vmem:[%s10301_s7 + $0xd70] sm:$0xff] %v2064_v46  ;;  %2067 = vst [vmem:[%s10301_s7 + $0xd78] sm:$0xff] %v2066_v47  ;;  %v2068_v48 = vld [vmem:[%s10296_s6 + $0x1b00] sm:$0xff]  ;;  %v2070_v49 = vld [vmem:[%s10296_s6 + $0x1b10] sm:$0xff] }
  0xf4   : > { %v2072_v50 = vld [vmem:[%s10296_s6 + $0x1b20] sm:$0xff]  ;;  %2069 = vst [vmem:[%s10301_s7 + $0xd80] sm:$0xff] %v2068_v48  ;;  %2071 = vst [vmem:[%s10301_s7 + $0xd88] sm:$0xff] %v2070_v49  ;;  %v2074_v51 = vld [vmem:[%s10296_s6 + $0x1b30] sm:$0xff] }
  0xf5   : > { %2073 = vst [vmem:[%s10301_s7 + $0xd90] sm:$0xff] %v2072_v50  ;;  %v2076_v52 = vld [vmem:[%s10296_s6 + $0x1b40] sm:$0xff]  ;;  %v2078_v53 = vld [vmem:[%s10296_s6 + $0x1b50] sm:$0xff]  ;;  %2075 = vst [vmem:[%s10301_s7 + $0xd98] sm:$0xff] %v2074_v51 }
  0xf6   : > { %2077 = vst [vmem:[%s10301_s7 + $0xda0] sm:$0xff] %v2076_v52  ;;  %2079 = vst [vmem:[%s10301_s7 + $0xda8] sm:$0xff] %v2078_v53  ;;  %v2080_v54 = vld [vmem:[%s10296_s6 + $0x1b60] sm:$0xff]  ;;  %v2082_v55 = vld [vmem:[%s10296_s6 + $0x1b70] sm:$0xff] }
  0xf7   : > { %v2084_v56 = vld [vmem:[%s10296_s6 + $0x1b80] sm:$0xff]  ;;  %2081 = vst [vmem:[%s10301_s7 + $0xdb0] sm:$0xff] %v2080_v54  ;;  %2083 = vst [vmem:[%s10301_s7 + $0xdb8] sm:$0xff] %v2082_v55  ;;  %v2086_v57 = vld [vmem:[%s10296_s6 + $0x1b90] sm:$0xff] }
  0xf8   : > { %2085 = vst [vmem:[%s10301_s7 + $0xdc0] sm:$0xff] %v2084_v56  ;;  %v2088_v58 = vld [vmem:[%s10296_s6 + $0x1ba0] sm:$0xff]  ;;  %v2090_v59 = vld [vmem:[%s10296_s6 + $0x1bb0] sm:$0xff]  ;;  %2087 = vst [vmem:[%s10301_s7 + $0xdc8] sm:$0xff] %v2086_v57 }
  0xf9   : > { %2089 = vst [vmem:[%s10301_s7 + $0xdd0] sm:$0xff] %v2088_v58  ;;  %2091 = vst [vmem:[%s10301_s7 + $0xdd8] sm:$0xff] %v2090_v59  ;;  %v2092_v60 = vld [vmem:[%s10296_s6 + $0x1bc0] sm:$0xff]  ;;  %v2094_v61 = vld [vmem:[%s10296_s6 + $0x1bd0] sm:$0xff] }
  0xfa   : > { %v2096_v62 = vld [vmem:[%s10296_s6 + $0x1be0] sm:$0xff]  ;;  %2093 = vst [vmem:[%s10301_s7 + $0xde0] sm:$0xff] %v2092_v60  ;;  %2095 = vst [vmem:[%s10301_s7 + $0xde8] sm:$0xff] %v2094_v61  ;;  %v2098_v63 = vld [vmem:[%s10296_s6 + $0x1bf0] sm:$0xff] }
  0xfb   : > { %2097 = vst [vmem:[%s10301_s7 + $0xdf0] sm:$0xff] %v2096_v62  ;;  %v2100_v0 = vld [vmem:[%s10296_s6 + $0x1c00] sm:$0xff]  ;;  %v2102_v1 = vld [vmem:[%s10296_s6 + $0x1c10] sm:$0xff]  ;;  %2099 = vst [vmem:[%s10301_s7 + $0xdf8] sm:$0xff] %v2098_v63 }
  0xfc   : > { %2101 = vst [vmem:[%s10301_s7 + $0xe00] sm:$0xff] %v2100_v0  ;;  %2103 = vst [vmem:[%s10301_s7 + $0xe08] sm:$0xff] %v2102_v1  ;;  %v2104_v2 = vld [vmem:[%s10296_s6 + $0x1c20] sm:$0xff]  ;;  %v2106_v3 = vld [vmem:[%s10296_s6 + $0x1c30] sm:$0xff] }
  0xfd   : > { %v2108_v4 = vld [vmem:[%s10296_s6 + $0x1c40] sm:$0xff]  ;;  %2105 = vst [vmem:[%s10301_s7 + $0xe10] sm:$0xff] %v2104_v2  ;;  %2107 = vst [vmem:[%s10301_s7 + $0xe18] sm:$0xff] %v2106_v3  ;;  %v2110_v5 = vld [vmem:[%s10296_s6 + $0x1c50] sm:$0xff] }
  0xfe   : > { %2109 = vst [vmem:[%s10301_s7 + $0xe20] sm:$0xff] %v2108_v4  ;;  %v2112_v6 = vld [vmem:[%s10296_s6 + $0x1c60] sm:$0xff]  ;;  %v2114_v7 = vld [vmem:[%s10296_s6 + $0x1c70] sm:$0xff]  ;;  %2111 = vst [vmem:[%s10301_s7 + $0xe28] sm:$0xff] %v2110_v5 }
  0xff   : > { %2113 = vst [vmem:[%s10301_s7 + $0xe30] sm:$0xff] %v2112_v6  ;;  %2115 = vst [vmem:[%s10301_s7 + $0xe38] sm:$0xff] %v2114_v7  ;;  %v2116_v8 = vld [vmem:[%s10296_s6 + $0x1c80] sm:$0xff]  ;;  %v2118_v9 = vld [vmem:[%s10296_s6 + $0x1c90] sm:$0xff] }
 0x100   : > { %v2120_v10 = vld [vmem:[%s10296_s6 + $0x1ca0] sm:$0xff]  ;;  %2117 = vst [vmem:[%s10301_s7 + $0xe40] sm:$0xff] %v2116_v8  ;;  %2119 = vst [vmem:[%s10301_s7 + $0xe48] sm:$0xff] %v2118_v9  ;;  %v2122_v11 = vld [vmem:[%s10296_s6 + $0x1cb0] sm:$0xff] }
 0x101   : > { %2121 = vst [vmem:[%s10301_s7 + $0xe50] sm:$0xff] %v2120_v10  ;;  %v2124_v12 = vld [vmem:[%s10296_s6 + $0x1cc0] sm:$0xff]  ;;  %v2126_v13 = vld [vmem:[%s10296_s6 + $0x1cd0] sm:$0xff]  ;;  %2123 = vst [vmem:[%s10301_s7 + $0xe58] sm:$0xff] %v2122_v11 }
 0x102   : > { %2125 = vst [vmem:[%s10301_s7 + $0xe60] sm:$0xff] %v2124_v12  ;;  %2127 = vst [vmem:[%s10301_s7 + $0xe68] sm:$0xff] %v2126_v13  ;;  %v2128_v14 = vld [vmem:[%s10296_s6 + $0x1ce0] sm:$0xff]  ;;  %v2130_v15 = vld [vmem:[%s10296_s6 + $0x1cf0] sm:$0xff] }
 0x103   : > { %v2132_v16 = vld [vmem:[%s10296_s6 + $0x1d00] sm:$0xff]  ;;  %2129 = vst [vmem:[%s10301_s7 + $0xe70] sm:$0xff] %v2128_v14  ;;  %2131 = vst [vmem:[%s10301_s7 + $0xe78] sm:$0xff] %v2130_v15  ;;  %v2134_v17 = vld [vmem:[%s10296_s6 + $0x1d10] sm:$0xff] }
 0x104   : > { %2133 = vst [vmem:[%s10301_s7 + $0xe80] sm:$0xff] %v2132_v16  ;;  %v2136_v18 = vld [vmem:[%s10296_s6 + $0x1d20] sm:$0xff]  ;;  %v2138_v19 = vld [vmem:[%s10296_s6 + $0x1d30] sm:$0xff]  ;;  %2135 = vst [vmem:[%s10301_s7 + $0xe88] sm:$0xff] %v2134_v17 }
 0x105   : > { %2137 = vst [vmem:[%s10301_s7 + $0xe90] sm:$0xff] %v2136_v18  ;;  %2139 = vst [vmem:[%s10301_s7 + $0xe98] sm:$0xff] %v2138_v19  ;;  %v2140_v20 = vld [vmem:[%s10296_s6 + $0x1d40] sm:$0xff]  ;;  %v2142_v21 = vld [vmem:[%s10296_s6 + $0x1d50] sm:$0xff] }
 0x106   : > { %v2144_v22 = vld [vmem:[%s10296_s6 + $0x1d60] sm:$0xff]  ;;  %2141 = vst [vmem:[%s10301_s7 + $0xea0] sm:$0xff] %v2140_v20  ;;  %2143 = vst [vmem:[%s10301_s7 + $0xea8] sm:$0xff] %v2142_v21  ;;  %v2146_v23 = vld [vmem:[%s10296_s6 + $0x1d70] sm:$0xff] }
 0x107   : > { %2145 = vst [vmem:[%s10301_s7 + $0xeb0] sm:$0xff] %v2144_v22  ;;  %v2148_v24 = vld [vmem:[%s10296_s6 + $0x1d80] sm:$0xff]  ;;  %v2150_v25 = vld [vmem:[%s10296_s6 + $0x1d90] sm:$0xff]  ;;  %2147 = vst [vmem:[%s10301_s7 + $0xeb8] sm:$0xff] %v2146_v23 }
 0x108   : > { %2149 = vst [vmem:[%s10301_s7 + $0xec0] sm:$0xff] %v2148_v24  ;;  %2151 = vst [vmem:[%s10301_s7 + $0xec8] sm:$0xff] %v2150_v25  ;;  %v2152_v26 = vld [vmem:[%s10296_s6 + $0x1da0] sm:$0xff]  ;;  %v2154_v27 = vld [vmem:[%s10296_s6 + $0x1db0] sm:$0xff] }
 0x109   : > { %v2156_v28 = vld [vmem:[%s10296_s6 + $0x1dc0] sm:$0xff]  ;;  %2153 = vst [vmem:[%s10301_s7 + $0xed0] sm:$0xff] %v2152_v26  ;;  %2155 = vst [vmem:[%s10301_s7 + $0xed8] sm:$0xff] %v2154_v27  ;;  %v2158_v29 = vld [vmem:[%s10296_s6 + $0x1dd0] sm:$0xff] }
 0x10a   : > { %2157 = vst [vmem:[%s10301_s7 + $0xee0] sm:$0xff] %v2156_v28  ;;  %v2160_v30 = vld [vmem:[%s10296_s6 + $0x1de0] sm:$0xff]  ;;  %v2162_v31 = vld [vmem:[%s10296_s6 + $0x1df0] sm:$0xff]  ;;  %2159 = vst [vmem:[%s10301_s7 + $0xee8] sm:$0xff] %v2158_v29 }
 0x10b   : > { %2161 = vst [vmem:[%s10301_s7 + $0xef0] sm:$0xff] %v2160_v30  ;;  %2163 = vst [vmem:[%s10301_s7 + $0xef8] sm:$0xff] %v2162_v31  ;;  %v2164_v32 = vld [vmem:[%s10296_s6 + $0x1e00] sm:$0xff]  ;;  %v2166_v33 = vld [vmem:[%s10296_s6 + $0x1e10] sm:$0xff] }
 0x10c   : > { %v2168_v34 = vld [vmem:[%s10296_s6 + $0x1e20] sm:$0xff]  ;;  %2165 = vst [vmem:[%s10301_s7 + $0xf00] sm:$0xff] %v2164_v32  ;;  %2167 = vst [vmem:[%s10301_s7 + $0xf08] sm:$0xff] %v2166_v33  ;;  %v2170_v35 = vld [vmem:[%s10296_s6 + $0x1e30] sm:$0xff] }
 0x10d   : > { %2169 = vst [vmem:[%s10301_s7 + $0xf10] sm:$0xff] %v2168_v34  ;;  %v2172_v36 = vld [vmem:[%s10296_s6 + $0x1e40] sm:$0xff]  ;;  %v2174_v37 = vld [vmem:[%s10296_s6 + $0x1e50] sm:$0xff]  ;;  %2171 = vst [vmem:[%s10301_s7 + $0xf18] sm:$0xff] %v2170_v35 }
 0x10e   : > { %2173 = vst [vmem:[%s10301_s7 + $0xf20] sm:$0xff] %v2172_v36  ;;  %2175 = vst [vmem:[%s10301_s7 + $0xf28] sm:$0xff] %v2174_v37  ;;  %v2176_v38 = vld [vmem:[%s10296_s6 + $0x1e60] sm:$0xff]  ;;  %v2178_v39 = vld [vmem:[%s10296_s6 + $0x1e70] sm:$0xff] }
 0x10f   : > { %v2180_v40 = vld [vmem:[%s10296_s6 + $0x1e80] sm:$0xff]  ;;  %2177 = vst [vmem:[%s10301_s7 + $0xf30] sm:$0xff] %v2176_v38  ;;  %2179 = vst [vmem:[%s10301_s7 + $0xf38] sm:$0xff] %v2178_v39  ;;  %v2182_v41 = vld [vmem:[%s10296_s6 + $0x1e90] sm:$0xff] }
 0x110   : > { %2181 = vst [vmem:[%s10301_s7 + $0xf40] sm:$0xff] %v2180_v40  ;;  %v2184_v42 = vld [vmem:[%s10296_s6 + $0x1ea0] sm:$0xff]  ;;  %v2186_v43 = vld [vmem:[%s10296_s6 + $0x1eb0] sm:$0xff]  ;;  %2183 = vst [vmem:[%s10301_s7 + $0xf48] sm:$0xff] %v2182_v41 }
 0x111   : > { %2185 = vst [vmem:[%s10301_s7 + $0xf50] sm:$0xff] %v2184_v42  ;;  %2187 = vst [vmem:[%s10301_s7 + $0xf58] sm:$0xff] %v2186_v43  ;;  %v2188_v44 = vld [vmem:[%s10296_s6 + $0x1ec0] sm:$0xff]  ;;  %v2190_v45 = vld [vmem:[%s10296_s6 + $0x1ed0] sm:$0xff] }
 0x112   : > { %v2192_v46 = vld [vmem:[%s10296_s6 + $0x1ee0] sm:$0xff]  ;;  %2189 = vst [vmem:[%s10301_s7 + $0xf60] sm:$0xff] %v2188_v44  ;;  %2191 = vst [vmem:[%s10301_s7 + $0xf68] sm:$0xff] %v2190_v45  ;;  %v2194_v47 = vld [vmem:[%s10296_s6 + $0x1ef0] sm:$0xff] }
 0x113   : > { %2193 = vst [vmem:[%s10301_s7 + $0xf70] sm:$0xff] %v2192_v46  ;;  %v2196_v48 = vld [vmem:[%s10296_s6 + $0x1f00] sm:$0xff]  ;;  %v2198_v49 = vld [vmem:[%s10296_s6 + $0x1f10] sm:$0xff]  ;;  %2195 = vst [vmem:[%s10301_s7 + $0xf78] sm:$0xff] %v2194_v47 }
 0x114   : > { %2197 = vst [vmem:[%s10301_s7 + $0xf80] sm:$0xff] %v2196_v48  ;;  %2199 = vst [vmem:[%s10301_s7 + $0xf88] sm:$0xff] %v2198_v49  ;;  %v2200_v50 = vld [vmem:[%s10296_s6 + $0x1f20] sm:$0xff]  ;;  %v2202_v51 = vld [vmem:[%s10296_s6 + $0x1f30] sm:$0xff] }
 0x115   : > { %v2204_v52 = vld [vmem:[%s10296_s6 + $0x1f40] sm:$0xff]  ;;  %2201 = vst [vmem:[%s10301_s7 + $0xf90] sm:$0xff] %v2200_v50  ;;  %2203 = vst [vmem:[%s10301_s7 + $0xf98] sm:$0xff] %v2202_v51  ;;  %v2206_v53 = vld [vmem:[%s10296_s6 + $0x1f50] sm:$0xff] }
 0x116   : > { %2205 = vst [vmem:[%s10301_s7 + $0xfa0] sm:$0xff] %v2204_v52  ;;  %v2208_v54 = vld [vmem:[%s10296_s6 + $0x1f60] sm:$0xff]  ;;  %v2210_v55 = vld [vmem:[%s10296_s6 + $0x1f70] sm:$0xff]  ;;  %2207 = vst [vmem:[%s10301_s7 + $0xfa8] sm:$0xff] %v2206_v53 }
 0x117   : > { %2209 = vst [vmem:[%s10301_s7 + $0xfb0] sm:$0xff] %v2208_v54  ;;  %2211 = vst [vmem:[%s10301_s7 + $0xfb8] sm:$0xff] %v2210_v55  ;;  %v2212_v56 = vld [vmem:[%s10296_s6 + $0x1f80] sm:$0xff]  ;;  %v2214_v57 = vld [vmem:[%s10296_s6 + $0x1f90] sm:$0xff] }
 0x118   : > { %v2216_v58 = vld [vmem:[%s10296_s6 + $0x1fa0] sm:$0xff]  ;;  %2213 = vst [vmem:[%s10301_s7 + $0xfc0] sm:$0xff] %v2212_v56  ;;  %2215 = vst [vmem:[%s10301_s7 + $0xfc8] sm:$0xff] %v2214_v57  ;;  %v2218_v59 = vld [vmem:[%s10296_s6 + $0x1fb0] sm:$0xff] }
 0x119   : > { %2217 = vst [vmem:[%s10301_s7 + $0xfd0] sm:$0xff] %v2216_v58  ;;  %v2220_v60 = vld [vmem:[%s10296_s6 + $0x1fc0] sm:$0xff]  ;;  %v2222_v61 = vld [vmem:[%s10296_s6 + $0x1fd0] sm:$0xff]  ;;  %2219 = vst [vmem:[%s10301_s7 + $0xfd8] sm:$0xff] %v2218_v59 }
 0x11a   : > { %2221 = vst [vmem:[%s10301_s7 + $0xfe0] sm:$0xff] %v2220_v60  ;;  %2223 = vst [vmem:[%s10301_s7 + $0xfe8] sm:$0xff] %v2222_v61  ;;  %v2224_v62 = vld [vmem:[%s10296_s6 + $0x1fe0] sm:$0xff]  ;;  %v2226_v63 = vld [vmem:[%s10296_s6 + $0x1ff0] sm:$0xff] }
 0x11b   : > { %2225 = vst [vmem:[%s10301_s7 + $0xff0] sm:$0xff] %v2224_v62  ;;  %2227 = vst [vmem:[%s10301_s7 + $0xff8] sm:$0xff] %v2226_v63 }
 0x11c PF: > { %p8658_p11 = scmp.ge.s32.totalorder %s10197_s17, 1  ;;  %p4316_p12 = scmp.lt.s32.totalorder %s10197_s17, 5 }
 0x11e   : > { %p4317_p13 = pnand %p8658_p11, %p4316_p12 }
 0x11f   : > { %s4323_s8 = sand.u32 (!%p4317_p13), 1, %s10173_s11   ;;  %p4354_p0 = scmp.lt.s32.totalorder (!%p4317_p13), %s10185_s14, 1 }
 0x120   : > { %4320 = sbr.rel (%p4317_p13) target bundleno = 1092 (0x444), region = 76  ;;  %s8659_s18 = sshll.u32 (!%p4317_p13), %s4323_s8, 12 }
 0x121   : > { %s11327_s21 = scalar_lea.vmem (!%p4317_p13), [#allocation4], %s8659_s18  ;;  %s4350_s29 = sand.u32 (!%p4317_p13), 1, %s10165_s9  }
 0x122   : > { %v9357_v0 = vld [vmem:[%s11327_s21 + $0x4] ss:$8 sps:$4 sm:$0xff] (!%p4317_p13)   ;;  %v9361_v2 = vld [vmem:[%s11327_s21] ss:$8 sps:$4 sm:$0xff] (!%p4317_p13)   ;;  %v9363_v4 = vld [vmem:[%s11327_s21 + $0x14] ss:$8 sps:$4 sm:$0xff] (!%p4317_p13)  }
 0x123   : > { %v9359_v1 = vld [vmem:[%s11327_s21 + $0x804] ss:$8 sps:$4 sm:$0xff] (!%p4317_p13)   ;;  %7640 = vmatprep.subr.bf16.mxu1 (!%p4317_p13), %v9357_v0  ;;  %v9362_v3 = vld [vmem:[%s11327_s21 + $0x800] ss:$8 sps:$4 sm:$0xff] (!%p4317_p13)   ;;  %v9365_v5 = vld [vmem:[%s11327_s21 + $0x814] ss:$8 sps:$4 sm:$0xff] (!%p4317_p13)  }
 0x124   : > { %7984 = vmatprep.subr.bf16.mxu0 (!%p4317_p13), %v9359_v1  ;;  %7641 = vmatpush1.bf16.msra.mxu1 (!%p4317_p13), %v9361_v2  ;;  %v9367_v6 = vld [vmem:[%s11327_s21 + $0x10] ss:$8 sps:$4 sm:$0xff] (!%p4317_p13)   ;;  %v9369_v8 = vld [vmem:[%s11327_s21 + $0x24] ss:$8 sps:$4 sm:$0xff] (!%p4317_p13)   ;;  %v9373_v10 = vld [vmem:[%s11327_s21 + $0x20] ss:$8 sps:$4 sm:$0xff] (!%p4317_p13)  }
 0x125   : > { %7985 = vmatpush1.bf16.msra.mxu0 (!%p4317_p13), %v9362_v3  ;;  %7642 = vmatprep.subr.bf16.mxu1 (!%p4317_p13), %v9363_v4  ;;  %v9368_v7 = vld [vmem:[%s11327_s21 + $0x810] ss:$8 sps:$4 sm:$0xff] (!%p4317_p13)   ;;  %v9371_v9 = vld [vmem:[%s11327_s21 + $0x824] ss:$8 sps:$4 sm:$0xff] (!%p4317_p13)   ;;  %v9374_v11 = vld [vmem:[%s11327_s21 + $0x820] ss:$8 sps:$4 sm:$0xff] (!%p4317_p13)  }
 0x126   : > { %7986 = vmatprep.subr.bf16.mxu0 (!%p4317_p13), %v9365_v5  ;;  %v9375_v12 = vld [vmem:[%s11327_s21 + $0x34] ss:$8 sps:$4 sm:$0xff] (!%p4317_p13)   ;;  %v9379_v14 = vld [vmem:[%s11327_s21 + $0x30] ss:$8 sps:$4 sm:$0xff] (!%p4317_p13)   ;;  %v9381_v16 = vld [vmem:[%s11327_s21 + $0x44] ss:$8 sps:$4 sm:$0xff] (!%p4317_p13)  }
 0x127   : > { %v9377_v13 = vld [vmem:[%s11327_s21 + $0x834] ss:$8 sps:$4 sm:$0xff]   ;;  %v9380_v15 = vld [vmem:[%s11327_s21 + $0x830] ss:$8 sps:$4 sm:$0xff]   ;;  %v9383_v17 = vld [vmem:[%s11327_s21 + $0x844] ss:$8 sps:$4 sm:$0xff]  }
 0x128   : > { %7643 = vmatpush1.bf16.msra.mxu1 %v9367_v6  ;;  %v9385_v18 = vld [vmem:[%s11327_s21 + $0x40] ss:$8 sps:$4 sm:$0xff]   ;;  %v9387_v20 = vld [vmem:[%s11327_s21 + $0x54] ss:$8 sps:$4 sm:$0xff]   ;;  %v9391_v22 = vld [vmem:[%s11327_s21 + $0x50] ss:$8 sps:$4 sm:$0xff]  }
 0x129   : > { %7987 = vmatpush1.bf16.msra.mxu0 %v9368_v7  ;;  %7644 = vmatprep.subr.bf16.mxu1 %v9369_v8  ;;  %v9386_v19 = vld [vmem:[%s11327_s21 + $0x840] ss:$8 sps:$4 sm:$0xff]   ;;  %v9389_v21 = vld [vmem:[%s11327_s21 + $0x854] ss:$8 sps:$4 sm:$0xff]   ;;  %v9392_v23 = vld [vmem:[%s11327_s21 + $0x850] ss:$8 sps:$4 sm:$0xff]  }
 0x12a   : > { %7988 = vmatprep.subr.bf16.mxu0 %v9371_v9  ;;  %v9393_v24 = vld [vmem:[%s11327_s21 + $0x64] ss:$8 sps:$4 sm:$0xff]   ;;  %v9397_v26 = vld [vmem:[%s11327_s21 + $0x60] ss:$8 sps:$4 sm:$0xff]   ;;  %v9399_v28 = vld [vmem:[%s11327_s21 + $0x74] ss:$8 sps:$4 sm:$0xff]  }
 0x12b   : > { %v9395_v25 = vld [vmem:[%s11327_s21 + $0x864] ss:$8 sps:$4 sm:$0xff]   ;;  %v9398_v27 = vld [vmem:[%s11327_s21 + $0x860] ss:$8 sps:$4 sm:$0xff]   ;;  %v9401_v29 = vld [vmem:[%s11327_s21 + $0x874] ss:$8 sps:$4 sm:$0xff]  }
 0x12c   : > { %7645 = vmatpush1.bf16.msra.mxu1 %v9373_v10  ;;  %v9403_v30 = vld [vmem:[%s11327_s21 + $0x70] ss:$8 sps:$4 sm:$0xff]   ;;  %v9405_v32 = vld [vmem:[%s11327_s21 + $0x84] ss:$8 sps:$4 sm:$0xff]   ;;  %v9409_v34 = vld [vmem:[%s11327_s21 + $0x80] ss:$8 sps:$4 sm:$0xff]  }
 0x12d   : > { %7989 = vmatpush1.bf16.msra.mxu0 %v9374_v11  ;;  %7646 = vmatprep.subr.bf16.mxu1 %v9375_v12  ;;  %v9404_v31 = vld [vmem:[%s11327_s21 + $0x870] ss:$8 sps:$4 sm:$0xff]   ;;  %v9407_v33 = vld [vmem:[%s11327_s21 + $0x884] ss:$8 sps:$4 sm:$0xff]   ;;  %v9410_v35 = vld [vmem:[%s11327_s21 + $0x880] ss:$8 sps:$4 sm:$0xff]  }
 0x12e   : > { %7990 = vmatprep.subr.bf16.mxu0 %v9377_v13  ;;  %v9411_v36 = vld [vmem:[%s11327_s21 + $0x94] ss:$8 sps:$4 sm:$0xff]   ;;  %s4355_s11 = scalar_select %p4354_p0, %s10185_s14, 1  ;;  %v9415_v38 = vld [vmem:[%s11327_s21 + $0x90] ss:$8 sps:$4 sm:$0xff]  }
 0x12f   : > { %v9413_v37 = vld [vmem:[%s11327_s21 + $0x894] ss:$8 sps:$4 sm:$0xff]   ;;  %v9416_v39 = vld [vmem:[%s11327_s21 + $0x890] ss:$8 sps:$4 sm:$0xff]   ;;  %v9417_v40 = vld [vmem:[%s11327_s21 + $0xa4] ss:$8 sps:$4 sm:$0xff]  }
 0x130   : > { %7647 = vmatpush1.bf16.msra.mxu1 %v9379_v14  ;;  %s9218_s22 = sshll.u32 %s4355_s11, 8  ;;  %v9419_v41 = vld [vmem:[%s11327_s21 + $0x8a4] ss:$8 sps:$4 sm:$0xff]   ;;  %v9421_v42 = vld [vmem:[%s11327_s21 + $0xa0] ss:$8 sps:$4 sm:$0xff]   ;;  %s8660_s30 = sshll.u32 %s4350_s29, 4 }
 0x131   : > { %7991 = vmatpush1.bf16.msra.mxu0 %v9380_v15  ;;  %7648 = vmatprep.subr.bf16.mxu1 %v9381_v16  ;;  %v9422_v43 = vld [vmem:[%s11327_s21 + $0x8a0] ss:$8 sps:$4 sm:$0xff]   ;;  %s11378_s26 = scalar_lea.vmem %s12047_s0, %s9218_s22  ;;  %v9423_v44 = vld [vmem:[%s11327_s21 + $0xb4] ss:$8 sps:$4 sm:$0xff]   ;;  %v9427_v46 = vld [vmem:[%s11327_s21 + $0xb0] ss:$8 sps:$4 sm:$0xff]  }
 0x132   : > { %7992 = vmatprep.subr.bf16.mxu0 %v9383_v17  ;;  %v9425_v45 = vld [vmem:[%s11327_s21 + $0x8b4] ss:$8 sps:$4 sm:$0xff]   ;;  %v9428_v47 = vld [vmem:[%s11327_s21 + $0x8b0] ss:$8 sps:$4 sm:$0xff]   ;;  %v9429_v50 = vld [vmem:[%s11327_s21 + $0xc4] ss:$8 sps:$4 sm:$0xff]  }
 0x133   : > { %v4376_v48 = vld [vmem:[%s11378_s26] sm:$0xff]  ;;  %v9431_v51 = vld [vmem:[%s11327_s21 + $0x8c4] ss:$8 sps:$4 sm:$0xff]   ;;  %v9439_v60 = vld [vmem:[%s11327_s21 + $0xd0] ss:$8 sps:$4 sm:$0xff]   ;;  %s4352_s9 = scalar_lea.vmem [#allocation5], %s8660_s30 }
 0x134   : > { %7649 = vmatpush1.bf16.msra.mxu1 %v9385_v18  ;;  %v4392_v49 = vld [vmem:[%s11378_s26 + $0x80] sm:$0xff]  ;;  %v9440_v61 = vld [vmem:[%s11327_s21 + $0x8d0] ss:$8 sps:$4 sm:$0xff]   ;;  %v9441_v62 = vld [vmem:[%s11327_s21 + $0xe4] ss:$8 sps:$4 sm:$0xff]   ;;  %s9212_s3 = sshll.u32 (%p10283_p9), %s10181_s13, 1 }
 0x135   : > { %7993 = vmatpush1.bf16.msra.mxu0 %v9386_v19  ;;  %7650 = vmatprep.subr.bf16.mxu1 %v9387_v20  ;;  %v8664_v52 = vcombine.high %v4376_v48, %v4392_v49  ;;  %v4384_v53 = vld [vmem:[%s11378_s26 + $0x40] sm:$0xff]  ;;  %v9443_v63 = vld [vmem:[%s11327_s21 + $0x8e4] ss:$8 sps:$4 sm:$0xff]   ;;  %v9451_v4 = vld [vmem:[%s11327_s21 + $0xf0] ss:$8 sps:$4 sm:$0xff]   ;;  %v8663_v8 = vcombine.low %v4376_v48, %v4392_v49  ;;  %s9213_s4 = sshll.u32 (%p10283_p9), %s10185_s14, 3 }
 0x136   : > { %7994 = vmatprep.subr.bf16.mxu0 %v9389_v21  ;;  %v4400_v54 = vld [vmem:[%s11378_s26 + $0xc0] sm:$0xff]  ;;  %v9452_v5 = vld [vmem:[%s11327_s21 + $0x8f0] ss:$8 sps:$4 sm:$0xff]   ;;  %v9455_v6 = vld [vmem:[%s11327_s21 + $0x104] ss:$8 sps:$4 sm:$0xff]   ;;  %s8506_s5 = sadd.s32 (%p10283_p9), %s9213_s4, %s9212_s3 }
 0x137   : > { %7672 = vmatprep.mubr.bf16.mxu1 %v8664_v52  ;;  %v8680_v55 = vcombine.high %v4384_v53, %v4400_v54  ;;  %v9433_v56 = vld [vmem:[%s11327_s21 + $0xc0] ss:$8 sps:$4 sm:$0xff]   ;;  %v9435_v58 = vld [vmem:[%s11327_s21 + $0xd4] ss:$8 sps:$4 sm:$0xff]   ;;  %v9458_v7 = vld [vmem:[%s11327_s21 + $0x904] ss:$8 sps:$4 sm:$0xff]   ;;  %v8679_v10 = vcombine.low %v4384_v53, %v4400_v54 }
 0x138   : > { %7651 = vmatpush1.bf16.msra.mxu1 %v9391_v22  ;;  %v9434_v57 = vld [vmem:[%s11327_s21 + $0x8c0] ss:$8 sps:$4 sm:$0xff]   ;;  %v9437_v59 = vld [vmem:[%s11327_s21 + $0x8d4] ss:$8 sps:$4 sm:$0xff]   ;;  %v9459_v14 = vld [vmem:[%s11327_s21 + $0x110] ss:$8 sps:$4 sm:$0xff]  }
 0x139   : > { %7995 = vmatpush1.bf16.msra.mxu0 %v9392_v23  ;;  %7652 = vmatprep.subr.bf16.mxu1 %v9393_v24  ;;  %v9445_v0 = vld [vmem:[%s11327_s21 + $0xe0] ss:$8 sps:$4 sm:$0xff]   ;;  %v9447_v2 = vld [vmem:[%s11327_s21 + $0xf4] ss:$8 sps:$4 sm:$0xff]   ;;  %v9462_v15 = vld [vmem:[%s11327_s21 + $0x910] ss:$8 sps:$4 sm:$0xff]  }
 0x13a   : > { %7996 = vmatprep.subr.bf16.mxu0 %v9395_v25  ;;  %8016 = vmatprep.mubr.bf16.mxu0 %v8680_v55  ;;  %v9446_v1 = vld [vmem:[%s11327_s21 + $0x8e0] ss:$8 sps:$4 sm:$0xff]   ;;  %v9449_v3 = vld [vmem:[%s11327_s21 + $0x8f4] ss:$8 sps:$4 sm:$0xff]   ;;  %v9467_v16 = vld [vmem:[%s11327_s21 + $0x124] ss:$8 sps:$4 sm:$0xff]  }
 0x13b   : > { %v9453_v9 = vld [vmem:[%s11327_s21 + $0x100] ss:$8 sps:$4 sm:$0xff]   ;;  %v9461_v12 = vld [vmem:[%s11327_s21 + $0x114] ss:$8 sps:$4 sm:$0xff]   ;;  %v9470_v17 = vld [vmem:[%s11327_s21 + $0x924] ss:$8 sps:$4 sm:$0xff]  }
 0x13c   : > { %7653 = vmatpush1.bf16.msra.mxu1 %v9397_v26  ;;  %v9456_v11 = vld [vmem:[%s11327_s21 + $0x900] ss:$8 sps:$4 sm:$0xff]   ;;  %v9464_v13 = vld [vmem:[%s11327_s21 + $0x914] ss:$8 sps:$4 sm:$0xff]   ;;  %v9471_v22 = vld [vmem:[%s11327_s21 + $0x130] ss:$8 sps:$4 sm:$0xff]  }
 0x13d   : > { %7997 = vmatpush1.bf16.msra.mxu0 %v9398_v27  ;;  %7654 = vmatprep.subr.bf16.mxu1 %v9399_v28  ;;  %v9465_v18 = vld [vmem:[%s11327_s21 + $0x120] ss:$8 sps:$4 sm:$0xff]   ;;  %v9473_v20 = vld [vmem:[%s11327_s21 + $0x134] ss:$8 sps:$4 sm:$0xff]   ;;  %v9474_v23 = vld [vmem:[%s11327_s21 + $0x930] ss:$8 sps:$4 sm:$0xff]  }
 0x13e   : > { %7998 = vmatprep.subr.bf16.mxu0 %v9401_v29  ;;  %v9468_v19 = vld [vmem:[%s11327_s21 + $0x920] ss:$8 sps:$4 sm:$0xff]   ;;  %v9476_v21 = vld [vmem:[%s11327_s21 + $0x934] ss:$8 sps:$4 sm:$0xff]   ;;  %v9479_v24 = vld [vmem:[%s11327_s21 + $0x144] ss:$8 sps:$4 sm:$0xff]  }
 0x13f   : > { %v9482_v25 = vld [vmem:[%s11327_s21 + $0x944] ss:$8 sps:$4 sm:$0xff]   ;;  %v9477_v26 = vld [vmem:[%s11327_s21 + $0x140] ss:$8 sps:$4 sm:$0xff]   ;;  %v9485_v28 = vld [vmem:[%s11327_s21 + $0x154] ss:$8 sps:$4 sm:$0xff]  }
 0x140   : > { %7655 = vmatpush1.bf16.msra.mxu1 %v9403_v30  ;;  %v9480_v27 = vld [vmem:[%s11327_s21 + $0x940] ss:$8 sps:$4 sm:$0xff]   ;;  %v9488_v29 = vld [vmem:[%s11327_s21 + $0x954] ss:$8 sps:$4 sm:$0xff]   ;;  %v9483_v30 = vld [vmem:[%s11327_s21 + $0x150] ss:$8 sps:$4 sm:$0xff]  }
 0x141   : > { %7999 = vmatpush1.bf16.msra.mxu0 %v9404_v31  ;;  %7656 = vmatprep.subr.bf16.mxu1 %v9405_v32  ;;  %v9486_v31 = vld [vmem:[%s11327_s21 + $0x950] ss:$8 sps:$4 sm:$0xff]   ;;  %v9491_v32 = vld [vmem:[%s11327_s21 + $0x164] ss:$8 sps:$4 sm:$0xff]   ;;  %v9501_v48 = vld [vmem:[%s11327_s21 + $0x180] ss:$8 sps:$4 sm:$0xff]  }
 0x142   : > { %8000 = vmatprep.subr.bf16.mxu0 %v9407_v33  ;;  %v9494_v33 = vld [vmem:[%s11327_s21 + $0x964] ss:$8 sps:$4 sm:$0xff]   ;;  %v9504_v49 = vld [vmem:[%s11327_s21 + $0x980] ss:$8 sps:$4 sm:$0xff]   ;;  %v9507_v52 = vld [vmem:[%s11327_s21 + $0x190] ss:$8 sps:$4 sm:$0xff]  }
 0x143   : > { %v9510_v53 = vld [vmem:[%s11327_s21 + $0x990] ss:$8 sps:$4 sm:$0xff]   ;;  %v9515_v54 = vld [vmem:[%s11327_s21 + $0x1a4] ss:$8 sps:$4 sm:$0xff]   ;;  %s9214_s6 = sshll.u32 (%p10283_p9), %s8506_s5, 2 }
 0x144   : > { %7657 = vmatpush1.bf16.msra.mxu1 %v9409_v34  ;;  %v9489_v34 = vld [vmem:[%s11327_s21 + $0x160] ss:$8 sps:$4 sm:$0xff]   ;;  %v9518_v55 = vld [vmem:[%s11327_s21 + $0x9a4] ss:$8 sps:$4 sm:$0xff]   ;;  %s8508_s18 = scalar_lea.vmem (%p10283_p9), %s12049_s2, %s9214_s6 }
 0x145   : > { %8001 = vmatpush1.bf16.msra.mxu0 %v9410_v35  ;;  %7658 = vmatprep.subr.bf16.mxu1 %v9411_v36  ;;  %v9492_v35 = vld [vmem:[%s11327_s21 + $0x960] ss:$8 sps:$4 sm:$0xff]  }
 0x146   : > { %8002 = vmatprep.subr.bf16.mxu0 %v9413_v37  ;;  %v11433_v36 = vld [vmem:[%s11378_s26 + $0x8] sm:$0xff] }
 0x147   : > { %v11436_v37 = vld [vmem:[%s11378_s26 + $0x88] sm:$0xff] }
 0x148   : > { %7659 = vmatpush1.bf16.msra.mxu1 %v9415_v38  ;;  %v9497_v38 = vld [vmem:[%s11327_s21 + $0x174] ss:$8 sps:$4 sm:$0xff]  }
 0x149   : > { %8003 = vmatpush1.bf16.msra.mxu0 %v9416_v39  ;;  %7660 = vmatprep.subr.bf16.mxu1 %v9417_v40  ;;  %v9500_v39 = vld [vmem:[%s11327_s21 + $0x974] ss:$8 sps:$4 sm:$0xff]   ;;  %v8666_v40 = vcombine.high %v11433_v36, %v11436_v37 }
 0x14a   : > { %8004 = vmatprep.subr.bf16.mxu0 %v9419_v41  ;;  %v11443_v41 = vld [vmem:[%s11378_s26 + $0x48] sm:$0xff] }
 0x14c   : > { %7661 = vmatpush1.bf16.msra.mxu1 %v9421_v42  ;;  %v11446_v42 = vld [vmem:[%s11378_s26 + $0xc8] sm:$0xff] }
 0x14d   : > { %8005 = vmatpush1.bf16.msra.mxu0 %v9422_v43  ;;  %7662 = vmatprep.subr.bf16.mxu1 %v9423_v44  ;;  %v8682_v43 = vcombine.high %v11443_v41, %v11446_v42  ;;  %v9495_v44 = vld [vmem:[%s11327_s21 + $0x170] ss:$8 sps:$4 sm:$0xff]  }
 0x14e   : > { %8006 = vmatprep.subr.bf16.mxu0 %v9425_v45  ;;  %v9498_v45 = vld [vmem:[%s11327_s21 + $0x970] ss:$8 sps:$4 sm:$0xff]  }
 0x150   : > { %7663 = vmatpush1.bf16.msra.mxu1 %v9427_v46  ;;  %v9503_v46 = vld [vmem:[%s11327_s21 + $0x184] ss:$8 sps:$4 sm:$0xff]  }
 0x151   : > { %8007 = vmatpush1.bf16.msra.mxu0 %v9428_v47  ;;  %7664 = vmatprep.subr.bf16.mxu1 %v9429_v50  ;;  %v9506_v47 = vld [vmem:[%s11327_s21 + $0x984] ss:$8 sps:$4 sm:$0xff]   ;;  %v9509_v50 = vld [vmem:[%s11327_s21 + $0x194] ss:$8 sps:$4 sm:$0xff]  }
 0x152   : > { %8008 = vmatprep.subr.bf16.mxu0 %v9431_v51  ;;  %v9512_v51 = vld [vmem:[%s11327_s21 + $0x994] ss:$8 sps:$4 sm:$0xff]  }
 0x154   : > { %7665 = vmatpush1.bf16.msra.mxu1 %v9433_v56  ;;  %v9513_v56 = vld [vmem:[%s11327_s21 + $0x1a0] ss:$8 sps:$4 sm:$0xff]  }
 0x155   : > { %8009 = vmatpush1.bf16.msra.mxu0 %v9434_v57  ;;  %7666 = vmatprep.subr.bf16.mxu1 %v9435_v58  ;;  %v9516_v57 = vld [vmem:[%s11327_s21 + $0x9a0] ss:$8 sps:$4 sm:$0xff]   ;;  %v9521_v58 = vld [vmem:[%s11327_s21 + $0x1b4] ss:$8 sps:$4 sm:$0xff]  }
 0x156   : > { %8010 = vmatprep.subr.bf16.mxu0 %v9437_v59  ;;  %v9524_v59 = vld [vmem:[%s11327_s21 + $0x9b4] ss:$8 sps:$4 sm:$0xff]  }
 0x158   : > { %7667 = vmatpush1.bf16.msra.mxu1 %v9439_v60  ;;  %v9519_v60 = vld [vmem:[%s11327_s21 + $0x1b0] ss:$8 sps:$4 sm:$0xff]  }
 0x159   : > { %8011 = vmatpush1.bf16.msra.mxu0 %v9440_v61  ;;  %7668 = vmatprep.subr.bf16.mxu1 %v9441_v62  ;;  %v9522_v61 = vld [vmem:[%s11327_s21 + $0x9b0] ss:$8 sps:$4 sm:$0xff]   ;;  %v9527_v62 = vld [vmem:[%s11327_s21 + $0x1c4] ss:$8 sps:$4 sm:$0xff]  }
 0x15a   : > { %8012 = vmatprep.subr.bf16.mxu0 %v9443_v63  ;;  %v9530_v63 = vld [vmem:[%s11327_s21 + $0x9c4] ss:$8 sps:$4 sm:$0xff]  }
 0x15c   : > { %7669 = vmatpush1.bf16.msra.mxu1 %v9445_v0  ;;  %v9525_v0 = vld [vmem:[%s11327_s21 + $0x1c0] ss:$8 sps:$4 sm:$0xff]  }
 0x15d   : > { %8013 = vmatpush1.bf16.msra.mxu0 %v9446_v1  ;;  %7670 = vmatprep.subr.bf16.mxu1 %v9447_v2  ;;  %v9528_v1 = vld [vmem:[%s11327_s21 + $0x9c0] ss:$8 sps:$4 sm:$0xff]   ;;  %v9533_v2 = vld [vmem:[%s11327_s21 + $0x1d4] ss:$8 sps:$4 sm:$0xff]  }
 0x15e   : > { %8014 = vmatprep.subr.bf16.mxu0 %v9449_v3  ;;  %v9536_v3 = vld [vmem:[%s11327_s21 + $0x9d4] ss:$8 sps:$4 sm:$0xff]  }
 0x160   : > { %7671 = vmatpush1.bf16.msra.mxu1 %v9451_v4  ;;  %v9531_v4 = vld [vmem:[%s11327_s21 + $0x1d0] ss:$8 sps:$4 sm:$0xff]  }
 0x161   : > { %8015 = vmatpush1.bf16.msra.mxu0 %v9452_v5  ;;  %7683 = vmatprep.subr.bf16.mxu1 %v9455_v6  ;;  %v9534_v5 = vld [vmem:[%s11327_s21 + $0x9d0] ss:$8 sps:$4 sm:$0xff]   ;;  %v9539_v6 = vld [vmem:[%s11327_s21 + $0x1e4] ss:$8 sps:$4 sm:$0xff]  }
 0x162   : > { %8027 = vmatprep.subr.bf16.mxu0 %v9458_v7  ;;  %v9542_v7 = vld [vmem:[%s11327_s21 + $0x9e4] ss:$8 sps:$4 sm:$0xff]  }
 0x163   : > { %7673 = vmatmul.mubr.bf16.vlgmr.msra.gmra.mrb[0].mxu1 %v8663_v8  ;;  %v9537_v8 = vld [vmem:[%s11327_s21 + $0x1e0] ss:$8 sps:$4 sm:$0xff]  }
 0x164   : > { %8017 = vmatmul.mubr.bf16.vlgmr.msra.gmra.mrb[0].mxu0 %v8679_v10  ;;  %7684 = vmatpush1.bf16.msra.mxu1 %v9453_v9  ;;  %v9540_v9 = vld [vmem:[%s11327_s21 + $0x9e0] ss:$8 sps:$4 sm:$0xff]   ;;  %v9545_v10 = vld [vmem:[%s11327_s21 + $0x1f4] ss:$8 sps:$4 sm:$0xff]  }
 0x165   : > { %8028 = vmatpush1.bf16.msra.mxu0 %v9456_v11  ;;  %7685 = vmatprep.subr.bf16.mxu1 %v9461_v12  ;;  %v9548_v11 = vld [vmem:[%s11327_s21 + $0x9f4] ss:$8 sps:$4 sm:$0xff]   ;;  %v9543_v12 = vld [vmem:[%s11327_s21 + $0x1f0] ss:$8 sps:$4 sm:$0xff]  }
 0x166   : > { %8029 = vmatprep.subr.bf16.mxu0 %v9464_v13  ;;  %7715 = vmatprep.mubr.bf16.mxu1 %v8666_v40  ;;  %v9546_v13 = vld [vmem:[%s11327_s21 + $0x9f0] ss:$8 sps:$4 sm:$0xff]   ;;  %v9573_v40 = vld [vmem:[%s11327_s21 + $0x240] ss:$8 sps:$4 sm:$0xff]  }
 0x167   : > { %8059 = vmatprep.mubr.bf16.mxu0 %v8682_v43  ;;  %v9584_v43 = vld [vmem:[%s11327_s21 + $0xa54] ss:$8 sps:$4 sm:$0xff]  }
 0x168   : > { %7686 = vmatpush1.bf16.msra.mxu1 %v9459_v14  ;;  %v9551_v14 = vld [vmem:[%s11327_s21 + $0x204] ss:$8 sps:$4 sm:$0xff]  }
 0x169   : > { %8030 = vmatpush1.bf16.msra.mxu0 %v9462_v15  ;;  %7687 = vmatprep.subr.bf16.mxu1 %v9467_v16  ;;  %v9554_v15 = vld [vmem:[%s11327_s21 + $0xa04] ss:$8 sps:$4 sm:$0xff]   ;;  %v8665_v16 = vcombine.low %v11433_v36, %v11436_v37  ;;  %v9567_v36 = vld [vmem:[%s11327_s21 + $0x230] ss:$8 sps:$4 sm:$0xff]  }
 0x16a   : > { %8031 = vmatprep.subr.bf16.mxu0 %v9470_v17  ;;  %v9549_v17 = vld [vmem:[%s11327_s21 + $0x200] ss:$8 sps:$4 sm:$0xff]   ;;  %v9570_v37 = vld [vmem:[%s11327_s21 + $0xa30] ss:$8 sps:$4 sm:$0xff]  }
 0x16c   : > { %7688 = vmatpush1.bf16.msra.mxu1 %v9465_v18  ;;  %v8681_v18 = vcombine.low %v11443_v41, %v11446_v42  ;;  %v9576_v41 = vld [vmem:[%s11327_s21 + $0xa40] ss:$8 sps:$4 sm:$0xff]   ;;  %v9581_v42 = vld [vmem:[%s11327_s21 + $0x254] ss:$8 sps:$4 sm:$0xff]  }
 0x16d   : > { %8032 = vmatpush1.bf16.msra.mxu0 %v9468_v19  ;;  %7689 = vmatprep.subr.bf16.mxu1 %v9473_v20  ;;  %v9552_v19 = vld [vmem:[%s11327_s21 + $0xa00] ss:$8 sps:$4 sm:$0xff]   ;;  %v9557_v20 = vld [vmem:[%s11327_s21 + $0x214] ss:$8 sps:$4 sm:$0xff]  }
 0x16e   : > { %8033 = vmatprep.subr.bf16.mxu0 %v9476_v21  ;;  %v9560_v21 = vld [vmem:[%s11327_s21 + $0xa14] ss:$8 sps:$4 sm:$0xff]  }
 0x170   : > { %7690 = vmatpush1.bf16.msra.mxu1 %v9471_v22  ;;  %v9555_v22 = vld [vmem:[%s11327_s21 + $0x210] ss:$8 sps:$4 sm:$0xff]  }
 0x171   : > { %8034 = vmatpush1.bf16.msra.mxu0 %v9474_v23  ;;  %7691 = vmatprep.subr.bf16.mxu1 %v9479_v24  ;;  %v9558_v23 = vld [vmem:[%s11327_s21 + $0xa10] ss:$8 sps:$4 sm:$0xff]  }
 0x172   : > { %8035 = vmatprep.subr.bf16.mxu0 %v9482_v25  ;;  %v11497_v24 = vld [vmem:[%s11378_s26 + $0x10] sm:$0xff] }
 0x173   : > { %v11500_v25 = vld [vmem:[%s11378_s26 + $0x90] sm:$0xff] }
 0x174   : > { %7692 = vmatpush1.bf16.msra.mxu1 %v9477_v26  ;;  %v9563_v26 = vld [vmem:[%s11327_s21 + $0x224] ss:$8 sps:$4 sm:$0xff]  }
 0x175   : > { %8036 = vmatpush1.bf16.msra.mxu0 %v9480_v27  ;;  %7693 = vmatprep.subr.bf16.mxu1 %v9485_v28  ;;  %v9566_v27 = vld [vmem:[%s11327_s21 + $0xa24] ss:$8 sps:$4 sm:$0xff]   ;;  %v8668_v28 = vcombine.high %v11497_v24, %v11500_v25 }
 0x176   : > { %8037 = vmatprep.subr.bf16.mxu0 %v9488_v29  ;;  %v11507_v29 = vld [vmem:[%s11378_s26 + $0x50] sm:$0xff] }
 0x178   : > { %7694 = vmatpush1.bf16.msra.mxu1 %v9483_v30  ;;  %v11510_v30 = vld [vmem:[%s11378_s26 + $0xd0] sm:$0xff] }
 0x179   : > { %8038 = vmatpush1.bf16.msra.mxu0 %v9486_v31  ;;  %7695 = vmatprep.subr.bf16.mxu1 %v9491_v32  ;;  %v8684_v31 = vcombine.high %v11507_v29, %v11510_v30  ;;  %v9561_v32 = vld [vmem:[%s11327_s21 + $0x220] ss:$8 sps:$4 sm:$0xff]  }
 0x17a   : > { %8039 = vmatprep.subr.bf16.mxu0 %v9494_v33  ;;  %v9564_v33 = vld [vmem:[%s11327_s21 + $0xa20] ss:$8 sps:$4 sm:$0xff]  }
 0x17c   : > { %7696 = vmatpush1.bf16.msra.mxu1 %v9489_v34  ;;  %v9569_v34 = vld [vmem:[%s11327_s21 + $0x234] ss:$8 sps:$4 sm:$0xff]  }
 0x17d   : > { %8040 = vmatpush1.bf16.msra.mxu0 %v9492_v35  ;;  %7697 = vmatprep.subr.bf16.mxu1 %v9497_v38  ;;  %v9572_v35 = vld [vmem:[%s11327_s21 + $0xa34] ss:$8 sps:$4 sm:$0xff]   ;;  %v9575_v38 = vld [vmem:[%s11327_s21 + $0x244] ss:$8 sps:$4 sm:$0xff]  }
 0x17e   : > { %8041 = vmatprep.subr.bf16.mxu0 %v9500_v39  ;;  %v9578_v39 = vld [vmem:[%s11327_s21 + $0xa44] ss:$8 sps:$4 sm:$0xff]  }
 0x180   : > { %7698 = vmatpush1.bf16.msra.mxu1 %v9495_v44  ;;  %v9579_v44 = vld [vmem:[%s11327_s21 + $0x250] ss:$8 sps:$4 sm:$0xff]  }
 0x181   : > { %8042 = vmatpush1.bf16.msra.mxu0 %v9498_v45  ;;  %7699 = vmatprep.subr.bf16.mxu1 %v9503_v46  ;;  %v9582_v45 = vld [vmem:[%s11327_s21 + $0xa50] ss:$8 sps:$4 sm:$0xff]   ;;  %v9587_v46 = vld [vmem:[%s11327_s21 + $0x264] ss:$8 sps:$4 sm:$0xff]  }
 0x182   : > { %8043 = vmatprep.subr.bf16.mxu0 %v9506_v47  ;;  %v9590_v47 = vld [vmem:[%s11327_s21 + $0xa64] ss:$8 sps:$4 sm:$0xff]  }
 0x184   : > { %7700 = vmatpush1.bf16.msra.mxu1 %v9501_v48  ;;  %v9585_v48 = vld [vmem:[%s11327_s21 + $0x260] ss:$8 sps:$4 sm:$0xff]  }
 0x185   : > { %8044 = vmatpush1.bf16.msra.mxu0 %v9504_v49  ;;  %7701 = vmatprep.subr.bf16.mxu1 %v9509_v50  ;;  %v9588_v49 = vld [vmem:[%s11327_s21 + $0xa60] ss:$8 sps:$4 sm:$0xff]   ;;  %v9593_v50 = vld [vmem:[%s11327_s21 + $0x274] ss:$8 sps:$4 sm:$0xff]  }
 0x186   : > { %8045 = vmatprep.subr.bf16.mxu0 %v9512_v51  ;;  %v9596_v51 = vld [vmem:[%s11327_s21 + $0xa74] ss:$8 sps:$4 sm:$0xff]  }
 0x188   : > { %7702 = vmatpush1.bf16.msra.mxu1 %v9507_v52  ;;  %v9591_v52 = vld [vmem:[%s11327_s21 + $0x270] ss:$8 sps:$4 sm:$0xff]  }
 0x189   : > { %8046 = vmatpush1.bf16.msra.mxu0 %v9510_v53  ;;  %7703 = vmatprep.subr.bf16.mxu1 %v9515_v54  ;;  %v9594_v53 = vld [vmem:[%s11327_s21 + $0xa70] ss:$8 sps:$4 sm:$0xff]   ;;  %v9599_v54 = vld [vmem:[%s11327_s21 + $0x284] ss:$8 sps:$4 sm:$0xff]  }
 0x18a   : > { %8047 = vmatprep.subr.bf16.mxu0 %v9518_v55  ;;  %v9602_v55 = vld [vmem:[%s11327_s21 + $0xa84] ss:$8 sps:$4 sm:$0xff]  }
 0x18c   : > { %7704 = vmatpush1.bf16.msra.mxu1 %v9513_v56  ;;  %v9597_v56 = vld [vmem:[%s11327_s21 + $0x280] ss:$8 sps:$4 sm:$0xff]  }
 0x18d   : > { %8048 = vmatpush1.bf16.msra.mxu0 %v9516_v57  ;;  %7705 = vmatprep.subr.bf16.mxu1 %v9521_v58  ;;  %v9600_v57 = vld [vmem:[%s11327_s21 + $0xa80] ss:$8 sps:$4 sm:$0xff]   ;;  %v9605_v58 = vld [vmem:[%s11327_s21 + $0x294] ss:$8 sps:$4 sm:$0xff]  }
 0x18e   : > { %8049 = vmatprep.subr.bf16.mxu0 %v9524_v59  ;;  %v9608_v59 = vld [vmem:[%s11327_s21 + $0xa94] ss:$8 sps:$4 sm:$0xff]  }
 0x190   : > { %7706 = vmatpush1.bf16.msra.mxu1 %v9519_v60  ;;  %v9603_v60 = vld [vmem:[%s11327_s21 + $0x290] ss:$8 sps:$4 sm:$0xff]  }
 0x191   : > { %8050 = vmatpush1.bf16.msra.mxu0 %v9522_v61  ;;  %7707 = vmatprep.subr.bf16.mxu1 %v9527_v62  ;;  %v9606_v61 = vld [vmem:[%s11327_s21 + $0xa90] ss:$8 sps:$4 sm:$0xff]   ;;  %v9611_v62 = vld [vmem:[%s11327_s21 + $0x2a4] ss:$8 sps:$4 sm:$0xff]  }
 0x192   : > { %8051 = vmatprep.subr.bf16.mxu0 %v9530_v63  ;;  %v9614_v63 = vld [vmem:[%s11327_s21 + $0xaa4] ss:$8 sps:$4 sm:$0xff]  }
 0x194   : > { %7708 = vmatpush1.bf16.msra.mxu1 %v9525_v0  ;;  %v9609_v0 = vld [vmem:[%s11327_s21 + $0x2a0] ss:$8 sps:$4 sm:$0xff]  }
 0x195   : > { %8052 = vmatpush1.bf16.msra.mxu0 %v9528_v1  ;;  %7709 = vmatprep.subr.bf16.mxu1 %v9533_v2  ;;  %v9612_v1 = vld [vmem:[%s11327_s21 + $0xaa0] ss:$8 sps:$4 sm:$0xff]   ;;  %v9617_v2 = vld [vmem:[%s11327_s21 + $0x2b4] ss:$8 sps:$4 sm:$0xff]  }
 0x196   : > { %8053 = vmatprep.subr.bf16.mxu0 %v9536_v3  ;;  %v9620_v3 = vld [vmem:[%s11327_s21 + $0xab4] ss:$8 sps:$4 sm:$0xff]  }
 0x198   : > { %7710 = vmatpush1.bf16.msra.mxu1 %v9531_v4  ;;  %v9615_v4 = vld [vmem:[%s11327_s21 + $0x2b0] ss:$8 sps:$4 sm:$0xff]  }
 0x199   : > { %8054 = vmatpush1.bf16.msra.mxu0 %v9534_v5  ;;  %7711 = vmatprep.subr.bf16.mxu1 %v9539_v6  ;;  %v9618_v5 = vld [vmem:[%s11327_s21 + $0xab0] ss:$8 sps:$4 sm:$0xff]   ;;  %v9623_v6 = vld [vmem:[%s11327_s21 + $0x2c4] ss:$8 sps:$4 sm:$0xff]  }
 0x19a   : > { %8055 = vmatprep.subr.bf16.mxu0 %v9542_v7  ;;  %v9626_v7 = vld [vmem:[%s11327_s21 + $0xac4] ss:$8 sps:$4 sm:$0xff]  }
 0x19c   : > { %7712 = vmatpush1.bf16.msra.mxu1 %v9537_v8  ;;  %v9621_v8 = vld [vmem:[%s11327_s21 + $0x2c0] ss:$8 sps:$4 sm:$0xff]  }
 0x19d   : > { %8056 = vmatpush1.bf16.msra.mxu0 %v9540_v9  ;;  %7713 = vmatprep.subr.bf16.mxu1 %v9545_v10  ;;  %v9624_v9 = vld [vmem:[%s11327_s21 + $0xac0] ss:$8 sps:$4 sm:$0xff]   ;;  %v9629_v10 = vld [vmem:[%s11327_s21 + $0x2d4] ss:$8 sps:$4 sm:$0xff]  }
 0x19e   : > { %8057 = vmatprep.subr.bf16.mxu0 %v9548_v11  ;;  %v9632_v11 = vld [vmem:[%s11327_s21 + $0xad4] ss:$8 sps:$4 sm:$0xff]  }
 0x1a0   : > { %7714 = vmatpush1.bf16.msra.mxu1 %v9543_v12  ;;  %v9627_v12 = vld [vmem:[%s11327_s21 + $0x2d0] ss:$8 sps:$4 sm:$0xff]  }
 0x1a1   : > { %8058 = vmatpush1.bf16.msra.mxu0 %v9546_v13  ;;  %7726 = vmatprep.subr.bf16.mxu1 %v9551_v14  ;;  %v9630_v13 = vld [vmem:[%s11327_s21 + $0xad0] ss:$8 sps:$4 sm:$0xff]   ;;  %v9635_v14 = vld [vmem:[%s11327_s21 + $0x2e4] ss:$8 sps:$4 sm:$0xff]  }
 0x1a2   : > { %8070 = vmatprep.subr.bf16.mxu0 %v9554_v15  ;;  %v9638_v15 = vld [vmem:[%s11327_s21 + $0xae4] ss:$8 sps:$4 sm:$0xff]  }
 0x1a3   : > { %7716 = vmatmul.mubr.bf16.vlgmr.msra.gmra.mrb[0].mxu1 %v8665_v16  ;;  %v9633_v16 = vld [vmem:[%s11327_s21 + $0x2e0] ss:$8 sps:$4 sm:$0xff]  }
 0x1a4   : > { %8060 = vmatmul.mubr.bf16.vlgmr.msra.gmra.mrb[0].mxu0 %v8681_v18  ;;  %7727 = vmatpush1.bf16.msra.mxu1 %v9549_v17  ;;  %v9636_v17 = vld [vmem:[%s11327_s21 + $0xae0] ss:$8 sps:$4 sm:$0xff]   ;;  %v9641_v18 = vld [vmem:[%s11327_s21 + $0x2f4] ss:$8 sps:$4 sm:$0xff]  }
 0x1a5   : > { %8071 = vmatpush1.bf16.msra.mxu0 %v9552_v19  ;;  %7728 = vmatprep.subr.bf16.mxu1 %v9557_v20  ;;  %v9644_v19 = vld [vmem:[%s11327_s21 + $0xaf4] ss:$8 sps:$4 sm:$0xff]   ;;  %v9639_v20 = vld [vmem:[%s11327_s21 + $0x2f0] ss:$8 sps:$4 sm:$0xff]  }
 0x1a6   : > { %8072 = vmatprep.subr.bf16.mxu0 %v9560_v21  ;;  %7758 = vmatprep.mubr.bf16.mxu1 %v8668_v28  ;;  %v9642_v21 = vld [vmem:[%s11327_s21 + $0xaf0] ss:$8 sps:$4 sm:$0xff]  }
 0x1a7   : > { %8102 = vmatprep.mubr.bf16.mxu0 %v8684_v31  ;;  %v11573_v28 = vld [vmem:[%s11378_s26 + $0x18] sm:$0xff] }
 0x1a8   : > { %7729 = vmatpush1.bf16.msra.mxu1 %v9555_v22  ;;  %v9647_v22 = vld [vmem:[%s11327_s21 + $0x304] ss:$8 sps:$4 sm:$0xff]   ;;  %v11576_v31 = vld [vmem:[%s11378_s26 + $0x98] sm:$0xff] }
 0x1a9   : > { %8073 = vmatpush1.bf16.msra.mxu0 %v9558_v23  ;;  %7730 = vmatprep.subr.bf16.mxu1 %v9563_v26  ;;  %v9650_v23 = vld [vmem:[%s11327_s21 + $0xb04] ss:$8 sps:$4 sm:$0xff]   ;;  %v9645_v26 = vld [vmem:[%s11327_s21 + $0x300] ss:$8 sps:$4 sm:$0xff]  }
 0x1aa   : > { %8074 = vmatprep.subr.bf16.mxu0 %v9566_v27  ;;  %v9648_v27 = vld [vmem:[%s11327_s21 + $0xb00] ss:$8 sps:$4 sm:$0xff]  }
 0x1ac   : > { %7731 = vmatpush1.bf16.msra.mxu1 %v9561_v32  ;;  %v8667_v32 = vcombine.low %v11497_v24, %v11500_v25  ;;  %v8670_v24 = vcombine.high %v11573_v28, %v11576_v31 }
 0x1ad   : > { %8075 = vmatpush1.bf16.msra.mxu0 %v9564_v33  ;;  %7732 = vmatprep.subr.bf16.mxu1 %v9569_v34  ;;  %v8683_v33 = vcombine.low %v11507_v29, %v11510_v30  ;;  %v11583_v34 = vld [vmem:[%s11378_s26 + $0x58] sm:$0xff] }
 0x1ae   : > { %8076 = vmatprep.subr.bf16.mxu0 %v9572_v35  ;;  %v11586_v35 = vld [vmem:[%s11378_s26 + $0xd8] sm:$0xff] }
 0x1af   : > { %v8686_v25 = vcombine.high %v11583_v34, %v11586_v35  ;;  %v9651_v29 = vld [vmem:[%s11327_s21 + $0x310] ss:$8 sps:$4 sm:$0xff]  }
 0x1b0   : > { %7733 = vmatpush1.bf16.msra.mxu1 %v9567_v36  ;;  %v9653_v36 = vld [vmem:[%s11327_s21 + $0x314] ss:$8 sps:$4 sm:$0xff]   ;;  %v9654_v30 = vld [vmem:[%s11327_s21 + $0xb10] ss:$8 sps:$4 sm:$0xff]  }
 0x1b1   : > { %8077 = vmatpush1.bf16.msra.mxu0 %v9570_v37  ;;  %7734 = vmatprep.subr.bf16.mxu1 %v9575_v38  ;;  %v9656_v37 = vld [vmem:[%s11327_s21 + $0xb14] ss:$8 sps:$4 sm:$0xff]   ;;  %v9659_v38 = vld [vmem:[%s11327_s21 + $0x324] ss:$8 sps:$4 sm:$0xff]  }
 0x1b2   : > { %8078 = vmatprep.subr.bf16.mxu0 %v9578_v39  ;;  %v9662_v39 = vld [vmem:[%s11327_s21 + $0xb24] ss:$8 sps:$4 sm:$0xff]  }
 0x1b4   : > { %7735 = vmatpush1.bf16.msra.mxu1 %v9573_v40  ;;  %v9657_v40 = vld [vmem:[%s11327_s21 + $0x320] ss:$8 sps:$4 sm:$0xff]  }
 0x1b5   : > { %8079 = vmatpush1.bf16.msra.mxu0 %v9576_v41  ;;  %7736 = vmatprep.subr.bf16.mxu1 %v9581_v42  ;;  %v9660_v41 = vld [vmem:[%s11327_s21 + $0xb20] ss:$8 sps:$4 sm:$0xff]   ;;  %v9665_v42 = vld [vmem:[%s11327_s21 + $0x334] ss:$8 sps:$4 sm:$0xff]  }
 0x1b6   : > { %8080 = vmatprep.subr.bf16.mxu0 %v9584_v43  ;;  %v9668_v43 = vld [vmem:[%s11327_s21 + $0xb34] ss:$8 sps:$4 sm:$0xff]  }
 0x1b8   : > { %7737 = vmatpush1.bf16.msra.mxu1 %v9579_v44  ;;  %v9663_v44 = vld [vmem:[%s11327_s21 + $0x330] ss:$8 sps:$4 sm:$0xff]  }
 0x1b9   : > { %8081 = vmatpush1.bf16.msra.mxu0 %v9582_v45  ;;  %7738 = vmatprep.subr.bf16.mxu1 %v9587_v46  ;;  %v9666_v45 = vld [vmem:[%s11327_s21 + $0xb30] ss:$8 sps:$4 sm:$0xff]   ;;  %v9671_v46 = vld [vmem:[%s11327_s21 + $0x344] ss:$8 sps:$4 sm:$0xff]  }
 0x1ba   : > { %8082 = vmatprep.subr.bf16.mxu0 %v9590_v47  ;;  %v9674_v47 = vld [vmem:[%s11327_s21 + $0xb44] ss:$8 sps:$4 sm:$0xff]  }
 0x1bc   : > { %7739 = vmatpush1.bf16.msra.mxu1 %v9585_v48  ;;  %v9669_v48 = vld [vmem:[%s11327_s21 + $0x340] ss:$8 sps:$4 sm:$0xff]  }
 0x1bd   : > { %8083 = vmatpush1.bf16.msra.mxu0 %v9588_v49  ;;  %7740 = vmatprep.subr.bf16.mxu1 %v9593_v50  ;;  %v9672_v49 = vld [vmem:[%s11327_s21 + $0xb40] ss:$8 sps:$4 sm:$0xff]   ;;  %v9677_v50 = vld [vmem:[%s11327_s21 + $0x354] ss:$8 sps:$4 sm:$0xff]  }
 0x1be   : > { %8084 = vmatprep.subr.bf16.mxu0 %v9596_v51  ;;  %v9680_v51 = vld [vmem:[%s11327_s21 + $0xb54] ss:$8 sps:$4 sm:$0xff]  }
 0x1c0   : > { %7741 = vmatpush1.bf16.msra.mxu1 %v9591_v52  ;;  %v9675_v52 = vld [vmem:[%s11327_s21 + $0x350] ss:$8 sps:$4 sm:$0xff]  }
 0x1c1   : > { %8085 = vmatpush1.bf16.msra.mxu0 %v9594_v53  ;;  %7742 = vmatprep.subr.bf16.mxu1 %v9599_v54  ;;  %v9678_v53 = vld [vmem:[%s11327_s21 + $0xb50] ss:$8 sps:$4 sm:$0xff]   ;;  %v9683_v54 = vld [vmem:[%s11327_s21 + $0x364] ss:$8 sps:$4 sm:$0xff]  }
 0x1c2   : > { %8086 = vmatprep.subr.bf16.mxu0 %v9602_v55  ;;  %v9686_v55 = vld [vmem:[%s11327_s21 + $0xb64] ss:$8 sps:$4 sm:$0xff]  }
 0x1c4   : > { %7743 = vmatpush1.bf16.msra.mxu1 %v9597_v56  ;;  %v9681_v56 = vld [vmem:[%s11327_s21 + $0x360] ss:$8 sps:$4 sm:$0xff]  }
 0x1c5   : > { %8087 = vmatpush1.bf16.msra.mxu0 %v9600_v57  ;;  %7744 = vmatprep.subr.bf16.mxu1 %v9605_v58  ;;  %v9684_v57 = vld [vmem:[%s11327_s21 + $0xb60] ss:$8 sps:$4 sm:$0xff]   ;;  %v9689_v58 = vld [vmem:[%s11327_s21 + $0x374] ss:$8 sps:$4 sm:$0xff]  }
 0x1c6   : > { %8088 = vmatprep.subr.bf16.mxu0 %v9608_v59  ;;  %v9692_v59 = vld [vmem:[%s11327_s21 + $0xb74] ss:$8 sps:$4 sm:$0xff]  }
 0x1c8   : > { %7745 = vmatpush1.bf16.msra.mxu1 %v9603_v60  ;;  %v9687_v60 = vld [vmem:[%s11327_s21 + $0x370] ss:$8 sps:$4 sm:$0xff]  }
 0x1c9   : > { %8089 = vmatpush1.bf16.msra.mxu0 %v9606_v61  ;;  %7746 = vmatprep.subr.bf16.mxu1 %v9611_v62  ;;  %v9690_v61 = vld [vmem:[%s11327_s21 + $0xb70] ss:$8 sps:$4 sm:$0xff]   ;;  %v9695_v62 = vld [vmem:[%s11327_s21 + $0x384] ss:$8 sps:$4 sm:$0xff]  }
 0x1ca   : > { %8090 = vmatprep.subr.bf16.mxu0 %v9614_v63  ;;  %v9698_v63 = vld [vmem:[%s11327_s21 + $0xb84] ss:$8 sps:$4 sm:$0xff]  }
 0x1cc   : > { %7747 = vmatpush1.bf16.msra.mxu1 %v9609_v0  ;;  %v9693_v0 = vld [vmem:[%s11327_s21 + $0x380] ss:$8 sps:$4 sm:$0xff]  }
 0x1cd   : > { %8091 = vmatpush1.bf16.msra.mxu0 %v9612_v1  ;;  %7748 = vmatprep.subr.bf16.mxu1 %v9617_v2  ;;  %v9696_v1 = vld [vmem:[%s11327_s21 + $0xb80] ss:$8 sps:$4 sm:$0xff]   ;;  %v9701_v2 = vld [vmem:[%s11327_s21 + $0x394] ss:$8 sps:$4 sm:$0xff]  }
 0x1ce   : > { %8092 = vmatprep.subr.bf16.mxu0 %v9620_v3  ;;  %v9704_v3 = vld [vmem:[%s11327_s21 + $0xb94] ss:$8 sps:$4 sm:$0xff]  }
 0x1d0   : > { %7749 = vmatpush1.bf16.msra.mxu1 %v9615_v4  ;;  %v9699_v4 = vld [vmem:[%s11327_s21 + $0x390] ss:$8 sps:$4 sm:$0xff]  }
 0x1d1   : > { %8093 = vmatpush1.bf16.msra.mxu0 %v9618_v5  ;;  %7750 = vmatprep.subr.bf16.mxu1 %v9623_v6  ;;  %v9702_v5 = vld [vmem:[%s11327_s21 + $0xb90] ss:$8 sps:$4 sm:$0xff]   ;;  %v9707_v6 = vld [vmem:[%s11327_s21 + $0x3a4] ss:$8 sps:$4 sm:$0xff]  }
 0x1d2   : > { %8094 = vmatprep.subr.bf16.mxu0 %v9626_v7  ;;  %v9710_v7 = vld [vmem:[%s11327_s21 + $0xba4] ss:$8 sps:$4 sm:$0xff]  }
 0x1d4   : > { %7751 = vmatpush1.bf16.msra.mxu1 %v9621_v8  ;;  %v9705_v8 = vld [vmem:[%s11327_s21 + $0x3a0] ss:$8 sps:$4 sm:$0xff]  }
 0x1d5   : > { %8095 = vmatpush1.bf16.msra.mxu0 %v9624_v9  ;;  %7752 = vmatprep.subr.bf16.mxu1 %v9629_v10  ;;  %v9708_v9 = vld [vmem:[%s11327_s21 + $0xba0] ss:$8 sps:$4 sm:$0xff]   ;;  %v9713_v10 = vld [vmem:[%s11327_s21 + $0x3b4] ss:$8 sps:$4 sm:$0xff]  }
 0x1d6   : > { %8096 = vmatprep.subr.bf16.mxu0 %v9632_v11  ;;  %v9716_v11 = vld [vmem:[%s11327_s21 + $0xbb4] ss:$8 sps:$4 sm:$0xff]  }
 0x1d8   : > { %7753 = vmatpush1.bf16.msra.mxu1 %v9627_v12  ;;  %v9711_v12 = vld [vmem:[%s11327_s21 + $0x3b0] ss:$8 sps:$4 sm:$0xff]  }
 0x1d9   : > { %8097 = vmatpush1.bf16.msra.mxu0 %v9630_v13  ;;  %7754 = vmatprep.subr.bf16.mxu1 %v9635_v14  ;;  %v9714_v13 = vld [vmem:[%s11327_s21 + $0xbb0] ss:$8 sps:$4 sm:$0xff]   ;;  %v9719_v14 = vld [vmem:[%s11327_s21 + $0x3c4] ss:$8 sps:$4 sm:$0xff]  }
 0x1da   : > { %8098 = vmatprep.subr.bf16.mxu0 %v9638_v15  ;;  %v9722_v15 = vld [vmem:[%s11327_s21 + $0xbc4] ss:$8 sps:$4 sm:$0xff]  }
 0x1dc   : > { %7755 = vmatpush1.bf16.msra.mxu1 %v9633_v16  ;;  %v9717_v16 = vld [vmem:[%s11327_s21 + $0x3c0] ss:$8 sps:$4 sm:$0xff]  }
 0x1dd   : > { %8099 = vmatpush1.bf16.msra.mxu0 %v9636_v17  ;;  %7756 = vmatprep.subr.bf16.mxu1 %v9641_v18  ;;  %v9720_v17 = vld [vmem:[%s11327_s21 + $0xbc0] ss:$8 sps:$4 sm:$0xff]   ;;  %v9725_v18 = vld [vmem:[%s11327_s21 + $0x3d4] ss:$8 sps:$4 sm:$0xff]  }
 0x1de   : > { %8100 = vmatprep.subr.bf16.mxu0 %v9644_v19  ;;  %v9728_v19 = vld [vmem:[%s11327_s21 + $0xbd4] ss:$8 sps:$4 sm:$0xff]  }
 0x1e0   : > { %7757 = vmatpush1.bf16.msra.mxu1 %v9639_v20  ;;  %v9723_v20 = vld [vmem:[%s11327_s21 + $0x3d0] ss:$8 sps:$4 sm:$0xff]  }
 0x1e1   : > { %8101 = vmatpush1.bf16.msra.mxu0 %v9642_v21  ;;  %7769 = vmatprep.subr.bf16.mxu1 %v9647_v22  ;;  %v9726_v21 = vld [vmem:[%s11327_s21 + $0xbd0] ss:$8 sps:$4 sm:$0xff]   ;;  %v9731_v22 = vld [vmem:[%s11327_s21 + $0x3e4] ss:$8 sps:$4 sm:$0xff]  }
 0x1e2   : > { %8113 = vmatprep.subr.bf16.mxu0 %v9650_v23  ;;  %v9734_v23 = vld [vmem:[%s11327_s21 + $0xbe4] ss:$8 sps:$4 sm:$0xff]  }
 0x1e3   : > { %7759 = vmatmul.mubr.bf16.vlgmr.msra.gmra.mrb[0].mxu1 %v8667_v32  ;;  %v9737_v32 = vld [vmem:[%s11327_s21 + $0x3f4] ss:$8 sps:$4 sm:$0xff]  }
 0x1e4   : > { %8103 = vmatmul.mubr.bf16.vlgmr.msra.gmra.mrb[0].mxu0 %v8683_v33  ;;  %7770 = vmatpush1.bf16.msra.mxu1 %v9645_v26  ;;  %v9729_v26 = vld [vmem:[%s11327_s21 + $0x3e0] ss:$8 sps:$4 sm:$0xff]   ;;  %v9740_v33 = vld [vmem:[%s11327_s21 + $0xbf4] ss:$8 sps:$4 sm:$0xff]  }
 0x1e5   : > { %8114 = vmatpush1.bf16.msra.mxu0 %v9648_v27  ;;  %7771 = vmatprep.subr.bf16.mxu1 %v9653_v36  ;;  %v9732_v27 = vld [vmem:[%s11327_s21 + $0xbe0] ss:$8 sps:$4 sm:$0xff]   ;;  %v9735_v36 = vld [vmem:[%s11327_s21 + $0x3f0] ss:$8 sps:$4 sm:$0xff]  }
 0x1e6   : > { %8115 = vmatprep.subr.bf16.mxu0 %v9656_v37  ;;  %7801 = vmatprep.mubr.bf16.mxu1 %v8670_v24  ;;  %v9738_v37 = vld [vmem:[%s11327_s21 + $0xbf0] ss:$8 sps:$4 sm:$0xff]   ;;  %v9743_v24 = vld [vmem:[%s11327_s21 + $0x404] ss:$8 sps:$4 sm:$0xff]  }
 0x1e7   : > { %8145 = vmatprep.mubr.bf16.mxu0 %v8686_v25  ;;  %v9746_v25 = vld [vmem:[%s11327_s21 + $0xc04] ss:$8 sps:$4 sm:$0xff]  }
 0x1e8   : > { %7772 = vmatpush1.bf16.msra.mxu1 %v9651_v29  ;;  %v9741_v29 = vld [vmem:[%s11327_s21 + $0x400] ss:$8 sps:$4 sm:$0xff]  }
 0x1e9   : > { %8116 = vmatpush1.bf16.msra.mxu0 %v9654_v30  ;;  %7773 = vmatprep.subr.bf16.mxu1 %v9659_v38  ;;  %v9744_v30 = vld [vmem:[%s11327_s21 + $0xc00] ss:$8 sps:$4 sm:$0xff]  }
 0x1ea   : > { %8117 = vmatprep.subr.bf16.mxu0 %v9662_v39  ;;  %v11657_v38 = vld [vmem:[%s11378_s26 + $0x20] sm:$0xff] }
 0x1eb   : > { %v11660_v39 = vld [vmem:[%s11378_s26 + $0xa0] sm:$0xff] }
 0x1ec   : > { %7774 = vmatpush1.bf16.msra.mxu1 %v9657_v40  ;;  %v8669_v40 = vcombine.low %v11573_v28, %v11576_v31  ;;  %v9747_v31 = vld [vmem:[%s11327_s21 + $0x410] ss:$8 sps:$4 sm:$0xff]  }
 0x1ed   : > { %8118 = vmatpush1.bf16.msra.mxu0 %v9660_v41  ;;  %7775 = vmatprep.subr.bf16.mxu1 %v9665_v42  ;;  %v8685_v41 = vcombine.low %v11583_v34, %v11586_v35  ;;  %v11667_v42 = vld [vmem:[%s11378_s26 + $0x60] sm:$0xff]  ;;  %v9750_v34 = vld [vmem:[%s11327_s21 + $0xc10] ss:$8 sps:$4 sm:$0xff]   ;;  %v9755_v35 = vld [vmem:[%s11327_s21 + $0x424] ss:$8 sps:$4 sm:$0xff]  }
 0x1ee   : > { %8119 = vmatprep.subr.bf16.mxu0 %v9668_v43  ;;  %v11670_v43 = vld [vmem:[%s11378_s26 + $0xe0] sm:$0xff] }
 0x1ef   : > { %v8688_v28 = vcombine.high %v11667_v42, %v11670_v43 }
 0x1f0   : > { %7776 = vmatpush1.bf16.msra.mxu1 %v9663_v44  ;;  %v9749_v44 = vld [vmem:[%s11327_s21 + $0x414] ss:$8 sps:$4 sm:$0xff]  }
 0x1f1   : > { %8120 = vmatpush1.bf16.msra.mxu0 %v9666_v45  ;;  %7777 = vmatprep.subr.bf16.mxu1 %v9671_v46  ;;  %v9752_v45 = vld [vmem:[%s11327_s21 + $0xc14] ss:$8 sps:$4 sm:$0xff]   ;;  %v8672_v46 = vcombine.high %v11657_v38, %v11660_v39 }
 0x1f2   : > { %8121 = vmatprep.subr.bf16.mxu0 %v9674_v47  ;;  %v9758_v47 = vld [vmem:[%s11327_s21 + $0xc24] ss:$8 sps:$4 sm:$0xff]  }
 0x1f4   : > { %7778 = vmatpush1.bf16.msra.mxu1 %v9669_v48  ;;  %v9753_v48 = vld [vmem:[%s11327_s21 + $0x420] ss:$8 sps:$4 sm:$0xff]  }
 0x1f5   : > { %8122 = vmatpush1.bf16.msra.mxu0 %v9672_v49  ;;  %7779 = vmatprep.subr.bf16.mxu1 %v9677_v50  ;;  %v9756_v49 = vld [vmem:[%s11327_s21 + $0xc20] ss:$8 sps:$4 sm:$0xff]   ;;  %v9761_v50 = vld [vmem:[%s11327_s21 + $0x434] ss:$8 sps:$4 sm:$0xff]  }
 0x1f6   : > { %8123 = vmatprep.subr.bf16.mxu0 %v9680_v51  ;;  %v9764_v51 = vld [vmem:[%s11327_s21 + $0xc34] ss:$8 sps:$4 sm:$0xff]  }
 0x1f8   : > { %7780 = vmatpush1.bf16.msra.mxu1 %v9675_v52  ;;  %v9759_v52 = vld [vmem:[%s11327_s21 + $0x430] ss:$8 sps:$4 sm:$0xff]  }
 0x1f9   : > { %8124 = vmatpush1.bf16.msra.mxu0 %v9678_v53  ;;  %7781 = vmatprep.subr.bf16.mxu1 %v9683_v54  ;;  %v9762_v53 = vld [vmem:[%s11327_s21 + $0xc30] ss:$8 sps:$4 sm:$0xff]   ;;  %v9767_v54 = vld [vmem:[%s11327_s21 + $0x444] ss:$8 sps:$4 sm:$0xff]  }
 0x1fa   : > { %8125 = vmatprep.subr.bf16.mxu0 %v9686_v55  ;;  %v9770_v55 = vld [vmem:[%s11327_s21 + $0xc44] ss:$8 sps:$4 sm:$0xff]  }
 0x1fc   : > { %7782 = vmatpush1.bf16.msra.mxu1 %v9681_v56  ;;  %v9765_v56 = vld [vmem:[%s11327_s21 + $0x440] ss:$8 sps:$4 sm:$0xff]  }
 0x1fd   : > { %8126 = vmatpush1.bf16.msra.mxu0 %v9684_v57  ;;  %7783 = vmatprep.subr.bf16.mxu1 %v9689_v58  ;;  %v9768_v57 = vld [vmem:[%s11327_s21 + $0xc40] ss:$8 sps:$4 sm:$0xff]   ;;  %v9773_v58 = vld [vmem:[%s11327_s21 + $0x454] ss:$8 sps:$4 sm:$0xff]  }
 0x1fe   : > { %8127 = vmatprep.subr.bf16.mxu0 %v9692_v59  ;;  %v9776_v59 = vld [vmem:[%s11327_s21 + $0xc54] ss:$8 sps:$4 sm:$0xff]  }
 0x200   : > { %7784 = vmatpush1.bf16.msra.mxu1 %v9687_v60  ;;  %v9771_v60 = vld [vmem:[%s11327_s21 + $0x450] ss:$8 sps:$4 sm:$0xff]  }
 0x201   : > { %8128 = vmatpush1.bf16.msra.mxu0 %v9690_v61  ;;  %7785 = vmatprep.subr.bf16.mxu1 %v9695_v62  ;;  %v9774_v61 = vld [vmem:[%s11327_s21 + $0xc50] ss:$8 sps:$4 sm:$0xff]   ;;  %v9779_v62 = vld [vmem:[%s11327_s21 + $0x464] ss:$8 sps:$4 sm:$0xff]  }
 0x202   : > { %8129 = vmatprep.subr.bf16.mxu0 %v9698_v63  ;;  %v9782_v63 = vld [vmem:[%s11327_s21 + $0xc64] ss:$8 sps:$4 sm:$0xff]  }
 0x204   : > { %7786 = vmatpush1.bf16.msra.mxu1 %v9693_v0  ;;  %v9777_v0 = vld [vmem:[%s11327_s21 + $0x460] ss:$8 sps:$4 sm:$0xff]  }
 0x205   : > { %8130 = vmatpush1.bf16.msra.mxu0 %v9696_v1  ;;  %7787 = vmatprep.subr.bf16.mxu1 %v9701_v2  ;;  %v9780_v1 = vld [vmem:[%s11327_s21 + $0xc60] ss:$8 sps:$4 sm:$0xff]   ;;  %v9785_v2 = vld [vmem:[%s11327_s21 + $0x474] ss:$8 sps:$4 sm:$0xff]  }
 0x206   : > { %8131 = vmatprep.subr.bf16.mxu0 %v9704_v3  ;;  %v9788_v3 = vld [vmem:[%s11327_s21 + $0xc74] ss:$8 sps:$4 sm:$0xff]  }
 0x208   : > { %7788 = vmatpush1.bf16.msra.mxu1 %v9699_v4  ;;  %v9783_v4 = vld [vmem:[%s11327_s21 + $0x470] ss:$8 sps:$4 sm:$0xff]  }
 0x209   : > { %8132 = vmatpush1.bf16.msra.mxu0 %v9702_v5  ;;  %7789 = vmatprep.subr.bf16.mxu1 %v9707_v6  ;;  %v9786_v5 = vld [vmem:[%s11327_s21 + $0xc70] ss:$8 sps:$4 sm:$0xff]   ;;  %v9791_v6 = vld [vmem:[%s11327_s21 + $0x484] ss:$8 sps:$4 sm:$0xff]  }
 0x20a   : > { %8133 = vmatprep.subr.bf16.mxu0 %v9710_v7  ;;  %v9794_v7 = vld [vmem:[%s11327_s21 + $0xc84] ss:$8 sps:$4 sm:$0xff]  }
 0x20c   : > { %7790 = vmatpush1.bf16.msra.mxu1 %v9705_v8  ;;  %v9789_v8 = vld [vmem:[%s11327_s21 + $0x480] ss:$8 sps:$4 sm:$0xff]  }
 0x20d   : > { %8134 = vmatpush1.bf16.msra.mxu0 %v9708_v9  ;;  %7791 = vmatprep.subr.bf16.mxu1 %v9713_v10  ;;  %v9792_v9 = vld [vmem:[%s11327_s21 + $0xc80] ss:$8 sps:$4 sm:$0xff]   ;;  %v9797_v10 = vld [vmem:[%s11327_s21 + $0x494] ss:$8 sps:$4 sm:$0xff]  }
 0x20e   : > { %8135 = vmatprep.subr.bf16.mxu0 %v9716_v11  ;;  %v9800_v11 = vld [vmem:[%s11327_s21 + $0xc94] ss:$8 sps:$4 sm:$0xff]  }
 0x210   : > { %7792 = vmatpush1.bf16.msra.mxu1 %v9711_v12  ;;  %v9795_v12 = vld [vmem:[%s11327_s21 + $0x490] ss:$8 sps:$4 sm:$0xff]  }
 0x211   : > { %8136 = vmatpush1.bf16.msra.mxu0 %v9714_v13  ;;  %7793 = vmatprep.subr.bf16.mxu1 %v9719_v14  ;;  %v9798_v13 = vld [vmem:[%s11327_s21 + $0xc90] ss:$8 sps:$4 sm:$0xff]   ;;  %v9803_v14 = vld [vmem:[%s11327_s21 + $0x4a4] ss:$8 sps:$4 sm:$0xff]  }
 0x212   : > { %8137 = vmatprep.subr.bf16.mxu0 %v9722_v15  ;;  %v9806_v15 = vld [vmem:[%s11327_s21 + $0xca4] ss:$8 sps:$4 sm:$0xff]  }
 0x214   : > { %7794 = vmatpush1.bf16.msra.mxu1 %v9717_v16  ;;  %v9801_v16 = vld [vmem:[%s11327_s21 + $0x4a0] ss:$8 sps:$4 sm:$0xff]  }
 0x215   : > { %8138 = vmatpush1.bf16.msra.mxu0 %v9720_v17  ;;  %7795 = vmatprep.subr.bf16.mxu1 %v9725_v18  ;;  %v9804_v17 = vld [vmem:[%s11327_s21 + $0xca0] ss:$8 sps:$4 sm:$0xff]   ;;  %v9809_v18 = vld [vmem:[%s11327_s21 + $0x4b4] ss:$8 sps:$4 sm:$0xff]  }
 0x216   : > { %8139 = vmatprep.subr.bf16.mxu0 %v9728_v19  ;;  %v9812_v19 = vld [vmem:[%s11327_s21 + $0xcb4] ss:$8 sps:$4 sm:$0xff]  }
 0x218   : > { %7796 = vmatpush1.bf16.msra.mxu1 %v9723_v20  ;;  %v9807_v20 = vld [vmem:[%s11327_s21 + $0x4b0] ss:$8 sps:$4 sm:$0xff]  }
 0x219   : > { %8140 = vmatpush1.bf16.msra.mxu0 %v9726_v21  ;;  %7797 = vmatprep.subr.bf16.mxu1 %v9731_v22  ;;  %v9810_v21 = vld [vmem:[%s11327_s21 + $0xcb0] ss:$8 sps:$4 sm:$0xff]   ;;  %v9815_v22 = vld [vmem:[%s11327_s21 + $0x4c4] ss:$8 sps:$4 sm:$0xff]  }
 0x21a   : > { %8141 = vmatprep.subr.bf16.mxu0 %v9734_v23  ;;  %v9818_v23 = vld [vmem:[%s11327_s21 + $0xcc4] ss:$8 sps:$4 sm:$0xff]  }
 0x21c   : > { %7798 = vmatpush1.bf16.msra.mxu1 %v9729_v26  ;;  %v9813_v26 = vld [vmem:[%s11327_s21 + $0x4c0] ss:$8 sps:$4 sm:$0xff]  }
 0x21d   : > { %8142 = vmatpush1.bf16.msra.mxu0 %v9732_v27  ;;  %7799 = vmatprep.subr.bf16.mxu1 %v9737_v32  ;;  %v9816_v27 = vld [vmem:[%s11327_s21 + $0xcc0] ss:$8 sps:$4 sm:$0xff]   ;;  %v9821_v32 = vld [vmem:[%s11327_s21 + $0x4d4] ss:$8 sps:$4 sm:$0xff]  }
 0x21e   : > { %8143 = vmatprep.subr.bf16.mxu0 %v9740_v33  ;;  %v9824_v33 = vld [vmem:[%s11327_s21 + $0xcd4] ss:$8 sps:$4 sm:$0xff]  }
 0x220   : > { %7800 = vmatpush1.bf16.msra.mxu1 %v9735_v36  ;;  %v9819_v36 = vld [vmem:[%s11327_s21 + $0x4d0] ss:$8 sps:$4 sm:$0xff]  }
 0x221   : > { %8144 = vmatpush1.bf16.msra.mxu0 %v9738_v37  ;;  %7812 = vmatprep.subr.bf16.mxu1 %v9743_v24  ;;  %v9822_v37 = vld [vmem:[%s11327_s21 + $0xcd0] ss:$8 sps:$4 sm:$0xff]   ;;  %v9827_v24 = vld [vmem:[%s11327_s21 + $0x4e4] ss:$8 sps:$4 sm:$0xff]  }
 0x222   : > { %8156 = vmatprep.subr.bf16.mxu0 %v9746_v25  ;;  %v9830_v25 = vld [vmem:[%s11327_s21 + $0xce4] ss:$8 sps:$4 sm:$0xff]  }
 0x223   : > { %7802 = vmatmul.mubr.bf16.vlgmr.msra.gmra.mrb[0].mxu1 %v8669_v40  ;;  %v9833_v40 = vld [vmem:[%s11327_s21 + $0x4f4] ss:$8 sps:$4 sm:$0xff]  }
 0x224   : > { %8146 = vmatmul.mubr.bf16.vlgmr.msra.gmra.mrb[0].mxu0 %v8685_v41  ;;  %7813 = vmatpush1.bf16.msra.mxu1 %v9741_v29  ;;  %v9825_v29 = vld [vmem:[%s11327_s21 + $0x4e0] ss:$8 sps:$4 sm:$0xff]   ;;  %v9836_v41 = vld [vmem:[%s11327_s21 + $0xcf4] ss:$8 sps:$4 sm:$0xff]  }
 0x225   : > { %8157 = vmatpush1.bf16.msra.mxu0 %v9744_v30  ;;  %7814 = vmatprep.subr.bf16.mxu1 %v9749_v44  ;;  %v9828_v30 = vld [vmem:[%s11327_s21 + $0xce0] ss:$8 sps:$4 sm:$0xff]   ;;  %v9831_v44 = vld [vmem:[%s11327_s21 + $0x4f0] ss:$8 sps:$4 sm:$0xff]  }
 0x226   : > { %8158 = vmatprep.subr.bf16.mxu0 %v9752_v45  ;;  %7844 = vmatprep.mubr.bf16.mxu1 %v8672_v46  ;;  %v9834_v45 = vld [vmem:[%s11327_s21 + $0xcf0] ss:$8 sps:$4 sm:$0xff]   ;;  %v9839_v46 = vld [vmem:[%s11327_s21 + $0x504] ss:$8 sps:$4 sm:$0xff]  }
 0x227   : > { %8188 = vmatprep.mubr.bf16.mxu0 %v8688_v28  ;;  %v9842_v28 = vld [vmem:[%s11327_s21 + $0xd04] ss:$8 sps:$4 sm:$0xff]  }
 0x228   : > { %7815 = vmatpush1.bf16.msra.mxu1 %v9747_v31  ;;  %v11739_v31 = vld [vmem:[%s11378_s26 + $0x28] sm:$0xff] }
 0x229   : > { %8159 = vmatpush1.bf16.msra.mxu0 %v9750_v34  ;;  %7816 = vmatprep.subr.bf16.mxu1 %v9755_v35  ;;  %v11742_v34 = vld [vmem:[%s11378_s26 + $0xa8] sm:$0xff] }
 0x22a   : > { %8160 = vmatprep.subr.bf16.mxu0 %v9758_v47  ;;  %v11745_v35 = vld [vmem:[%s11378_s26 + $0x68] sm:$0xff] }
 0x22b   : > { %v11748_v47 = vld [vmem:[%s11378_s26 + $0xe8] sm:$0xff] }
 0x22c   : > { %7817 = vmatpush1.bf16.msra.mxu1 %v9753_v48  ;;  %v8671_v48 = vcombine.low %v11657_v38, %v11660_v39  ;;  %v8690_v38 = vcombine.high %v11745_v35, %v11748_v47  ;;  %v9843_v39 = vld [vmem:[%s11327_s21 + $0x510] ss:$8 sps:$4 sm:$0xff]  }
 0x22d   : > { %8161 = vmatpush1.bf16.msra.mxu0 %v9756_v49  ;;  %7818 = vmatprep.subr.bf16.mxu1 %v9761_v50  ;;  %v8687_v49 = vcombine.low %v11667_v42, %v11670_v43  ;;  %v9837_v50 = vld [vmem:[%s11327_s21 + $0x500] ss:$8 sps:$4 sm:$0xff]   ;;  %v9846_v42 = vld [vmem:[%s11327_s21 + $0xd10] ss:$8 sps:$4 sm:$0xff]   ;;  %v9851_v43 = vld [vmem:[%s11327_s21 + $0x524] ss:$8 sps:$4 sm:$0xff]  }
 0x22e   : > { %8162 = vmatprep.subr.bf16.mxu0 %v9764_v51  ;;  %v9840_v51 = vld [vmem:[%s11327_s21 + $0xd00] ss:$8 sps:$4 sm:$0xff]  }
 0x230   : > { %7819 = vmatpush1.bf16.msra.mxu1 %v9759_v52  ;;  %v9845_v52 = vld [vmem:[%s11327_s21 + $0x514] ss:$8 sps:$4 sm:$0xff]  }
 0x231   : > { %8163 = vmatpush1.bf16.msra.mxu0 %v9762_v53  ;;  %7820 = vmatprep.subr.bf16.mxu1 %v9767_v54  ;;  %v9848_v53 = vld [vmem:[%s11327_s21 + $0xd14] ss:$8 sps:$4 sm:$0xff]   ;;  %v8674_v54 = vcombine.high %v11739_v31, %v11742_v34 }
 0x232   : > { %8164 = vmatprep.subr.bf16.mxu0 %v9770_v55  ;;  %v9854_v55 = vld [vmem:[%s11327_s21 + $0xd24] ss:$8 sps:$4 sm:$0xff]  }
 0x234   : > { %7821 = vmatpush1.bf16.msra.mxu1 %v9765_v56  ;;  %v9849_v56 = vld [vmem:[%s11327_s21 + $0x520] ss:$8 sps:$4 sm:$0xff]  }
 0x235   : > { %8165 = vmatpush1.bf16.msra.mxu0 %v9768_v57  ;;  %7822 = vmatprep.subr.bf16.mxu1 %v9773_v58  ;;  %v9852_v57 = vld [vmem:[%s11327_s21 + $0xd20] ss:$8 sps:$4 sm:$0xff]   ;;  %v9857_v58 = vld [vmem:[%s11327_s21 + $0x534] ss:$8 sps:$4 sm:$0xff]  }
 0x236   : > { %8166 = vmatprep.subr.bf16.mxu0 %v9776_v59  ;;  %v9860_v59 = vld [vmem:[%s11327_s21 + $0xd34] ss:$8 sps:$4 sm:$0xff]  }
 0x238   : > { %7823 = vmatpush1.bf16.msra.mxu1 %v9771_v60  ;;  %v9855_v60 = vld [vmem:[%s11327_s21 + $0x530] ss:$8 sps:$4 sm:$0xff]  }
 0x239   : > { %8167 = vmatpush1.bf16.msra.mxu0 %v9774_v61  ;;  %7824 = vmatprep.subr.bf16.mxu1 %v9779_v62  ;;  %v9858_v61 = vld [vmem:[%s11327_s21 + $0xd30] ss:$8 sps:$4 sm:$0xff]   ;;  %v9863_v62 = vld [vmem:[%s11327_s21 + $0x544] ss:$8 sps:$4 sm:$0xff]  }
 0x23a   : > { %8168 = vmatprep.subr.bf16.mxu0 %v9782_v63  ;;  %v9866_v63 = vld [vmem:[%s11327_s21 + $0xd44] ss:$8 sps:$4 sm:$0xff]  }
 0x23c   : > { %7825 = vmatpush1.bf16.msra.mxu1 %v9777_v0  ;;  %v9861_v0 = vld [vmem:[%s11327_s21 + $0x540] ss:$8 sps:$4 sm:$0xff]  }
 0x23d   : > { %8169 = vmatpush1.bf16.msra.mxu0 %v9780_v1  ;;  %7826 = vmatprep.subr.bf16.mxu1 %v9785_v2  ;;  %v9864_v1 = vld [vmem:[%s11327_s21 + $0xd40] ss:$8 sps:$4 sm:$0xff]   ;;  %v9869_v2 = vld [vmem:[%s11327_s21 + $0x554] ss:$8 sps:$4 sm:$0xff]  }
 0x23e   : > { %8170 = vmatprep.subr.bf16.mxu0 %v9788_v3  ;;  %v9872_v3 = vld [vmem:[%s11327_s21 + $0xd54] ss:$8 sps:$4 sm:$0xff]  }
 0x240   : > { %7827 = vmatpush1.bf16.msra.mxu1 %v9783_v4  ;;  %v9867_v4 = vld [vmem:[%s11327_s21 + $0x550] ss:$8 sps:$4 sm:$0xff]  }
 0x241   : > { %8171 = vmatpush1.bf16.msra.mxu0 %v9786_v5  ;;  %7828 = vmatprep.subr.bf16.mxu1 %v9791_v6  ;;  %v9870_v5 = vld [vmem:[%s11327_s21 + $0xd50] ss:$8 sps:$4 sm:$0xff]   ;;  %v9875_v6 = vld [vmem:[%s11327_s21 + $0x564] ss:$8 sps:$4 sm:$0xff]  }
 0x242   : > { %8172 = vmatprep.subr.bf16.mxu0 %v9794_v7  ;;  %v9878_v7 = vld [vmem:[%s11327_s21 + $0xd64] ss:$8 sps:$4 sm:$0xff]  }
 0x244   : > { %7829 = vmatpush1.bf16.msra.mxu1 %v9789_v8  ;;  %v9873_v8 = vld [vmem:[%s11327_s21 + $0x560] ss:$8 sps:$4 sm:$0xff]  }
 0x245   : > { %8173 = vmatpush1.bf16.msra.mxu0 %v9792_v9  ;;  %7830 = vmatprep.subr.bf16.mxu1 %v9797_v10  ;;  %v9876_v9 = vld [vmem:[%s11327_s21 + $0xd60] ss:$8 sps:$4 sm:$0xff]   ;;  %v9881_v10 = vld [vmem:[%s11327_s21 + $0x574] ss:$8 sps:$4 sm:$0xff]  }
 0x246   : > { %8174 = vmatprep.subr.bf16.mxu0 %v9800_v11  ;;  %v9884_v11 = vld [vmem:[%s11327_s21 + $0xd74] ss:$8 sps:$4 sm:$0xff]  }
 0x248   : > { %7831 = vmatpush1.bf16.msra.mxu1 %v9795_v12  ;;  %v9879_v12 = vld [vmem:[%s11327_s21 + $0x570] ss:$8 sps:$4 sm:$0xff]  }
 0x249   : > { %8175 = vmatpush1.bf16.msra.mxu0 %v9798_v13  ;;  %7832 = vmatprep.subr.bf16.mxu1 %v9803_v14  ;;  %v9882_v13 = vld [vmem:[%s11327_s21 + $0xd70] ss:$8 sps:$4 sm:$0xff]   ;;  %v9887_v14 = vld [vmem:[%s11327_s21 + $0x584] ss:$8 sps:$4 sm:$0xff]  }
 0x24a   : > { %8176 = vmatprep.subr.bf16.mxu0 %v9806_v15  ;;  %v9890_v15 = vld [vmem:[%s11327_s21 + $0xd84] ss:$8 sps:$4 sm:$0xff]  }
 0x24c   : > { %7833 = vmatpush1.bf16.msra.mxu1 %v9801_v16  ;;  %v9885_v16 = vld [vmem:[%s11327_s21 + $0x580] ss:$8 sps:$4 sm:$0xff]  }
 0x24d   : > { %8177 = vmatpush1.bf16.msra.mxu0 %v9804_v17  ;;  %7834 = vmatprep.subr.bf16.mxu1 %v9809_v18  ;;  %v9888_v17 = vld [vmem:[%s11327_s21 + $0xd80] ss:$8 sps:$4 sm:$0xff]   ;;  %v9893_v18 = vld [vmem:[%s11327_s21 + $0x594] ss:$8 sps:$4 sm:$0xff]  }
 0x24e   : > { %8178 = vmatprep.subr.bf16.mxu0 %v9812_v19  ;;  %v9896_v19 = vld [vmem:[%s11327_s21 + $0xd94] ss:$8 sps:$4 sm:$0xff]  }
 0x250   : > { %7835 = vmatpush1.bf16.msra.mxu1 %v9807_v20  ;;  %v9891_v20 = vld [vmem:[%s11327_s21 + $0x590] ss:$8 sps:$4 sm:$0xff]  }
 0x251   : > { %8179 = vmatpush1.bf16.msra.mxu0 %v9810_v21  ;;  %7836 = vmatprep.subr.bf16.mxu1 %v9815_v22  ;;  %v9894_v21 = vld [vmem:[%s11327_s21 + $0xd90] ss:$8 sps:$4 sm:$0xff]   ;;  %v9899_v22 = vld [vmem:[%s11327_s21 + $0x5a4] ss:$8 sps:$4 sm:$0xff]  }
 0x252   : > { %8180 = vmatprep.subr.bf16.mxu0 %v9818_v23  ;;  %v9902_v23 = vld [vmem:[%s11327_s21 + $0xda4] ss:$8 sps:$4 sm:$0xff]  }
 0x254   : > { %7837 = vmatpush1.bf16.msra.mxu1 %v9813_v26  ;;  %v9897_v26 = vld [vmem:[%s11327_s21 + $0x5a0] ss:$8 sps:$4 sm:$0xff]  }
 0x255   : > { %8181 = vmatpush1.bf16.msra.mxu0 %v9816_v27  ;;  %7838 = vmatprep.subr.bf16.mxu1 %v9821_v32  ;;  %v9900_v27 = vld [vmem:[%s11327_s21 + $0xda0] ss:$8 sps:$4 sm:$0xff]   ;;  %v9905_v32 = vld [vmem:[%s11327_s21 + $0x5b4] ss:$8 sps:$4 sm:$0xff]  }
 0x256   : > { %8182 = vmatprep.subr.bf16.mxu0 %v9824_v33  ;;  %v9908_v33 = vld [vmem:[%s11327_s21 + $0xdb4] ss:$8 sps:$4 sm:$0xff]  }
 0x258   : > { %7839 = vmatpush1.bf16.msra.mxu1 %v9819_v36  ;;  %v9903_v36 = vld [vmem:[%s11327_s21 + $0x5b0] ss:$8 sps:$4 sm:$0xff]  }
 0x259   : > { %8183 = vmatpush1.bf16.msra.mxu0 %v9822_v37  ;;  %7840 = vmatprep.subr.bf16.mxu1 %v9827_v24  ;;  %v9906_v37 = vld [vmem:[%s11327_s21 + $0xdb0] ss:$8 sps:$4 sm:$0xff]   ;;  %v9911_v24 = vld [vmem:[%s11327_s21 + $0x5c4] ss:$8 sps:$4 sm:$0xff]  }
 0x25a   : > { %8184 = vmatprep.subr.bf16.mxu0 %v9830_v25  ;;  %v9914_v25 = vld [vmem:[%s11327_s21 + $0xdc4] ss:$8 sps:$4 sm:$0xff]  }
 0x25c   : > { %7841 = vmatpush1.bf16.msra.mxu1 %v9825_v29  ;;  %v9909_v29 = vld [vmem:[%s11327_s21 + $0x5c0] ss:$8 sps:$4 sm:$0xff]  }
 0x25d   : > { %8185 = vmatpush1.bf16.msra.mxu0 %v9828_v30  ;;  %7842 = vmatprep.subr.bf16.mxu1 %v9833_v40  ;;  %v9912_v30 = vld [vmem:[%s11327_s21 + $0xdc0] ss:$8 sps:$4 sm:$0xff]   ;;  %v9917_v40 = vld [vmem:[%s11327_s21 + $0x5d4] ss:$8 sps:$4 sm:$0xff]  }
 0x25e   : > { %8186 = vmatprep.subr.bf16.mxu0 %v9836_v41  ;;  %v9920_v41 = vld [vmem:[%s11327_s21 + $0xdd4] ss:$8 sps:$4 sm:$0xff]  }
 0x260   : > { %7843 = vmatpush1.bf16.msra.mxu1 %v9831_v44  ;;  %v9915_v44 = vld [vmem:[%s11327_s21 + $0x5d0] ss:$8 sps:$4 sm:$0xff]  }
 0x261   : > { %8187 = vmatpush1.bf16.msra.mxu0 %v9834_v45  ;;  %7855 = vmatprep.subr.bf16.mxu1 %v9839_v46  ;;  %v9918_v45 = vld [vmem:[%s11327_s21 + $0xdd0] ss:$8 sps:$4 sm:$0xff]   ;;  %v9923_v46 = vld [vmem:[%s11327_s21 + $0x5e4] ss:$8 sps:$4 sm:$0xff]  }
 0x262   : > { %8199 = vmatprep.subr.bf16.mxu0 %v9842_v28  ;;  %v9926_v28 = vld [vmem:[%s11327_s21 + $0xde4] ss:$8 sps:$4 sm:$0xff]  }
 0x263   : > { %7845 = vmatmul.mubr.bf16.vlgmr.msra.gmra.mrb[0].mxu1 %v8671_v48  ;;  %v9921_v48 = vld [vmem:[%s11327_s21 + $0x5e0] ss:$8 sps:$4 sm:$0xff]  }
 0x264   : > { %8189 = vmatmul.mubr.bf16.vlgmr.msra.gmra.mrb[0].mxu0 %v8687_v49  ;;  %7856 = vmatpush1.bf16.msra.mxu1 %v9837_v50  ;;  %v9924_v49 = vld [vmem:[%s11327_s21 + $0xde0] ss:$8 sps:$4 sm:$0xff]   ;;  %v9929_v50 = vld [vmem:[%s11327_s21 + $0x5f4] ss:$8 sps:$4 sm:$0xff]  }
 0x265   : > { %8200 = vmatpush1.bf16.msra.mxu0 %v9840_v51  ;;  %7857 = vmatprep.subr.bf16.mxu1 %v9845_v52  ;;  %v9932_v51 = vld [vmem:[%s11327_s21 + $0xdf4] ss:$8 sps:$4 sm:$0xff]   ;;  %v9927_v52 = vld [vmem:[%s11327_s21 + $0x5f0] ss:$8 sps:$4 sm:$0xff]  }
 0x266   : > { %8201 = vmatprep.subr.bf16.mxu0 %v9848_v53  ;;  %7887 = vmatprep.mubr.bf16.mxu1 %v8674_v54  ;;  %v9930_v53 = vld [vmem:[%s11327_s21 + $0xdf0] ss:$8 sps:$4 sm:$0xff]   ;;  %v9935_v54 = vld [vmem:[%s11327_s21 + $0x604] ss:$8 sps:$4 sm:$0xff]  }
 0x267   : > { %8231 = vmatprep.mubr.bf16.mxu0 %v8690_v38  ;;  %v9938_v38 = vld [vmem:[%s11327_s21 + $0xe04] ss:$8 sps:$4 sm:$0xff]  }
 0x268   : > { %7858 = vmatpush1.bf16.msra.mxu1 %v9843_v39  ;;  %v11823_v39 = vld [vmem:[%s11378_s26 + $0x30] sm:$0xff] }
 0x269   : > { %8202 = vmatpush1.bf16.msra.mxu0 %v9846_v42  ;;  %7859 = vmatprep.subr.bf16.mxu1 %v9851_v43  ;;  %v8673_v42 = vcombine.low %v11739_v31, %v11742_v34  ;;  %v8689_v43 = vcombine.low %v11745_v35, %v11748_v47  ;;  %v9941_v31 = vld [vmem:[%s11327_s21 + $0x614] ss:$8 sps:$4 sm:$0xff]  }
 0x26a   : > { %8203 = vmatprep.subr.bf16.mxu0 %v9854_v55  ;;  %v11830_v55 = vld [vmem:[%s11378_s26 + $0xb0] sm:$0xff]  ;;  %v9944_v34 = vld [vmem:[%s11327_s21 + $0xe14] ss:$8 sps:$4 sm:$0xff]  }
 0x26b   : > { %v8676_v35 = vcombine.high %v11823_v39, %v11830_v55 }
 0x26c   : > { %7860 = vmatpush1.bf16.msra.mxu1 %v9849_v56  ;;  %v11833_v56 = vld [vmem:[%s11378_s26 + $0x70] sm:$0xff] }
 0x26d   : > { %8204 = vmatpush1.bf16.msra.mxu0 %v9852_v57  ;;  %7861 = vmatprep.subr.bf16.mxu1 %v9857_v58  ;;  %v11836_v57 = vld [vmem:[%s11378_s26 + $0xf0] sm:$0xff]  ;;  %v9933_v58 = vld [vmem:[%s11327_s21 + $0x600] ss:$8 sps:$4 sm:$0xff]  }
 0x26e   : > { %8205 = vmatprep.subr.bf16.mxu0 %v9860_v59  ;;  %v9936_v59 = vld [vmem:[%s11327_s21 + $0xe00] ss:$8 sps:$4 sm:$0xff]   ;;  %v8692_v47 = vcombine.high %v11833_v56, %v11836_v57 }
 0x270   : > { %7862 = vmatpush1.bf16.msra.mxu1 %v9855_v60  ;;  %v9939_v60 = vld [vmem:[%s11327_s21 + $0x610] ss:$8 sps:$4 sm:$0xff]  }
 0x271   : > { %8206 = vmatpush1.bf16.msra.mxu0 %v9858_v61  ;;  %7863 = vmatprep.subr.bf16.mxu1 %v9863_v62  ;;  %v9942_v61 = vld [vmem:[%s11327_s21 + $0xe10] ss:$8 sps:$4 sm:$0xff]   ;;  %v9947_v62 = vld [vmem:[%s11327_s21 + $0x624] ss:$8 sps:$4 sm:$0xff]  }
 0x272   : > { %8207 = vmatprep.subr.bf16.mxu0 %v9866_v63  ;;  %v9950_v63 = vld [vmem:[%s11327_s21 + $0xe24] ss:$8 sps:$4 sm:$0xff]  }
 0x274   : > { %7864 = vmatpush1.bf16.msra.mxu1 %v9861_v0  ;;  %v9945_v0 = vld [vmem:[%s11327_s21 + $0x620] ss:$8 sps:$4 sm:$0xff]  }
 0x275   : > { %8208 = vmatpush1.bf16.msra.mxu0 %v9864_v1  ;;  %7865 = vmatprep.subr.bf16.mxu1 %v9869_v2  ;;  %v9948_v1 = vld [vmem:[%s11327_s21 + $0xe20] ss:$8 sps:$4 sm:$0xff]   ;;  %v9953_v2 = vld [vmem:[%s11327_s21 + $0x634] ss:$8 sps:$4 sm:$0xff]  }
 0x276   : > { %8209 = vmatprep.subr.bf16.mxu0 %v9872_v3  ;;  %v9956_v3 = vld [vmem:[%s11327_s21 + $0xe34] ss:$8 sps:$4 sm:$0xff]  }
 0x278   : > { %7866 = vmatpush1.bf16.msra.mxu1 %v9867_v4  ;;  %v9951_v4 = vld [vmem:[%s11327_s21 + $0x630] ss:$8 sps:$4 sm:$0xff]  }
 0x279   : > { %8210 = vmatpush1.bf16.msra.mxu0 %v9870_v5  ;;  %7867 = vmatprep.subr.bf16.mxu1 %v9875_v6  ;;  %v9954_v5 = vld [vmem:[%s11327_s21 + $0xe30] ss:$8 sps:$4 sm:$0xff]   ;;  %v9959_v6 = vld [vmem:[%s11327_s21 + $0x644] ss:$8 sps:$4 sm:$0xff]  }
 0x27a   : > { %8211 = vmatprep.subr.bf16.mxu0 %v9878_v7  ;;  %v9962_v7 = vld [vmem:[%s11327_s21 + $0xe44] ss:$8 sps:$4 sm:$0xff]  }
 0x27c   : > { %7868 = vmatpush1.bf16.msra.mxu1 %v9873_v8  ;;  %v9957_v8 = vld [vmem:[%s11327_s21 + $0x640] ss:$8 sps:$4 sm:$0xff]  }
 0x27d   : > { %8212 = vmatpush1.bf16.msra.mxu0 %v9876_v9  ;;  %7869 = vmatprep.subr.bf16.mxu1 %v9881_v10  ;;  %v9960_v9 = vld [vmem:[%s11327_s21 + $0xe40] ss:$8 sps:$4 sm:$0xff]   ;;  %v9965_v10 = vld [vmem:[%s11327_s21 + $0x654] ss:$8 sps:$4 sm:$0xff]  }
 0x27e   : > { %8213 = vmatprep.subr.bf16.mxu0 %v9884_v11  ;;  %v9968_v11 = vld [vmem:[%s11327_s21 + $0xe54] ss:$8 sps:$4 sm:$0xff]  }
 0x280   : > { %7870 = vmatpush1.bf16.msra.mxu1 %v9879_v12  ;;  %v9963_v12 = vld [vmem:[%s11327_s21 + $0x650] ss:$8 sps:$4 sm:$0xff]  }
 0x281   : > { %8214 = vmatpush1.bf16.msra.mxu0 %v9882_v13  ;;  %7871 = vmatprep.subr.bf16.mxu1 %v9887_v14  ;;  %v9966_v13 = vld [vmem:[%s11327_s21 + $0xe50] ss:$8 sps:$4 sm:$0xff]   ;;  %v9971_v14 = vld [vmem:[%s11327_s21 + $0x664] ss:$8 sps:$4 sm:$0xff]  }
 0x282   : > { %8215 = vmatprep.subr.bf16.mxu0 %v9890_v15  ;;  %v9974_v15 = vld [vmem:[%s11327_s21 + $0xe64] ss:$8 sps:$4 sm:$0xff]  }
 0x284   : > { %7872 = vmatpush1.bf16.msra.mxu1 %v9885_v16  ;;  %v9969_v16 = vld [vmem:[%s11327_s21 + $0x660] ss:$8 sps:$4 sm:$0xff]  }
 0x285   : > { %8216 = vmatpush1.bf16.msra.mxu0 %v9888_v17  ;;  %7873 = vmatprep.subr.bf16.mxu1 %v9893_v18  ;;  %v9972_v17 = vld [vmem:[%s11327_s21 + $0xe60] ss:$8 sps:$4 sm:$0xff]   ;;  %v9977_v18 = vld [vmem:[%s11327_s21 + $0x674] ss:$8 sps:$4 sm:$0xff]  }
 0x286   : > { %8217 = vmatprep.subr.bf16.mxu0 %v9896_v19  ;;  %v9980_v19 = vld [vmem:[%s11327_s21 + $0xe74] ss:$8 sps:$4 sm:$0xff]  }
 0x288   : > { %7874 = vmatpush1.bf16.msra.mxu1 %v9891_v20  ;;  %v9975_v20 = vld [vmem:[%s11327_s21 + $0x670] ss:$8 sps:$4 sm:$0xff]  }
 0x289   : > { %8218 = vmatpush1.bf16.msra.mxu0 %v9894_v21  ;;  %7875 = vmatprep.subr.bf16.mxu1 %v9899_v22  ;;  %v9978_v21 = vld [vmem:[%s11327_s21 + $0xe70] ss:$8 sps:$4 sm:$0xff]   ;;  %v9983_v22 = vld [vmem:[%s11327_s21 + $0x684] ss:$8 sps:$4 sm:$0xff]  }
 0x28a   : > { %8219 = vmatprep.subr.bf16.mxu0 %v9902_v23  ;;  %v9986_v23 = vld [vmem:[%s11327_s21 + $0xe84] ss:$8 sps:$4 sm:$0xff]  }
 0x28c   : > { %7876 = vmatpush1.bf16.msra.mxu1 %v9897_v26  ;;  %v9981_v26 = vld [vmem:[%s11327_s21 + $0x680] ss:$8 sps:$4 sm:$0xff]  }
 0x28d   : > { %8220 = vmatpush1.bf16.msra.mxu0 %v9900_v27  ;;  %7877 = vmatprep.subr.bf16.mxu1 %v9905_v32  ;;  %v9984_v27 = vld [vmem:[%s11327_s21 + $0xe80] ss:$8 sps:$4 sm:$0xff]   ;;  %v9989_v32 = vld [vmem:[%s11327_s21 + $0x694] ss:$8 sps:$4 sm:$0xff]  }
 0x28e   : > { %8221 = vmatprep.subr.bf16.mxu0 %v9908_v33  ;;  %v9992_v33 = vld [vmem:[%s11327_s21 + $0xe94] ss:$8 sps:$4 sm:$0xff]  }
 0x290   : > { %7878 = vmatpush1.bf16.msra.mxu1 %v9903_v36  ;;  %v9987_v36 = vld [vmem:[%s11327_s21 + $0x690] ss:$8 sps:$4 sm:$0xff]  }
 0x291   : > { %8222 = vmatpush1.bf16.msra.mxu0 %v9906_v37  ;;  %7879 = vmatprep.subr.bf16.mxu1 %v9911_v24  ;;  %v9990_v37 = vld [vmem:[%s11327_s21 + $0xe90] ss:$8 sps:$4 sm:$0xff]   ;;  %v9995_v24 = vld [vmem:[%s11327_s21 + $0x6a4] ss:$8 sps:$4 sm:$0xff]  }
 0x292   : > { %8223 = vmatprep.subr.bf16.mxu0 %v9914_v25  ;;  %v9998_v25 = vld [vmem:[%s11327_s21 + $0xea4] ss:$8 sps:$4 sm:$0xff]  }
 0x294   : > { %7880 = vmatpush1.bf16.msra.mxu1 %v9909_v29  ;;  %v9993_v29 = vld [vmem:[%s11327_s21 + $0x6a0] ss:$8 sps:$4 sm:$0xff]  }
 0x295   : > { %8224 = vmatpush1.bf16.msra.mxu0 %v9912_v30  ;;  %7881 = vmatprep.subr.bf16.mxu1 %v9917_v40  ;;  %v9996_v30 = vld [vmem:[%s11327_s21 + $0xea0] ss:$8 sps:$4 sm:$0xff]   ;;  %v10001_v40 = vld [vmem:[%s11327_s21 + $0x6b4] ss:$8 sps:$4 sm:$0xff]  }
 0x296   : > { %8225 = vmatprep.subr.bf16.mxu0 %v9920_v41  ;;  %v10004_v41 = vld [vmem:[%s11327_s21 + $0xeb4] ss:$8 sps:$4 sm:$0xff]  }
 0x298   : > { %7882 = vmatpush1.bf16.msra.mxu1 %v9915_v44  ;;  %v9999_v44 = vld [vmem:[%s11327_s21 + $0x6b0] ss:$8 sps:$4 sm:$0xff]  }
 0x299   : > { %8226 = vmatpush1.bf16.msra.mxu0 %v9918_v45  ;;  %7883 = vmatprep.subr.bf16.mxu1 %v9923_v46  ;;  %v10002_v45 = vld [vmem:[%s11327_s21 + $0xeb0] ss:$8 sps:$4 sm:$0xff]   ;;  %v10007_v46 = vld [vmem:[%s11327_s21 + $0x6c4] ss:$8 sps:$4 sm:$0xff]  }
 0x29a   : > { %8227 = vmatprep.subr.bf16.mxu0 %v9926_v28  ;;  %v10010_v28 = vld [vmem:[%s11327_s21 + $0xec4] ss:$8 sps:$4 sm:$0xff]  }
 0x29c   : > { %7884 = vmatpush1.bf16.msra.mxu1 %v9921_v48  ;;  %v10005_v48 = vld [vmem:[%s11327_s21 + $0x6c0] ss:$8 sps:$4 sm:$0xff]  }
 0x29d   : > { %8228 = vmatpush1.bf16.msra.mxu0 %v9924_v49  ;;  %7885 = vmatprep.subr.bf16.mxu1 %v9929_v50  ;;  %v10008_v49 = vld [vmem:[%s11327_s21 + $0xec0] ss:$8 sps:$4 sm:$0xff]   ;;  %v10013_v50 = vld [vmem:[%s11327_s21 + $0x6d4] ss:$8 sps:$4 sm:$0xff]  }
 0x29e   : > { %8229 = vmatprep.subr.bf16.mxu0 %v9932_v51  ;;  %v10016_v51 = vld [vmem:[%s11327_s21 + $0xed4] ss:$8 sps:$4 sm:$0xff]  }
 0x2a0   : > { %7886 = vmatpush1.bf16.msra.mxu1 %v9927_v52  ;;  %v10011_v52 = vld [vmem:[%s11327_s21 + $0x6d0] ss:$8 sps:$4 sm:$0xff]  }
 0x2a1   : > { %8230 = vmatpush1.bf16.msra.mxu0 %v9930_v53  ;;  %7898 = vmatprep.subr.bf16.mxu1 %v9935_v54  ;;  %v10014_v53 = vld [vmem:[%s11327_s21 + $0xed0] ss:$8 sps:$4 sm:$0xff]   ;;  %v10019_v54 = vld [vmem:[%s11327_s21 + $0x6e4] ss:$8 sps:$4 sm:$0xff]  }
 0x2a2   : > { %8242 = vmatprep.subr.bf16.mxu0 %v9938_v38  ;;  %v10022_v38 = vld [vmem:[%s11327_s21 + $0xee4] ss:$8 sps:$4 sm:$0xff]  }
 0x2a3   : > { %7888 = vmatmul.mubr.bf16.vlgmr.msra.gmra.mrb[0].mxu1 %v8673_v42  ;;  %v10017_v42 = vld [vmem:[%s11327_s21 + $0x6e0] ss:$8 sps:$4 sm:$0xff]  }
 0x2a4   : > { %8232 = vmatmul.mubr.bf16.vlgmr.msra.gmra.mrb[0].mxu0 %v8689_v43  ;;  %7899 = vmatpush1.bf16.msra.mxu1 %v9933_v58  ;;  %v10020_v43 = vld [vmem:[%s11327_s21 + $0xee0] ss:$8 sps:$4 sm:$0xff]   ;;  %v10025_v58 = vld [vmem:[%s11327_s21 + $0x6f4] ss:$8 sps:$4 sm:$0xff]  }
 0x2a5   : > { %8243 = vmatpush1.bf16.msra.mxu0 %v9936_v59  ;;  %7900 = vmatprep.subr.bf16.mxu1 %v9941_v31  ;;  %v10028_v59 = vld [vmem:[%s11327_s21 + $0xef4] ss:$8 sps:$4 sm:$0xff]   ;;  %v10023_v31 = vld [vmem:[%s11327_s21 + $0x6f0] ss:$8 sps:$4 sm:$0xff]  }
 0x2a6   : > { %8244 = vmatprep.subr.bf16.mxu0 %v9944_v34  ;;  %7930 = vmatprep.mubr.bf16.mxu1 %v8676_v35  ;;  %v10026_v34 = vld [vmem:[%s11327_s21 + $0xef0] ss:$8 sps:$4 sm:$0xff]   ;;  %v10031_v35 = vld [vmem:[%s11327_s21 + $0x704] ss:$8 sps:$4 sm:$0xff]  }
 0x2a7   : > { %8274 = vmatprep.mubr.bf16.mxu0 %v8692_v47  ;;  %v10034_v47 = vld [vmem:[%s11327_s21 + $0xf04] ss:$8 sps:$4 sm:$0xff]  }
 0x2a8   : > { %7901 = vmatpush1.bf16.msra.mxu1 %v9939_v60  ;;  %v11907_v60 = vld [vmem:[%s11378_s26 + $0x38] sm:$0xff] }
 0x2a9   : > { %8245 = vmatpush1.bf16.msra.mxu0 %v9942_v61  ;;  %7902 = vmatprep.subr.bf16.mxu1 %v9947_v62  ;;  %v8675_v61 = vcombine.low %v11823_v39, %v11830_v55  ;;  %v8691_v62 = vcombine.low %v11833_v56, %v11836_v57  ;;  %v10037_v39 = vld [vmem:[%s11327_s21 + $0x714] ss:$8 sps:$4 sm:$0xff]  }
 0x2aa   : > { %8246 = vmatprep.subr.bf16.mxu0 %v9950_v63  ;;  %v11914_v63 = vld [vmem:[%s11378_s26 + $0xb8] sm:$0xff] }
 0x2ab   : > { %v10040_v55 = vld [vmem:[%s11327_s21 + $0xf14] ss:$8 sps:$4 sm:$0xff]   ;;  %v8678_v56 = vcombine.high %v11907_v60, %v11914_v63 }
 0x2ac   : > { %7903 = vmatpush1.bf16.msra.mxu1 %v9945_v0  ;;  %v11917_v0 = vld [vmem:[%s11378_s26 + $0x78] sm:$0xff] }
 0x2ad   : > { %8247 = vmatpush1.bf16.msra.mxu0 %v9948_v1  ;;  %7904 = vmatprep.subr.bf16.mxu1 %v9953_v2  ;;  %v11920_v1 = vld [vmem:[%s11378_s26 + $0xf8] sm:$0xff]  ;;  %v10029_v2 = vld [vmem:[%s11327_s21 + $0x700] ss:$8 sps:$4 sm:$0xff]  }
 0x2ae   : > { %8248 = vmatprep.subr.bf16.mxu0 %v9956_v3  ;;  %v10032_v3 = vld [vmem:[%s11327_s21 + $0xf00] ss:$8 sps:$4 sm:$0xff]   ;;  %v8694_v57 = vcombine.high %v11917_v0, %v11920_v1 }
 0x2b0   : > { %7905 = vmatpush1.bf16.msra.mxu1 %v9951_v4  ;;  %v10035_v4 = vld [vmem:[%s11327_s21 + $0x710] ss:$8 sps:$4 sm:$0xff]  }
 0x2b1   : > { %8249 = vmatpush1.bf16.msra.mxu0 %v9954_v5  ;;  %7906 = vmatprep.subr.bf16.mxu1 %v9959_v6  ;;  %v10038_v5 = vld [vmem:[%s11327_s21 + $0xf10] ss:$8 sps:$4 sm:$0xff]   ;;  %v10043_v6 = vld [vmem:[%s11327_s21 + $0x724] ss:$8 sps:$4 sm:$0xff]  }
 0x2b2   : > { %8250 = vmatprep.subr.bf16.mxu0 %v9962_v7  ;;  %v10046_v7 = vld [vmem:[%s11327_s21 + $0xf24] ss:$8 sps:$4 sm:$0xff]  }
 0x2b4   : > { %7907 = vmatpush1.bf16.msra.mxu1 %v9957_v8  ;;  %v10041_v8 = vld [vmem:[%s11327_s21 + $0x720] ss:$8 sps:$4 sm:$0xff]  }
 0x2b5   : > { %8251 = vmatpush1.bf16.msra.mxu0 %v9960_v9  ;;  %7908 = vmatprep.subr.bf16.mxu1 %v9965_v10  ;;  %v10044_v9 = vld [vmem:[%s11327_s21 + $0xf20] ss:$8 sps:$4 sm:$0xff]   ;;  %v10049_v10 = vld [vmem:[%s11327_s21 + $0x734] ss:$8 sps:$4 sm:$0xff]  }
 0x2b6   : > { %8252 = vmatprep.subr.bf16.mxu0 %v9968_v11  ;;  %v10052_v11 = vld [vmem:[%s11327_s21 + $0xf34] ss:$8 sps:$4 sm:$0xff]  }
 0x2b8   : > { %7909 = vmatpush1.bf16.msra.mxu1 %v9963_v12  ;;  %v10047_v12 = vld [vmem:[%s11327_s21 + $0x730] ss:$8 sps:$4 sm:$0xff]  }
 0x2b9   : > { %8253 = vmatpush1.bf16.msra.mxu0 %v9966_v13  ;;  %7910 = vmatprep.subr.bf16.mxu1 %v9971_v14  ;;  %v10050_v13 = vld [vmem:[%s11327_s21 + $0xf30] ss:$8 sps:$4 sm:$0xff]   ;;  %v10055_v14 = vld [vmem:[%s11327_s21 + $0x744] ss:$8 sps:$4 sm:$0xff]  }
 0x2ba   : > { %8254 = vmatprep.subr.bf16.mxu0 %v9974_v15  ;;  %v10058_v15 = vld [vmem:[%s11327_s21 + $0xf44] ss:$8 sps:$4 sm:$0xff]  }
 0x2bc   : > { %7911 = vmatpush1.bf16.msra.mxu1 %v9969_v16  ;;  %v10053_v16 = vld [vmem:[%s11327_s21 + $0x740] ss:$8 sps:$4 sm:$0xff]  }
 0x2bd   : > { %8255 = vmatpush1.bf16.msra.mxu0 %v9972_v17  ;;  %7912 = vmatprep.subr.bf16.mxu1 %v9977_v18  ;;  %v10056_v17 = vld [vmem:[%s11327_s21 + $0xf40] ss:$8 sps:$4 sm:$0xff]   ;;  %v10061_v18 = vld [vmem:[%s11327_s21 + $0x754] ss:$8 sps:$4 sm:$0xff]  }
 0x2be   : > { %8256 = vmatprep.subr.bf16.mxu0 %v9980_v19  ;;  %v10064_v19 = vld [vmem:[%s11327_s21 + $0xf54] ss:$8 sps:$4 sm:$0xff]  }
 0x2c0   : > { %7913 = vmatpush1.bf16.msra.mxu1 %v9975_v20  ;;  %v10059_v20 = vld [vmem:[%s11327_s21 + $0x750] ss:$8 sps:$4 sm:$0xff]  }
 0x2c1   : > { %8257 = vmatpush1.bf16.msra.mxu0 %v9978_v21  ;;  %7914 = vmatprep.subr.bf16.mxu1 %v9983_v22  ;;  %v10062_v21 = vld [vmem:[%s11327_s21 + $0xf50] ss:$8 sps:$4 sm:$0xff]   ;;  %v10067_v22 = vld [vmem:[%s11327_s21 + $0x764] ss:$8 sps:$4 sm:$0xff]  }
 0x2c2   : > { %8258 = vmatprep.subr.bf16.mxu0 %v9986_v23  ;;  %v10070_v23 = vld [vmem:[%s11327_s21 + $0xf64] ss:$8 sps:$4 sm:$0xff]  }
 0x2c4   : > { %7915 = vmatpush1.bf16.msra.mxu1 %v9981_v26  ;;  %v10065_v26 = vld [vmem:[%s11327_s21 + $0x760] ss:$8 sps:$4 sm:$0xff]  }
 0x2c5   : > { %8259 = vmatpush1.bf16.msra.mxu0 %v9984_v27  ;;  %7916 = vmatprep.subr.bf16.mxu1 %v9989_v32  ;;  %v10068_v27 = vld [vmem:[%s11327_s21 + $0xf60] ss:$8 sps:$4 sm:$0xff]   ;;  %v10073_v32 = vld [vmem:[%s11327_s21 + $0x774] ss:$8 sps:$4 sm:$0xff]  }
 0x2c6   : > { %8260 = vmatprep.subr.bf16.mxu0 %v9992_v33  ;;  %v10076_v33 = vld [vmem:[%s11327_s21 + $0xf74] ss:$8 sps:$4 sm:$0xff]  }
 0x2c8   : > { %7917 = vmatpush1.bf16.msra.mxu1 %v9987_v36  ;;  %v10071_v36 = vld [vmem:[%s11327_s21 + $0x770] ss:$8 sps:$4 sm:$0xff]  }
 0x2c9   : > { %8261 = vmatpush1.bf16.msra.mxu0 %v9990_v37  ;;  %7918 = vmatprep.subr.bf16.mxu1 %v9995_v24  ;;  %v10074_v37 = vld [vmem:[%s11327_s21 + $0xf70] ss:$8 sps:$4 sm:$0xff]   ;;  %v10079_v24 = vld [vmem:[%s11327_s21 + $0x784] ss:$8 sps:$4 sm:$0xff]  }
 0x2ca   : > { %8262 = vmatprep.subr.bf16.mxu0 %v9998_v25  ;;  %v10082_v25 = vld [vmem:[%s11327_s21 + $0xf84] ss:$8 sps:$4 sm:$0xff]  }
 0x2cc   : > { %7919 = vmatpush1.bf16.msra.mxu1 %v9993_v29  ;;  %v10077_v29 = vld [vmem:[%s11327_s21 + $0x780] ss:$8 sps:$4 sm:$0xff]  }
 0x2cd   : > { %8263 = vmatpush1.bf16.msra.mxu0 %v9996_v30  ;;  %7920 = vmatprep.subr.bf16.mxu1 %v10001_v40  ;;  %v10080_v30 = vld [vmem:[%s11327_s21 + $0xf80] ss:$8 sps:$4 sm:$0xff]   ;;  %v10085_v40 = vld [vmem:[%s11327_s21 + $0x794] ss:$8 sps:$4 sm:$0xff]  }
 0x2ce   : > { %8264 = vmatprep.subr.bf16.mxu0 %v10004_v41  ;;  %v10088_v41 = vld [vmem:[%s11327_s21 + $0xf94] ss:$8 sps:$4 sm:$0xff]  }
 0x2d0   : > { %7921 = vmatpush1.bf16.msra.mxu1 %v9999_v44  ;;  %v10083_v44 = vld [vmem:[%s11327_s21 + $0x790] ss:$8 sps:$4 sm:$0xff]  }
 0x2d1   : > { %8265 = vmatpush1.bf16.msra.mxu0 %v10002_v45  ;;  %7922 = vmatprep.subr.bf16.mxu1 %v10007_v46  ;;  %v10086_v45 = vld [vmem:[%s11327_s21 + $0xf90] ss:$8 sps:$4 sm:$0xff]   ;;  %v10091_v46 = vld [vmem:[%s11327_s21 + $0x7a4] ss:$8 sps:$4 sm:$0xff]  }
 0x2d2   : > { %8266 = vmatprep.subr.bf16.mxu0 %v10010_v28  ;;  %v10094_v28 = vld [vmem:[%s11327_s21 + $0xfa4] ss:$8 sps:$4 sm:$0xff]  }
 0x2d4   : > { %7923 = vmatpush1.bf16.msra.mxu1 %v10005_v48  ;;  %v10089_v48 = vld [vmem:[%s11327_s21 + $0x7a0] ss:$8 sps:$4 sm:$0xff]  }
 0x2d5   : > { %8267 = vmatpush1.bf16.msra.mxu0 %v10008_v49  ;;  %7924 = vmatprep.subr.bf16.mxu1 %v10013_v50  ;;  %v10092_v49 = vld [vmem:[%s11327_s21 + $0xfa0] ss:$8 sps:$4 sm:$0xff]   ;;  %v10097_v50 = vld [vmem:[%s11327_s21 + $0x7b4] ss:$8 sps:$4 sm:$0xff]  }
 0x2d6   : > { %8268 = vmatprep.subr.bf16.mxu0 %v10016_v51  ;;  %v10100_v51 = vld [vmem:[%s11327_s21 + $0xfb4] ss:$8 sps:$4 sm:$0xff]  }
 0x2d8   : > { %7925 = vmatpush1.bf16.msra.mxu1 %v10011_v52  ;;  %v10095_v52 = vld [vmem:[%s11327_s21 + $0x7b0] ss:$8 sps:$4 sm:$0xff]  }
 0x2d9   : > { %8269 = vmatpush1.bf16.msra.mxu0 %v10014_v53  ;;  %7926 = vmatprep.subr.bf16.mxu1 %v10019_v54  ;;  %v10098_v53 = vld [vmem:[%s11327_s21 + $0xfb0] ss:$8 sps:$4 sm:$0xff]   ;;  %v10103_v54 = vld [vmem:[%s11327_s21 + $0x7c4] ss:$8 sps:$4 sm:$0xff]  }
 0x2da   : > { %8270 = vmatprep.subr.bf16.mxu0 %v10022_v38  ;;  %v10106_v38 = vld [vmem:[%s11327_s21 + $0xfc4] ss:$8 sps:$4 sm:$0xff]  }
 0x2dc   : > { %7927 = vmatpush1.bf16.msra.mxu1 %v10017_v42  ;;  %v10101_v42 = vld [vmem:[%s11327_s21 + $0x7c0] ss:$8 sps:$4 sm:$0xff]  }
 0x2dd   : > { %8271 = vmatpush1.bf16.msra.mxu0 %v10020_v43  ;;  %7928 = vmatprep.subr.bf16.mxu1 %v10025_v58  ;;  %v10104_v43 = vld [vmem:[%s11327_s21 + $0xfc0] ss:$8 sps:$4 sm:$0xff]   ;;  %v10109_v58 = vld [vmem:[%s11327_s21 + $0x7d4] ss:$8 sps:$4 sm:$0xff]  }
 0x2de   : > { %8272 = vmatprep.subr.bf16.mxu0 %v10028_v59  ;;  %v10112_v59 = vld [vmem:[%s11327_s21 + $0xfd4] ss:$8 sps:$4 sm:$0xff]  }
 0x2e0   : > { %7929 = vmatpush1.bf16.msra.mxu1 %v10023_v31  ;;  %v10107_v31 = vld [vmem:[%s11327_s21 + $0x7d0] ss:$8 sps:$4 sm:$0xff]  }
 0x2e1   : > { %8273 = vmatpush1.bf16.msra.mxu0 %v10026_v34  ;;  %7941 = vmatprep.subr.bf16.mxu1 %v10031_v35  ;;  %v10110_v34 = vld [vmem:[%s11327_s21 + $0xfd0] ss:$8 sps:$4 sm:$0xff]   ;;  %v10115_v35 = vld [vmem:[%s11327_s21 + $0x7e4] ss:$8 sps:$4 sm:$0xff]  }
 0x2e2   : > { %8285 = vmatprep.subr.bf16.mxu0 %v10034_v47  ;;  %v10118_v47 = vld [vmem:[%s11327_s21 + $0xfe4] ss:$8 sps:$4 sm:$0xff]  }
 0x2e3   : > { %7931 = vmatmul.mubr.bf16.vlgmr.msra.gmra.mrb[0].mxu1 %v8675_v61  ;;  %v10113_v61 = vld [vmem:[%s11327_s21 + $0x7e0] ss:$8 sps:$4 sm:$0xff]  }
 0x2e4   : > { %8275 = vmatmul.mubr.bf16.vlgmr.msra.gmra.mrb[0].mxu0 %v8691_v62  ;;  %7942 = vmatpush1.bf16.msra.mxu1 %v10029_v2  ;;  %v10116_v62 = vld [vmem:[%s11327_s21 + $0xfe0] ss:$8 sps:$4 sm:$0xff]   ;;  %v10121_v2 = vld [vmem:[%s11327_s21 + $0x7f4] ss:$8 sps:$4 sm:$0xff]  }
 0x2e5   : > { %8286 = vmatpush1.bf16.msra.mxu0 %v10032_v3  ;;  %7943 = vmatprep.subr.bf16.mxu1 %v10037_v39  ;;  %v10124_v3 = vld [vmem:[%s11327_s21 + $0xff4] ss:$8 sps:$4 sm:$0xff]   ;;  %v10119_v39 = vld [vmem:[%s11327_s21 + $0x7f0] ss:$8 sps:$4 sm:$0xff]  }
 0x2e6   : > { %8287 = vmatprep.subr.bf16.mxu0 %v10040_v55  ;;  %7973 = vmatprep.mubr.bf16.mxu1 %v8678_v56  ;;  %v10122_v55 = vld [vmem:[%s11327_s21 + $0xff0] ss:$8 sps:$4 sm:$0xff]   ;;  %v8677_v56 = vcombine.low %v11907_v60, %v11914_v63 }
 0x2e7   : > { %8317 = vmatprep.mubr.bf16.mxu0 %v8694_v57  ;;  %v8693_v57 = vcombine.low %v11917_v0, %v11920_v1 }
 0x2e8   : > { %7944 = vmatpush1.bf16.msra.mxu1 %v10035_v4  ;;  %v4370_v4 = vlaneseq }
 0x2e9   : > { %8288 = vmatpush1.bf16.msra.mxu0 %v10038_v5  ;;  %7945 = vmatprep.subr.bf16.mxu1 %v10043_v6  ;;  %v10199_v6 = vmov 0.0  }
 0x2ea   : > { %8289 = vmatprep.subr.bf16.mxu0 %v10046_v7  ;;  %vm11992_vm0 = vcmp.lt.s32.totalorder %v4370_v4, 256 }
 0x2eb   : > { %4374 = vst.msk [vmem:[#allocation2] sm:$0x3] %vm11992_vm0, %v10199_v6  ;;  %4375 = vst.msk [vmem:[#allocation3] sm:$0x3] %vm11992_vm0, %v10199_v6 }
 0x2ec   : > { %7946 = vmatpush1.bf16.msra.mxu1 %v10041_v8 }
 0x2ed   : > { %8290 = vmatpush1.bf16.msra.mxu0 %v10044_v9  ;;  %7947 = vmatprep.subr.bf16.mxu1 %v10049_v10 }
 0x2ee   : > { %8291 = vmatprep.subr.bf16.mxu0 %v10052_v11 }
 0x2f0   : > { %7948 = vmatpush1.bf16.msra.mxu1 %v10047_v12 }
 0x2f1   : > { %8292 = vmatpush1.bf16.msra.mxu0 %v10050_v13  ;;  %7949 = vmatprep.subr.bf16.mxu1 %v10055_v14 }
 0x2f2   : > { %8293 = vmatprep.subr.bf16.mxu0 %v10058_v15 }
 0x2f4   : > { %7950 = vmatpush1.bf16.msra.mxu1 %v10053_v16 }
 0x2f5   : > { %8294 = vmatpush1.bf16.msra.mxu0 %v10056_v17  ;;  %7951 = vmatprep.subr.bf16.mxu1 %v10061_v18 }
 0x2f6   : > { %8295 = vmatprep.subr.bf16.mxu0 %v10064_v19 }
 0x2f8   : > { %7952 = vmatpush1.bf16.msra.mxu1 %v10059_v20 }
 0x2f9   : > { %8296 = vmatpush1.bf16.msra.mxu0 %v10062_v21  ;;  %7953 = vmatprep.subr.bf16.mxu1 %v10067_v22 }
 0x2fa   : > { %8297 = vmatprep.subr.bf16.mxu0 %v10070_v23 }
 0x2fc   : > { %7954 = vmatpush1.bf16.msra.mxu1 %v10065_v26 }
 0x2fd   : > { %8298 = vmatpush1.bf16.msra.mxu0 %v10068_v27  ;;  %7955 = vmatprep.subr.bf16.mxu1 %v10073_v32 }
 0x2fe   : > { %8299 = vmatprep.subr.bf16.mxu0 %v10076_v33 }
 0x300   : > { %7956 = vmatpush1.bf16.msra.mxu1 %v10071_v36 }
 0x301   : > { %8300 = vmatpush1.bf16.msra.mxu0 %v10074_v37  ;;  %7957 = vmatprep.subr.bf16.mxu1 %v10079_v24  ;;  %v10200_v24 = vmov 1966171168  }
 0x302   : > { %8301 = vmatprep.subr.bf16.mxu0 %v10082_v25  ;;  %v8364_v25 = vunpack.c.l.s4 %v10200_v24 }
 0x304   : > { %7958 = vmatpush1.bf16.msra.mxu1 %v10077_v29 }
 0x305   : > { %8302 = vmatpush1.bf16.msra.mxu0 %v10080_v30  ;;  %7959 = vmatprep.subr.bf16.mxu1 %v10085_v40 }
 0x306   : > { %8303 = vmatprep.subr.bf16.mxu0 %v10088_v41 }
 0x308   : > { %7960 = vmatpush1.bf16.msra.mxu1 %v10083_v44 }
 0x309   : > { %8304 = vmatpush1.bf16.msra.mxu0 %v10086_v45  ;;  %7961 = vmatprep.subr.bf16.mxu1 %v10091_v46 }
 0x30a   : > { %8305 = vmatprep.subr.bf16.mxu0 %v10094_v28 }
 0x30c   : > { %7962 = vmatpush1.bf16.msra.mxu1 %v10089_v48  ;;  %v8365_v48 = vunpack.c.0.s8 %v8364_v25 }
 0x30d   : > { %8306 = vmatpush1.bf16.msra.mxu0 %v10092_v49  ;;  %7963 = vmatprep.subr.bf16.mxu1 %v10097_v50  ;;  %v8367_v49 = vshrl.u32 %v4370_v4, 7 }
 0x30e   : > { %8307 = vmatprep.subr.bf16.mxu0 %v10100_v51 }
 0x30f   : > { %v8444_v4 = vsub.s32 0, %v8367_v49  ;;  %v8448_v6 = vsub.s32 1, %v8367_v49 }
 0x310   : > { %7964 = vmatpush1.bf16.msra.mxu1 %v10095_v52 }
 0x311   : > { %8308 = vmatpush1.bf16.msra.mxu0 %v10098_v53  ;;  %7965 = vmatprep.subr.bf16.mxu1 %v10103_v54 }
 0x312   : > { %8309 = vmatprep.subr.bf16.mxu0 %v10106_v38 }
 0x314   : > { %7966 = vmatpush1.bf16.msra.mxu1 %v10101_v42 }
 0x315   : > { %8310 = vmatpush1.bf16.msra.mxu0 %v10104_v43  ;;  %7967 = vmatprep.subr.bf16.mxu1 %v10109_v58  ;;  %v8368_v58 = vsub.s32 %v8365_v48, %v8367_v49 }
 0x316   : > { %8311 = vmatprep.subr.bf16.mxu0 %v10112_v59 }
 0x318   : > { %7968 = vmatpush1.bf16.msra.mxu1 %v10107_v31 }
 0x319   : > { %8312 = vmatpush1.bf16.msra.mxu0 %v10110_v34  ;;  %7969 = vmatprep.subr.bf16.mxu1 %v10115_v35 }
 0x31a   : > { %8313 = vmatprep.subr.bf16.mxu0 %v10118_v47 }
 0x31c   : > { %7970 = vmatpush1.bf16.msra.mxu1 %v10113_v61 }
 0x31d   : > { %8314 = vmatpush1.bf16.msra.mxu0 %v10116_v62  ;;  %7971 = vmatprep.subr.bf16.mxu1 %v10121_v2  ;;  %v8345_v62 = vld [vmem:[#allocation2] sm:$0x3] }
 0x31e   : > { %8315 = vmatprep.subr.bf16.mxu0 %v10124_v3 }
 0x320   : > { %7972 = vmatpush1.bf16.msra.mxu1 %v10119_v39  ;;  %v8384_v39 = vld [vmem:[#allocation3] sm:$0x3] }
 0x321   : > { %8316 = vmatpush1.bf16.msra.mxu0 %v10122_v55 }
 0x323   : > { %7974 = vmatmul.mubr.bf16.vlgmr.msra.gmra.mrb[0].mxu1 %v8677_v56 }
 0x324   : > { %8318 = vmatmul.mubr.bf16.vlgmr.msra.gmra.mrb[0].mxu0 %v8693_v57 }
 0x3f6   : > { %v7975_v60 = vpop.f32.mrb[0].mxu1 }
 0x3f7   : > { %v8319_v63 = vpop.f32.mrb[0].mxu0  ;;  %v7977_v0 = vpop.f32.mrb[1].mxu1 }
 0x3f8   : > { %v9223_v7 = vadd.f32 %v8319_v63, %v7975_v60  ;;  %v8321_v1 = vpop.f32.mrb[1].mxu0  ;;  %v7979_v9 = vpop.f32.mrb[2].mxu1 }
 0x3f9   : > { %v9224_v8 = vadd.f32 %v8321_v1, %v7977_v0  ;;  %v8323_v10 = vpop.f32.mrb[2].mxu0  ;;  %v7981_v12 = vpop.f32.mrb[3].mxu1 }
 0x3fa   : > { %v9225_v11 = vadd.f32 %v8323_v10, %v7979_v9  ;;  %v8325_v13 = vpop.f32.mrb[3].mxu0  ;;  %v8385_v16 = vmul.f32 %v9223_v7, %v9223_v7 }
 0x3fb   : > { %v12000_v14 = vpack.c.bf16 %v9224_v8, %v9223_v7  ;;  %v9226_v15 = vadd.f32 %v8325_v13, %v7981_v12  ;;  %v8386_v19 = vmul.f32 %v9224_v8, %v9224_v8 }
 0x3fc   : > { %v8346_v17 = vadd.f32 %v9225_v11, %v9223_v7  ;;  %v8387_v18 = vmul.f32 %v9225_v11, %v9225_v11 }
 0x3fd   : > { %v12002_v20 = vpack.c.bf16 %v9226_v15, %v9225_v11  ;;  %v8353_v21 = vadd.f32 %v9226_v15, %v9224_v8  ;;  %v8388_v22 = vmul.f32 %v9226_v15, %v9226_v15  ;;  %v8437_v0 = vunpack.c.l.bf16 %v12000_v14 }
 0x3fe   : > { %v8347_v23 = vrot.slane %v8346_v17, 4  ;;  %v8389_v26 = vadd.f32 %v8387_v18, %v8385_v16  ;;  %v8438_v1 = vunpack.c.h.bf16 %v12000_v14 }
 0x3ff   : > { %v8354_v27 = vrot.slane %v8353_v21, 4  ;;  %v8396_v32 = vadd.f32 %v8388_v22, %v8386_v19  ;;  %v8439_v8 = vunpack.c.l.bf16 %v12002_v20  ;;  %v8440_v13 = vunpack.c.h.bf16 %v12002_v20 }
 0x400   : > { %v8348_v33 = vadd.f32 %v8347_v23, %v8346_v17  ;;  %v8390_v36 = vrot.slane %v8389_v26, 4 }
 0x401   : > { %v8355_v37 = vadd.f32 %v8354_v27, %v8353_v21  ;;  %v8397_v29 = vrot.slane %v8396_v32, 4 }
 0x402   : > { %v8349_v30 = vrot.slane %v8348_v33, 2  ;;  %v8391_v40 = vadd.f32 %v8390_v36, %v8389_v26 }
 0x403   : > { %v8356_v41 = vrot.slane %v8355_v37, 2  ;;  %v8398_v44 = vadd.f32 %v8397_v29, %v8396_v32 }
 0x404   : > { %v8350_v45 = vadd.f32 %v8349_v30, %v8348_v33  ;;  %v8392_v46 = vrot.slane %v8391_v40, 2 }
 0x405   : > { %v8357_v28 = vadd.f32 %v8356_v41, %v8355_v37  ;;  %v8399_v50 = vrot.slane %v8398_v44, 2 }
 0x406   : > { %v8351_v51 = vrot.slane %v8350_v45, 1  ;;  %v8393_v52 = vadd.f32 %v8392_v46, %v8391_v40 }
 0x407   : > { %v8358_v53 = vrot.slane %v8357_v28, 1  ;;  %v8400_v54 = vadd.f32 %v8399_v50, %v8398_v44 }
 0x408   : > { %v8352_v38 = vadd.f32 %v8351_v51, %v8350_v45  ;;  %v8394_v42 = vrot.slane %v8393_v52, 1 }
 0x409   : > { %v8359_v43 = vadd.f32 %v8358_v53, %v8357_v28  ;;  %v8401_v59 = vrot.slane %v8400_v54, 1 }
 0x40a   : > { %v8395_v31 = vadd.f32 %v8394_v42, %v8393_v52 }
 0x40b   : > { %v8362_v34 = vcombine.low %v8352_v38, %v8359_v43  ;;  %v8402_v35 = vadd.f32 %v8401_v59, %v8400_v54 }
 0x40d   : > { %v8369_v47 = vrot.slane %v8362_v34, %v8368_v58  ;;  %v8405_v61 = vcombine.low %v8395_v31, %v8402_v35 }
 0x40f   : > { %v8376_v2 = vrot.slane %v8369_v47, %v8368_v58  ;;  %v8412_v3 = vrot.slane %v8405_v61, %v8368_v58 }
 0x411   : > { %v8378_v55 = vadd.f32 %v8376_v2, %v8345_v62  ;;  %v8419_v56 = vrot.slane %v8412_v3, %v8368_v58 }
 0x413   : > { %8383 = vst.msk [vmem:[#allocation2] sm:$0x3] %vm11992_vm0, %v8378_v55  ;;  %v8421_v57 = vadd.f32 %v8419_v56, %v8384_v39 }
 0x415   : > { %8422 = vst.msk [vmem:[#allocation3] sm:$0x3] %vm11992_vm0, %v8421_v57 }
 0x41a   : > { %v8426_v60 = vld [vmem:[#allocation2] sm:$0x3] }
 0x41b   : > { %v8427_v63 = vmul.f32 0.25, %v8426_v60 }
 0x41c   : > { %v8428_v7 = vld [vmem:[#allocation3] sm:$0x3] }
 0x41d   : > { %v8429_v9 = vmul.f32 0.25, %v8428_v7  ;;  %v8430_v10 = vmul.f32 %v8427_v63, %v8427_v63  ;;  %v8445_v11 = vrot.slane %v8427_v63, %v8444_v4  ;;  %v8449_v12 = vrot.slane %v8427_v63, %v8448_v6 }
 0x41f   : > { %v8431_v5 = vsub.f32 %v8429_v9, %v8430_v10  ;;  %v8452_v15 = vsub.f32 %v8437_v0, %v8445_v11  ;;  %v8453_v16 = vsub.f32 %v8438_v1, %v8449_v12  ;;  %v8454_v17 = vsub.f32 %v8439_v8, %v8445_v11 }
 0x420   : > { %v8455_v18 = vsub.f32 %v8440_v13, %v8449_v12 }
 0x421   : > { %v8432_v19 = vmax.f32 %v8431_v5, 0.0 }
 0x423   : > { %v8433_v21 = vadd.f32 1e-05, %v8432_v19 }
 0x425   : > { %10125 = vrsqrt.f32 %v8433_v21 }
 0x42f   : > { %v10126_v22 = vpop.eup %10125 }
 0x430   : > { %v8460_v23 = vrot.slane %v10126_v22, %v8444_v4  ;;  %v8464_v14 = vrot.slane %v10126_v22, %v8448_v6 }
 0x432   : > { %v8467_v26 = vmul.f32 %v8460_v23, %v8452_v15  ;;  %v8468_v27 = vmul.f32 %v8464_v14, %v8453_v16  ;;  %v8469_v32 = vmul.f32 %v8460_v23, %v8454_v17  ;;  %v8470_v33 = vmul.f32 %v8464_v14, %v8455_v18 }
 0x434   : > { %vm8471_vm1 = vcmp.ge.f32.partialorder %v8467_v26, 0.0  ;;  %vm8472_vm2 = vcmp.ge.f32.partialorder %v8468_v27, 0.0  ;;  %vm8473_vm3 = vcmp.ge.f32.partialorder %v8469_v32, 0.0  ;;  %vm8474_vm4 = vcmp.ge.f32.partialorder %v8470_v33, 0.0 }
 0x435   : > { %v8475_v20 = vmul.f32 0.2, %v8467_v26  ;;  %v8476_v36 = vmul.f32 0.2, %v8468_v27  ;;  %v8477_v37 = vmul.f32 0.2, %v8469_v32 }
 0x436   : > { %v8478_v24 = vmul.f32 0.2, %v8470_v33  ;;  %8503 = sbr.rel (!%p10283_p9) target bundleno = 1092 (0x444), region = 92 }
 0x437   : > { %v8479_v25 = vsel %vm8471_vm1, %v8467_v26, %v8475_v20  ;;  %v8480_v29 = vsel %vm8472_vm2, %v8468_v27, %v8476_v36  ;;  %v8481_v30 = vsel %vm8473_vm3, %v8469_v32, %v8477_v37 }
 0x438   : > { %v8482_v40 = vsel %vm8474_vm4, %v8470_v33, %v8478_v24  ;;  %v9221_v41 = vpack.c.bf16 %v8480_v29, %v8479_v25 }
 0x439   : > { %v9222_v44 = vpack.c.bf16 %v8482_v40, %v8481_v30 }
 0x43a   : > { %8495 = vst [vmem:[%s4352_s9] sm:$0xff] %v9221_v41 }
 0x43b   : > { %8496 = vst [vmem:[%s4352_s9 + $0x8] sm:$0xff] %v9222_v44 }
 0x441   : > { %v8538_v45 = vld [vmem:[%s4352_s9] sm:$0xff] }
 0x442   : > { %v8540_v46 = vld [vmem:[%s4352_s9 + $0x8] sm:$0xff]  ;;  %8539 = vst [vmem:[%s8508_s18] sm:$0xff] %v8538_v45 }
 0x443   : > { %8541 = vst [vmem:[%s8508_s18 + $0x10] sm:$0xff] %v8540_v46 }
 0x444 PF: > { %s12_s17 = sadd.s32 1, %s10197_s17   ;;  %s12053_s9 = smov %s10169_s10 }
 0x445   : > { %p9_p1 = scmp.ge.s32.totalorder %s12_s17, 6   ;;  %s12054_s10 = smov %s10288_s28 }
 0x446   : > { %s12055_s11 = smov %s10177_s12  ;;  %s12056_s12 = smov %s10277_s24 }
 0x447   : > { %s12057_s13 = smov %s10189_s15  ;;  %s12058_s14 = smov %s10193_s16 }
 0x448   : > { %s12059_s15 = smov %s12062_s19  ;;  %s12060_s16 = smov %s12066_s20 }
 0x449   :  { %11 = sbr.rel (!%p9_p1) target bundleno = 5 (0x5), region = 171 }

// kernel: discriminator_forward.9
= control target key start
LH: loop header
LB: loop body
LE: loop exit
PB: predicated region body
PF: predicated region fallthrough
CT: control target
= control target key end

     0   :  { %s7979_s12 = smov 0   ;;  %s7981_s13 = smov 0   ;;  %s9673_s0 = inlined_call_operand.vmem [shape: bf16[2,16,8192], index: 0, kind: input, shape index: {}]   ;;  %s9674_s1 = inlined_call_operand.vmem [shape: bf16[8192,128], index: 1, kind: input, shape index: {}]   ;;  %s9675_s2 = inlined_call_operand.vmem [shape: f32[1,128], index: 2, kind: input, shape index: {}]   ;;  %s9676_s3 = inlined_call_operand.vmem [shape: f32[2,16,128], index: 3, kind: output, shape index: {}]  }
   0x1   :  { %s7983_s14 = smov 0  }
   0x2 LB: > { %s25_s15 = sadd.s32 1, %s7953_s13  ;;  %p6109_p0 = scmp.ge.s32.totalorder %s7957_s14, 1  ;;  %s7957_s14 = sphi %s7983_s14, %s13_s14   ;;  %s7953_s13 = sphi %s7981_s13, %s9678_s13   ;;  %s7949_s12 = sphi %s7979_s12, %s9677_s12  }
   0x3   : > { %p27_p1 = scmp.ge.s32.totalorder %s25_s15, 2  ;;  %p159_p2 = scmp.lt.s32.totalorder %s7957_s14, 3 }
   0x5   : > { %s9680_s15 = smov (%p27_p1, %s25_s15), 0  ;;  %p160_p3 = pnand %p6109_p0, %p159_p2 }
   0x6   : > { %v7423_v0 = vld [vmem:[%s9674_s1 + $0x40] sm:$0xff] (!%p160_p3)   ;;  %v7427_v4 = vld [vmem:[%s9674_s1 + $0x48] sm:$0xff] (!%p160_p3)   ;;  %v7431_v8 = vld [vmem:[%s9674_s1 + $0x50] sm:$0xff] (!%p160_p3)   ;;  %p193_p4 = scmp.lt.s32.totalorder (!%p160_p3), %s7949_s12, 1 }
   0x7   : > { %163 = sbr.rel (%p160_p3) target bundleno = 743 (0x2e7), region = 32  ;;  %v7424_v1 = vld [vmem:[%s9674_s1 + $0xc0] sm:$0xff] (!%p160_p3)   ;;  %6695 = vmatprep.subr.bf16.mxu0 (!%p160_p3), %v7423_v0  ;;  %v7428_v5 = vld [vmem:[%s9674_s1 + $0xc8] sm:$0xff] (!%p160_p3)   ;;  %v7432_v9 = vld [vmem:[%s9674_s1 + $0xd0] sm:$0xff] (!%p160_p3)  }
   0x8   : > { %v7425_v2 = vld [vmem:[%s9674_s1] sm:$0xff] (!%p160_p3)   ;;  %6717 = vmatprep.subr.bf16.mxu1 (!%p160_p3), %v7424_v1  ;;  %v7429_v6 = vld [vmem:[%s9674_s1 + $0x8] sm:$0xff] (!%p160_p3)   ;;  %v7433_v10 = vld [vmem:[%s9674_s1 + $0x10] sm:$0xff] (!%p160_p3)  }
   0x9   : > { %v7426_v3 = vld [vmem:[%s9674_s1 + $0x80] sm:$0xff] (!%p160_p3)   ;;  %6696 = vmatpush3.bf16.msra.mxu0 (!%p160_p3), %v7425_v2  ;;  %v7430_v7 = vld [vmem:[%s9674_s1 + $0x88] sm:$0xff] (!%p160_p3)   ;;  %v7434_v11 = vld [vmem:[%s9674_s1 + $0x90] sm:$0xff] (!%p160_p3)  }
   0xa   : > { %6718 = vmatpush3.bf16.msra.mxu1 (!%p160_p3), %v7426_v3  ;;  %6697 = vmatprep.subr.bf16.mxu0 (!%p160_p3), %v7427_v4  ;;  %v7435_v12 = vld [vmem:[%s9674_s1 + $0x58] sm:$0xff] (!%p160_p3)   ;;  %v7439_v16 = vld [vmem:[%s9674_s1 + $0x60] sm:$0xff] (!%p160_p3)   ;;  %v7443_v20 = vld [vmem:[%s9674_s1 + $0x68] sm:$0xff] (!%p160_p3)  }
   0xb   : > { %6719 = vmatprep.subr.bf16.mxu1 (!%p160_p3), %v7428_v5  ;;  %v7436_v13 = vld [vmem:[%s9674_s1 + $0xd8] sm:$0xff] (!%p160_p3)   ;;  %v7440_v17 = vld [vmem:[%s9674_s1 + $0xe0] sm:$0xff] (!%p160_p3)   ;;  %v7444_v21 = vld [vmem:[%s9674_s1 + $0xe8] sm:$0xff] (!%p160_p3)  }
   0xc   : > { %v7437_v14 = vld [vmem:[%s9674_s1 + $0x18] sm:$0xff] (!%p160_p3)   ;;  %v7441_v18 = vld [vmem:[%s9674_s1 + $0x20] sm:$0xff] (!%p160_p3)   ;;  %v7445_v22 = vld [vmem:[%s9674_s1 + $0x28] sm:$0xff] (!%p160_p3)  }
   0xd   : > { %6698 = vmatpush3.bf16.msra.mxu0 (!%p160_p3), %v7429_v6  ;;  %v7438_v15 = vld [vmem:[%s9674_s1 + $0x98] sm:$0xff] (!%p160_p3)   ;;  %v7442_v19 = vld [vmem:[%s9674_s1 + $0xa0] sm:$0xff] (!%p160_p3)   ;;  %v7446_v23 = vld [vmem:[%s9674_s1 + $0xa8] sm:$0xff] (!%p160_p3)  }
   0xe   : > { %6720 = vmatpush3.bf16.msra.mxu1 %v7430_v7  ;;  %6699 = vmatprep.subr.bf16.mxu0 %v7431_v8  ;;  %s9682_s12 = smov (!%p193_p4, %s7949_s12), 1  ;;  %v7447_v24 = vld [vmem:[%s9674_s1 + $0x70] sm:$0xff]   ;;  %v7451_v28 = vld [vmem:[%s9674_s1 + $0x78] sm:$0xff]   ;;  %v7455_v40 = vld [vmem:[%s9674_s1 + $0x140] sm:$0xff]  }
   0xf   : > { %6721 = vmatprep.subr.bf16.mxu1 %v7432_v9  ;;  %v7448_v25 = vld [vmem:[%s9674_s1 + $0xf0] sm:$0xff]   ;;  %s6693_s24 = sshll.u32 %s9682_s12, 9  ;;  %v7452_v29 = vld [vmem:[%s9674_s1 + $0xf8] sm:$0xff]   ;;  %v7456_v41 = vld [vmem:[%s9674_s1 + $0x1c0] sm:$0xff]  }
  0x10   : > { %v7449_v26 = vld [vmem:[%s9674_s1 + $0x30] sm:$0xff]   ;;  %s8097_s6 = scalar_lea.vmem %s9673_s0, %s6693_s24  ;;  %v7453_v30 = vld [vmem:[%s9674_s1 + $0x38] sm:$0xff]   ;;  %v7457_v42 = vld [vmem:[%s9674_s1 + $0x100] sm:$0xff]  }
  0x11   : > { %6700 = vmatpush3.bf16.msra.mxu0 %v7433_v10  ;;  %v7450_v27 = vld [vmem:[%s9674_s1 + $0xb0] sm:$0xff]   ;;  %v7454_v31 = vld [vmem:[%s9674_s1 + $0xb8] sm:$0xff]   ;;  %v214_v32 = vld [vmem:[%s8097_s6] sm:$0xff] }
  0x12   : > { %6722 = vmatpush3.bf16.msra.mxu1 %v7434_v11  ;;  %6701 = vmatprep.subr.bf16.mxu0 %v7435_v12  ;;  %v246_v33 = vld [vmem:[%s8097_s6 + $0x100] sm:$0xff]  ;;  %v215_v34 = vld [vmem:[%s8097_s6 + $0x8] sm:$0xff]  ;;  %v7463_v48 = vld [vmem:[%s9674_s1 + $0x150] sm:$0xff]  }
  0x13   : > { %6723 = vmatprep.subr.bf16.mxu1 %v7436_v13  ;;  %v6115_v35 = vcombine.low %v214_v32, %v246_v33  ;;  %v6116_v36 = vcombine.high %v214_v32, %v246_v33  ;;  %v247_v37 = vld [vmem:[%s8097_s6 + $0x108] sm:$0xff]  ;;  %v7458_v43 = vld [vmem:[%s9674_s1 + $0x180] sm:$0xff]   ;;  %v7464_v49 = vld [vmem:[%s9674_s1 + $0x1d0] sm:$0xff]  }
  0x14   : > { %v6117_v38 = vcombine.low %v215_v34, %v247_v37  ;;  %v6118_v39 = vcombine.high %v215_v34, %v247_v37  ;;  %v7459_v44 = vld [vmem:[%s9674_s1 + $0x148] sm:$0xff]   ;;  %v7465_v50 = vld [vmem:[%s9674_s1 + $0x110] sm:$0xff]   ;;  %v7467_v52 = vld [vmem:[%s9674_s1 + $0x158] sm:$0xff]  }
  0x15   : > { %6702 = vmatpush3.bf16.msra.mxu0 %v7437_v14  ;;  %4733 = vmatprep.mubr.bf16.mxu0 %v6116_v36  ;;  %v7460_v45 = vld [vmem:[%s9674_s1 + $0x1c8] sm:$0xff]   ;;  %v7466_v51 = vld [vmem:[%s9674_s1 + $0x190] sm:$0xff]   ;;  %v7468_v53 = vld [vmem:[%s9674_s1 + $0x1d8] sm:$0xff]  }
  0x16   : > { %6724 = vmatpush3.bf16.msra.mxu1 %v7438_v15  ;;  %6703 = vmatprep.subr.bf16.mxu0 %v7439_v16  ;;  %v7461_v46 = vld [vmem:[%s9674_s1 + $0x108] sm:$0xff]   ;;  %v7469_v54 = vld [vmem:[%s9674_s1 + $0x118] sm:$0xff]   ;;  %v7471_v56 = vld [vmem:[%s9674_s1 + $0x160] sm:$0xff]  }
  0x17   : > { %6725 = vmatprep.subr.bf16.mxu1 %v7440_v17  ;;  %4774 = vmatprep.mubr.bf16.mxu1 %v6118_v39  ;;  %v7462_v47 = vld [vmem:[%s9674_s1 + $0x188] sm:$0xff]   ;;  %v7470_v55 = vld [vmem:[%s9674_s1 + $0x198] sm:$0xff]   ;;  %v7472_v57 = vld [vmem:[%s9674_s1 + $0x1e0] sm:$0xff]  }
  0x18   : > { %v7473_v58 = vld [vmem:[%s9674_s1 + $0x120] sm:$0xff]   ;;  %v7475_v60 = vld [vmem:[%s9674_s1 + $0x168] sm:$0xff]   ;;  %v7479_v0 = vld [vmem:[%s9674_s1 + $0x170] sm:$0xff]  }
  0x19   : > { %6704 = vmatpush3.bf16.msra.mxu0 %v7441_v18  ;;  %v7474_v59 = vld [vmem:[%s9674_s1 + $0x1a0] sm:$0xff]   ;;  %v7476_v61 = vld [vmem:[%s9674_s1 + $0x1e8] sm:$0xff]   ;;  %v7480_v1 = vld [vmem:[%s9674_s1 + $0x1f0] sm:$0xff]  }
  0x1a   : > { %6726 = vmatpush3.bf16.msra.mxu1 %v7442_v19  ;;  %6705 = vmatprep.subr.bf16.mxu0 %v7443_v20  ;;  %v7477_v62 = vld [vmem:[%s9674_s1 + $0x128] sm:$0xff]   ;;  %v7481_v2 = vld [vmem:[%s9674_s1 + $0x130] sm:$0xff]   ;;  %v7483_v4 = vld [vmem:[%s9674_s1 + $0x178] sm:$0xff]  }
  0x1b   : > { %6727 = vmatprep.subr.bf16.mxu1 %v7444_v21  ;;  %v7478_v63 = vld [vmem:[%s9674_s1 + $0x1a8] sm:$0xff]   ;;  %v7482_v3 = vld [vmem:[%s9674_s1 + $0x1b0] sm:$0xff]   ;;  %v7484_v5 = vld [vmem:[%s9674_s1 + $0x1f8] sm:$0xff]  }
  0x1c   : > { %v7485_v6 = vld [vmem:[%s9674_s1 + $0x138] sm:$0xff]   ;;  %v216_v8 = vld [vmem:[%s8097_s6 + $0x10] sm:$0xff]  ;;  %v7487_v16 = vld [vmem:[%s9674_s1 + $0x240] sm:$0xff]  }
  0x1d   : > { %6706 = vmatpush3.bf16.msra.mxu0 %v7445_v22  ;;  %v7486_v7 = vld [vmem:[%s9674_s1 + $0x1b8] sm:$0xff]   ;;  %v248_v9 = vld [vmem:[%s8097_s6 + $0x110] sm:$0xff]  ;;  %v7488_v17 = vld [vmem:[%s9674_s1 + $0x2c0] sm:$0xff]  }
  0x1e   : > { %6728 = vmatpush3.bf16.msra.mxu1 %v7446_v23  ;;  %6707 = vmatprep.subr.bf16.mxu0 %v7447_v24  ;;  %v6119_v10 = vcombine.low %v216_v8, %v248_v9  ;;  %v6120_v11 = vcombine.high %v216_v8, %v248_v9  ;;  %v217_v12 = vld [vmem:[%s8097_s6 + $0x18] sm:$0xff]  ;;  %v7489_v18 = vld [vmem:[%s9674_s1 + $0x200] sm:$0xff]   ;;  %v7491_v20 = vld [vmem:[%s9674_s1 + $0x248] sm:$0xff]  }
  0x1f   : > { %6729 = vmatprep.subr.bf16.mxu1 %v7448_v25  ;;  %v249_v13 = vld [vmem:[%s8097_s6 + $0x118] sm:$0xff]  ;;  %v7490_v19 = vld [vmem:[%s9674_s1 + $0x280] sm:$0xff]   ;;  %v7492_v21 = vld [vmem:[%s9674_s1 + $0x2c8] sm:$0xff]  }
  0x20   : > { %v6121_v14 = vcombine.low %v217_v12, %v249_v13  ;;  %v6122_v15 = vcombine.high %v217_v12, %v249_v13  ;;  %v7493_v22 = vld [vmem:[%s9674_s1 + $0x208] sm:$0xff]   ;;  %v7495_v24 = vld [vmem:[%s9674_s1 + $0x250] sm:$0xff]   ;;  %v7503_v32 = vld [vmem:[%s9674_s1 + $0x260] sm:$0xff]  }
  0x21   : > { %6708 = vmatpush3.bf16.msra.mxu0 %v7449_v26  ;;  %v7494_v23 = vld [vmem:[%s9674_s1 + $0x288] sm:$0xff]   ;;  %v7496_v25 = vld [vmem:[%s9674_s1 + $0x2d0] sm:$0xff]   ;;  %v7504_v33 = vld [vmem:[%s9674_s1 + $0x2e0] sm:$0xff]  }
  0x22   : > { %6730 = vmatpush3.bf16.msra.mxu1 %v7450_v27  ;;  %6709 = vmatprep.subr.bf16.mxu0 %v7451_v28  ;;  %v7497_v26 = vld [vmem:[%s9674_s1 + $0x210] sm:$0xff]   ;;  %v7499_v28 = vld [vmem:[%s9674_s1 + $0x258] sm:$0xff]   ;;  %v7505_v34 = vld [vmem:[%s9674_s1 + $0x220] sm:$0xff]  }
  0x23   : > { %6731 = vmatprep.subr.bf16.mxu1 %v7452_v29  ;;  %v7498_v27 = vld [vmem:[%s9674_s1 + $0x290] sm:$0xff]   ;;  %v7500_v29 = vld [vmem:[%s9674_s1 + $0x2d8] sm:$0xff]   ;;  %v7507_v36 = vld [vmem:[%s9674_s1 + $0x268] sm:$0xff]  }
  0x24   : > { %v7508_v37 = vld [vmem:[%s9674_s1 + $0x2e8] sm:$0xff]   ;;  %v7535_v8 = vld [vmem:[%s9674_s1 + $0x360] sm:$0xff]  }
  0x25   : > { %6710 = vmatpush3.bf16.msra.mxu0 %v7453_v30  ;;  %v7501_v30 = vld [vmem:[%s9674_s1 + $0x218] sm:$0xff]   ;;  %v7510_v39 = vld [vmem:[%s9674_s1 + $0x2a8] sm:$0xff]   ;;  %v7536_v9 = vld [vmem:[%s9674_s1 + $0x3e0] sm:$0xff]  }
  0x26   : > { %6732 = vmatpush3.bf16.msra.mxu1 %v7454_v31  ;;  %6739 = vmatprep.subr.bf16.mxu0 %v7455_v40  ;;  %v7502_v31 = vld [vmem:[%s9674_s1 + $0x298] sm:$0xff]   ;;  %v7511_v40 = vld [vmem:[%s9674_s1 + $0x270] sm:$0xff]   ;;  %v7539_v12 = vld [vmem:[%s9674_s1 + $0x368] sm:$0xff]  }
  0x27   : > { %6761 = vmatprep.subr.bf16.mxu1 %v7456_v41  ;;  %v7512_v41 = vld [vmem:[%s9674_s1 + $0x2f0] sm:$0xff]   ;;  %v7540_v13 = vld [vmem:[%s9674_s1 + $0x3e8] sm:$0xff]  }
  0x28   : > { %4734 = vmatmul.mubr.bf16.vlgmr.msra.gmra.mrb[0].mxu0 %v6115_v35  ;;  %v7506_v35 = vld [vmem:[%s9674_s1 + $0x2a0] sm:$0xff]  }
  0x29   : > { %4775 = vmatmul.mubr.bf16.vlgmr.msra.gmra.mrb[0].mxu1 %v6117_v38  ;;  %6740 = vmatpush3.bf16.msra.mxu0 %v7457_v42  ;;  %v7509_v38 = vld [vmem:[%s9674_s1 + $0x228] sm:$0xff]   ;;  %v7513_v42 = vld [vmem:[%s9674_s1 + $0x230] sm:$0xff]  }
  0x2a   : > { %6762 = vmatpush3.bf16.msra.mxu1 %v7458_v43  ;;  %6741 = vmatprep.subr.bf16.mxu0 %v7459_v44  ;;  %v7514_v43 = vld [vmem:[%s9674_s1 + $0x2b0] sm:$0xff]   ;;  %v7515_v44 = vld [vmem:[%s9674_s1 + $0x278] sm:$0xff]  }
  0x2b   : > { %6763 = vmatprep.subr.bf16.mxu1 %v7460_v45  ;;  %4815 = vmatprep.mubr.bf16.mxu0 %v6120_v11  ;;  %v7516_v45 = vld [vmem:[%s9674_s1 + $0x2f8] sm:$0xff]   ;;  %v7538_v11 = vld [vmem:[%s9674_s1 + $0x3a0] sm:$0xff]  }
  0x2c   : > { %4856 = vmatprep.mubr.bf16.mxu1 %v6122_v15  ;;  %v7542_v15 = vld [vmem:[%s9674_s1 + $0x3a8] sm:$0xff]  }
  0x2d   : > { %6742 = vmatpush3.bf16.msra.mxu0 %v7461_v46  ;;  %v7517_v46 = vld [vmem:[%s9674_s1 + $0x238] sm:$0xff]  }
  0x2e   : > { %6764 = vmatpush3.bf16.msra.mxu1 %v7462_v47  ;;  %6743 = vmatprep.subr.bf16.mxu0 %v7463_v48  ;;  %v7518_v47 = vld [vmem:[%s9674_s1 + $0x2b8] sm:$0xff]   ;;  %v218_v48 = vld [vmem:[%s8097_s6 + $0x20] sm:$0xff] }
  0x2f   : > { %6765 = vmatprep.subr.bf16.mxu1 %v7464_v49  ;;  %v250_v49 = vld [vmem:[%s8097_s6 + $0x120] sm:$0xff] }
  0x31   : > { %6744 = vmatpush3.bf16.msra.mxu0 %v7465_v50  ;;  %v219_v50 = vld [vmem:[%s8097_s6 + $0x28] sm:$0xff] }
  0x32   : > { %6766 = vmatpush3.bf16.msra.mxu1 %v7466_v51  ;;  %6745 = vmatprep.subr.bf16.mxu0 %v7467_v52  ;;  %v251_v51 = vld [vmem:[%s8097_s6 + $0x128] sm:$0xff]  ;;  %v6123_v52 = vcombine.low %v218_v48, %v250_v49 }
  0x33   : > { %6767 = vmatprep.subr.bf16.mxu1 %v7468_v53  ;;  %v6124_v53 = vcombine.high %v218_v48, %v250_v49  ;;  %v7567_v48 = vld [vmem:[%s9674_s1 + $0x460] sm:$0xff]  }
  0x34   : > { %v7568_v49 = vld [vmem:[%s9674_s1 + $0x4e0] sm:$0xff]  }
  0x35   : > { %6746 = vmatpush3.bf16.msra.mxu0 %v7469_v54  ;;  %v6125_v54 = vcombine.low %v219_v50, %v251_v51 }
  0x36   : > { %6768 = vmatpush3.bf16.msra.mxu1 %v7470_v55  ;;  %6747 = vmatprep.subr.bf16.mxu0 %v7471_v56  ;;  %v6126_v55 = vcombine.high %v219_v50, %v251_v51  ;;  %v7519_v56 = vld [vmem:[%s9674_s1 + $0x340] sm:$0xff]  }
  0x37   : > { %6769 = vmatprep.subr.bf16.mxu1 %v7472_v57  ;;  %v7520_v57 = vld [vmem:[%s9674_s1 + $0x3c0] sm:$0xff]  }
  0x38   : > { %v7569_v50 = vld [vmem:[%s9674_s1 + $0x420] sm:$0xff]  }
  0x39   : > { %6748 = vmatpush3.bf16.msra.mxu0 %v7473_v58  ;;  %v7521_v58 = vld [vmem:[%s9674_s1 + $0x300] sm:$0xff]  }
  0x3a   : > { %6770 = vmatpush3.bf16.msra.mxu1 %v7474_v59  ;;  %6749 = vmatprep.subr.bf16.mxu0 %v7475_v60  ;;  %v7522_v59 = vld [vmem:[%s9674_s1 + $0x380] sm:$0xff]   ;;  %v7523_v60 = vld [vmem:[%s9674_s1 + $0x348] sm:$0xff]  }
  0x3b   : > { %6771 = vmatprep.subr.bf16.mxu1 %v7476_v61  ;;  %v7524_v61 = vld [vmem:[%s9674_s1 + $0x3c8] sm:$0xff]   ;;  %v7570_v51 = vld [vmem:[%s9674_s1 + $0x4a0] sm:$0xff]  }
  0x3d   : > { %6750 = vmatpush3.bf16.msra.mxu0 %v7477_v62  ;;  %v7525_v62 = vld [vmem:[%s9674_s1 + $0x308] sm:$0xff]  }
  0x3e   : > { %6772 = vmatpush3.bf16.msra.mxu1 %v7478_v63  ;;  %6751 = vmatprep.subr.bf16.mxu0 %v7479_v0  ;;  %v7526_v63 = vld [vmem:[%s9674_s1 + $0x388] sm:$0xff]   ;;  %v7527_v0 = vld [vmem:[%s9674_s1 + $0x350] sm:$0xff]  }
  0x3f   : > { %6773 = vmatprep.subr.bf16.mxu1 %v7480_v1  ;;  %v7528_v1 = vld [vmem:[%s9674_s1 + $0x3d0] sm:$0xff]  }
  0x41   : > { %6752 = vmatpush3.bf16.msra.mxu0 %v7481_v2  ;;  %v7529_v2 = vld [vmem:[%s9674_s1 + $0x310] sm:$0xff]  }
  0x42   : > { %6774 = vmatpush3.bf16.msra.mxu1 %v7482_v3  ;;  %6753 = vmatprep.subr.bf16.mxu0 %v7483_v4  ;;  %v7530_v3 = vld [vmem:[%s9674_s1 + $0x390] sm:$0xff]   ;;  %v7531_v4 = vld [vmem:[%s9674_s1 + $0x358] sm:$0xff]  }
  0x43   : > { %6775 = vmatprep.subr.bf16.mxu1 %v7484_v5  ;;  %v7532_v5 = vld [vmem:[%s9674_s1 + $0x3d8] sm:$0xff]  }
  0x45   : > { %6754 = vmatpush3.bf16.msra.mxu0 %v7485_v6  ;;  %v7533_v6 = vld [vmem:[%s9674_s1 + $0x318] sm:$0xff]  }
  0x46   : > { %6776 = vmatpush3.bf16.msra.mxu1 %v7486_v7  ;;  %6783 = vmatprep.subr.bf16.mxu0 %v7487_v16  ;;  %v7534_v7 = vld [vmem:[%s9674_s1 + $0x398] sm:$0xff]   ;;  %v7543_v16 = vld [vmem:[%s9674_s1 + $0x370] sm:$0xff]  }
  0x47   : > { %6805 = vmatprep.subr.bf16.mxu1 %v7488_v17  ;;  %v7544_v17 = vld [vmem:[%s9674_s1 + $0x3f0] sm:$0xff]  }
  0x48   : > { %4816 = vmatmul.mubr.bf16.vlgmr.msra.gmra.mrb[4].mxu0 %v6119_v10  ;;  %v7537_v10 = vld [vmem:[%s9674_s1 + $0x320] sm:$0xff]  }
  0x49   : > { %4857 = vmatmul.mubr.bf16.vlgmr.msra.gmra.mrb[4].mxu1 %v6121_v14  ;;  %6784 = vmatpush3.bf16.msra.mxu0 %v7489_v18  ;;  %v7541_v14 = vld [vmem:[%s9674_s1 + $0x328] sm:$0xff]   ;;  %v7545_v18 = vld [vmem:[%s9674_s1 + $0x330] sm:$0xff]  }
  0x4a   : > { %6806 = vmatpush3.bf16.msra.mxu1 %v7490_v19  ;;  %6785 = vmatprep.subr.bf16.mxu0 %v7491_v20  ;;  %v7546_v19 = vld [vmem:[%s9674_s1 + $0x3b0] sm:$0xff]   ;;  %v7547_v20 = vld [vmem:[%s9674_s1 + $0x378] sm:$0xff]  }
  0x4b   : > { %6807 = vmatprep.subr.bf16.mxu1 %v7492_v21  ;;  %4897 = vmatprep.mubr.bf16.mxu0 %v6124_v53  ;;  %v7548_v21 = vld [vmem:[%s9674_s1 + $0x3f8] sm:$0xff]   ;;  %v7572_v53 = vld [vmem:[%s9674_s1 + $0x4e8] sm:$0xff]  }
  0x4c   : > { %4938 = vmatprep.mubr.bf16.mxu1 %v6126_v55  ;;  %v7574_v55 = vld [vmem:[%s9674_s1 + $0x4a8] sm:$0xff]  }
  0x4d   : > { %6786 = vmatpush3.bf16.msra.mxu0 %v7493_v22  ;;  %v7549_v22 = vld [vmem:[%s9674_s1 + $0x338] sm:$0xff]  }
  0x4e   : > { %6808 = vmatpush3.bf16.msra.mxu1 %v7494_v23  ;;  %6787 = vmatprep.subr.bf16.mxu0 %v7495_v24  ;;  %v7550_v23 = vld [vmem:[%s9674_s1 + $0x3b8] sm:$0xff]   ;;  %v220_v24 = vld [vmem:[%s8097_s6 + $0x30] sm:$0xff] }
  0x4f   : > { %6809 = vmatprep.subr.bf16.mxu1 %v7496_v25  ;;  %v252_v25 = vld [vmem:[%s8097_s6 + $0x130] sm:$0xff] }
  0x51   : > { %6788 = vmatpush3.bf16.msra.mxu0 %v7497_v26  ;;  %v221_v26 = vld [vmem:[%s8097_s6 + $0x38] sm:$0xff] }
  0x52   : > { %6810 = vmatpush3.bf16.msra.mxu1 %v7498_v27  ;;  %6789 = vmatprep.subr.bf16.mxu0 %v7499_v28  ;;  %v6127_v27 = vcombine.low %v220_v24, %v252_v25  ;;  %v6128_v28 = vcombine.high %v220_v24, %v252_v25  ;;  %v7599_v24 = vld [vmem:[%s9674_s1 + $0x560] sm:$0xff]  }
  0x53   : > { %6811 = vmatprep.subr.bf16.mxu1 %v7500_v29  ;;  %v253_v29 = vld [vmem:[%s8097_s6 + $0x138] sm:$0xff]  ;;  %v7600_v25 = vld [vmem:[%s9674_s1 + $0x5e0] sm:$0xff]  }
  0x55   : > { %6790 = vmatpush3.bf16.msra.mxu0 %v7501_v30  ;;  %v6129_v30 = vcombine.low %v221_v26, %v253_v29 }
  0x56   : > { %6812 = vmatpush3.bf16.msra.mxu1 %v7502_v31  ;;  %6791 = vmatprep.subr.bf16.mxu0 %v7503_v32  ;;  %v6130_v31 = vcombine.high %v221_v26, %v253_v29  ;;  %v7551_v32 = vld [vmem:[%s9674_s1 + $0x440] sm:$0xff]   ;;  %v7604_v29 = vld [vmem:[%s9674_s1 + $0x5e8] sm:$0xff]  }
  0x57   : > { %6813 = vmatprep.subr.bf16.mxu1 %v7504_v33  ;;  %v7552_v33 = vld [vmem:[%s9674_s1 + $0x4c0] sm:$0xff]  }
  0x58   : > { %v7601_v26 = vld [vmem:[%s9674_s1 + $0x520] sm:$0xff]  }
  0x59   : > { %6792 = vmatpush3.bf16.msra.mxu0 %v7505_v34  ;;  %v7553_v34 = vld [vmem:[%s9674_s1 + $0x400] sm:$0xff]  }
  0x5a   : > { %6814 = vmatpush3.bf16.msra.mxu1 %v7506_v35  ;;  %6793 = vmatprep.subr.bf16.mxu0 %v7507_v36  ;;  %v7554_v35 = vld [vmem:[%s9674_s1 + $0x480] sm:$0xff]   ;;  %v7555_v36 = vld [vmem:[%s9674_s1 + $0x448] sm:$0xff]  }
  0x5b   : > { %6815 = vmatprep.subr.bf16.mxu1 %v7508_v37  ;;  %v7556_v37 = vld [vmem:[%s9674_s1 + $0x4c8] sm:$0xff]  }
  0x5d   : > { %6794 = vmatpush3.bf16.msra.mxu0 %v7509_v38  ;;  %v7557_v38 = vld [vmem:[%s9674_s1 + $0x408] sm:$0xff]  }
  0x5e   : > { %6816 = vmatpush3.bf16.msra.mxu1 %v7510_v39  ;;  %6795 = vmatprep.subr.bf16.mxu0 %v7511_v40  ;;  %v7558_v39 = vld [vmem:[%s9674_s1 + $0x488] sm:$0xff]   ;;  %v7559_v40 = vld [vmem:[%s9674_s1 + $0x450] sm:$0xff]  }
  0x5f   : > { %6817 = vmatprep.subr.bf16.mxu1 %v7512_v41  ;;  %v7560_v41 = vld [vmem:[%s9674_s1 + $0x4d0] sm:$0xff]  }
  0x61   : > { %6796 = vmatpush3.bf16.msra.mxu0 %v7513_v42  ;;  %v7561_v42 = vld [vmem:[%s9674_s1 + $0x410] sm:$0xff]  }
  0x62   : > { %6818 = vmatpush3.bf16.msra.mxu1 %v7514_v43  ;;  %6797 = vmatprep.subr.bf16.mxu0 %v7515_v44  ;;  %v7562_v43 = vld [vmem:[%s9674_s1 + $0x490] sm:$0xff]   ;;  %v7563_v44 = vld [vmem:[%s9674_s1 + $0x458] sm:$0xff]  }
  0x63   : > { %6819 = vmatprep.subr.bf16.mxu1 %v7516_v45  ;;  %v7564_v45 = vld [vmem:[%s9674_s1 + $0x4d8] sm:$0xff]  }
  0x65   : > { %6798 = vmatpush3.bf16.msra.mxu0 %v7517_v46  ;;  %v7565_v46 = vld [vmem:[%s9674_s1 + $0x418] sm:$0xff]  }
  0x66   : > { %6820 = vmatpush3.bf16.msra.mxu1 %v7518_v47  ;;  %6827 = vmatprep.subr.bf16.mxu0 %v7519_v56  ;;  %v7566_v47 = vld [vmem:[%s9674_s1 + $0x498] sm:$0xff]   ;;  %v7575_v56 = vld [vmem:[%s9674_s1 + $0x470] sm:$0xff]  }
  0x67   : > { %6849 = vmatprep.subr.bf16.mxu1 %v7520_v57  ;;  %v7576_v57 = vld [vmem:[%s9674_s1 + $0x4f0] sm:$0xff]  }
  0x68   : > { %4898 = vmatmul.mubr.bf16.vlgmr.msra.gmra.mrb[8].mxu0 %v6123_v52  ;;  %v7571_v52 = vld [vmem:[%s9674_s1 + $0x468] sm:$0xff]  }
  0x69   : > { %4939 = vmatmul.mubr.bf16.vlgmr.msra.gmra.mrb[8].mxu1 %v6125_v54  ;;  %6828 = vmatpush3.bf16.msra.mxu0 %v7521_v58  ;;  %v7573_v54 = vld [vmem:[%s9674_s1 + $0x428] sm:$0xff]   ;;  %v7577_v58 = vld [vmem:[%s9674_s1 + $0x430] sm:$0xff]  }
  0x6a   : > { %6850 = vmatpush3.bf16.msra.mxu1 %v7522_v59  ;;  %6829 = vmatprep.subr.bf16.mxu0 %v7523_v60  ;;  %v7578_v59 = vld [vmem:[%s9674_s1 + $0x4b0] sm:$0xff]   ;;  %v7579_v60 = vld [vmem:[%s9674_s1 + $0x478] sm:$0xff]  }
  0x6b   : > { %6851 = vmatprep.subr.bf16.mxu1 %v7524_v61  ;;  %4979 = vmatprep.mubr.bf16.mxu0 %v6128_v28  ;;  %v7580_v61 = vld [vmem:[%s9674_s1 + $0x4f8] sm:$0xff]   ;;  %v7603_v28 = vld [vmem:[%s9674_s1 + $0x568] sm:$0xff]  }
  0x6c   : > { %5020 = vmatprep.mubr.bf16.mxu1 %v6130_v31  ;;  %v7606_v31 = vld [vmem:[%s9674_s1 + $0x5a8] sm:$0xff]  }
  0x6d   : > { %6830 = vmatpush3.bf16.msra.mxu0 %v7525_v62  ;;  %v7581_v62 = vld [vmem:[%s9674_s1 + $0x438] sm:$0xff]  }
  0x6e   : > { %6852 = vmatpush3.bf16.msra.mxu1 %v7526_v63  ;;  %6831 = vmatprep.subr.bf16.mxu0 %v7527_v0  ;;  %v7582_v63 = vld [vmem:[%s9674_s1 + $0x4b8] sm:$0xff]   ;;  %v222_v0 = vld [vmem:[%s8097_s6 + $0x40] sm:$0xff] }
  0x6f   : > { %6853 = vmatprep.subr.bf16.mxu1 %v7528_v1  ;;  %v254_v1 = vld [vmem:[%s8097_s6 + $0x140] sm:$0xff] }
  0x71   : > { %6832 = vmatpush3.bf16.msra.mxu0 %v7529_v2  ;;  %v6131_v2 = vcombine.low %v222_v0, %v254_v1 }
  0x72   : > { %6854 = vmatpush3.bf16.msra.mxu1 %v7530_v3  ;;  %6833 = vmatprep.subr.bf16.mxu0 %v7531_v4  ;;  %v6132_v3 = vcombine.high %v222_v0, %v254_v1  ;;  %v223_v4 = vld [vmem:[%s8097_s6 + $0x48] sm:$0xff]  ;;  %v7631_v0 = vld [vmem:[%s9674_s1 + $0x660] sm:$0xff]  }
  0x73   : > { %6855 = vmatprep.subr.bf16.mxu1 %v7532_v5  ;;  %v255_v5 = vld [vmem:[%s8097_s6 + $0x148] sm:$0xff]  ;;  %v7632_v1 = vld [vmem:[%s9674_s1 + $0x6e0] sm:$0xff]  }
  0x75   : > { %6834 = vmatpush3.bf16.msra.mxu0 %v7533_v6  ;;  %v6133_v6 = vcombine.low %v223_v4, %v255_v5 }
  0x76   : > { %6856 = vmatpush3.bf16.msra.mxu1 %v7534_v7  ;;  %6835 = vmatprep.subr.bf16.mxu0 %v7535_v8  ;;  %v6134_v7 = vcombine.high %v223_v4, %v255_v5  ;;  %v7583_v8 = vld [vmem:[%s9674_s1 + $0x540] sm:$0xff]   ;;  %v7635_v4 = vld [vmem:[%s9674_s1 + $0x668] sm:$0xff]  }
  0x77   : > { %6857 = vmatprep.subr.bf16.mxu1 %v7536_v9  ;;  %v7584_v9 = vld [vmem:[%s9674_s1 + $0x5c0] sm:$0xff]   ;;  %v7636_v5 = vld [vmem:[%s9674_s1 + $0x6e8] sm:$0xff]  }
  0x79   : > { %6836 = vmatpush3.bf16.msra.mxu0 %v7537_v10  ;;  %v7585_v10 = vld [vmem:[%s9674_s1 + $0x500] sm:$0xff]  }
  0x7a   : > { %6858 = vmatpush3.bf16.msra.mxu1 %v7538_v11  ;;  %6837 = vmatprep.subr.bf16.mxu0 %v7539_v12  ;;  %v7586_v11 = vld [vmem:[%s9674_s1 + $0x580] sm:$0xff]   ;;  %v7587_v12 = vld [vmem:[%s9674_s1 + $0x548] sm:$0xff]  }
  0x7b   : > { %6859 = vmatprep.subr.bf16.mxu1 %v7540_v13  ;;  %v7588_v13 = vld [vmem:[%s9674_s1 + $0x5c8] sm:$0xff]  }
  0x7d   : > { %6838 = vmatpush3.bf16.msra.mxu0 %v7541_v14  ;;  %v7589_v14 = vld [vmem:[%s9674_s1 + $0x508] sm:$0xff]  }
  0x7e   : > { %6860 = vmatpush3.bf16.msra.mxu1 %v7542_v15  ;;  %6839 = vmatprep.subr.bf16.mxu0 %v7543_v16  ;;  %v7590_v15 = vld [vmem:[%s9674_s1 + $0x588] sm:$0xff]   ;;  %v7591_v16 = vld [vmem:[%s9674_s1 + $0x550] sm:$0xff]  }
  0x7f   : > { %6861 = vmatprep.subr.bf16.mxu1 %v7544_v17  ;;  %v7592_v17 = vld [vmem:[%s9674_s1 + $0x5d0] sm:$0xff]  }
  0x81   : > { %6840 = vmatpush3.bf16.msra.mxu0 %v7545_v18  ;;  %v7593_v18 = vld [vmem:[%s9674_s1 + $0x510] sm:$0xff]  }
  0x82   : > { %6862 = vmatpush3.bf16.msra.mxu1 %v7546_v19  ;;  %6841 = vmatprep.subr.bf16.mxu0 %v7547_v20  ;;  %v7594_v19 = vld [vmem:[%s9674_s1 + $0x590] sm:$0xff]   ;;  %v7595_v20 = vld [vmem:[%s9674_s1 + $0x558] sm:$0xff]  }
  0x83   : > { %6863 = vmatprep.subr.bf16.mxu1 %v7548_v21  ;;  %v7596_v21 = vld [vmem:[%s9674_s1 + $0x5d8] sm:$0xff]  }
  0x85   : > { %6842 = vmatpush3.bf16.msra.mxu0 %v7549_v22  ;;  %v7597_v22 = vld [vmem:[%s9674_s1 + $0x518] sm:$0xff]  }
  0x86   : > { %6864 = vmatpush3.bf16.msra.mxu1 %v7550_v23  ;;  %6871 = vmatprep.subr.bf16.mxu0 %v7551_v32  ;;  %v7598_v23 = vld [vmem:[%s9674_s1 + $0x598] sm:$0xff]   ;;  %v7607_v32 = vld [vmem:[%s9674_s1 + $0x570] sm:$0xff]  }
  0x87   : > { %6893 = vmatprep.subr.bf16.mxu1 %v7552_v33  ;;  %v7608_v33 = vld [vmem:[%s9674_s1 + $0x5f0] sm:$0xff]  }
  0x88   : > { %4980 = vmatmul.mubr.bf16.vlgmr.msra.gmra.mrb[12].mxu0 %v6127_v27  ;;  %v7602_v27 = vld [vmem:[%s9674_s1 + $0x5a0] sm:$0xff]  }
  0x89   : > { %5021 = vmatmul.mubr.bf16.vlgmr.msra.gmra.mrb[12].mxu1 %v6129_v30  ;;  %6872 = vmatpush3.bf16.msra.mxu0 %v7553_v34  ;;  %v7605_v30 = vld [vmem:[%s9674_s1 + $0x528] sm:$0xff]   ;;  %v7609_v34 = vld [vmem:[%s9674_s1 + $0x530] sm:$0xff]  }
  0x8a   : > { %6894 = vmatpush3.bf16.msra.mxu1 %v7554_v35  ;;  %6873 = vmatprep.subr.bf16.mxu0 %v7555_v36  ;;  %v7610_v35 = vld [vmem:[%s9674_s1 + $0x5b0] sm:$0xff]   ;;  %v7611_v36 = vld [vmem:[%s9674_s1 + $0x578] sm:$0xff]  }
  0x8b   : > { %6895 = vmatprep.subr.bf16.mxu1 %v7556_v37  ;;  %5061 = vmatprep.mubr.bf16.mxu0 %v6132_v3  ;;  %v7612_v37 = vld [vmem:[%s9674_s1 + $0x5f8] sm:$0xff]   ;;  %v7634_v3 = vld [vmem:[%s9674_s1 + $0x6a0] sm:$0xff]  }
  0x8c   : > { %5102 = vmatprep.mubr.bf16.mxu1 %v6134_v7  ;;  %v7638_v7 = vld [vmem:[%s9674_s1 + $0x6a8] sm:$0xff]  }
  0x8d   : > { %6874 = vmatpush3.bf16.msra.mxu0 %v7557_v38  ;;  %v7613_v38 = vld [vmem:[%s9674_s1 + $0x538] sm:$0xff]  }
  0x8e   : > { %6896 = vmatpush3.bf16.msra.mxu1 %v7558_v39  ;;  %6875 = vmatprep.subr.bf16.mxu0 %v7559_v40  ;;  %v7614_v39 = vld [vmem:[%s9674_s1 + $0x5b8] sm:$0xff]   ;;  %v224_v40 = vld [vmem:[%s8097_s6 + $0x50] sm:$0xff] }
  0x8f   : > { %6897 = vmatprep.subr.bf16.mxu1 %v7560_v41  ;;  %v256_v41 = vld [vmem:[%s8097_s6 + $0x150] sm:$0xff] }
  0x91   : > { %6876 = vmatpush3.bf16.msra.mxu0 %v7561_v42  ;;  %v225_v42 = vld [vmem:[%s8097_s6 + $0x58] sm:$0xff] }
  0x92   : > { %6898 = vmatpush3.bf16.msra.mxu1 %v7562_v43  ;;  %6877 = vmatprep.subr.bf16.mxu0 %v7563_v44  ;;  %v257_v43 = vld [vmem:[%s8097_s6 + $0x158] sm:$0xff]  ;;  %v6135_v44 = vcombine.low %v224_v40, %v256_v41 }
  0x93   : > { %6899 = vmatprep.subr.bf16.mxu1 %v7564_v45  ;;  %v6136_v45 = vcombine.high %v224_v40, %v256_v41  ;;  %v7662_v41 = vld [vmem:[%s9674_s1 + $0x798] sm:$0xff]  }
  0x95   : > { %6878 = vmatpush3.bf16.msra.mxu0 %v7565_v46  ;;  %v6137_v46 = vcombine.low %v225_v42, %v257_v43 }
  0x96   : > { %6900 = vmatpush3.bf16.msra.mxu1 %v7566_v47  ;;  %6879 = vmatprep.subr.bf16.mxu0 %v7567_v48  ;;  %v6138_v47 = vcombine.high %v225_v42, %v257_v43  ;;  %v7615_v48 = vld [vmem:[%s9674_s1 + $0x640] sm:$0xff]  }
  0x97   : > { %6901 = vmatprep.subr.bf16.mxu1 %v7568_v49  ;;  %v7616_v49 = vld [vmem:[%s9674_s1 + $0x6c0] sm:$0xff]  }
  0x98   : > { %v7663_v43 = vld [vmem:[%s9674_s1 + $0x760] sm:$0xff]  }
  0x99   : > { %6880 = vmatpush3.bf16.msra.mxu0 %v7569_v50  ;;  %v7617_v50 = vld [vmem:[%s9674_s1 + $0x600] sm:$0xff]  }
  0x9a   : > { %6902 = vmatpush3.bf16.msra.mxu1 %v7570_v51  ;;  %6881 = vmatprep.subr.bf16.mxu0 %v7571_v52  ;;  %v7618_v51 = vld [vmem:[%s9674_s1 + $0x680] sm:$0xff]   ;;  %v7619_v52 = vld [vmem:[%s9674_s1 + $0x648] sm:$0xff]  }
  0x9b   : > { %6903 = vmatprep.subr.bf16.mxu1 %v7572_v53  ;;  %v7620_v53 = vld [vmem:[%s9674_s1 + $0x6c8] sm:$0xff]  }
  0x9d   : > { %6882 = vmatpush3.bf16.msra.mxu0 %v7573_v54  ;;  %v7621_v54 = vld [vmem:[%s9674_s1 + $0x608] sm:$0xff]  }
  0x9e   : > { %6904 = vmatpush3.bf16.msra.mxu1 %v7574_v55  ;;  %6883 = vmatprep.subr.bf16.mxu0 %v7575_v56  ;;  %v7622_v55 = vld [vmem:[%s9674_s1 + $0x688] sm:$0xff]   ;;  %v7623_v56 = vld [vmem:[%s9674_s1 + $0x650] sm:$0xff]  }
  0x9f   : > { %6905 = vmatprep.subr.bf16.mxu1 %v7576_v57  ;;  %v7624_v57 = vld [vmem:[%s9674_s1 + $0x6d0] sm:$0xff]  }
  0xa1   : > { %6884 = vmatpush3.bf16.msra.mxu0 %v7577_v58  ;;  %v7625_v58 = vld [vmem:[%s9674_s1 + $0x610] sm:$0xff]  }
  0xa2   : > { %6906 = vmatpush3.bf16.msra.mxu1 %v7578_v59  ;;  %6885 = vmatprep.subr.bf16.mxu0 %v7579_v60  ;;  %v7626_v59 = vld [vmem:[%s9674_s1 + $0x690] sm:$0xff]   ;;  %v7627_v60 = vld [vmem:[%s9674_s1 + $0x658] sm:$0xff]  }
  0xa3   : > { %6907 = vmatprep.subr.bf16.mxu1 %v7580_v61  ;;  %v7628_v61 = vld [vmem:[%s9674_s1 + $0x6d8] sm:$0xff]  }
  0xa5   : > { %6886 = vmatpush3.bf16.msra.mxu0 %v7581_v62  ;;  %v7629_v62 = vld [vmem:[%s9674_s1 + $0x618] sm:$0xff]  }
  0xa6   : > { %6908 = vmatpush3.bf16.msra.mxu1 %v7582_v63  ;;  %6915 = vmatprep.subr.bf16.mxu0 %v7583_v8  ;;  %v7630_v63 = vld [vmem:[%s9674_s1 + $0x698] sm:$0xff]   ;;  %v7639_v8 = vld [vmem:[%s9674_s1 + $0x670] sm:$0xff]  }
  0xa7   : > { %6937 = vmatprep.subr.bf16.mxu1 %v7584_v9  ;;  %v7640_v9 = vld [vmem:[%s9674_s1 + $0x6f0] sm:$0xff]  }
  0xa8   : > { %5062 = vmatmul.mubr.bf16.vlgmr.msra.gmra.mrb[16].mxu0 %v6131_v2  ;;  %v7633_v2 = vld [vmem:[%s9674_s1 + $0x620] sm:$0xff]  }
  0xa9   : > { %5103 = vmatmul.mubr.bf16.vlgmr.msra.gmra.mrb[16].mxu1 %v6133_v6  ;;  %6916 = vmatpush3.bf16.msra.mxu0 %v7585_v10  ;;  %v7637_v6 = vld [vmem:[%s9674_s1 + $0x628] sm:$0xff]   ;;  %v7641_v10 = vld [vmem:[%s9674_s1 + $0x630] sm:$0xff]  }
  0xaa   : > { %6938 = vmatpush3.bf16.msra.mxu1 %v7586_v11  ;;  %6917 = vmatprep.subr.bf16.mxu0 %v7587_v12  ;;  %v7642_v11 = vld [vmem:[%s9674_s1 + $0x6b0] sm:$0xff]   ;;  %v7643_v12 = vld [vmem:[%s9674_s1 + $0x678] sm:$0xff]  }
  0xab   : > { %6939 = vmatprep.subr.bf16.mxu1 %v7588_v13  ;;  %5143 = vmatprep.mubr.bf16.mxu0 %v6136_v45  ;;  %v7644_v13 = vld [vmem:[%s9674_s1 + $0x6f8] sm:$0xff]  }
  0xac   : > { %5184 = vmatprep.mubr.bf16.mxu1 %v6138_v47 }
  0xad   : > { %6918 = vmatpush3.bf16.msra.mxu0 %v7589_v14  ;;  %v7645_v14 = vld [vmem:[%s9674_s1 + $0x638] sm:$0xff]  }
  0xae   : > { %6940 = vmatpush3.bf16.msra.mxu1 %v7590_v15  ;;  %6919 = vmatprep.subr.bf16.mxu0 %v7591_v16  ;;  %v7646_v15 = vld [vmem:[%s9674_s1 + $0x6b8] sm:$0xff]   ;;  %v226_v16 = vld [vmem:[%s8097_s6 + $0x60] sm:$0xff] }
  0xaf   : > { %6941 = vmatprep.subr.bf16.mxu1 %v7592_v17  ;;  %v258_v17 = vld [vmem:[%s8097_s6 + $0x160] sm:$0xff] }
  0xb1   : > { %6920 = vmatpush3.bf16.msra.mxu0 %v7593_v18  ;;  %v227_v18 = vld [vmem:[%s8097_s6 + $0x68] sm:$0xff] }
  0xb2   : > { %6942 = vmatpush3.bf16.msra.mxu1 %v7594_v19  ;;  %6921 = vmatprep.subr.bf16.mxu0 %v7595_v20  ;;  %v6139_v19 = vcombine.low %v226_v16, %v258_v17  ;;  %v6140_v20 = vcombine.high %v226_v16, %v258_v17  ;;  %v7679_v17 = vld [vmem:[%s9674_s1 + $0x840] sm:$0xff]  }
  0xb3   : > { %6943 = vmatprep.subr.bf16.mxu1 %v7596_v21  ;;  %v259_v21 = vld [vmem:[%s8097_s6 + $0x168] sm:$0xff] }
  0xb5   : > { %6922 = vmatpush3.bf16.msra.mxu0 %v7597_v22  ;;  %v6141_v22 = vcombine.low %v227_v18, %v259_v21 }
  0xb6   : > { %6944 = vmatpush3.bf16.msra.mxu1 %v7598_v23  ;;  %6923 = vmatprep.subr.bf16.mxu0 %v7599_v24  ;;  %v6142_v23 = vcombine.high %v227_v18, %v259_v21  ;;  %v7647_v24 = vld [vmem:[%s9674_s1 + $0x740] sm:$0xff]   ;;  %v7683_v21 = vld [vmem:[%s9674_s1 + $0x848] sm:$0xff]  }
  0xb7   : > { %6945 = vmatprep.subr.bf16.mxu1 %v7600_v25  ;;  %v7648_v25 = vld [vmem:[%s9674_s1 + $0x7c0] sm:$0xff]  }
  0xb8   : > { %v7680_v18 = vld [vmem:[%s9674_s1 + $0x8c0] sm:$0xff]  }
  0xb9   : > { %6924 = vmatpush3.bf16.msra.mxu0 %v7601_v26  ;;  %v7649_v26 = vld [vmem:[%s9674_s1 + $0x700] sm:$0xff]  }
  0xba   : > { %6946 = vmatpush3.bf16.msra.mxu1 %v7602_v27  ;;  %6925 = vmatprep.subr.bf16.mxu0 %v7603_v28  ;;  %v7650_v27 = vld [vmem:[%s9674_s1 + $0x780] sm:$0xff]   ;;  %v7651_v28 = vld [vmem:[%s9674_s1 + $0x748] sm:$0xff]  }
  0xbb   : > { %6947 = vmatprep.subr.bf16.mxu1 %v7604_v29  ;;  %v7652_v29 = vld [vmem:[%s9674_s1 + $0x7c8] sm:$0xff]  }
  0xbd   : > { %6926 = vmatpush3.bf16.msra.mxu0 %v7605_v30  ;;  %v7653_v30 = vld [vmem:[%s9674_s1 + $0x708] sm:$0xff]  }
  0xbe   : > { %6948 = vmatpush3.bf16.msra.mxu1 %v7606_v31  ;;  %6927 = vmatprep.subr.bf16.mxu0 %v7607_v32  ;;  %v7654_v31 = vld [vmem:[%s9674_s1 + $0x788] sm:$0xff]   ;;  %v7655_v32 = vld [vmem:[%s9674_s1 + $0x750] sm:$0xff]  }
  0xbf   : > { %6949 = vmatprep.subr.bf16.mxu1 %v7608_v33  ;;  %v7656_v33 = vld [vmem:[%s9674_s1 + $0x7d0] sm:$0xff]  }
  0xc1   : > { %6928 = vmatpush3.bf16.msra.mxu0 %v7609_v34  ;;  %v7657_v34 = vld [vmem:[%s9674_s1 + $0x710] sm:$0xff]  }
  0xc2   : > { %6950 = vmatpush3.bf16.msra.mxu1 %v7610_v35  ;;  %6929 = vmatprep.subr.bf16.mxu0 %v7611_v36  ;;  %v7658_v35 = vld [vmem:[%s9674_s1 + $0x790] sm:$0xff]   ;;  %v7659_v36 = vld [vmem:[%s9674_s1 + $0x758] sm:$0xff]  }
  0xc3   : > { %6951 = vmatprep.subr.bf16.mxu1 %v7612_v37  ;;  %v7660_v37 = vld [vmem:[%s9674_s1 + $0x7d8] sm:$0xff]  }
  0xc5   : > { %6930 = vmatpush3.bf16.msra.mxu0 %v7613_v38 }
  0xc6   : > { %6952 = vmatpush3.bf16.msra.mxu1 %v7614_v39  ;;  %6959 = vmatprep.subr.bf16.mxu0 %v7615_v48  ;;  %v7661_v39 = vld [vmem:[%s9674_s1 + $0x718] sm:$0xff]  }
  0xc7   : > { %6981 = vmatprep.subr.bf16.mxu1 %v7616_v49  ;;  %v7665_v49 = vld [vmem:[%s9674_s1 + $0x720] sm:$0xff]  }
  0xc8   : > { %5144 = vmatmul.mubr.bf16.vlgmr.msra.gmra.mrb[20].mxu0 %v6135_v44 }
  0xc9   : > { %5185 = vmatmul.mubr.bf16.vlgmr.msra.gmra.mrb[20].mxu1 %v6137_v46  ;;  %6960 = vmatpush3.bf16.msra.mxu0 %v7617_v50  ;;  %v7664_v46 = vld [vmem:[%s9674_s1 + $0x7e0] sm:$0xff]  }
  0xca   : > { %6982 = vmatpush3.bf16.msra.mxu1 %v7618_v51  ;;  %6961 = vmatprep.subr.bf16.mxu0 %v7619_v52  ;;  %v7666_v51 = vld [vmem:[%s9674_s1 + $0x7a0] sm:$0xff]  }
  0xcb   : > { %6983 = vmatprep.subr.bf16.mxu1 %v7620_v53  ;;  %5225 = vmatprep.mubr.bf16.mxu0 %v6140_v20  ;;  %v6114_v52 = vld [vmem:[%s9675_s2] ss:$0 sm:$0xff] }
  0xcc   : > { %5266 = vmatprep.mubr.bf16.mxu1 %v6142_v23  ;;  %v7682_v20 = vld [vmem:[%s9674_s1 + $0x880] sm:$0xff]   ;;  %v7685_v23 = vld [vmem:[%s9674_s1 + $0x808] sm:$0xff]  }
  0xcd   : > { %6962 = vmatpush3.bf16.msra.mxu0 %v7621_v54 }
  0xce   : > { %6984 = vmatpush3.bf16.msra.mxu1 %v7622_v55  ;;  %6963 = vmatprep.subr.bf16.mxu0 %v7623_v56  ;;  %v7667_v55 = vld [vmem:[%s9674_s1 + $0x768] sm:$0xff]  }
  0xcf   : > { %6985 = vmatprep.subr.bf16.mxu1 %v7624_v57 }
  0xd1   : > { %6964 = vmatpush3.bf16.msra.mxu0 %v7625_v58  ;;  %v7668_v58 = vld [vmem:[%s9674_s1 + $0x7e8] sm:$0xff]  }
  0xd2   : > { %6986 = vmatpush3.bf16.msra.mxu1 %v7626_v59  ;;  %6965 = vmatprep.subr.bf16.mxu0 %v7627_v60 }
  0xd3   : > { %6987 = vmatprep.subr.bf16.mxu1 %v7628_v61  ;;  %v7669_v61 = vld [vmem:[%s9674_s1 + $0x728] sm:$0xff]  }
  0xd5   : > { %6966 = vmatpush3.bf16.msra.mxu0 %v7629_v62 }
  0xd6   : > { %6988 = vmatpush3.bf16.msra.mxu1 %v7630_v63  ;;  %6967 = vmatprep.subr.bf16.mxu0 %v7631_v0  ;;  %v7670_v63 = vld [vmem:[%s9674_s1 + $0x7a8] sm:$0xff]  }
  0xd7   : > { %6989 = vmatprep.subr.bf16.mxu1 %v7632_v1  ;;  %v7671_v1 = vld [vmem:[%s9674_s1 + $0x770] sm:$0xff]  }
  0xd9   : > { %6968 = vmatpush3.bf16.msra.mxu0 %v7633_v2  ;;  %v7672_v2 = vld [vmem:[%s9674_s1 + $0x7f0] sm:$0xff]  }
  0xda   : > { %6990 = vmatpush3.bf16.msra.mxu1 %v7634_v3  ;;  %6969 = vmatprep.subr.bf16.mxu0 %v7635_v4  ;;  %v7673_v3 = vld [vmem:[%s9674_s1 + $0x730] sm:$0xff]  }
  0xdb   : > { %6991 = vmatprep.subr.bf16.mxu1 %v7636_v5  ;;  %v7674_v4 = vld [vmem:[%s9674_s1 + $0x7b0] sm:$0xff]   ;;  %v7675_v5 = vld [vmem:[%s9674_s1 + $0x778] sm:$0xff]  }
  0xdd   : > { %6970 = vmatpush3.bf16.msra.mxu0 %v7637_v6  ;;  %v7676_v6 = vld [vmem:[%s9674_s1 + $0x7f8] sm:$0xff]  }
  0xde   : > { %6992 = vmatpush3.bf16.msra.mxu1 %v7638_v7  ;;  %6971 = vmatprep.subr.bf16.mxu0 %v7639_v8  ;;  %v7677_v7 = vld [vmem:[%s9674_s1 + $0x738] sm:$0xff]  }
  0xdf   : > { %6993 = vmatprep.subr.bf16.mxu1 %v7640_v9  ;;  %v7678_v8 = vld [vmem:[%s9674_s1 + $0x7b8] sm:$0xff]   ;;  %v228_v9 = vld [vmem:[%s8097_s6 + $0x70] sm:$0xff] }
  0xe1   : > { %6972 = vmatpush3.bf16.msra.mxu0 %v7641_v10  ;;  %v260_v10 = vld [vmem:[%s8097_s6 + $0x170] sm:$0xff] }
  0xe2   : > { %6994 = vmatpush3.bf16.msra.mxu1 %v7642_v11  ;;  %6973 = vmatprep.subr.bf16.mxu0 %v7643_v12  ;;  %v229_v11 = vld [vmem:[%s8097_s6 + $0x78] sm:$0xff] }
  0xe3   : > { %6995 = vmatprep.subr.bf16.mxu1 %v7644_v13  ;;  %v261_v12 = vld [vmem:[%s8097_s6 + $0x178] sm:$0xff]  ;;  %v6143_v13 = vcombine.low %v228_v9, %v260_v10 }
  0xe4   : > { %v6146_v16 = vcombine.high %v229_v11, %v261_v12 }
  0xe5   : > { %6974 = vmatpush3.bf16.msra.mxu0 %v7645_v14  ;;  %v6144_v14 = vcombine.high %v228_v9, %v260_v10  ;;  %v7711_v9 = vld [vmem:[%s9674_s1 + $0x940] sm:$0xff]  }
  0xe6   : > { %6996 = vmatpush3.bf16.msra.mxu1 %v7646_v15  ;;  %7003 = vmatprep.subr.bf16.mxu0 %v7647_v24  ;;  %v6145_v15 = vcombine.low %v229_v11, %v261_v12  ;;  %v7686_v24 = vld [vmem:[%s9674_s1 + $0x888] sm:$0xff]   ;;  %v7712_v10 = vld [vmem:[%s9674_s1 + $0x9c0] sm:$0xff]  }
  0xe7   : > { %7025 = vmatprep.subr.bf16.mxu1 %v7648_v25  ;;  %v7687_v25 = vld [vmem:[%s9674_s1 + $0x850] sm:$0xff]   ;;  %v7713_v11 = vld [vmem:[%s9674_s1 + $0x900] sm:$0xff]  }
  0xe8   : > { %5226 = vmatmul.mubr.bf16.vlgmr.msra.gmra.mrb[24].mxu0 %v6139_v19  ;;  %v7681_v19 = vld [vmem:[%s9674_s1 + $0x800] sm:$0xff]  }
  0xe9   : > { %5267 = vmatmul.mubr.bf16.vlgmr.msra.gmra.mrb[24].mxu1 %v6141_v22  ;;  %7004 = vmatpush3.bf16.msra.mxu0 %v7649_v26  ;;  %v7684_v22 = vld [vmem:[%s9674_s1 + $0x8c8] sm:$0xff]   ;;  %v7688_v26 = vld [vmem:[%s9674_s1 + $0x8d0] sm:$0xff]   ;;  %v7714_v12 = vld [vmem:[%s9674_s1 + $0x980] sm:$0xff]  }
  0xea   : > { %7026 = vmatpush3.bf16.msra.mxu1 %v7650_v27  ;;  %7005 = vmatprep.subr.bf16.mxu0 %v7651_v28  ;;  %v7689_v27 = vld [vmem:[%s9674_s1 + $0x810] sm:$0xff]  }
  0xeb   : > { %7027 = vmatprep.subr.bf16.mxu1 %v7652_v29  ;;  %5307 = vmatprep.mubr.bf16.mxu0 %v6144_v14  ;;  %v7690_v28 = vld [vmem:[%s9674_s1 + $0x890] sm:$0xff]   ;;  %v7691_v29 = vld [vmem:[%s9674_s1 + $0x858] sm:$0xff]   ;;  %v7716_v14 = vld [vmem:[%s9674_s1 + $0x9c8] sm:$0xff]  }
  0xec   : > { %5348 = vmatprep.mubr.bf16.mxu1 %v6146_v16  ;;  %v7718_v16 = vld [vmem:[%s9674_s1 + $0x988] sm:$0xff]  }
  0xed   : > { %7006 = vmatpush3.bf16.msra.mxu0 %v7653_v30  ;;  %v7692_v30 = vld [vmem:[%s9674_s1 + $0x8d8] sm:$0xff]  }
  0xee   : > { %7028 = vmatpush3.bf16.msra.mxu1 %v7654_v31  ;;  %7007 = vmatprep.subr.bf16.mxu0 %v7655_v32  ;;  %v7693_v32 = vld [vmem:[%s9674_s1 + $0x818] sm:$0xff]  }
  0xef   : > { %7029 = vmatprep.subr.bf16.mxu1 %v7656_v33 }
  0xf1   : > { %7008 = vmatpush3.bf16.msra.mxu0 %v7657_v34  ;;  %v7694_v34 = vld [vmem:[%s9674_s1 + $0x898] sm:$0xff]  }
  0xf2   : > { %7030 = vmatpush3.bf16.msra.mxu1 %v7658_v35  ;;  %7009 = vmatprep.subr.bf16.mxu0 %v7659_v36  ;;  %v7695_v36 = vld [vmem:[%s9674_s1 + $0x860] sm:$0xff]  }
  0xf3   : > { %7031 = vmatprep.subr.bf16.mxu1 %v7660_v37 }
  0xf5   : > { %7010 = vmatpush3.bf16.msra.mxu0 %v7661_v39  ;;  %v7696_v39 = vld [vmem:[%s9674_s1 + $0x8e0] sm:$0xff]  }
  0xf6   : > { %7032 = vmatpush3.bf16.msra.mxu1 %v7662_v41  ;;  %7011 = vmatprep.subr.bf16.mxu0 %v7663_v43 }
  0xf7   : > { %7033 = vmatprep.subr.bf16.mxu1 %v7664_v46 }
  0xf9   : > { %7012 = vmatpush3.bf16.msra.mxu0 %v7665_v49 }
  0xfa   : > { %7034 = vmatpush3.bf16.msra.mxu1 %v7666_v51  ;;  %7013 = vmatprep.subr.bf16.mxu0 %v7667_v55  ;;  %v7700_v51 = vld [vmem:[%s9674_s1 + $0x8e8] sm:$0xff]  }
  0xfb   : > { %v6711_v38 = vpop.f32.mrb[0].mxu0  ;;  %7035 = vmatprep.subr.bf16.mxu1 %v7668_v58  ;;  %v7702_v55 = vld [vmem:[%s9674_s1 + $0x8a8] sm:$0xff]   ;;  %v7704_v58 = vld [vmem:[%s9674_s1 + $0x8f0] sm:$0xff]  }
  0xfc   : > { %v6733_v40 = vpop.f32.mrb[0].mxu1  ;;  %v6712_v42 = vpop.f32.mrb[1].mxu0 }
  0xfd   : > { %v6713_v44 = vadd.f32 %v6712_v42, %v6711_v38  ;;  %v6734_v45 = vpop.f32.mrb[1].mxu1  ;;  %v6714_v48 = vpop.f32.mrb[2].mxu0  ;;  %7014 = vmatpush3.bf16.msra.mxu0 %v7669_v61  ;;  %v7697_v42 = vld [vmem:[%s9674_s1 + $0x820] sm:$0xff]   ;;  %v7707_v61 = vld [vmem:[%s9674_s1 + $0x878] sm:$0xff]  }
  0xfe   : > { %v6735_v47 = vadd.f32 %v6734_v45, %v6733_v40  ;;  %v6736_v50 = vpop.f32.mrb[2].mxu1  ;;  %v6715_v53 = vpop.f32.mrb[3].mxu0  ;;  %7036 = vmatpush3.bf16.msra.mxu1 %v7670_v63  ;;  %7015 = vmatprep.subr.bf16.mxu0 %v7671_v1  ;;  %v7698_v45 = vld [vmem:[%s9674_s1 + $0x8a0] sm:$0xff]   ;;  %v7709_v63 = vld [vmem:[%s9674_s1 + $0x838] sm:$0xff]  }
  0xff   : > { %v4736_v54 = vadd.f32 %v6713_v44, %v6114_v52  ;;  %v6716_v56 = vadd.f32 %v6715_v53, %v6714_v48  ;;  %v6737_v57 = vpop.f32.mrb[3].mxu1  ;;  %7037 = vmatprep.subr.bf16.mxu1 %v7672_v2  ;;  %v7699_v48 = vld [vmem:[%s9674_s1 + $0x868] sm:$0xff]   ;;  %v230_v1 = vld [vmem:[%s8097_s6 + $0x80] sm:$0xff] }
 0x100   : > { %v6738_v59 = vadd.f32 %v6737_v57, %v6736_v50  ;;  %v7701_v53 = vld [vmem:[%s9674_s1 + $0x828] sm:$0xff]   ;;  %v7703_v57 = vld [vmem:[%s9674_s1 + $0x870] sm:$0xff]   ;;  %v262_v2 = vld [vmem:[%s8097_s6 + $0x180] sm:$0xff] }
 0x101   : > { %v8778_v60 = vadd.f32 %v6735_v47, %v4736_v54  ;;  %v4739_v62 = vadd.f32 %v6716_v56, %v6114_v52  ;;  %7016 = vmatpush3.bf16.msra.mxu0 %v7673_v3  ;;  %v231_v3 = vld [vmem:[%s8097_s6 + $0x88] sm:$0xff] }
 0x102   : > { %7038 = vmatpush3.bf16.msra.mxu1 %v7674_v4  ;;  %7017 = vmatprep.subr.bf16.mxu0 %v7675_v5  ;;  %v6147_v4 = vcombine.low %v230_v1, %v262_v2  ;;  %v6148_v5 = vcombine.high %v230_v1, %v262_v2  ;;  %v7743_v1 = vld [vmem:[%s9674_s1 + $0xa40] sm:$0xff]  }
 0x103   : > { %v8786_v0 = vadd.f32 %v6738_v59, %v4739_v62  ;;  %7039 = vmatprep.subr.bf16.mxu1 %v7676_v6  ;;  %v7705_v59 = vld [vmem:[%s9674_s1 + $0x830] sm:$0xff]   ;;  %v7708_v62 = vld [vmem:[%s9674_s1 + $0x8f8] sm:$0xff]   ;;  %v263_v6 = vld [vmem:[%s8097_s6 + $0x188] sm:$0xff] }
 0x104   : > { %v7744_v2 = vld [vmem:[%s9674_s1 + $0xac0] sm:$0xff]  }
 0x105   : > { %7018 = vmatpush3.bf16.msra.mxu0 %v7677_v7  ;;  %v6149_v7 = vcombine.low %v231_v3, %v263_v6 }
 0x106   : > { %7040 = vmatpush3.bf16.msra.mxu1 %v7678_v8  ;;  %7047 = vmatprep.subr.bf16.mxu0 %v7679_v17  ;;  %v6150_v8 = vcombine.high %v231_v3, %v263_v6  ;;  %v7719_v17 = vld [vmem:[%s9674_s1 + $0x950] sm:$0xff]   ;;  %v7745_v3 = vld [vmem:[%s9674_s1 + $0xa00] sm:$0xff]   ;;  %v7748_v6 = vld [vmem:[%s9674_s1 + $0xac8] sm:$0xff]  }
 0x107   : > { %7069 = vmatprep.subr.bf16.mxu1 %v7680_v18  ;;  %v7720_v18 = vld [vmem:[%s9674_s1 + $0x9d0] sm:$0xff]  }
 0x108   : > { %5308 = vmatmul.mubr.bf16.vlgmr.msra.gmra.mrb[28].mxu0 %v6143_v13  ;;  %v7715_v13 = vld [vmem:[%s9674_s1 + $0x948] sm:$0xff]  }
 0x109   : > { %5349 = vmatmul.mubr.bf16.vlgmr.msra.gmra.mrb[28].mxu1 %v6145_v15  ;;  %7048 = vmatpush3.bf16.msra.mxu0 %v7681_v19  ;;  %v7717_v15 = vld [vmem:[%s9674_s1 + $0x908] sm:$0xff]   ;;  %v7721_v19 = vld [vmem:[%s9674_s1 + $0x910] sm:$0xff]  }
 0x10a   : > { %7070 = vmatpush3.bf16.msra.mxu1 %v7682_v20  ;;  %7049 = vmatprep.subr.bf16.mxu0 %v7683_v21  ;;  %v7722_v20 = vld [vmem:[%s9674_s1 + $0x990] sm:$0xff]   ;;  %v7723_v21 = vld [vmem:[%s9674_s1 + $0x958] sm:$0xff]  }
 0x10b   : > { %7071 = vmatprep.subr.bf16.mxu1 %v7684_v22  ;;  %5389 = vmatprep.mubr.bf16.mxu0 %v6148_v5  ;;  %v7724_v22 = vld [vmem:[%s9674_s1 + $0x9d8] sm:$0xff]   ;;  %v7747_v5 = vld [vmem:[%s9674_s1 + $0xa48] sm:$0xff]  }
 0x10c   : > { %5430 = vmatprep.mubr.bf16.mxu1 %v6150_v8  ;;  %v7750_v8 = vld [vmem:[%s9674_s1 + $0xa88] sm:$0xff]  }
 0x10d   : > { %7050 = vmatpush3.bf16.msra.mxu0 %v7685_v23 }
 0x10e   : > { %7072 = vmatpush3.bf16.msra.mxu1 %v7686_v24  ;;  %7051 = vmatprep.subr.bf16.mxu0 %v7687_v25  ;;  %v7725_v24 = vld [vmem:[%s9674_s1 + $0x918] sm:$0xff]  }
 0x10f   : > { %7073 = vmatprep.subr.bf16.mxu1 %v7688_v26  ;;  %v7726_v26 = vld [vmem:[%s9674_s1 + $0x998] sm:$0xff]  }
 0x111   : > { %7052 = vmatpush3.bf16.msra.mxu0 %v7689_v27 }
 0x112   : > { %7074 = vmatpush3.bf16.msra.mxu1 %v7690_v28  ;;  %7053 = vmatprep.subr.bf16.mxu0 %v7691_v29  ;;  %v7727_v28 = vld [vmem:[%s9674_s1 + $0x960] sm:$0xff]  }
 0x113   : > { %7075 = vmatprep.subr.bf16.mxu1 %v7692_v30 }
 0x115   : > { %7054 = vmatpush3.bf16.msra.mxu0 %v7693_v32 }
 0x116   : > { %7076 = vmatpush3.bf16.msra.mxu1 %v7694_v34  ;;  %7055 = vmatprep.subr.bf16.mxu0 %v7695_v36  ;;  %v7729_v34 = vld [vmem:[%s9674_s1 + $0x920] sm:$0xff]  }
 0x117   : > { %7077 = vmatprep.subr.bf16.mxu1 %v7696_v39 }
 0x119   : > { %7056 = vmatpush3.bf16.msra.mxu0 %v7697_v42 }
 0x11a   : > { %7078 = vmatpush3.bf16.msra.mxu1 %v7698_v45  ;;  %7057 = vmatprep.subr.bf16.mxu0 %v7699_v48  ;;  %v7733_v45 = vld [vmem:[%s9674_s1 + $0x928] sm:$0xff]  }
 0x11b   : > { %v6755_v31 = vpop.f32.mrb[4].mxu0  ;;  %7079 = vmatprep.subr.bf16.mxu1 %v7700_v51  ;;  %v7737_v51 = vld [vmem:[%s9674_s1 + $0x930] sm:$0xff]  }
 0x11c   : > { %v6777_v33 = vpop.f32.mrb[4].mxu1  ;;  %v6756_v35 = vpop.f32.mrb[5].mxu0 }
 0x11d   : > { %v6757_v37 = vadd.f32 %v6756_v35, %v6755_v31  ;;  %v6778_v38 = vpop.f32.mrb[5].mxu1  ;;  %v6758_v41 = vpop.f32.mrb[6].mxu0  ;;  %7058 = vmatpush3.bf16.msra.mxu0 %v7701_v53  ;;  %v7728_v31 = vld [vmem:[%s9674_s1 + $0x9e0] sm:$0xff]   ;;  %v7739_v53 = vld [vmem:[%s9674_s1 + $0x978] sm:$0xff]  }
 0x11e   : > { %v6779_v40 = vadd.f32 %v6778_v38, %v6777_v33  ;;  %v6780_v44 = vpop.f32.mrb[6].mxu1  ;;  %v6759_v46 = vpop.f32.mrb[7].mxu0  ;;  %7080 = vmatpush3.bf16.msra.mxu1 %v7702_v55  ;;  %7059 = vmatprep.subr.bf16.mxu0 %v7703_v57  ;;  %v7741_v55 = vld [vmem:[%s9674_s1 + $0x938] sm:$0xff]   ;;  %v232_v57 = vld [vmem:[%s8097_s6 + $0x90] sm:$0xff] }
 0x11f   : > { %v4818_v43 = vadd.f32 %v6757_v37, %v8778_v60  ;;  %v6760_v49 = vadd.f32 %v6759_v46, %v6758_v41  ;;  %v6781_v50 = vpop.f32.mrb[7].mxu1  ;;  %7081 = vmatprep.subr.bf16.mxu1 %v7704_v58  ;;  %v7706_v60 = vld [vmem:[%s9674_s1 + $0x8b0] sm:$0xff]   ;;  %v7730_v37 = vld [vmem:[%s9674_s1 + $0x9a0] sm:$0xff]  }
 0x120   : > { %v6782_v52 = vadd.f32 %v6781_v50, %v6780_v44  ;;  %v7736_v50 = vld [vmem:[%s9674_s1 + $0x9f0] sm:$0xff]  }
 0x121   : > { %v8877_v47 = vadd.f32 %v6779_v40, %v4818_v43  ;;  %v4821_v54 = vadd.f32 %v6760_v49, %v8786_v0  ;;  %7060 = vmatpush3.bf16.msra.mxu0 %v7705_v59  ;;  %v7710_v0 = vld [vmem:[%s9674_s1 + $0x8b8] sm:$0xff]   ;;  %v7731_v40 = vld [vmem:[%s9674_s1 + $0x968] sm:$0xff]   ;;  %v7735_v49 = vld [vmem:[%s9674_s1 + $0x970] sm:$0xff]  }
 0x122   : > { %7082 = vmatpush3.bf16.msra.mxu1 %v7706_v60  ;;  %7061 = vmatprep.subr.bf16.mxu0 %v7707_v61  ;;  %v7732_v43 = vld [vmem:[%s9674_s1 + $0x9e8] sm:$0xff]   ;;  %v264_v58 = vld [vmem:[%s8097_s6 + $0x190] sm:$0xff]  ;;  %v233_v61 = vld [vmem:[%s8097_s6 + $0x98] sm:$0xff] }
 0x123   : > { %v8892_v56 = vadd.f32 %v6782_v52, %v4821_v54  ;;  %7083 = vmatprep.subr.bf16.mxu1 %v7708_v62  ;;  %v7738_v52 = vld [vmem:[%s9674_s1 + $0x9b0] sm:$0xff]   ;;  %v7740_v54 = vld [vmem:[%s9674_s1 + $0x9f8] sm:$0xff]   ;;  %v6151_v59 = vcombine.low %v232_v57, %v264_v58  ;;  %v6152_v60 = vcombine.high %v232_v57, %v264_v58  ;;  %v7775_v57 = vld [vmem:[%s9674_s1 + $0xb40] sm:$0xff]  }
 0x124   : > { %v265_v62 = vld [vmem:[%s8097_s6 + $0x198] sm:$0xff]  ;;  %v7776_v58 = vld [vmem:[%s9674_s1 + $0xbc0] sm:$0xff]  }
 0x125   : > { %7062 = vmatpush3.bf16.msra.mxu0 %v7709_v63  ;;  %v6153_v63 = vcombine.low %v233_v61, %v265_v62 }
 0x126   : > { %7084 = vmatpush3.bf16.msra.mxu1 %v7710_v0  ;;  %7091 = vmatprep.subr.bf16.mxu0 %v7711_v9  ;;  %v6154_v0 = vcombine.high %v233_v61, %v265_v62  ;;  %v7751_v9 = vld [vmem:[%s9674_s1 + $0xa50] sm:$0xff]   ;;  %v7779_v61 = vld [vmem:[%s9674_s1 + $0xb48] sm:$0xff]  }
 0x127   : > { %7113 = vmatprep.subr.bf16.mxu1 %v7712_v10  ;;  %v7752_v10 = vld [vmem:[%s9674_s1 + $0xad0] sm:$0xff]   ;;  %v7780_v62 = vld [vmem:[%s9674_s1 + $0xbc8] sm:$0xff]  }
 0x128   : > { %5390 = vmatmul.mubr.bf16.vlgmr.msra.gmra.mrb[32].mxu0 %v6147_v4  ;;  %v7746_v4 = vld [vmem:[%s9674_s1 + $0xa80] sm:$0xff]  }
 0x129   : > { %5431 = vmatmul.mubr.bf16.vlgmr.msra.gmra.mrb[32].mxu1 %v6149_v7  ;;  %7092 = vmatpush3.bf16.msra.mxu0 %v7713_v11  ;;  %v7749_v7 = vld [vmem:[%s9674_s1 + $0xa08] sm:$0xff]   ;;  %v7753_v11 = vld [vmem:[%s9674_s1 + $0xa10] sm:$0xff]  }
 0x12a   : > { %7114 = vmatpush3.bf16.msra.mxu1 %v7714_v12  ;;  %7093 = vmatprep.subr.bf16.mxu0 %v7715_v13  ;;  %v7754_v12 = vld [vmem:[%s9674_s1 + $0xa90] sm:$0xff]   ;;  %v7755_v13 = vld [vmem:[%s9674_s1 + $0xa58] sm:$0xff]  }
 0x12b   : > { %7115 = vmatprep.subr.bf16.mxu1 %v7716_v14  ;;  %5471 = vmatprep.mubr.bf16.mxu0 %v6152_v60  ;;  %v7756_v14 = vld [vmem:[%s9674_s1 + $0xad8] sm:$0xff]   ;;  %v7778_v60 = vld [vmem:[%s9674_s1 + $0xb80] sm:$0xff]  }
 0x12c   : > { %5512 = vmatprep.mubr.bf16.mxu1 %v6154_v0  ;;  %v7782_v0 = vld [vmem:[%s9674_s1 + $0xb88] sm:$0xff]  }
 0x12d   : > { %7094 = vmatpush3.bf16.msra.mxu0 %v7717_v15 }
 0x12e   : > { %7116 = vmatpush3.bf16.msra.mxu1 %v7718_v16  ;;  %7095 = vmatprep.subr.bf16.mxu0 %v7719_v17  ;;  %v7757_v16 = vld [vmem:[%s9674_s1 + $0xa18] sm:$0xff]  }
 0x12f   : > { %7117 = vmatprep.subr.bf16.mxu1 %v7720_v18  ;;  %v7758_v18 = vld [vmem:[%s9674_s1 + $0xa98] sm:$0xff]  }
 0x131   : > { %7096 = vmatpush3.bf16.msra.mxu0 %v7721_v19 }
 0x132   : > { %7118 = vmatpush3.bf16.msra.mxu1 %v7722_v20  ;;  %7097 = vmatprep.subr.bf16.mxu0 %v7723_v21  ;;  %v7759_v20 = vld [vmem:[%s9674_s1 + $0xa60] sm:$0xff]  }
 0x133   : > { %7119 = vmatprep.subr.bf16.mxu1 %v7724_v22 }
 0x135   : > { %7098 = vmatpush3.bf16.msra.mxu0 %v7725_v24 }
 0x136   : > { %7120 = vmatpush3.bf16.msra.mxu1 %v7726_v26  ;;  %7099 = vmatprep.subr.bf16.mxu0 %v7727_v28  ;;  %v7761_v26 = vld [vmem:[%s9674_s1 + $0xa20] sm:$0xff]  }
 0x137   : > { %7121 = vmatprep.subr.bf16.mxu1 %v7728_v31 }
 0x139   : > { %7100 = vmatpush3.bf16.msra.mxu0 %v7729_v34 }
 0x13a   : > { %7122 = vmatpush3.bf16.msra.mxu1 %v7730_v37  ;;  %7101 = vmatprep.subr.bf16.mxu0 %v7731_v40  ;;  %v7765_v37 = vld [vmem:[%s9674_s1 + $0xa28] sm:$0xff]  }
 0x13b   : > { %v6799_v23 = vpop.f32.mrb[8].mxu0  ;;  %7123 = vmatprep.subr.bf16.mxu1 %v7732_v43  ;;  %v7769_v43 = vld [vmem:[%s9674_s1 + $0xa30] sm:$0xff]  }
 0x13c   : > { %v6821_v25 = vpop.f32.mrb[8].mxu1  ;;  %v6800_v27 = vpop.f32.mrb[9].mxu0 }
 0x13d   : > { %v6801_v29 = vadd.f32 %v6800_v27, %v6799_v23  ;;  %v6822_v30 = vpop.f32.mrb[9].mxu1  ;;  %v6802_v33 = vpop.f32.mrb[10].mxu0  ;;  %7102 = vmatpush3.bf16.msra.mxu0 %v7733_v45  ;;  %v7760_v23 = vld [vmem:[%s9674_s1 + $0xae0] sm:$0xff]   ;;  %v7771_v45 = vld [vmem:[%s9674_s1 + $0xa78] sm:$0xff]  }
 0x13e   : > { %v6823_v32 = vadd.f32 %v6822_v30, %v6821_v25  ;;  %v6824_v36 = vpop.f32.mrb[10].mxu1  ;;  %v6803_v38 = vpop.f32.mrb[11].mxu0  ;;  %7103 = vmatprep.subr.bf16.mxu0 %v7735_v49  ;;  %v234_v49 = vld [vmem:[%s8097_s6 + $0xa0] sm:$0xff] }
 0x13f   : > { %v4900_v35 = vadd.f32 %v6801_v29, %v8877_v47  ;;  %v6804_v41 = vadd.f32 %v6803_v38, %v6802_v33  ;;  %v6825_v42 = vpop.f32.mrb[11].mxu1  ;;  %v7734_v47 = vld [vmem:[%s9674_s1 + $0x9a8] sm:$0xff]   ;;  %v7762_v29 = vld [vmem:[%s9674_s1 + $0xaa0] sm:$0xff]  }
 0x140   : > { %v6826_v44 = vadd.f32 %v6825_v42, %v6824_v36  ;;  %7124 = vmatpush3.bf16.msra.mxu1 %v7734_v47  ;;  %v7768_v42 = vld [vmem:[%s9674_s1 + $0xaf0] sm:$0xff]   ;;  %v7773_v47 = vld [vmem:[%s9674_s1 + $0xa38] sm:$0xff]  }
 0x141   : > { %v8983_v39 = vadd.f32 %v6823_v32, %v4900_v35  ;;  %v4903_v46 = vadd.f32 %v6804_v41, %v8892_v56  ;;  %7125 = vmatprep.subr.bf16.mxu1 %v7736_v50  ;;  %7104 = vmatpush3.bf16.msra.mxu0 %v7737_v51  ;;  %v7742_v56 = vld [vmem:[%s9674_s1 + $0x9b8] sm:$0xff]   ;;  %v7763_v32 = vld [vmem:[%s9674_s1 + $0xa68] sm:$0xff]   ;;  %v7767_v41 = vld [vmem:[%s9674_s1 + $0xa70] sm:$0xff]  }
 0x142   : > { %7105 = vmatprep.subr.bf16.mxu0 %v7739_v53  ;;  %v7764_v35 = vld [vmem:[%s9674_s1 + $0xae8] sm:$0xff]   ;;  %v266_v50 = vld [vmem:[%s8097_s6 + $0x1a0] sm:$0xff] }
 0x143   : > { %v8998_v48 = vadd.f32 %v6826_v44, %v4903_v46  ;;  %v7770_v44 = vld [vmem:[%s9674_s1 + $0xab0] sm:$0xff]   ;;  %v7772_v46 = vld [vmem:[%s9674_s1 + $0xaf8] sm:$0xff]   ;;  %v235_v51 = vld [vmem:[%s8097_s6 + $0xa8] sm:$0xff]  ;;  %v6155_v53 = vcombine.low %v234_v49, %v266_v50 }
 0x144   : > { %7126 = vmatpush3.bf16.msra.mxu1 %v7738_v52  ;;  %v267_v52 = vld [vmem:[%s8097_s6 + $0x1a8] sm:$0xff] }
 0x145   : > { %7127 = vmatprep.subr.bf16.mxu1 %v7740_v54  ;;  %7106 = vmatpush3.bf16.msra.mxu0 %v7741_v55  ;;  %v6156_v54 = vcombine.high %v234_v49, %v266_v50  ;;  %v6157_v55 = vcombine.low %v235_v51, %v267_v52  ;;  %v7807_v49 = vld [vmem:[%s9674_s1 + $0xc40] sm:$0xff]  }
 0x146   : > { %7135 = vmatprep.subr.bf16.mxu0 %v7743_v1  ;;  %v7783_v1 = vld [vmem:[%s9674_s1 + $0xb50] sm:$0xff]   ;;  %v7808_v50 = vld [vmem:[%s9674_s1 + $0xcc0] sm:$0xff]  }
 0x148   : > { %7128 = vmatpush3.bf16.msra.mxu1 %v7742_v56  ;;  %5472 = vmatmul.mubr.bf16.vlgmr.msra.gmra.mrb[36].mxu0 %v6151_v59  ;;  %v6158_v56 = vcombine.high %v235_v51, %v267_v52  ;;  %v7777_v59 = vld [vmem:[%s9674_s1 + $0xb00] sm:$0xff]  }
 0x149   : > { %7157 = vmatprep.subr.bf16.mxu1 %v7744_v2  ;;  %7136 = vmatpush3.bf16.msra.mxu0 %v7745_v3  ;;  %v7784_v2 = vld [vmem:[%s9674_s1 + $0xbd0] sm:$0xff]   ;;  %v7809_v51 = vld [vmem:[%s9674_s1 + $0xc00] sm:$0xff]  }
 0x14a   : > { %7137 = vmatprep.subr.bf16.mxu0 %v7747_v5  ;;  %5553 = vmatprep.mubr.bf16.mxu0 %v6156_v54  ;;  %v7785_v3 = vld [vmem:[%s9674_s1 + $0xb10] sm:$0xff]   ;;  %v7787_v5 = vld [vmem:[%s9674_s1 + $0xb58] sm:$0xff]   ;;  %v7810_v52 = vld [vmem:[%s9674_s1 + $0xc80] sm:$0xff]  }
 0x14b   : > { %5513 = vmatmul.mubr.bf16.vlgmr.msra.gmra.mrb[36].mxu1 %v6153_v63  ;;  %v7781_v63 = vld [vmem:[%s9674_s1 + $0xb08] sm:$0xff]  }
 0x14c   : > { %7158 = vmatpush3.bf16.msra.mxu1 %v7746_v4  ;;  %5594 = vmatprep.mubr.bf16.mxu1 %v6158_v56  ;;  %v7786_v4 = vld [vmem:[%s9674_s1 + $0xb90] sm:$0xff]   ;;  %v7812_v54 = vld [vmem:[%s9674_s1 + $0xcc8] sm:$0xff]  }
 0x14d   : > { %7159 = vmatprep.subr.bf16.mxu1 %v7748_v6  ;;  %7138 = vmatpush3.bf16.msra.mxu0 %v7749_v7  ;;  %v7788_v6 = vld [vmem:[%s9674_s1 + $0xbd8] sm:$0xff]   ;;  %v7814_v56 = vld [vmem:[%s9674_s1 + $0xc88] sm:$0xff]  }
 0x14e   : > { %7139 = vmatprep.subr.bf16.mxu0 %v7751_v9 }
 0x150   : > { %7160 = vmatpush3.bf16.msra.mxu1 %v7750_v8  ;;  %v7789_v8 = vld [vmem:[%s9674_s1 + $0xb18] sm:$0xff]  }
 0x151   : > { %7161 = vmatprep.subr.bf16.mxu1 %v7752_v10  ;;  %7140 = vmatpush3.bf16.msra.mxu0 %v7753_v11  ;;  %v7790_v10 = vld [vmem:[%s9674_s1 + $0xb98] sm:$0xff]  }
 0x152   : > { %7141 = vmatprep.subr.bf16.mxu0 %v7755_v13 }
 0x154   : > { %7162 = vmatpush3.bf16.msra.mxu1 %v7754_v12  ;;  %v7791_v12 = vld [vmem:[%s9674_s1 + $0xb60] sm:$0xff]  }
 0x155   : > { %7163 = vmatprep.subr.bf16.mxu1 %v7756_v14  ;;  %7142 = vmatpush3.bf16.msra.mxu0 %v7757_v16 }
 0x156   : > { %7143 = vmatprep.subr.bf16.mxu0 %v7759_v20 }
 0x158   : > { %7164 = vmatpush3.bf16.msra.mxu1 %v7758_v18  ;;  %v7793_v18 = vld [vmem:[%s9674_s1 + $0xb20] sm:$0xff]  }
 0x159   : > { %7165 = vmatprep.subr.bf16.mxu1 %v7760_v23  ;;  %7144 = vmatpush3.bf16.msra.mxu0 %v7761_v26 }
 0x15a   : > { %7145 = vmatprep.subr.bf16.mxu0 %v7763_v32 }
 0x15b   : > { %v6843_v15 = vpop.f32.mrb[12].mxu0 }
 0x15c   : > { %v6865_v17 = vpop.f32.mrb[12].mxu1  ;;  %v6844_v19 = vpop.f32.mrb[13].mxu0  ;;  %7166 = vmatpush3.bf16.msra.mxu1 %v7762_v29  ;;  %v7797_v29 = vld [vmem:[%s9674_s1 + $0xb28] sm:$0xff]  }
 0x15d   : > { %v6845_v21 = vadd.f32 %v6844_v19, %v6843_v15  ;;  %v6866_v22 = vpop.f32.mrb[13].mxu1  ;;  %v6846_v25 = vpop.f32.mrb[14].mxu0  ;;  %7167 = vmatprep.subr.bf16.mxu1 %v7764_v35  ;;  %7146 = vmatpush3.bf16.msra.mxu0 %v7765_v37  ;;  %v7792_v15 = vld [vmem:[%s9674_s1 + $0xbe0] sm:$0xff]   ;;  %v7801_v35 = vld [vmem:[%s9674_s1 + $0xb30] sm:$0xff]   ;;  %v7803_v37 = vld [vmem:[%s9674_s1 + $0xb78] sm:$0xff]  }
 0x15e   : > { %v6867_v24 = vadd.f32 %v6866_v22, %v6865_v17  ;;  %v6868_v28 = vpop.f32.mrb[14].mxu1  ;;  %v6847_v30 = vpop.f32.mrb[15].mxu0  ;;  %7147 = vmatprep.subr.bf16.mxu0 %v7767_v41  ;;  %v236_v41 = vld [vmem:[%s8097_s6 + $0xb0] sm:$0xff] }
 0x15f   : > { %v4982_v27 = vadd.f32 %v6845_v21, %v8983_v39  ;;  %v6848_v33 = vadd.f32 %v6847_v30, %v6846_v25  ;;  %v6869_v34 = vpop.f32.mrb[15].mxu1  ;;  %v7766_v39 = vld [vmem:[%s9674_s1 + $0xaa8] sm:$0xff]   ;;  %v7794_v21 = vld [vmem:[%s9674_s1 + $0xba0] sm:$0xff]  }
 0x160   : > { %v6870_v36 = vadd.f32 %v6869_v34, %v6868_v28  ;;  %7168 = vmatpush3.bf16.msra.mxu1 %v7766_v39  ;;  %v7800_v34 = vld [vmem:[%s9674_s1 + $0xbf0] sm:$0xff]   ;;  %v7805_v39 = vld [vmem:[%s9674_s1 + $0xb38] sm:$0xff]  }
 0x161   : > { %v9089_v31 = vadd.f32 %v6867_v24, %v4982_v27  ;;  %v4985_v38 = vadd.f32 %v6848_v33, %v8998_v48  ;;  %7169 = vmatprep.subr.bf16.mxu1 %v7768_v42  ;;  %7148 = vmatpush3.bf16.msra.mxu0 %v7769_v43  ;;  %v7774_v48 = vld [vmem:[%s9674_s1 + $0xab8] sm:$0xff]   ;;  %v7795_v24 = vld [vmem:[%s9674_s1 + $0xb68] sm:$0xff]   ;;  %v7799_v33 = vld [vmem:[%s9674_s1 + $0xb70] sm:$0xff]  }
 0x162   : > { %7149 = vmatprep.subr.bf16.mxu0 %v7771_v45  ;;  %v7796_v27 = vld [vmem:[%s9674_s1 + $0xbe8] sm:$0xff]   ;;  %v268_v42 = vld [vmem:[%s8097_s6 + $0x1b0] sm:$0xff]  ;;  %v237_v43 = vld [vmem:[%s8097_s6 + $0xb8] sm:$0xff] }
 0x163   : > { %v9104_v40 = vadd.f32 %v6870_v36, %v4985_v38  ;;  %v7802_v36 = vld [vmem:[%s9674_s1 + $0xbb0] sm:$0xff]   ;;  %v7804_v38 = vld [vmem:[%s9674_s1 + $0xbf8] sm:$0xff]   ;;  %v6160_v45 = vcombine.high %v236_v41, %v268_v42 }
 0x164   : > { %7170 = vmatpush3.bf16.msra.mxu1 %v7770_v44  ;;  %v6159_v44 = vcombine.low %v236_v41, %v268_v42  ;;  %v7839_v41 = vld [vmem:[%s9674_s1 + $0xd40] sm:$0xff]  }
 0x165   : > { %7171 = vmatprep.subr.bf16.mxu1 %v7772_v46  ;;  %7150 = vmatpush3.bf16.msra.mxu0 %v7773_v47  ;;  %v269_v46 = vld [vmem:[%s8097_s6 + $0x1b8] sm:$0xff]  ;;  %v7840_v42 = vld [vmem:[%s9674_s1 + $0xdc0] sm:$0xff]  }
 0x166   : > { %7179 = vmatprep.subr.bf16.mxu0 %v7775_v57  ;;  %v6161_v47 = vcombine.low %v237_v43, %v269_v46  ;;  %v7815_v57 = vld [vmem:[%s9674_s1 + $0xc50] sm:$0xff]  }
 0x168   : > { %7172 = vmatpush3.bf16.msra.mxu1 %v7774_v48  ;;  %5554 = vmatmul.mubr.bf16.vlgmr.msra.gmra.mrb[40].mxu0 %v6155_v53  ;;  %v6162_v48 = vcombine.high %v237_v43, %v269_v46  ;;  %v7811_v53 = vld [vmem:[%s9674_s1 + $0xc48] sm:$0xff]   ;;  %v7841_v43 = vld [vmem:[%s9674_s1 + $0xd00] sm:$0xff]  }
 0x169   : > { %7201 = vmatprep.subr.bf16.mxu1 %v7776_v58  ;;  %7180 = vmatpush3.bf16.msra.mxu0 %v7777_v59  ;;  %v7816_v58 = vld [vmem:[%s9674_s1 + $0xcd0] sm:$0xff]   ;;  %v7844_v46 = vld [vmem:[%s9674_s1 + $0xdc8] sm:$0xff]  }
 0x16a   : > { %7181 = vmatprep.subr.bf16.mxu0 %v7779_v61  ;;  %5635 = vmatprep.mubr.bf16.mxu0 %v6160_v45  ;;  %v7817_v59 = vld [vmem:[%s9674_s1 + $0xc10] sm:$0xff]   ;;  %v7819_v61 = vld [vmem:[%s9674_s1 + $0xc58] sm:$0xff]   ;;  %v7843_v45 = vld [vmem:[%s9674_s1 + $0xd48] sm:$0xff]  }
 0x16b   : > { %5595 = vmatmul.mubr.bf16.vlgmr.msra.gmra.mrb[40].mxu1 %v6157_v55  ;;  %v7813_v55 = vld [vmem:[%s9674_s1 + $0xc08] sm:$0xff]  }
 0x16c   : > { %7202 = vmatpush3.bf16.msra.mxu1 %v7778_v60  ;;  %5676 = vmatprep.mubr.bf16.mxu1 %v6162_v48  ;;  %v7818_v60 = vld [vmem:[%s9674_s1 + $0xc90] sm:$0xff]   ;;  %v7846_v48 = vld [vmem:[%s9674_s1 + $0xd88] sm:$0xff]  }
 0x16d   : > { %7203 = vmatprep.subr.bf16.mxu1 %v7780_v62  ;;  %7182 = vmatpush3.bf16.msra.mxu0 %v7781_v63  ;;  %v7820_v62 = vld [vmem:[%s9674_s1 + $0xcd8] sm:$0xff]  }
 0x16e   : > { %7183 = vmatprep.subr.bf16.mxu0 %v7783_v1 }
 0x170   : > { %7204 = vmatpush3.bf16.msra.mxu1 %v7782_v0  ;;  %v7821_v0 = vld [vmem:[%s9674_s1 + $0xc18] sm:$0xff]  }
 0x171   : > { %7205 = vmatprep.subr.bf16.mxu1 %v7784_v2  ;;  %7184 = vmatpush3.bf16.msra.mxu0 %v7785_v3  ;;  %v7822_v2 = vld [vmem:[%s9674_s1 + $0xc98] sm:$0xff]  }
 0x172   : > { %7185 = vmatprep.subr.bf16.mxu0 %v7787_v5 }
 0x174   : > { %7206 = vmatpush3.bf16.msra.mxu1 %v7786_v4  ;;  %v7823_v4 = vld [vmem:[%s9674_s1 + $0xc60] sm:$0xff]  }
 0x175   : > { %7207 = vmatprep.subr.bf16.mxu1 %v7788_v6  ;;  %7186 = vmatpush3.bf16.msra.mxu0 %v7789_v8 }
 0x176   : > { %7187 = vmatprep.subr.bf16.mxu0 %v7791_v12 }
 0x178   : > { %7208 = vmatpush3.bf16.msra.mxu1 %v7790_v10  ;;  %v7825_v10 = vld [vmem:[%s9674_s1 + $0xc20] sm:$0xff]  }
 0x179   : > { %7209 = vmatprep.subr.bf16.mxu1 %v7792_v15  ;;  %7188 = vmatpush3.bf16.msra.mxu0 %v7793_v18 }
 0x17a   : > { %7189 = vmatprep.subr.bf16.mxu0 %v7795_v24 }
 0x17b   : > { %v6887_v7 = vpop.f32.mrb[16].mxu0 }
 0x17c   : > { %v6909_v9 = vpop.f32.mrb[16].mxu1  ;;  %v6888_v11 = vpop.f32.mrb[17].mxu0  ;;  %7210 = vmatpush3.bf16.msra.mxu1 %v7794_v21  ;;  %v7829_v21 = vld [vmem:[%s9674_s1 + $0xc28] sm:$0xff]  }
 0x17d   : > { %v6889_v13 = vadd.f32 %v6888_v11, %v6887_v7  ;;  %v6910_v14 = vpop.f32.mrb[17].mxu1  ;;  %v6890_v17 = vpop.f32.mrb[18].mxu0  ;;  %7211 = vmatprep.subr.bf16.mxu1 %v7796_v27  ;;  %7190 = vmatpush3.bf16.msra.mxu0 %v7797_v29  ;;  %v7824_v7 = vld [vmem:[%s9674_s1 + $0xce0] sm:$0xff]   ;;  %v7833_v27 = vld [vmem:[%s9674_s1 + $0xc30] sm:$0xff]   ;;  %v7835_v29 = vld [vmem:[%s9674_s1 + $0xc78] sm:$0xff]  }
 0x17e   : > { %v6911_v16 = vadd.f32 %v6910_v14, %v6909_v9  ;;  %v6912_v20 = vpop.f32.mrb[18].mxu1  ;;  %v6891_v22 = vpop.f32.mrb[19].mxu0  ;;  %7191 = vmatprep.subr.bf16.mxu0 %v7799_v33  ;;  %v238_v33 = vld [vmem:[%s8097_s6 + $0xc0] sm:$0xff] }
 0x17f   : > { %v5064_v19 = vadd.f32 %v6889_v13, %v9089_v31  ;;  %v6892_v25 = vadd.f32 %v6891_v22, %v6890_v17  ;;  %v6913_v26 = vpop.f32.mrb[19].mxu1  ;;  %v7798_v31 = vld [vmem:[%s9674_s1 + $0xba8] sm:$0xff]   ;;  %v7826_v13 = vld [vmem:[%s9674_s1 + $0xca0] sm:$0xff]  }
 0x180   : > { %v6914_v28 = vadd.f32 %v6913_v26, %v6912_v20  ;;  %7212 = vmatpush3.bf16.msra.mxu1 %v7798_v31  ;;  %v7832_v26 = vld [vmem:[%s9674_s1 + $0xcf0] sm:$0xff]   ;;  %v7837_v31 = vld [vmem:[%s9674_s1 + $0xc38] sm:$0xff]  }
 0x181   : > { %v9195_v23 = vadd.f32 %v6911_v16, %v5064_v19  ;;  %v5067_v30 = vadd.f32 %v6892_v25, %v9104_v40  ;;  %7213 = vmatprep.subr.bf16.mxu1 %v7800_v34  ;;  %7192 = vmatpush3.bf16.msra.mxu0 %v7801_v35  ;;  %v7806_v40 = vld [vmem:[%s9674_s1 + $0xbb8] sm:$0xff]   ;;  %v7827_v16 = vld [vmem:[%s9674_s1 + $0xc68] sm:$0xff]   ;;  %v7831_v25 = vld [vmem:[%s9674_s1 + $0xc70] sm:$0xff]  }
 0x182   : > { %7193 = vmatprep.subr.bf16.mxu0 %v7803_v37  ;;  %v7828_v19 = vld [vmem:[%s9674_s1 + $0xce8] sm:$0xff]   ;;  %v270_v34 = vld [vmem:[%s8097_s6 + $0x1c0] sm:$0xff] }
 0x183   : > { %v9210_v32 = vadd.f32 %v6914_v28, %v5067_v30  ;;  %v7834_v28 = vld [vmem:[%s9674_s1 + $0xcb0] sm:$0xff]   ;;  %v7836_v30 = vld [vmem:[%s9674_s1 + $0xcf8] sm:$0xff]   ;;  %v6163_v35 = vcombine.low %v238_v33, %v270_v34  ;;  %v239_v37 = vld [vmem:[%s8097_s6 + $0xc8] sm:$0xff] }
 0x184   : > { %7214 = vmatpush3.bf16.msra.mxu1 %v7802_v36  ;;  %v6164_v36 = vcombine.high %v238_v33, %v270_v34  ;;  %v7871_v33 = vld [vmem:[%s9674_s1 + $0xe40] sm:$0xff]  }
 0x185   : > { %7215 = vmatprep.subr.bf16.mxu1 %v7804_v38  ;;  %7194 = vmatpush3.bf16.msra.mxu0 %v7805_v39  ;;  %v271_v38 = vld [vmem:[%s8097_s6 + $0x1c8] sm:$0xff]  ;;  %v7872_v34 = vld [vmem:[%s9674_s1 + $0xec0] sm:$0xff]  }
 0x186   : > { %7223 = vmatprep.subr.bf16.mxu0 %v7807_v49  ;;  %v6165_v39 = vcombine.low %v239_v37, %v271_v38  ;;  %v7847_v49 = vld [vmem:[%s9674_s1 + $0xd50] sm:$0xff]  }
 0x188   : > { %7216 = vmatpush3.bf16.msra.mxu1 %v7806_v40  ;;  %5636 = vmatmul.mubr.bf16.vlgmr.msra.gmra.mrb[44].mxu0 %v6159_v44  ;;  %v6166_v40 = vcombine.high %v239_v37, %v271_v38  ;;  %v7842_v44 = vld [vmem:[%s9674_s1 + $0xd80] sm:$0xff]   ;;  %v7875_v37 = vld [vmem:[%s9674_s1 + $0xe48] sm:$0xff]  }
 0x189   : > { %7245 = vmatprep.subr.bf16.mxu1 %v7808_v50  ;;  %7224 = vmatpush3.bf16.msra.mxu0 %v7809_v51  ;;  %v7848_v50 = vld [vmem:[%s9674_s1 + $0xdd0] sm:$0xff]   ;;  %v7876_v38 = vld [vmem:[%s9674_s1 + $0xec8] sm:$0xff]  }
 0x18a   : > { %7225 = vmatprep.subr.bf16.mxu0 %v7811_v53  ;;  %5717 = vmatprep.mubr.bf16.mxu0 %v6164_v36  ;;  %v7849_v51 = vld [vmem:[%s9674_s1 + $0xd10] sm:$0xff]   ;;  %v7851_v53 = vld [vmem:[%s9674_s1 + $0xd58] sm:$0xff]   ;;  %v7874_v36 = vld [vmem:[%s9674_s1 + $0xe80] sm:$0xff]  }
 0x18b   : > { %5677 = vmatmul.mubr.bf16.vlgmr.msra.gmra.mrb[44].mxu1 %v6161_v47  ;;  %v7845_v47 = vld [vmem:[%s9674_s1 + $0xd08] sm:$0xff]  }
 0x18c   : > { %7246 = vmatpush3.bf16.msra.mxu1 %v7810_v52  ;;  %5758 = vmatprep.mubr.bf16.mxu1 %v6166_v40  ;;  %v7850_v52 = vld [vmem:[%s9674_s1 + $0xd90] sm:$0xff]   ;;  %v7878_v40 = vld [vmem:[%s9674_s1 + $0xe88] sm:$0xff]  }
 0x18d   : > { %7247 = vmatprep.subr.bf16.mxu1 %v7812_v54  ;;  %7226 = vmatpush3.bf16.msra.mxu0 %v7813_v55  ;;  %v7852_v54 = vld [vmem:[%s9674_s1 + $0xdd8] sm:$0xff]  }
 0x18e   : > { %7227 = vmatprep.subr.bf16.mxu0 %v7815_v57 }
 0x190   : > { %7248 = vmatpush3.bf16.msra.mxu1 %v7814_v56  ;;  %v7853_v56 = vld [vmem:[%s9674_s1 + $0xd18] sm:$0xff]  }
 0x191   : > { %7249 = vmatprep.subr.bf16.mxu1 %v7816_v58  ;;  %7228 = vmatpush3.bf16.msra.mxu0 %v7817_v59  ;;  %v7854_v58 = vld [vmem:[%s9674_s1 + $0xd98] sm:$0xff]  }
 0x192   : > { %7229 = vmatprep.subr.bf16.mxu0 %v7819_v61 }
 0x194   : > { %7250 = vmatpush3.bf16.msra.mxu1 %v7818_v60  ;;  %v7855_v60 = vld [vmem:[%s9674_s1 + $0xd60] sm:$0xff]  }
 0x195   : > { %7251 = vmatprep.subr.bf16.mxu1 %v7820_v62  ;;  %7230 = vmatpush3.bf16.msra.mxu0 %v7821_v0 }
 0x196   : > { %7231 = vmatprep.subr.bf16.mxu0 %v7823_v4 }
 0x198   : > { %7252 = vmatpush3.bf16.msra.mxu1 %v7822_v2  ;;  %v7857_v2 = vld [vmem:[%s9674_s1 + $0xd20] sm:$0xff]  }
 0x199   : > { %7253 = vmatprep.subr.bf16.mxu1 %v7824_v7  ;;  %7232 = vmatpush3.bf16.msra.mxu0 %v7825_v10 }
 0x19a   : > { %7233 = vmatprep.subr.bf16.mxu0 %v7827_v16 }
 0x19b   : > { %v6931_v63 = vpop.f32.mrb[20].mxu0 }
 0x19c   : > { %v6953_v1 = vpop.f32.mrb[20].mxu1  ;;  %v6932_v3 = vpop.f32.mrb[21].mxu0  ;;  %7254 = vmatpush3.bf16.msra.mxu1 %v7826_v13  ;;  %v7861_v13 = vld [vmem:[%s9674_s1 + $0xd28] sm:$0xff]  }
 0x19d   : > { %v6933_v5 = vadd.f32 %v6932_v3, %v6931_v63  ;;  %v6954_v6 = vpop.f32.mrb[21].mxu1  ;;  %v6934_v9 = vpop.f32.mrb[22].mxu0  ;;  %7255 = vmatprep.subr.bf16.mxu1 %v7828_v19  ;;  %7234 = vmatpush3.bf16.msra.mxu0 %v7829_v21  ;;  %v7856_v63 = vld [vmem:[%s9674_s1 + $0xde0] sm:$0xff]   ;;  %v7865_v19 = vld [vmem:[%s9674_s1 + $0xd30] sm:$0xff]   ;;  %v7867_v21 = vld [vmem:[%s9674_s1 + $0xd78] sm:$0xff]  }
 0x19e   : > { %v6955_v8 = vadd.f32 %v6954_v6, %v6953_v1  ;;  %v6956_v12 = vpop.f32.mrb[22].mxu1  ;;  %v6935_v14 = vpop.f32.mrb[23].mxu0  ;;  %7235 = vmatprep.subr.bf16.mxu0 %v7831_v25  ;;  %v240_v25 = vld [vmem:[%s8097_s6 + $0xd0] sm:$0xff] }
 0x19f   : > { %v5146_v11 = vadd.f32 %v6933_v5, %v9195_v23  ;;  %v6936_v17 = vadd.f32 %v6935_v14, %v6934_v9  ;;  %v6957_v18 = vpop.f32.mrb[23].mxu1  ;;  %v7830_v23 = vld [vmem:[%s9674_s1 + $0xca8] sm:$0xff]   ;;  %v7858_v5 = vld [vmem:[%s9674_s1 + $0xda0] sm:$0xff]  }
 0x1a0   : > { %v6958_v20 = vadd.f32 %v6957_v18, %v6956_v12  ;;  %7256 = vmatpush3.bf16.msra.mxu1 %v7830_v23  ;;  %v7864_v18 = vld [vmem:[%s9674_s1 + $0xdf0] sm:$0xff]   ;;  %v7869_v23 = vld [vmem:[%s9674_s1 + $0xd38] sm:$0xff]  }
 0x1a1   : > { %v9301_v15 = vadd.f32 %v6955_v8, %v5146_v11  ;;  %v5149_v22 = vadd.f32 %v6936_v17, %v9210_v32  ;;  %7257 = vmatprep.subr.bf16.mxu1 %v7832_v26  ;;  %7236 = vmatpush3.bf16.msra.mxu0 %v7833_v27  ;;  %v7838_v32 = vld [vmem:[%s9674_s1 + $0xcb8] sm:$0xff]   ;;  %v7859_v8 = vld [vmem:[%s9674_s1 + $0xd68] sm:$0xff]   ;;  %v7863_v17 = vld [vmem:[%s9674_s1 + $0xd70] sm:$0xff]  }
 0x1a2   : > { %7237 = vmatprep.subr.bf16.mxu0 %v7835_v29  ;;  %v7860_v11 = vld [vmem:[%s9674_s1 + $0xde8] sm:$0xff]   ;;  %v272_v26 = vld [vmem:[%s8097_s6 + $0x1d0] sm:$0xff]  ;;  %v241_v27 = vld [vmem:[%s8097_s6 + $0xd8] sm:$0xff] }
 0x1a3   : > { %v9316_v24 = vadd.f32 %v6958_v20, %v5149_v22  ;;  %v7866_v20 = vld [vmem:[%s9674_s1 + $0xdb0] sm:$0xff]   ;;  %v7868_v22 = vld [vmem:[%s9674_s1 + $0xdf8] sm:$0xff]   ;;  %v6167_v29 = vcombine.low %v240_v25, %v272_v26 }
 0x1a4   : > { %7258 = vmatpush3.bf16.msra.mxu1 %v7834_v28  ;;  %v273_v28 = vld [vmem:[%s8097_s6 + $0x1d8] sm:$0xff] }
 0x1a5   : > { %7259 = vmatprep.subr.bf16.mxu1 %v7836_v30  ;;  %7238 = vmatpush3.bf16.msra.mxu0 %v7837_v31  ;;  %v6168_v30 = vcombine.high %v240_v25, %v272_v26  ;;  %v6169_v31 = vcombine.low %v241_v27, %v273_v28  ;;  %v7903_v25 = vld [vmem:[%s9674_s1 + $0xf40] sm:$0xff]  }
 0x1a6   : > { %7267 = vmatprep.subr.bf16.mxu0 %v7839_v41  ;;  %v7879_v41 = vld [vmem:[%s9674_s1 + $0xe50] sm:$0xff]   ;;  %v7904_v26 = vld [vmem:[%s9674_s1 + $0xfc0] sm:$0xff]  }
 0x1a8   : > { %7260 = vmatpush3.bf16.msra.mxu1 %v7838_v32  ;;  %5718 = vmatmul.mubr.bf16.vlgmr.msra.gmra.mrb[48].mxu0 %v6163_v35  ;;  %v6170_v32 = vcombine.high %v241_v27, %v273_v28  ;;  %v7873_v35 = vld [vmem:[%s9674_s1 + $0xe00] sm:$0xff]  }
 0x1a9   : > { %7289 = vmatprep.subr.bf16.mxu1 %v7840_v42  ;;  %7268 = vmatpush3.bf16.msra.mxu0 %v7841_v43  ;;  %v7880_v42 = vld [vmem:[%s9674_s1 + $0xed0] sm:$0xff]   ;;  %v7905_v27 = vld [vmem:[%s9674_s1 + $0xf00] sm:$0xff]  }
 0x1aa   : > { %7269 = vmatprep.subr.bf16.mxu0 %v7843_v45  ;;  %5799 = vmatprep.mubr.bf16.mxu0 %v6168_v30  ;;  %v7881_v43 = vld [vmem:[%s9674_s1 + $0xe10] sm:$0xff]   ;;  %v7883_v45 = vld [vmem:[%s9674_s1 + $0xe58] sm:$0xff]   ;;  %v7906_v28 = vld [vmem:[%s9674_s1 + $0xf80] sm:$0xff]  }
 0x1ab   : > { %5759 = vmatmul.mubr.bf16.vlgmr.msra.gmra.mrb[48].mxu1 %v6165_v39  ;;  %v7877_v39 = vld [vmem:[%s9674_s1 + $0xe08] sm:$0xff]  }
 0x1ac   : > { %7290 = vmatpush3.bf16.msra.mxu1 %v7842_v44  ;;  %5840 = vmatprep.mubr.bf16.mxu1 %v6170_v32  ;;  %v7882_v44 = vld [vmem:[%s9674_s1 + $0xe90] sm:$0xff]   ;;  %v7908_v30 = vld [vmem:[%s9674_s1 + $0xfc8] sm:$0xff]  }
 0x1ad   : > { %7291 = vmatprep.subr.bf16.mxu1 %v7844_v46  ;;  %7270 = vmatpush3.bf16.msra.mxu0 %v7845_v47  ;;  %v7884_v46 = vld [vmem:[%s9674_s1 + $0xed8] sm:$0xff]   ;;  %v7910_v32 = vld [vmem:[%s9674_s1 + $0xf88] sm:$0xff]  }
 0x1ae   : > { %7271 = vmatprep.subr.bf16.mxu0 %v7847_v49  ;;  %v7885_v47 = vld [vmem:[%s9674_s1 + $0xe18] sm:$0xff]  }
 0x1af   : > { %v7886_v49 = vld [vmem:[%s9674_s1 + $0xe98] sm:$0xff]  }
 0x1b0   : > { %7292 = vmatpush3.bf16.msra.mxu1 %v7846_v48 }
 0x1b1   : > { %7293 = vmatprep.subr.bf16.mxu1 %v7848_v50  ;;  %7272 = vmatpush3.bf16.msra.mxu0 %v7849_v51  ;;  %v7887_v51 = vld [vmem:[%s9674_s1 + $0xe60] sm:$0xff]  }
 0x1b2   : > { %7273 = vmatprep.subr.bf16.mxu0 %v7851_v53  ;;  %v7888_v53 = vld [vmem:[%s9674_s1 + $0xee0] sm:$0xff]  }
 0x1b4   : > { %7294 = vmatpush3.bf16.msra.mxu1 %v7850_v52 }
 0x1b5   : > { %7295 = vmatprep.subr.bf16.mxu1 %v7852_v54  ;;  %7274 = vmatpush3.bf16.msra.mxu0 %v7853_v56  ;;  %v7889_v56 = vld [vmem:[%s9674_s1 + $0xe20] sm:$0xff]  }
 0x1b6   : > { %7275 = vmatprep.subr.bf16.mxu0 %v7855_v60 }
 0x1b8   : > { %7296 = vmatpush3.bf16.msra.mxu1 %v7854_v58 }
 0x1b9   : > { %7297 = vmatprep.subr.bf16.mxu1 %v7856_v63  ;;  %7276 = vmatpush3.bf16.msra.mxu0 %v7857_v2 }
 0x1ba   : > { %7277 = vmatprep.subr.bf16.mxu0 %v7859_v8  ;;  %v7895_v8 = vld [vmem:[%s9674_s1 + $0xe70] sm:$0xff]  }
 0x1bb   : > { %v6975_v55 = vpop.f32.mrb[24].mxu0 }
 0x1bc   : > { %v6997_v57 = vpop.f32.mrb[24].mxu1  ;;  %v6976_v59 = vpop.f32.mrb[25].mxu0  ;;  %7298 = vmatpush3.bf16.msra.mxu1 %v7858_v5 }
 0x1bd   : > { %v6977_v61 = vadd.f32 %v6976_v59, %v6975_v55  ;;  %v6998_v62 = vpop.f32.mrb[25].mxu1  ;;  %v6978_v1 = vpop.f32.mrb[26].mxu0  ;;  %7299 = vmatprep.subr.bf16.mxu1 %v7860_v11  ;;  %7278 = vmatpush3.bf16.msra.mxu0 %v7861_v13  ;;  %v7890_v59 = vld [vmem:[%s9674_s1 + $0xea0] sm:$0xff]   ;;  %v7897_v11 = vld [vmem:[%s9674_s1 + $0xe30] sm:$0xff]   ;;  %v7899_v13 = vld [vmem:[%s9674_s1 + $0xe78] sm:$0xff]  }
 0x1be   : > { %v6999_v0 = vadd.f32 %v6998_v62, %v6997_v57  ;;  %v7000_v4 = vpop.f32.mrb[26].mxu1  ;;  %v6979_v6 = vpop.f32.mrb[27].mxu0  ;;  %7279 = vmatprep.subr.bf16.mxu0 %v7863_v17  ;;  %v7891_v62 = vld [vmem:[%s9674_s1 + $0xe68] sm:$0xff]   ;;  %v242_v17 = vld [vmem:[%s8097_s6 + $0xe0] sm:$0xff] }
 0x1bf   : > { %v5228_v3 = vadd.f32 %v6977_v61, %v9301_v15  ;;  %v6980_v9 = vadd.f32 %v6979_v6, %v6978_v1  ;;  %v7001_v10 = vpop.f32.mrb[27].mxu1  ;;  %v7862_v15 = vld [vmem:[%s9674_s1 + $0xda8] sm:$0xff]  }
 0x1c0   : > { %v7002_v12 = vadd.f32 %v7001_v10, %v7000_v4  ;;  %7300 = vmatpush3.bf16.msra.mxu1 %v7862_v15  ;;  %v7892_v1 = vld [vmem:[%s9674_s1 + $0xee8] sm:$0xff]   ;;  %v7896_v10 = vld [vmem:[%s9674_s1 + $0xef0] sm:$0xff]   ;;  %v7901_v15 = vld [vmem:[%s9674_s1 + $0xe38] sm:$0xff]  }
 0x1c1   : > { %v9407_v7 = vadd.f32 %v6999_v0, %v5228_v3  ;;  %v5231_v14 = vadd.f32 %v6980_v9, %v9316_v24  ;;  %7301 = vmatprep.subr.bf16.mxu1 %v7864_v18  ;;  %7280 = vmatpush3.bf16.msra.mxu0 %v7865_v19  ;;  %v7870_v24 = vld [vmem:[%s9674_s1 + $0xdb8] sm:$0xff]   ;;  %v7893_v4 = vld [vmem:[%s9674_s1 + $0xe28] sm:$0xff]   ;;  %v274_v18 = vld [vmem:[%s8097_s6 + $0x1e0] sm:$0xff] }
 0x1c2   : > { %7281 = vmatprep.subr.bf16.mxu0 %v7867_v21  ;;  %v7894_v6 = vld [vmem:[%s9674_s1 + $0xea8] sm:$0xff]   ;;  %v6172_v21 = vcombine.high %v242_v17, %v274_v18 }
 0x1c3   : > { %v9422_v16 = vadd.f32 %v7002_v12, %v5231_v14  ;;  %v7898_v12 = vld [vmem:[%s9674_s1 + $0xeb0] sm:$0xff]   ;;  %v7900_v14 = vld [vmem:[%s9674_s1 + $0xef8] sm:$0xff]   ;;  %v243_v19 = vld [vmem:[%s8097_s6 + $0xe8] sm:$0xff] }
 0x1c4   : > { %7302 = vmatpush3.bf16.msra.mxu1 %v7866_v20  ;;  %v6171_v20 = vcombine.low %v242_v17, %v274_v18 }
 0x1c5   : > { %7303 = vmatprep.subr.bf16.mxu1 %v7868_v22  ;;  %7282 = vmatpush3.bf16.msra.mxu0 %v7869_v23  ;;  %v275_v22 = vld [vmem:[%s8097_s6 + $0x1e8] sm:$0xff] }
 0x1c6   : > { %7311 = vmatprep.subr.bf16.mxu0 %v7871_v33  ;;  %v6173_v23 = vcombine.low %v243_v19, %v275_v22  ;;  %v7911_v33 = vld [vmem:[%s9674_s1 + $0xf50] sm:$0xff]  }
 0x1c8   : > { %7304 = vmatpush3.bf16.msra.mxu1 %v7870_v24  ;;  %5800 = vmatmul.mubr.bf16.vlgmr.msra.gmra.mrb[52].mxu0 %v6167_v29  ;;  %v6174_v24 = vcombine.high %v243_v19, %v275_v22  ;;  %v7907_v29 = vld [vmem:[%s9674_s1 + $0xf48] sm:$0xff]  }
 0x1c9   : > { %7333 = vmatprep.subr.bf16.mxu1 %v7872_v34  ;;  %7312 = vmatpush3.bf16.msra.mxu0 %v7873_v35  ;;  %v7912_v34 = vld [vmem:[%s9674_s1 + $0xfd0] sm:$0xff]  }
 0x1ca   : > { %7313 = vmatprep.subr.bf16.mxu0 %v7875_v37  ;;  %5881 = vmatprep.mubr.bf16.mxu0 %v6172_v21  ;;  %v7913_v35 = vld [vmem:[%s9674_s1 + $0xf10] sm:$0xff]   ;;  %v7915_v37 = vld [vmem:[%s9674_s1 + $0xf58] sm:$0xff]  }
 0x1cb   : > { %5841 = vmatmul.mubr.bf16.vlgmr.msra.gmra.mrb[52].mxu1 %v6169_v31  ;;  %v7909_v31 = vld [vmem:[%s9674_s1 + $0xf08] sm:$0xff]  }
 0x1cc   : > { %7334 = vmatpush3.bf16.msra.mxu1 %v7874_v36  ;;  %5922 = vmatprep.mubr.bf16.mxu1 %v6174_v24  ;;  %v7914_v36 = vld [vmem:[%s9674_s1 + $0xf90] sm:$0xff]  }
 0x1cd   : > { %7335 = vmatprep.subr.bf16.mxu1 %v7876_v38  ;;  %7314 = vmatpush3.bf16.msra.mxu0 %v7877_v39  ;;  %v7916_v38 = vld [vmem:[%s9674_s1 + $0xfd8] sm:$0xff]  }
 0x1ce   : > { %7315 = vmatprep.subr.bf16.mxu0 %v7879_v41 }
 0x1d0   : > { %7336 = vmatpush3.bf16.msra.mxu1 %v7878_v40  ;;  %v7917_v40 = vld [vmem:[%s9674_s1 + $0xf18] sm:$0xff]  }
 0x1d1   : > { %7337 = vmatprep.subr.bf16.mxu1 %v7880_v42  ;;  %7316 = vmatpush3.bf16.msra.mxu0 %v7881_v43  ;;  %v7918_v42 = vld [vmem:[%s9674_s1 + $0xf98] sm:$0xff]  }
 0x1d2   : > { %7317 = vmatprep.subr.bf16.mxu0 %v7883_v45 }
 0x1d4   : > { %7338 = vmatpush3.bf16.msra.mxu1 %v7882_v44  ;;  %v7919_v44 = vld [vmem:[%s9674_s1 + $0xf60] sm:$0xff]  }
 0x1d5   : > { %7339 = vmatprep.subr.bf16.mxu1 %v7884_v46  ;;  %7318 = vmatpush3.bf16.msra.mxu0 %v7885_v47  ;;  %v7920_v47 = vld [vmem:[%s9674_s1 + $0xfe0] sm:$0xff]  }
 0x1d6   : > { %7319 = vmatprep.subr.bf16.mxu0 %v7887_v51 }
 0x1d8   : > { %7340 = vmatpush3.bf16.msra.mxu1 %v7886_v49 }
 0x1d9   : > { %7341 = vmatprep.subr.bf16.mxu1 %v7888_v53  ;;  %7320 = vmatpush3.bf16.msra.mxu0 %v7889_v56  ;;  %v7922_v53 = vld [vmem:[%s9674_s1 + $0xfa0] sm:$0xff]   ;;  %v7923_v56 = vld [vmem:[%s9674_s1 + $0xf68] sm:$0xff]  }
 0x1da   : > { %7321 = vmatprep.subr.bf16.mxu0 %v7891_v62 }
 0x1db   : > { %v7019_v48 = vpop.f32.mrb[28].mxu0 }
 0x1dc   : > { %v7041_v50 = vpop.f32.mrb[28].mxu1  ;;  %v7020_v52 = vpop.f32.mrb[29].mxu0  ;;  %7342 = vmatpush3.bf16.msra.mxu1 %v7890_v59  ;;  %v7924_v59 = vld [vmem:[%s9674_s1 + $0xfe8] sm:$0xff]  }
 0x1dd   : > { %v7021_v54 = vadd.f32 %v7020_v52, %v7019_v48  ;;  %v7042_v55 = vpop.f32.mrb[29].mxu1  ;;  %v7022_v58 = vpop.f32.mrb[30].mxu0  ;;  %7343 = vmatprep.subr.bf16.mxu1 %v7892_v1  ;;  %7322 = vmatpush3.bf16.msra.mxu0 %v7893_v4  ;;  %v7927_v1 = vld [vmem:[%s9674_s1 + $0xf70] sm:$0xff]  }
 0x1de   : > { %v7043_v57 = vadd.f32 %v7042_v55, %v7041_v50  ;;  %v7044_v61 = vpop.f32.mrb[30].mxu1  ;;  %v7023_v63 = vpop.f32.mrb[31].mxu0  ;;  %7323 = vmatprep.subr.bf16.mxu0 %v7895_v8  ;;  %v7921_v50 = vld [vmem:[%s9674_s1 + $0xf20] sm:$0xff]   ;;  %v7930_v4 = vld [vmem:[%s9674_s1 + $0xfb0] sm:$0xff]   ;;  %v7934_v8 = vld [vmem:[%s9674_s1 + $0xfb8] sm:$0xff]  }
 0x1df   : > { %v5310_v60 = vadd.f32 %v7021_v54, %v9407_v7  ;;  %v7024_v2 = vadd.f32 %v7023_v63, %v7022_v58  ;;  %v7045_v3 = vpop.f32.mrb[31].mxu1  ;;  %v7926_v63 = vld [vmem:[%s9674_s1 + $0xfa8] sm:$0xff]  }
 0x1e0   : > { %v7046_v5 = vadd.f32 %v7045_v3, %v7044_v61  ;;  %7344 = vmatpush3.bf16.msra.mxu1 %v7894_v6  ;;  %v7925_v61 = vld [vmem:[%s9674_s1 + $0xf28] sm:$0xff]   ;;  %v7929_v3 = vld [vmem:[%s9674_s1 + $0xf30] sm:$0xff]   ;;  %v7932_v6 = vld [vmem:[%s9674_s1 + $0xff8] sm:$0xff]  }
 0x1e1   : > { %v9516_v0 = vadd.f32 %v7043_v57, %v5310_v60  ;;  %v5313_v7 = vadd.f32 %v7024_v2, %v9422_v16  ;;  %7345 = vmatprep.subr.bf16.mxu1 %v7896_v10  ;;  %7324 = vmatpush3.bf16.msra.mxu0 %v7897_v11  ;;  %v7902_v16 = vld [vmem:[%s9674_s1 + $0xeb8] sm:$0xff]   ;;  %v7928_v2 = vld [vmem:[%s9674_s1 + $0xff0] sm:$0xff]  }
 0x1e2   : > { %7325 = vmatprep.subr.bf16.mxu0 %v7899_v13  ;;  %v276_v10 = vld [vmem:[%s8097_s6 + $0x1f0] sm:$0xff]  ;;  %v245_v13 = vld [vmem:[%s8097_s6 + $0xf8] sm:$0xff] }
 0x1e3   : > { %v9531_v9 = vadd.f32 %v7046_v5, %v5313_v7  ;;  %v7931_v5 = vld [vmem:[%s9674_s1 + $0xf78] sm:$0xff]  }
 0x1e4   : > { %7346 = vmatpush3.bf16.msra.mxu1 %v7898_v12  ;;  %v7933_v7 = vld [vmem:[%s9674_s1 + $0xf38] sm:$0xff]  }
 0x1e5   : > { %7347 = vmatprep.subr.bf16.mxu1 %v7900_v14  ;;  %7326 = vmatpush3.bf16.msra.mxu0 %v7901_v15  ;;  %v277_v14 = vld [vmem:[%s8097_s6 + $0x1f8] sm:$0xff] }
 0x1e6   : > { %7355 = vmatprep.subr.bf16.mxu0 %v7903_v25  ;;  %v6177_v15 = vcombine.low %v245_v13, %v277_v14 }
 0x1e8   : > { %7348 = vmatpush3.bf16.msra.mxu1 %v7902_v16  ;;  %5882 = vmatmul.mubr.bf16.vlgmr.msra.gmra.mrb[56].mxu0 %v6171_v20  ;;  %v6178_v16 = vcombine.high %v245_v13, %v277_v14 }
 0x1e9   : > { %7377 = vmatprep.subr.bf16.mxu1 %v7904_v26  ;;  %7356 = vmatpush3.bf16.msra.mxu0 %v7905_v27 }
 0x1ea   : > { %7357 = vmatprep.subr.bf16.mxu0 %v7907_v29 }
 0x1eb   : > { %5923 = vmatmul.mubr.bf16.vlgmr.msra.gmra.mrb[56].mxu1 %v6173_v23 }
 0x1ec   : > { %7378 = vmatpush3.bf16.msra.mxu1 %v7906_v28  ;;  %6004 = vmatprep.mubr.bf16.mxu1 %v6178_v16 }
 0x1ed   : > { %7379 = vmatprep.subr.bf16.mxu1 %v7908_v30  ;;  %7358 = vmatpush3.bf16.msra.mxu0 %v7909_v31 }
 0x1ee   : > { %7359 = vmatprep.subr.bf16.mxu0 %v7911_v33 }
 0x1f0   : > { %7380 = vmatpush3.bf16.msra.mxu1 %v7910_v32 }
 0x1f1   : > { %7381 = vmatprep.subr.bf16.mxu1 %v7912_v34  ;;  %7360 = vmatpush3.bf16.msra.mxu0 %v7913_v35 }
 0x1f2   : > { %7361 = vmatprep.subr.bf16.mxu0 %v7915_v37 }
 0x1f4   : > { %7382 = vmatpush3.bf16.msra.mxu1 %v7914_v36 }
 0x1f5   : > { %7383 = vmatprep.subr.bf16.mxu1 %v7916_v38  ;;  %7362 = vmatpush3.bf16.msra.mxu0 %v7917_v40 }
 0x1f6   : > { %7363 = vmatprep.subr.bf16.mxu0 %v7919_v44 }
 0x1f8   : > { %7384 = vmatpush3.bf16.msra.mxu1 %v7918_v42 }
 0x1f9   : > { %7385 = vmatprep.subr.bf16.mxu1 %v7920_v47  ;;  %7364 = vmatpush3.bf16.msra.mxu0 %v7921_v50 }
 0x1fa   : > { %7365 = vmatprep.subr.bf16.mxu0 %v7923_v56 }
 0x1fb   : > { %v7063_v39 = vpop.f32.mrb[32].mxu0 }
 0x1fc   : > { %v7085_v41 = vpop.f32.mrb[32].mxu1  ;;  %v7064_v43 = vpop.f32.mrb[33].mxu0  ;;  %7386 = vmatpush3.bf16.msra.mxu1 %v7922_v53 }
 0x1fd   : > { %v7065_v45 = vadd.f32 %v7064_v43, %v7063_v39  ;;  %v7086_v46 = vpop.f32.mrb[33].mxu1  ;;  %v7066_v49 = vpop.f32.mrb[34].mxu0  ;;  %7387 = vmatprep.subr.bf16.mxu1 %v7924_v59  ;;  %7366 = vmatpush3.bf16.msra.mxu0 %v7925_v61 }
 0x1fe   : > { %v7087_v48 = vadd.f32 %v7086_v46, %v7085_v41  ;;  %v7088_v52 = vpop.f32.mrb[34].mxu1  ;;  %v7067_v54 = vpop.f32.mrb[35].mxu0  ;;  %7367 = vmatprep.subr.bf16.mxu0 %v7927_v1 }
 0x1ff   : > { %v5392_v51 = vadd.f32 %v7065_v45, %v9516_v0  ;;  %v7068_v57 = vadd.f32 %v7067_v54, %v7066_v49  ;;  %v7089_v58 = vpop.f32.mrb[35].mxu1 }
 0x200   : > { %v7090_v60 = vadd.f32 %v7089_v58, %v7088_v52  ;;  %7388 = vmatpush3.bf16.msra.mxu1 %v7926_v63 }
 0x201   : > { %v5433_v55 = vadd.f32 %v7087_v48, %v5392_v51  ;;  %v5395_v62 = vadd.f32 %v7068_v57, %v9531_v9  ;;  %7389 = vmatprep.subr.bf16.mxu1 %v7928_v2  ;;  %7368 = vmatpush3.bf16.msra.mxu0 %v7929_v3  ;;  %v244_v9 = vld [vmem:[%s8097_s6 + $0xf0] sm:$0xff]  ;;  %s6694_s6 = sshll.u32 %s9682_s12, 4 }
 0x202   : > { %7369 = vmatprep.subr.bf16.mxu0 %v7931_v5  ;;  %v6175_v11 = vcombine.low %v244_v9, %v276_v10  ;;  %v6176_v12 = vcombine.high %v244_v9, %v276_v10  ;;  %s211_s7 = scalar_lea.vmem %s9676_s3, %s6694_s6 }
 0x203   : > { %v5436_v0 = vadd.f32 %v7090_v60, %v5395_v62 }
 0x204   : > { %7390 = vmatpush3.bf16.msra.mxu1 %v7930_v4  ;;  %5963 = vmatprep.mubr.bf16.mxu0 %v6176_v12 }
 0x205   : > { %7391 = vmatprep.subr.bf16.mxu1 %v7932_v6  ;;  %7370 = vmatpush3.bf16.msra.mxu0 %v7933_v7 }
 0x208   : > { %7392 = vmatpush3.bf16.msra.mxu1 %v7934_v8  ;;  %5964 = vmatmul.mubr.bf16.vlgmr.msra.gmra.mrb[60].mxu0 %v6175_v11 }
 0x20b   : > { %6005 = vmatmul.mubr.bf16.vlgmr.msra.gmra.mrb[60].mxu1 %v6177_v15 }
 0x21b   : > { %v7107_v17 = vpop.f32.mrb[36].mxu0 }
 0x21c   : > { %v7108_v19 = vpop.f32.mrb[37].mxu0 }
 0x21d   : > { %v7109_v20 = vadd.f32 %v7108_v19, %v7107_v17  ;;  %v7110_v22 = vpop.f32.mrb[38].mxu0 }
 0x21e   : > { %v7129_v18 = vpop.f32.mrb[36].mxu1  ;;  %v7111_v25 = vpop.f32.mrb[39].mxu0 }
 0x21f   : > { %v7130_v21 = vpop.f32.mrb[37].mxu1  ;;  %v5474_v26 = vadd.f32 %v7109_v20, %v5433_v55  ;;  %v7112_v27 = vadd.f32 %v7111_v25, %v7110_v22 }
 0x220   : > { %v7131_v23 = vadd.f32 %v7130_v21, %v7129_v18  ;;  %v7132_v24 = vpop.f32.mrb[38].mxu1 }
 0x221   : > { %v7133_v28 = vpop.f32.mrb[39].mxu1  ;;  %v5477_v31 = vadd.f32 %v7112_v27, %v5436_v0 }
 0x222   : > { %v7134_v29 = vadd.f32 %v7133_v28, %v7132_v24  ;;  %v5515_v30 = vadd.f32 %v7131_v23, %v5474_v26 }
 0x224   : > { %v5518_v32 = vadd.f32 %v7134_v29, %v5477_v31 }
 0x23b   : > { %v7151_v33 = vpop.f32.mrb[40].mxu0 }
 0x23c   : > { %v7152_v35 = vpop.f32.mrb[41].mxu0 }
 0x23d   : > { %v7153_v37 = vadd.f32 %v7152_v35, %v7151_v33  ;;  %v7154_v39 = vpop.f32.mrb[42].mxu0 }
 0x23e   : > { %v7173_v34 = vpop.f32.mrb[40].mxu1  ;;  %v7155_v41 = vpop.f32.mrb[43].mxu0 }
 0x23f   : > { %v7174_v36 = vpop.f32.mrb[41].mxu1  ;;  %v5556_v43 = vadd.f32 %v7153_v37, %v5515_v30  ;;  %v7156_v44 = vadd.f32 %v7155_v41, %v7154_v39 }
 0x240   : > { %v7175_v38 = vadd.f32 %v7174_v36, %v7173_v34  ;;  %v7176_v40 = vpop.f32.mrb[42].mxu1 }
 0x241   : > { %v7177_v42 = vpop.f32.mrb[43].mxu1  ;;  %v5559_v47 = vadd.f32 %v7156_v44, %v5518_v32 }
 0x242   : > { %v7178_v45 = vadd.f32 %v7177_v42, %v7176_v40  ;;  %v5597_v46 = vadd.f32 %v7175_v38, %v5556_v43 }
 0x244   : > { %v5600_v48 = vadd.f32 %v7178_v45, %v5559_v47 }
 0x25b   : > { %v7195_v49 = vpop.f32.mrb[44].mxu0 }
 0x25c   : > { %v7196_v51 = vpop.f32.mrb[45].mxu0 }
 0x25d   : > { %v7197_v52 = vadd.f32 %v7196_v51, %v7195_v49  ;;  %v7198_v54 = vpop.f32.mrb[46].mxu0 }
 0x25e   : > { %v7217_v50 = vpop.f32.mrb[44].mxu1  ;;  %v7199_v57 = vpop.f32.mrb[47].mxu0 }
 0x25f   : > { %v7218_v53 = vpop.f32.mrb[45].mxu1  ;;  %v5638_v58 = vadd.f32 %v7197_v52, %v5597_v46  ;;  %v7200_v59 = vadd.f32 %v7199_v57, %v7198_v54 }
 0x260   : > { %v7219_v55 = vadd.f32 %v7218_v53, %v7217_v50  ;;  %v7220_v56 = vpop.f32.mrb[46].mxu1 }
 0x261   : > { %v7221_v60 = vpop.f32.mrb[47].mxu1  ;;  %v5641_v63 = vadd.f32 %v7200_v59, %v5600_v48 }
 0x262   : > { %v7222_v61 = vadd.f32 %v7221_v60, %v7220_v56  ;;  %v5679_v62 = vadd.f32 %v7219_v55, %v5638_v58 }
 0x264   : > { %v5682_v0 = vadd.f32 %v7222_v61, %v5641_v63 }
 0x27b   : > { %v7239_v1 = vpop.f32.mrb[48].mxu0 }
 0x27c   : > { %v7240_v3 = vpop.f32.mrb[49].mxu0 }
 0x27d   : > { %v7241_v4 = vadd.f32 %v7240_v3, %v7239_v1  ;;  %v7242_v6 = vpop.f32.mrb[50].mxu0 }
 0x27e   : > { %v7261_v2 = vpop.f32.mrb[48].mxu1  ;;  %v7243_v9 = vpop.f32.mrb[51].mxu0 }
 0x27f   : > { %v7262_v5 = vpop.f32.mrb[49].mxu1  ;;  %v5720_v10 = vadd.f32 %v7241_v4, %v5679_v62  ;;  %v7244_v11 = vadd.f32 %v7243_v9, %v7242_v6 }
 0x280   : > { %v7263_v7 = vadd.f32 %v7262_v5, %v7261_v2  ;;  %v7264_v8 = vpop.f32.mrb[50].mxu1 }
 0x281   : > { %v7265_v12 = vpop.f32.mrb[51].mxu1  ;;  %v5723_v15 = vadd.f32 %v7244_v11, %v5682_v0 }
 0x282   : > { %v7266_v13 = vadd.f32 %v7265_v12, %v7264_v8  ;;  %v5761_v14 = vadd.f32 %v7263_v7, %v5720_v10 }
 0x284   : > { %v5764_v16 = vadd.f32 %v7266_v13, %v5723_v15 }
 0x29b   : > { %v7283_v17 = vpop.f32.mrb[52].mxu0 }
 0x29c   : > { %v7284_v19 = vpop.f32.mrb[53].mxu0 }
 0x29d   : > { %v7285_v21 = vadd.f32 %v7284_v19, %v7283_v17  ;;  %v7286_v23 = vpop.f32.mrb[54].mxu0 }
 0x29e   : > { %v7305_v18 = vpop.f32.mrb[52].mxu1  ;;  %v7287_v25 = vpop.f32.mrb[55].mxu0 }
 0x29f   : > { %v7306_v20 = vpop.f32.mrb[53].mxu1  ;;  %v5802_v27 = vadd.f32 %v7285_v21, %v5761_v14  ;;  %v7288_v28 = vadd.f32 %v7287_v25, %v7286_v23 }
 0x2a0   : > { %v7307_v22 = vadd.f32 %v7306_v20, %v7305_v18  ;;  %v7308_v24 = vpop.f32.mrb[54].mxu1 }
 0x2a1   : > { %v7309_v26 = vpop.f32.mrb[55].mxu1  ;;  %v5805_v31 = vadd.f32 %v7288_v28, %v5764_v16 }
 0x2a2   : > { %v7310_v29 = vadd.f32 %v7309_v26, %v7308_v24  ;;  %v5843_v30 = vadd.f32 %v7307_v22, %v5802_v27 }
 0x2a4   : > { %v5846_v32 = vadd.f32 %v7310_v29, %v5805_v31 }
 0x2bb   : > { %v7327_v33 = vpop.f32.mrb[56].mxu0 }
 0x2bc   : > { %v7328_v35 = vpop.f32.mrb[57].mxu0 }
 0x2bd   : > { %v7329_v36 = vadd.f32 %v7328_v35, %v7327_v33  ;;  %v7330_v38 = vpop.f32.mrb[58].mxu0 }
 0x2be   : > { %v7349_v34 = vpop.f32.mrb[56].mxu1  ;;  %v7331_v41 = vpop.f32.mrb[59].mxu0 }
 0x2bf   : > { %v7350_v37 = vpop.f32.mrb[57].mxu1  ;;  %v5884_v42 = vadd.f32 %v7329_v36, %v5843_v30  ;;  %v7332_v43 = vadd.f32 %v7331_v41, %v7330_v38 }
 0x2c0   : > { %v7351_v39 = vadd.f32 %v7350_v37, %v7349_v34  ;;  %v7352_v40 = vpop.f32.mrb[58].mxu1 }
 0x2c1   : > { %v7353_v44 = vpop.f32.mrb[59].mxu1  ;;  %v5887_v47 = vadd.f32 %v7332_v43, %v5846_v32 }
 0x2c2   : > { %v7354_v45 = vadd.f32 %v7353_v44, %v7352_v40  ;;  %v5925_v46 = vadd.f32 %v7351_v39, %v5884_v42 }
 0x2c4   : > { %v5928_v48 = vadd.f32 %v7354_v45, %v5887_v47 }
 0x2db   : > { %v7371_v49 = vpop.f32.mrb[60].mxu0 }
 0x2dc   : > { %v7372_v51 = vpop.f32.mrb[61].mxu0 }
 0x2dd   : > { %v7373_v52 = vadd.f32 %v7372_v51, %v7371_v49  ;;  %v7374_v54 = vpop.f32.mrb[62].mxu0 }
 0x2de   : > { %v7393_v50 = vpop.f32.mrb[60].mxu1  ;;  %v7375_v57 = vpop.f32.mrb[63].mxu0 }
 0x2df   : > { %v7394_v53 = vpop.f32.mrb[61].mxu1  ;;  %v5966_v58 = vadd.f32 %v7373_v52, %v5925_v46  ;;  %v7376_v59 = vadd.f32 %v7375_v57, %v7374_v54 }
 0x2e0   : > { %v7395_v55 = vadd.f32 %v7394_v53, %v7393_v50  ;;  %v7396_v56 = vpop.f32.mrb[62].mxu1 }
 0x2e1   : > { %v7397_v60 = vpop.f32.mrb[63].mxu1  ;;  %v5969_v63 = vadd.f32 %v7376_v59, %v5928_v48 }
 0x2e2   : > { %v7398_v61 = vadd.f32 %v7397_v60, %v7396_v56  ;;  %v6007_v62 = vadd.f32 %v7395_v55, %v5966_v58 }
 0x2e4   : > { %6013 = vst [vmem:[%s211_s7] sm:$0xff] %v6007_v62  ;;  %v6010_v0 = vadd.f32 %v7398_v61, %v5969_v63 }
 0x2e6   : > { %6014 = vst [vmem:[%s211_s7 + $0x8] sm:$0xff] %v6010_v0 }
 0x2e7 PF: > { %s13_s14 = sadd.s32 1, %s7957_s14   ;;  %s9677_s12 = smov %s7953_s13 }
 0x2e8   : > { %p10_p5 = scmp.ge.s32.totalorder %s13_s14, 4   ;;  %s9678_s13 = smov %s9680_s15 }
 0x2ea   :  { %12 = sbr.rel (!%p10_p5) target bundleno = 2 (0x2), region = 62 }

</bundles_post_ra>
